<compile_context>
chip_gen: v6e
topology: v6e:2x2x1
jax: 0.10.0
libtpu: 0.0.40
codegen_flags: <defaults>
</compile_context>

<pallas_src>
import jax
import jax.numpy as jnp
import numpy as np
from jax.experimental import pallas as pl
from jax.experimental.pallas import tpu as pltpu


def _round_up(n, m):
    return ((n + m - 1) // m) * m


# ----------------------------------------------------------------------------
# Pallas kernel 1: single-block fused matmul + bias + ReLU (the conv layers).
# ----------------------------------------------------------------------------
def _matmul_bias_relu_kernel(a_ref, w_ref, b_ref, o_ref):
    acc = jnp.dot(a_ref[...], w_ref[...], preferred_element_type=jnp.float32)
    o_ref[...] = jnp.maximum(acc + b_ref[...], 0.0).astype(o_ref.dtype)


def matmul_bias_relu(a, w, b):
    """out = relu(a @ w + b); a, w, b, out all VMEM-resident (single block)."""
    M, K = a.shape
    Kw, N = w.shape
    assert K == Kw
    b2 = b.reshape(1, N).astype(jnp.float32)
    return pl.pallas_call(
        _matmul_bias_relu_kernel,
        out_shape=jax.ShapeDtypeStruct((M, N), jnp.float32),
        grid=(1,),
        in_specs=[
            pl.BlockSpec((M, K), lambda i: (0, 0)),
            pl.BlockSpec((K, N), lambda i: (0, 0)),
            pl.BlockSpec((1, N), lambda i: (0, 0)),
        ],
        out_specs=pl.BlockSpec((M, N), lambda i: (0, 0)),
        compiler_params=pltpu.CompilerParams(
            dimension_semantics=("arbitrary",)),
    )(a, w, b2)


# ----------------------------------------------------------------------------
# Pallas kernel 2: fused fc3 -> fc4 -> fc5 (+ ReLUs + tanh), K-tiled over fc3.
# Weights stream/reside in bf16; matmuls accumulate in f32.
# ----------------------------------------------------------------------------
def _fused_fc_kernel(a_ref, w3_ref, b3_ref, w4_ref, b4_ref, w5_ref, b5_ref,
                     o_ref, acc_ref):
    k = pl.program_id(0)

    @pl.when(k == 0)
    def _():
        acc_ref[...] = jnp.zeros_like(acc_ref)

    # fc3 partial product for this K tile (bf16 MXU inputs, f32 accumulate).
    a_bf = a_ref[...].astype(jnp.bfloat16)
    acc_ref[...] += jnp.dot(a_bf, w3_ref[...],
                            preferred_element_type=jnp.float32)

    @pl.when(k == pl.num_programs(0) - 1)
    def _():
        h3 = jnp.maximum(acc_ref[...] + b3_ref[...], 0.0)           # fc3 + ReLU
        h4 = jnp.maximum(
            jnp.dot(h3.astype(jnp.bfloat16), w4_ref[...],
                    preferred_element_type=jnp.float32) + b4_ref[...],
            0.0)                                                     # fc4 + ReLU
        h5 = jnp.maximum(
            jnp.dot(h4.astype(jnp.bfloat16), w5_ref[...],
                    preferred_element_type=jnp.float32) + b5_ref[...],
            0.0)                                                     # fc5 + ReLU
        o_ref[...] = jnp.tanh(h5).astype(o_ref.dtype)                # tanh


def fused_fc(a, w3, b3, w4, b4, w5, b5, *, k_tile=3456):
    """tanh(relu(relu(relu(a@w3+b3) @ w4+b4) @ w5+b5)) in one pallas_call.

    w3 (bf16) streams over K in lane-aligned k_tile chunks (3456 = 27*128
    divides 10368 -> 3 grid steps); w4, w5 (bf16) and the f32 biases are
    resident (constant index_map).  All N dims must already be padded to
    multiples of 128 so output stores are unmasked / lane-dense.
    """
    M, K = a.shape
    if K % k_tile:                 # never hit for this network (K = 10368)
        k_tile = K
    nk = K // k_tile
    N3, N4, N5 = w3.shape[1], w4.shape[1], w5.shape[1]

    return pl.pallas_call(
        _fused_fc_kernel,
        out_shape=jax.ShapeDtypeStruct((M, N5), jnp.float32),
        grid_spec=pltpu.PrefetchScalarGridSpec(
            num_scalar_prefetch=0,
            grid=(nk,),
            in_specs=[
                pl.BlockSpec((M, k_tile), lambda k: (0, k)),    # activations
                pl.BlockSpec((k_tile, N3), lambda k: (k, 0)),   # w3: K-streamed
                pl.BlockSpec((1, N3), lambda k: (0, 0)),        # b3: resident
                pl.BlockSpec((N3, N4), lambda k: (0, 0)),       # w4: resident
                pl.BlockSpec((1, N4), lambda k: (0, 0)),        # b4: resident
                pl.BlockSpec((N4, N5), lambda k: (0, 0)),       # w5: resident
                pl.BlockSpec((1, N5), lambda k: (0, 0)),        # b5: resident
            ],
            out_specs=pl.BlockSpec((M, N5), lambda k: (0, 0)),
            scratch_shapes=[pltpu.VMEM((M, N3), jnp.float32)],  # fc3 accumulator
        ),
        compiler_params=pltpu.CompilerParams(
            dimension_semantics=("arbitrary",),
            vmem_limit_bytes=32 << 20,
        ),
    )(a, w3, b3, w4, b4, w5, b5)
    # TODO(synk): v7x-only — split fc3's K reduction across the two TensorCores
    # (pl.core_map + CMEM/VMEM_SHARED exchange of the tiny (M,512) partials,
    # fc4/fc5/tanh epilogue under pltpu.run_on_first_core) for up to ~2x there.
    # TODO(synk): v5e/v6e-only — optional int8 weight-only quant of w3 with
    # per-column scales folded into the fc3 epilogue (not valid on v7x: fp8-only
    # MXU); kept out to avoid target-specific dispatch in this script.


# ----------------------------------------------------------------------------
# im2col glue (plain JAX, fused by XLA under jit). NHWC in, NHWC-feature out.
# ----------------------------------------------------------------------------
def im2col_nhwc(x, kh, kw, stride):
    """NHWC -> (B*oh*ow, kh*kw*C) patches; feature order (kh, kw, c)."""
    B, H, W, C = x.shape
    oh = (H - kh) // stride + 1
    ow = (W - kw) // stride + 1
    cols = []
    for i in range(kh):
        for j in range(kw):
            cols.append(x[:, i:i + stride * oh:stride,
                          j:j + stride * ow:stride, :])   # (B, oh, ow, C)
    col = jnp.stack(cols, axis=3)                          # (B, oh, ow, kh*kw, C)
    return col.reshape(B * oh * ow, kh * kw * C), oh, ow


def conv2d_relu_nhwc(x, wmat, b, kh, kw, stride, cout):
    """x: (B, H, W, Cin) NHWC; wmat: (kh*kw*Cin, Cout) pre-transposed; b: (Cout,)."""
    B = x.shape[0]
    col, oh, ow = im2col_nhwc(x, kh, kw, stride)
    out = matmul_bias_relu(col, wmat, b)        # Pallas fused matmul+bias+ReLU
    return out.reshape(B, oh, ow, cout)         # stays NHWC (no transpose back)


# ----------------------------------------------------------------------------
# One-time weight preparation (out of the per-forward path).
# ----------------------------------------------------------------------------
def prepare_params(p):
    """Convert PyTorch-layout params into kernel-ready layouts, once:
      * conv weights OIHW -> (kh*kw*cin, cout) matching NHWC im2col order (f32),
      * w3 rows permuted NCHW-flatten (c,h,w) -> NHWC-flatten (h,w,c),
      * FC output dims zero-padded to lane multiples of 128 (400->512,
        300->384, out->128); the next layer's weight rows are zero-padded to
        match, so the math is exact,
      * w3/w4/w5 cast to bf16 (streamed weights) — biases stay f32."""
    co1, ci1, kh1, kw1 = p["w1"].shape
    co2, ci2, kh2, kw2 = p["w2"].shape
    w1 = p["w1"].transpose(2, 3, 1, 0).reshape(kh1 * kw1 * ci1, co1)
    w2 = p["w2"].transpose(2, 3, 1, 0).reshape(kh2 * kw2 * ci2, co2)

    n3, n4, n5 = p["w3"].shape[1], p["w4"].shape[1], p["w5"].shape[1]
    n3p, n4p, n5p = _round_up(n3, 128), _round_up(n4, 128), _round_up(n5, 128)

    # fc3 rows: (c, h, w) order -> (h, w, c) order (matches NHWC flatten).
    w3 = p["w3"].reshape(co2, 18, 18, n3).transpose(1, 2, 0, 3)
    w3 = w3.reshape(18 * 18 * co2, n3)
    w3 = jnp.pad(w3, ((0, 0), (0, n3p - n3))).astype(jnp.bfloat16)
    b3 = jnp.pad(p["b3"], (0, n3p - n3)).reshape(1, n3p).astype(jnp.float32)

    w4 = jnp.pad(p["w4"], ((0, n3p - n3), (0, n4p - n4))).astype(jnp.bfloat16)
    b4 = jnp.pad(p["b4"], (0, n4p - n4)).reshape(1, n4p).astype(jnp.float32)

    w5 = jnp.pad(p["w5"], ((0, n4p - n4), (0, n5p - n5))).astype(jnp.bfloat16)
    b5 = jnp.pad(p["b5"], (0, n5p - n5)).reshape(1, n5p).astype(jnp.float32)

    return dict(w1=w1, b1=p["b1"], w2=w2, b2=p["b2"],
                w3=w3, b3=b3, w4=w4, b4=b4, w5=w5, b5=b5)


# ----------------------------------------------------------------------------
# ActorNetwork forward
# ----------------------------------------------------------------------------
def actor_forward(x, kp, output_dim):
    """x: (B, 4, 84, 84) NCHW (PyTorch convention). Returns (B, output_dim)."""
    B = x.shape[0]
    x = jnp.transpose(x, (0, 2, 3, 1))                         # NCHW -> NHWC, once
    x = conv2d_relu_nhwc(x, kp["w1"], kp["b1"], 8, 8, 4, 32)   # (B, 20, 20, 32)
    x = conv2d_relu_nhwc(x, kp["w2"], kp["b2"], 3, 3, 1, 32)   # (B, 18, 18, 32)
    a = x.reshape(B, -1)                    # NHWC flatten, matches permuted w3
    out = fused_fc(a, kp["w3"], kp["b3"], kp["w4"], kp["b4"],
                   kp["w5"], kp["b5"])                         # (B, 128)
    return out[:, :output_dim]
    # TODO(synk): fuse conv1+conv2+flatten into one pallas_call (conv1 output
    # kept in VMEM scratch, conv2 patches built from 9 static slices in-kernel)
    # and/or fold the conv stage into fused_fc via memory_space=pl.ANY + manual
    # DMA so the first w3 K-tile is prefetched under the conv matmuls; both
    # need in-kernel (rows,32)->(h,w,32) relayouts and are left out here for
    # lowering robustness (conv stage is only a few us of the total).


# ----------------------------------------------------------------------------
# Init (PyTorch-equivalent layouts) + pure-JAX reference for correctness.
# ----------------------------------------------------------------------------
def init_params(key, output_dim):
    ks = jax.random.split(key, 10)

    def lin(kw, kb, fan_in, shape_w, shape_b):
        bound = 1.0 / np.sqrt(fan_in)
        w = jax.random.uniform(kw, shape_w, jnp.float32, -bound, bound)
        b = jax.random.uniform(kb, shape_b, jnp.float32, -bound, bound)
        return w, b

    w1, b1 = lin(ks[0], ks[1], 4 * 8 * 8, (32, 4, 8, 8), (32,))
    w2, b2 = lin(ks[2], ks[3], 32 * 3 * 3, (32, 32, 3, 3), (32,))
    w3, b3 = lin(ks[4], ks[5], 18 * 18 * 32, (18 * 18 * 32, 400), (400,))
    w4, b4 = lin(ks[6], ks[7], 400, (400, 300), (300,))
    w5, b5 = lin(ks[8], ks[9], 300, (300, output_dim), (output_dim,))
    return dict(w1=w1, b1=b1, w2=w2, b2=b2, w3=w3, b3=b3,
                w4=w4, b4=b4, w5=w5, b5=b5)


def _reference_forward(x, p):
    dn = ("NCHW", "OIHW", "NCHW")
    y = jax.lax.conv_general_dilated(x, p["w1"], (4, 4), "VALID",
                                     dimension_numbers=dn)
    y = jax.nn.relu(y + p["b1"][None, :, None, None])
    y = jax.lax.conv_general_dilated(y, p["w2"], (1, 1), "VALID",
                                     dimension_numbers=dn)
    y = jax.nn.relu(y + p["b2"][None, :, None, None])
    y = y.reshape(y.shape[0], -1)
    y = jax.nn.relu(y @ p["w3"] + p["b3"])
    y = jax.nn.relu(y @ p["w4"] + p["b4"])
    y = jax.nn.relu(y @ p["w5"] + p["b5"])
    return jnp.tanh(y)


if __name__ == "__main__":
    key = jax.random.PRNGKey(0)
    kx, kp = jax.random.split(key)

    batch, output_dim = 2, 4
    # 84x84 input is implied by fc3 = 18*18*32 after the two convolutions.
    # TODO(synk): at batch=2 this is pure weight-streaming; batch >=128/256
    # (per-generation MXU rows) amortizes the w3 read for near-linear gains.
    x = jax.random.uniform(kx, (batch, 4, 84, 84), jnp.float32)
    params = init_params(kp, output_dim)
    kparams = prepare_params(params)          # one-time, out of the hot path

    fwd = jax.jit(actor_forward, static_argnums=(2,))
    out = jax.block_until_ready(fwd(x, kparams, output_dim))
    assert out.shape == (batch, output_dim), out.shape

    ref = jax.block_until_ready(_reference_forward(x, params))
    # bf16 weight streaming -> loosened tolerance vs. the f32 reference.
    np.testing.assert_allclose(np.asarray(out), np.asarray(ref),
                               rtol=2e-2, atol=2e-2)

    print("KERNEL_OK")
</pallas_src>

<mosaic_0001>
module attributes {stable_mosaic.version = 11 : i64} {
  func.func @_matmul_bias_relu_kernel(%arg0: i32, %arg1: memref<800x256xf32, #tpu.memory_space<vmem>>, %arg2: memref<256x32xf32, #tpu.memory_space<vmem>>, %arg3: memref<1x32xf32, #tpu.memory_space<vmem>>, %arg4: memref<800x32xf32, #tpu.memory_space<vmem>>) attributes {dimension_semantics = [#tpu.dimension_semantics<arbitrary>], iteration_bounds = array<i64: 1>, scalar_prefetch = 0 : i64, scratch_operands = 0 : i64, tpu.core_type = #tpu.core_type<tc>, window_params = [{pipeline_mode = #tpu.pipeline_mode<synchronous>, transform_indices = @transform_0, window_bounds = array<i64: 800, 256>}, {pipeline_mode = #tpu.pipeline_mode<synchronous>, transform_indices = @transform_1, window_bounds = array<i64: 256, 32>}, {pipeline_mode = #tpu.pipeline_mode<synchronous>, transform_indices = @transform_2, window_bounds = array<i64: 1, 32>}, {pipeline_mode = #tpu.pipeline_mode<synchronous>, transform_indices = @transform_3, window_bounds = array<i64: 800, 32>}]} {
    %c0 = arith.constant 0 : index
    %c0_0 = arith.constant 0 : index
    %0 = vector.load %arg1[%c0, %c0_0] : memref<800x256xf32, #tpu.memory_space<vmem>>, vector<800x256xf32>
    %c0_1 = arith.constant 0 : index
    %c0_2 = arith.constant 0 : index
    %1 = vector.load %arg2[%c0_1, %c0_2] : memref<256x32xf32, #tpu.memory_space<vmem>>, vector<256x32xf32>
    %cst = arith.constant dense<0.000000e+00> : vector<800x32xf32>
    %2 = tpu.matmul %0, %1, %cst {dimension_numbers = #tpu.dot_dimension_numbers<[1], [0], [0], [1], [0, 0, 1, 1], [], []>} : vector<800x256xf32>, vector<256x32xf32>, vector<800x32xf32> -> vector<800x32xf32>
    %c0_3 = arith.constant 0 : index
    %c0_4 = arith.constant 0 : index
    %3 = vector.load %arg3[%c0_3, %c0_4] : memref<1x32xf32, #tpu.memory_space<vmem>>, vector<1x32xf32>
    %4 = vector.broadcast %3 : vector<1x32xf32> to vector<800x32xf32>
    %5 = arith.addf %2, %4 : vector<800x32xf32>
    %cst_5 = arith.constant 0.000000e+00 : f32
    %6 = vector.broadcast %cst_5 : f32 to vector<800x32xf32>
    %7 = arith.maximumf %5, %6 : vector<800x32xf32>
    %c0_6 = arith.constant 0 : index
    %c0_7 = arith.constant 0 : index
    %8 = vector.load %arg4[%c0_6, %c0_7] : memref<800x32xf32, #tpu.memory_space<vmem>>, vector<800x32xf32>
    tpu.vector_store %arg4[%c0_6, %c0_7], %7 {strides = array<i32>} : memref<800x32xf32, #tpu.memory_space<vmem>>, vector<800x32xf32>,
    return
  }
  func.func @transform_0(%arg0: i32) -> (i32, i32) {
    %c0_i32 = arith.constant 0 : i32
    %c0_i32_0 = arith.constant 0 : i32
    %c0_i32_1 = arith.constant 0 : i32
    return %c0_i32, %c0_i32_0 : i32, i32
  }
  func.func @transform_1(%arg0: i32) -> (i32, i32) {
    %c0_i32 = arith.constant 0 : i32
    %c0_i32_0 = arith.constant 0 : i32
    %c0_i32_1 = arith.constant 0 : i32
    return %c0_i32, %c0_i32_0 : i32, i32
  }
  func.func @transform_2(%arg0: i32) -> (i32, i32) {
    %c0_i32 = arith.constant 0 : i32
    %c0_i32_0 = arith.constant 0 : i32
    %c0_i32_1 = arith.constant 0 : i32
    return %c0_i32, %c0_i32_0 : i32, i32
  }
  func.func @transform_3(%arg0: i32) -> (i32, i32) {
    %c0_i32 = arith.constant 0 : i32
    %c0_i32_0 = arith.constant 0 : i32
    %c0_i32_1 = arith.constant 0 : i32
    return %c0_i32, %c0_i32_0 : i32, i32
  }
}

module attributes {stable_mosaic.version = 11 : i64} {
  func.func @_matmul_bias_relu_kernel(%arg0: i32, %arg1: memref<648x288xf32, #tpu.memory_space<vmem>>, %arg2: memref<288x32xf32, #tpu.memory_space<vmem>>, %arg3: memref<1x32xf32, #tpu.memory_space<vmem>>, %arg4: memref<648x32xf32, #tpu.memory_space<vmem>>) attributes {dimension_semantics = [#tpu.dimension_semantics<arbitrary>], iteration_bounds = array<i64: 1>, scalar_prefetch = 0 : i64, scratch_operands = 0 : i64, tpu.core_type = #tpu.core_type<tc>, window_params = [{pipeline_mode = #tpu.pipeline_mode<synchronous>, transform_indices = @transform_0, window_bounds = array<i64: 648, 288>}, {pipeline_mode = #tpu.pipeline_mode<synchronous>, transform_indices = @transform_1, window_bounds = array<i64: 288, 32>}, {pipeline_mode = #tpu.pipeline_mode<synchronous>, transform_indices = @transform_2, window_bounds = array<i64: 1, 32>}, {pipeline_mode = #tpu.pipeline_mode<synchronous>, transform_indices = @transform_3, window_bounds = array<i64: 648, 32>}]} {
    %c0 = arith.constant 0 : index
    %c0_0 = arith.constant 0 : index
    %0 = vector.load %arg1[%c0, %c0_0] : memref<648x288xf32, #tpu.memory_space<vmem>>, vector<648x288xf32>
    %c0_1 = arith.constant 0 : index
    %c0_2 = arith.constant 0 : index
    %1 = vector.load %arg2[%c0_1, %c0_2] : memref<288x32xf32, #tpu.memory_space<vmem>>, vector<288x32xf32>
    %cst = arith.constant dense<0.000000e+00> : vector<648x32xf32>
    %2 = tpu.matmul %0, %1, %cst {dimension_numbers = #tpu.dot_dimension_numbers<[1], [0], [0], [1], [0, 0, 1, 1], [], []>} : vector<648x288xf32>, vector<288x32xf32>, vector<648x32xf32> -> vector<648x32xf32>
    %c0_3 = arith.constant 0 : index
    %c0_4 = arith.constant 0 : index
    %3 = vector.load %arg3[%c0_3, %c0_4] : memref<1x32xf32, #tpu.memory_space<vmem>>, vector<1x32xf32>
    %4 = vector.broadcast %3 : vector<1x32xf32> to vector<648x32xf32>
    %5 = arith.addf %2, %4 : vector<648x32xf32>
    %cst_5 = arith.constant 0.000000e+00 : f32
    %6 = vector.broadcast %cst_5 : f32 to vector<648x32xf32>
    %7 = arith.maximumf %5, %6 : vector<648x32xf32>
    %c0_6 = arith.constant 0 : index
    %c0_7 = arith.constant 0 : index
    %8 = vector.load %arg4[%c0_6, %c0_7] : memref<648x32xf32, #tpu.memory_space<vmem>>, vector<648x32xf32>
    tpu.vector_store %arg4[%c0_6, %c0_7], %7 {strides = array<i32>} : memref<648x32xf32, #tpu.memory_space<vmem>>, vector<648x32xf32>,
    return
  }
  func.func @transform_0(%arg0: i32) -> (i32, i32) {
    %c0_i32 = arith.constant 0 : i32
    %c0_i32_0 = arith.constant 0 : i32
    %c0_i32_1 = arith.constant 0 : i32
    return %c0_i32, %c0_i32_0 : i32, i32
  }
  func.func @transform_1(%arg0: i32) -> (i32, i32) {
    %c0_i32 = arith.constant 0 : i32
    %c0_i32_0 = arith.constant 0 : i32
    %c0_i32_1 = arith.constant 0 : i32
    return %c0_i32, %c0_i32_0 : i32, i32
  }
  func.func @transform_2(%arg0: i32) -> (i32, i32) {
    %c0_i32 = arith.constant 0 : i32
    %c0_i32_0 = arith.constant 0 : i32
    %c0_i32_1 = arith.constant 0 : i32
    return %c0_i32, %c0_i32_0 : i32, i32
  }
  func.func @transform_3(%arg0: i32) -> (i32, i32) {
    %c0_i32 = arith.constant 0 : i32
    %c0_i32_0 = arith.constant 0 : i32
    %c0_i32_1 = arith.constant 0 : i32
    return %c0_i32, %c0_i32_0 : i32, i32
  }
}

module attributes {stable_mosaic.version = 11 : i64} {
  func.func @_fused_fc_kernel(%arg0: i32, %arg1: memref<2x3456xf32, #tpu.memory_space<vmem>>, %arg2: memref<3456x512xbf16, #tpu.memory_space<vmem>>, %arg3: memref<1x512xf32, #tpu.memory_space<vmem>>, %arg4: memref<512x384xbf16, #tpu.memory_space<vmem>>, %arg5: memref<1x384xf32, #tpu.memory_space<vmem>>, %arg6: memref<384x128xbf16, #tpu.memory_space<vmem>>, %arg7: memref<1x128xf32, #tpu.memory_space<vmem>>, %arg8: memref<2x128xf32, #tpu.memory_space<vmem>>, %arg9: memref<2x512xf32, #tpu.memory_space<vmem>>) attributes {dimension_semantics = [#tpu.dimension_semantics<arbitrary>], iteration_bounds = array<i64: 3>, scalar_prefetch = 0 : i64, scratch_operands = 1 : i64, tpu.core_type = #tpu.core_type<tc>, window_params = [{transform_indices = @transform_0, window_bounds = array<i64: 2, 3456>}, {transform_indices = @transform_1, window_bounds = array<i64: 3456, 512>}, {pipeline_mode = #tpu.pipeline_mode<synchronous>, transform_indices = @transform_2, window_bounds = array<i64: 1, 512>}, {pipeline_mode = #tpu.pipeline_mode<synchronous>, transform_indices = @transform_3, window_bounds = array<i64: 512, 384>}, {pipeline_mode = #tpu.pipeline_mode<synchronous>, transform_indices = @transform_4, window_bounds = array<i64: 1, 384>}, {pipeline_mode = #tpu.pipeline_mode<synchronous>, transform_indices = @transform_5, window_bounds = array<i64: 384, 128>}, {pipeline_mode = #tpu.pipeline_mode<synchronous>, transform_indices = @transform_6, window_bounds = array<i64: 1, 128>}, {pipeline_mode = #tpu.pipeline_mode<synchronous>, transform_indices = @transform_7, window_bounds = array<i64: 2, 128>}]} {
    %c0_i32 = arith.constant 0 : i32
    %0 = arith.cmpi eq, %arg0, %c0_i32 : i32
    %1 = arith.extui %0 : i1 to i32
    %c0_i32_0 = arith.constant 0 : i32
    %2 = arith.cmpi ne, %1, %c0_i32_0 : i32
    scf.if %2 {
      %cst_9 = arith.constant 0.000000e+00 : f32
      %13 = vector.broadcast %cst_9 : f32 to vector<2x512xf32>
      %c0_10 = arith.constant 0 : index
      %c0_11 = arith.constant 0 : index
      %14 = vector.load %arg9[%c0_10, %c0_11] : memref<2x512xf32, #tpu.memory_space<vmem>>, vector<2x512xf32>
      tpu.vector_store %arg9[%c0_10, %c0_11], %13 {strides = array<i32>} : memref<2x512xf32, #tpu.memory_space<vmem>>, vector<2x512xf32>,
    } else {
    }
    %c0 = arith.constant 0 : index
    %c0_1 = arith.constant 0 : index
    %3 = vector.load %arg1[%c0, %c0_1] : memref<2x3456xf32, #tpu.memory_space<vmem>>, vector<2x3456xf32>
    %4 = arith.truncf %3 : vector<2x3456xf32> to vector<2x3456xbf16>
    %c0_2 = arith.constant 0 : index
    %c0_3 = arith.constant 0 : index
    %5 = vector.load %arg9[%c0_2, %c0_3] : memref<2x512xf32, #tpu.memory_space<vmem>>, vector<2x512xf32>
    %c0_4 = arith.constant 0 : index
    %c0_5 = arith.constant 0 : index
    %6 = vector.load %arg2[%c0_4, %c0_5] : memref<3456x512xbf16, #tpu.memory_space<vmem>>, vector<3456x512xbf16>
    %cst = arith.constant dense<0.000000e+00> : vector<2x512xf32>
    %7 = tpu.matmul %4, %6, %cst {dimension_numbers = #tpu.dot_dimension_numbers<[1], [0], [0], [1], [0, 0, 1, 1], [], []>} : vector<2x3456xbf16>, vector<3456x512xbf16>, vector<2x512xf32> -> vector<2x512xf32>
    %8 = arith.addf %5, %7 : vector<2x512xf32>
    %c0_6 = arith.constant 0 : index
    %c0_7 = arith.constant 0 : index
    %9 = vector.load %arg9[%c0_6, %c0_7] : memref<2x512xf32, #tpu.memory_space<vmem>>, vector<2x512xf32>
    tpu.vector_store %arg9[%c0_6, %c0_7], %8 {strides = array<i32>} : memref<2x512xf32, #tpu.memory_space<vmem>>, vector<2x512xf32>,
    %c2_i32 = arith.constant 2 : i32
    %10 = arith.cmpi eq, %arg0, %c2_i32 : i32
    %11 = arith.extui %10 : i1 to i32
    %c0_i32_8 = arith.constant 0 : i32
    %12 = arith.cmpi ne, %11, %c0_i32_8 : i32
    scf.if %12 {
      %c0_9 = arith.constant 0 : index
      %c0_10 = arith.constant 0 : index
      %13 = vector.load %arg9[%c0_9, %c0_10] : memref<2x512xf32, #tpu.memory_space<vmem>>, vector<2x512xf32>
      %c0_11 = arith.constant 0 : index
      %c0_12 = arith.constant 0 : index
      %14 = vector.load %arg3[%c0_11, %c0_12] : memref<1x512xf32, #tpu.memory_space<vmem>>, vector<1x512xf32>
      %15 = vector.broadcast %14 : vector<1x512xf32> to vector<2x512xf32>
      %16 = arith.addf %13, %15 : vector<2x512xf32>
      %cst_13 = arith.constant 0.000000e+00 : f32
      %17 = vector.broadcast %cst_13 : f32 to vector<2x512xf32>
      %18 = arith.maximumf %16, %17 : vector<2x512xf32>
      %19 = arith.truncf %18 : vector<2x512xf32> to vector<2x512xbf16>
      %c0_14 = arith.constant 0 : index
      %c0_15 = arith.constant 0 : index
      %20 = vector.load %arg4[%c0_14, %c0_15] : memref<512x384xbf16, #tpu.memory_space<vmem>>, vector<512x384xbf16>
      %cst_16 = arith.constant dense<0.000000e+00> : vector<2x384xf32>
      %21 = tpu.matmul %19, %20, %cst_16 {dimension_numbers = #tpu.dot_dimension_numbers<[1], [0], [0], [1], [0, 0, 1, 1], [], []>} : vector<2x512xbf16>, vector<512x384xbf16>, vector<2x384xf32> -> vector<2x384xf32>
      %c0_17 = arith.constant 0 : index
      %c0_18 = arith.constant 0 : index
      %22 = vector.load %arg5[%c0_17, %c0_18] : memref<1x384xf32, #tpu.memory_space<vmem>>, vector<1x384xf32>
      %23 = vector.broadcast %22 : vector<1x384xf32> to vector<2x384xf32>
      %24 = arith.addf %21, %23 : vector<2x384xf32>
      %cst_19 = arith.constant 0.000000e+00 : f32
      %25 = vector.broadcast %cst_19 : f32 to vector<2x384xf32>
      %26 = arith.maximumf %24, %25 : vector<2x384xf32>
      %27 = arith.truncf %26 : vector<2x384xf32> to vector<2x384xbf16>
      %c0_20 = arith.constant 0 : index
      %c0_21 = arith.constant 0 : index
      %28 = vector.load %arg6[%c0_20, %c0_21] : memref<384x128xbf16, #tpu.memory_space<vmem>>, vector<384x128xbf16>
      %cst_22 = arith.constant dense<0.000000e+00> : vector<2x128xf32>
      %29 = tpu.matmul %27, %28, %cst_22 {dimension_numbers = #tpu.dot_dimension_numbers<[1], [0], [0], [1], [0, 0, 1, 1], [], []>} : vector<2x384xbf16>, vector<384x128xbf16>, vector<2x128xf32> -> vector<2x128xf32>
      %c0_23 = arith.constant 0 : index
      %c0_24 = arith.constant 0 : index
      %30 = vector.load %arg7[%c0_23, %c0_24] : memref<1x128xf32, #tpu.memory_space<vmem>>, vector<1x128xf32>
      %31 = vector.broadcast %30 : vector<1x128xf32> to vector<2x128xf32>
      %32 = arith.addf %29, %31 : vector<2x128xf32>
      %cst_25 = arith.constant 0.000000e+00 : f32
      %33 = vector.broadcast %cst_25 : f32 to vector<2x128xf32>
      %34 = arith.maximumf %32, %33 : vector<2x128xf32>
      %35 = math.tanh %34 : vector<2x128xf32>
      %c0_26 = arith.constant 0 : index
      %c0_27 = arith.constant 0 : index
      %36 = vector.load %arg8[%c0_26, %c0_27] : memref<2x128xf32, #tpu.memory_space<vmem>>, vector<2x128xf32>
      tpu.vector_store %arg8[%c0_26, %c0_27], %35 {strides = array<i32>} : memref<2x128xf32, #tpu.memory_space<vmem>>, vector<2x128xf32>,
    } else {
    }
    return
  }
  func.func @transform_0(%arg0: i32) -> (i32, i32) {
    %c0_i32 = arith.constant 0 : i32
    %c0_i32_0 = arith.constant 0 : i32
    return %c0_i32, %arg0 : i32, i32
  }
  func.func @transform_1(%arg0: i32) -> (i32, i32) {
    %c0_i32 = arith.constant 0 : i32
    %c0_i32_0 = arith.constant 0 : i32
    return %arg0, %c0_i32 : i32, i32
  }
  func.func @transform_2(%arg0: i32) -> (i32, i32) {
    %c0_i32 = arith.constant 0 : i32
    %c0_i32_0 = arith.constant 0 : i32
    %c0_i32_1 = arith.constant 0 : i32
    return %c0_i32, %c0_i32_0 : i32, i32
  }
  func.func @transform_3(%arg0: i32) -> (i32, i32) {
    %c0_i32 = arith.constant 0 : i32
    %c0_i32_0 = arith.constant 0 : i32
    %c0_i32_1 = arith.constant 0 : i32
    return %c0_i32, %c0_i32_0 : i32, i32
  }
  func.func @transform_4(%arg0: i32) -> (i32, i32) {
    %c0_i32 = arith.constant 0 : i32
    %c0_i32_0 = arith.constant 0 : i32
    %c0_i32_1 = arith.constant 0 : i32
    return %c0_i32, %c0_i32_0 : i32, i32
  }
  func.func @transform_5(%arg0: i32) -> (i32, i32) {
    %c0_i32 = arith.constant 0 : i32
    %c0_i32_0 = arith.constant 0 : i32
    %c0_i32_1 = arith.constant 0 : i32
    return %c0_i32, %c0_i32_0 : i32, i32
  }
  func.func @transform_6(%arg0: i32) -> (i32, i32) {
    %c0_i32 = arith.constant 0 : i32
    %c0_i32_0 = arith.constant 0 : i32
    %c0_i32_1 = arith.constant 0 : i32
    return %c0_i32, %c0_i32_0 : i32, i32
  }
  func.func @transform_7(%arg0: i32) -> (i32, i32) {
    %c0_i32 = arith.constant 0 : i32
    %c0_i32_0 = arith.constant 0 : i32
    %c0_i32_1 = arith.constant 0 : i32
    return %c0_i32, %c0_i32_0 : i32, i32
  }
}

</mosaic_0001>

<bundles_post_ra>
// kernel: actor_forward.3
= control target key start
LH: loop header
LB: loop body
LE: loop exit
PB: predicated region body
PF: predicated region fallthrough
CT: control target
= control target key end

     0   :  { %v1089_v0 = vmov 0.0   ;;  %vm918_vm0 = vcmask 261120   ;;  %s2375_s1 = inlined_call_operand.vmem [shape: f32[256,32], index: 1, kind: input, shape index: {}]   ;;  %s2376_s0 = inlined_call_operand.vmem [shape: f32[800,256], index: 0, kind: input, shape index: {}]   ;;  %s2377_s2 = inlined_call_operand.vmem [shape: f32[1,32], index: 2, kind: input, shape index: {}]   ;;  %s2378_s3 = inlined_call_operand.vmem [shape: f32[800,32], index: 3, kind: output, shape index: {}]  }
   0x1   :  { %253 = vmatprep.subr.mxu0 %v1089_v0  ;;  %1024 = vmatprep.subr.mxu1 %v1089_v0  ;;  %v229_v1 = vld [vmem:[%s2375_s1 + $0x78] sm:$0xff]  ;;  %v228_v2 = vld [vmem:[%s2375_s1 + $0x70] sm:$0xff]  ;;  %v227_v3 = vld [vmem:[%s2375_s1 + $0x68] sm:$0xff] }
   0x2   :  { %254 = vmatpush1.msra.mxu0 %v229_v1  ;;  %1056 = vmatpush1.msra.mxu1 %v229_v1  ;;  %v226_v4 = vld [vmem:[%s2375_s1 + $0x60] sm:$0xff]  ;;  %v225_v5 = vld [vmem:[%s2375_s1 + $0x58] sm:$0xff]  ;;  %v224_v6 = vld [vmem:[%s2375_s1 + $0x50] sm:$0xff] }
   0x3   :  { %255 = vmatprep.subr.mxu0 %v1089_v0  ;;  %1025 = vmatprep.subr.mxu1 %v1089_v0  ;;  %v223_v7 = vld [vmem:[%s2375_s1 + $0x48] sm:$0xff]  ;;  %v222_v8 = vld [vmem:[%s2375_s1 + $0x40] sm:$0xff]  ;;  %v221_v9 = vld [vmem:[%s2375_s1 + $0x38] sm:$0xff] }
   0x4   :  { %256 = vmatpush1.msra.mxu0 %v228_v2  ;;  %1057 = vmatpush1.msra.mxu1 %v228_v2  ;;  %v220_v10 = vld [vmem:[%s2375_s1 + $0x30] sm:$0xff]  ;;  %v219_v11 = vld [vmem:[%s2375_s1 + $0x28] sm:$0xff]  ;;  %v218_v12 = vld [vmem:[%s2375_s1 + $0x20] sm:$0xff] }
   0x5   :  { %257 = vmatprep.subr.mxu0 %v1089_v0  ;;  %1026 = vmatprep.subr.mxu1 %v1089_v0  ;;  %v217_v13 = vld [vmem:[%s2375_s1 + $0x18] sm:$0xff]  ;;  %v216_v14 = vld [vmem:[%s2375_s1 + $0x10] sm:$0xff]  ;;  %v215_v15 = vld [vmem:[%s2375_s1 + $0x8] sm:$0xff] }
   0x6   :  { %258 = vmatpush1.msra.mxu0 %v227_v3  ;;  %1058 = vmatpush1.msra.mxu1 %v227_v3  ;;  %v214_v16 = vld [vmem:[%s2375_s1] sm:$0xff]  ;;  %v245_v17 = vld [vmem:[%s2375_s1 + $0xf8] sm:$0xff]  ;;  %v244_v18 = vld [vmem:[%s2375_s1 + $0xf0] sm:$0xff] }
   0x7   :  { %259 = vmatprep.subr.mxu0 %v1089_v0  ;;  %1027 = vmatprep.subr.mxu1 %v1089_v0  ;;  %v243_v19 = vld [vmem:[%s2375_s1 + $0xe8] sm:$0xff]  ;;  %v242_v20 = vld [vmem:[%s2375_s1 + $0xe0] sm:$0xff]  ;;  %v241_v21 = vld [vmem:[%s2375_s1 + $0xd8] sm:$0xff] }
   0x8   :  { %260 = vmatpush1.msra.mxu0 %v226_v4  ;;  %1059 = vmatpush1.msra.mxu1 %v226_v4  ;;  %v240_v22 = vld [vmem:[%s2375_s1 + $0xd0] sm:$0xff]  ;;  %v239_v23 = vld [vmem:[%s2375_s1 + $0xc8] sm:$0xff]  ;;  %v238_v24 = vld [vmem:[%s2375_s1 + $0xc0] sm:$0xff] }
   0x9   :  { %261 = vmatprep.subr.mxu0 %v1089_v0  ;;  %1028 = vmatprep.subr.mxu1 %v1089_v0  ;;  %v237_v25 = vld [vmem:[%s2375_s1 + $0xb8] sm:$0xff]  ;;  %v236_v26 = vld [vmem:[%s2375_s1 + $0xb0] sm:$0xff]  ;;  %v235_v27 = vld [vmem:[%s2375_s1 + $0xa8] sm:$0xff] }
   0xa   :  { %262 = vmatpush1.msra.mxu0 %v225_v5  ;;  %1060 = vmatpush1.msra.mxu1 %v225_v5  ;;  %v234_v28 = vld [vmem:[%s2375_s1 + $0xa0] sm:$0xff]  ;;  %v233_v29 = vld [vmem:[%s2375_s1 + $0x98] sm:$0xff]  ;;  %v232_v30 = vld [vmem:[%s2375_s1 + $0x90] sm:$0xff] }
   0xb   :  { %263 = vmatprep.subr.mxu0 %v1089_v0  ;;  %1029 = vmatprep.subr.mxu1 %v1089_v0  ;;  %v231_v31 = vld [vmem:[%s2375_s1 + $0x88] sm:$0xff]  ;;  %v230_v32 = vld [vmem:[%s2375_s1 + $0x80] sm:$0xff]  ;;  %v17_v37 = vld [vmem:[%s2376_s0 + $0x18] sm:$0xff] }
   0xc   :  { %264 = vmatpush1.msra.mxu0 %v224_v6  ;;  %1061 = vmatpush1.msra.mxu1 %v224_v6  ;;  %v15_v33 = vld [vmem:[%s2376_s0 + $0x8] sm:$0xff]  ;;  %v14_v35 = vld [vmem:[%s2376_s0] sm:$0xff]  ;;  %v117_v38 = vld [vmem:[%s2376_s0 + $0x338] sm:$0xff] }
   0xd   :  { %265 = vmatprep.subr.mxu0 %v1089_v0  ;;  %1030 = vmatprep.subr.mxu1 %v1089_v0  ;;  %v115_v34 = vld [vmem:[%s2376_s0 + $0x328] sm:$0xff]  ;;  %v114_v36 = vld [vmem:[%s2376_s0 + $0x320] sm:$0xff]  ;;  %v16_v39 = vld [vmem:[%s2376_s0 + $0x10] sm:$0xff] }
   0xe   :  { %266 = vmatpush1.msra.mxu0 %v223_v7  ;;  %1062 = vmatpush1.msra.mxu1 %v223_v7  ;;  %v116_v40 = vld [vmem:[%s2376_s0 + $0x330] sm:$0xff]  ;;  %v19_v41 = vld [vmem:[%s2376_s0 + $0x28] sm:$0xff]  ;;  %v18_v43 = vld [vmem:[%s2376_s0 + $0x20] sm:$0xff] }
   0xf   :  { %267 = vmatprep.subr.mxu0 %v1089_v0  ;;  %1031 = vmatprep.subr.mxu1 %v1089_v0  ;;  %v119_v42 = vld [vmem:[%s2376_s0 + $0x348] sm:$0xff]  ;;  %v118_v44 = vld [vmem:[%s2376_s0 + $0x340] sm:$0xff]  ;;  %v21_v45 = vld [vmem:[%s2376_s0 + $0x38] sm:$0xff] }
  0x10   :  { %268 = vmatpush1.msra.mxu0 %v222_v8  ;;  %1063 = vmatpush1.msra.mxu1 %v222_v8  ;;  %v121_v46 = vld [vmem:[%s2376_s0 + $0x358] sm:$0xff]  ;;  %v20_v47 = vld [vmem:[%s2376_s0 + $0x30] sm:$0xff]  ;;  %v23_v49 = vld [vmem:[%s2376_s0 + $0x48] sm:$0xff] }
  0x11   :  { %269 = vmatprep.subr.mxu0 %v1089_v0  ;;  %1032 = vmatprep.subr.mxu1 %v1089_v0  ;;  %v120_v48 = vld [vmem:[%s2376_s0 + $0x350] sm:$0xff]  ;;  %v123_v50 = vld [vmem:[%s2376_s0 + $0x368] sm:$0xff]  ;;  %v22_v51 = vld [vmem:[%s2376_s0 + $0x40] sm:$0xff] }
  0x12   :  { %270 = vmatpush1.msra.mxu0 %v221_v9  ;;  %1064 = vmatpush1.msra.mxu1 %v221_v9  ;;  %v122_v52 = vld [vmem:[%s2376_s0 + $0x360] sm:$0xff]  ;;  %v25_v53 = vld [vmem:[%s2376_s0 + $0x58] sm:$0xff]  ;;  %v24_v55 = vld [vmem:[%s2376_s0 + $0x50] sm:$0xff] }
  0x13   :  { %271 = vmatprep.subr.mxu0 %v1089_v0  ;;  %1033 = vmatprep.subr.mxu1 %v1089_v0  ;;  %v125_v54 = vld [vmem:[%s2376_s0 + $0x378] sm:$0xff]  ;;  %v124_v56 = vld [vmem:[%s2376_s0 + $0x370] sm:$0xff]  ;;  %v27_v57 = vld [vmem:[%s2376_s0 + $0x68] sm:$0xff] }
  0x14   :  { %272 = vmatpush1.msra.mxu0 %v220_v10  ;;  %1065 = vmatpush1.msra.mxu1 %v220_v10  ;;  %v127_v58 = vld [vmem:[%s2376_s0 + $0x388] sm:$0xff]  ;;  %v26_v59 = vld [vmem:[%s2376_s0 + $0x60] sm:$0xff]  ;;  %v29_v61 = vld [vmem:[%s2376_s0 + $0x78] sm:$0xff] }
  0x15   :  { %273 = vmatprep.subr.mxu0 %v1089_v0  ;;  %1034 = vmatprep.subr.mxu1 %v1089_v0  ;;  %v126_v60 = vld [vmem:[%s2376_s0 + $0x380] sm:$0xff]  ;;  %v129_v62 = vld [vmem:[%s2376_s0 + $0x398] sm:$0xff]  ;;  %v28_v63 = vld [vmem:[%s2376_s0 + $0x70] sm:$0xff] }
  0x16   :  { %274 = vmatpush1.msra.mxu0 %v219_v11  ;;  %1066 = vmatpush1.msra.mxu1 %v219_v11  ;;  %v31_v1 = vld [vmem:[%s2376_s0 + $0x88] sm:$0xff]  ;;  %v30_v3 = vld [vmem:[%s2376_s0 + $0x80] sm:$0xff]  ;;  %v33_v5 = vld [vmem:[%s2376_s0 + $0x98] sm:$0xff] }
  0x17   :  { %275 = vmatprep.subr.mxu0 %v1089_v0  ;;  %1035 = vmatprep.subr.mxu1 %v1089_v0  ;;  %v131_v2 = vld [vmem:[%s2376_s0 + $0x3a8] sm:$0xff]  ;;  %v130_v4 = vld [vmem:[%s2376_s0 + $0x3a0] sm:$0xff]  ;;  %v133_v6 = vld [vmem:[%s2376_s0 + $0x3b8] sm:$0xff] }
  0x18   :  { %276 = vmatpush1.msra.mxu0 %v218_v12  ;;  %1067 = vmatpush1.msra.mxu1 %v218_v12  ;;  %v32_v7 = vld [vmem:[%s2376_s0 + $0x90] sm:$0xff]  ;;  %v35_v9 = vld [vmem:[%s2376_s0 + $0xa8] sm:$0xff]  ;;  %v34_v11 = vld [vmem:[%s2376_s0 + $0xa0] sm:$0xff] }
  0x19   :  { %277 = vmatprep.subr.mxu0 %v1089_v0  ;;  %1036 = vmatprep.subr.mxu1 %v1089_v0  ;;  %v132_v8 = vld [vmem:[%s2376_s0 + $0x3b0] sm:$0xff]  ;;  %v135_v10 = vld [vmem:[%s2376_s0 + $0x3c8] sm:$0xff]  ;;  %v134_v12 = vld [vmem:[%s2376_s0 + $0x3c0] sm:$0xff] }
  0x1a   :  { %278 = vmatpush1.msra.mxu0 %v217_v13  ;;  %1068 = vmatpush1.msra.mxu1 %v217_v13  ;;  %v37_v13 = vld [vmem:[%s2376_s0 + $0xb8] sm:$0xff] }
  0x1b   :  { %279 = vmatprep.subr.mxu0 %v1089_v0  ;;  %1037 = vmatprep.subr.mxu1 %v1089_v0 }
  0x1c   :  { %280 = vmatpush1.msra.mxu0 %v216_v14  ;;  %1069 = vmatpush1.msra.mxu1 %v216_v14  ;;  %v137_v14 = vld [vmem:[%s2376_s0 + $0x3d8] sm:$0xff] }
  0x1d   :  { %281 = vmatprep.subr.mxu0 %v1089_v0  ;;  %1038 = vmatprep.subr.mxu1 %v1089_v0 }
  0x1e   :  { %282 = vmatpush1.msra.mxu0 %v215_v15  ;;  %1070 = vmatpush1.msra.mxu1 %v215_v15  ;;  %v36_v15 = vld [vmem:[%s2376_s0 + $0xb0] sm:$0xff] }
  0x1f   :  { %283 = vmatprep.subr.mxu0 %v1089_v0  ;;  %1039 = vmatprep.subr.mxu1 %v1089_v0 }
  0x20   :  { %284 = vmatpush1.msra.mxu0 %v214_v16  ;;  %1071 = vmatpush1.msra.mxu1 %v214_v16  ;;  %v136_v16 = vld [vmem:[%s2376_s0 + $0x3d0] sm:$0xff] }
  0x21   :  { %285 = vmatprep.subr.mxu0 %v1089_v0  ;;  %1040 = vmatprep.subr.mxu1 %v1089_v0 }
  0x22   :  { %286 = vmatpush2.msra.mxu0 %v245_v17  ;;  %1072 = vmatpush2.msra.mxu1 %v245_v17  ;;  %v39_v17 = vld [vmem:[%s2376_s0 + $0xc8] sm:$0xff] }
  0x23   :  { %287 = vmatprep.subr.mxu0 %v1089_v0  ;;  %1041 = vmatprep.subr.mxu1 %v1089_v0 }
  0x24   :  { %288 = vmatpush2.msra.mxu0 %v244_v18  ;;  %1073 = vmatpush2.msra.mxu1 %v244_v18  ;;  %v139_v18 = vld [vmem:[%s2376_s0 + $0x3e8] sm:$0xff] }
  0x25   :  { %289 = vmatprep.subr.mxu0 %v1089_v0  ;;  %1042 = vmatprep.subr.mxu1 %v1089_v0 }
  0x26   :  { %290 = vmatpush2.msra.mxu0 %v243_v19  ;;  %1074 = vmatpush2.msra.mxu1 %v243_v19  ;;  %v38_v19 = vld [vmem:[%s2376_s0 + $0xc0] sm:$0xff] }
  0x27   :  { %291 = vmatprep.subr.mxu0 %v1089_v0  ;;  %1043 = vmatprep.subr.mxu1 %v1089_v0 }
  0x28   :  { %292 = vmatpush2.msra.mxu0 %v242_v20  ;;  %1075 = vmatpush2.msra.mxu1 %v242_v20  ;;  %v138_v20 = vld [vmem:[%s2376_s0 + $0x3e0] sm:$0xff] }
  0x29   :  { %293 = vmatprep.subr.mxu0 %v1089_v0  ;;  %1044 = vmatprep.subr.mxu1 %v1089_v0 }
  0x2a   :  { %294 = vmatpush2.msra.mxu0 %v241_v21  ;;  %1076 = vmatpush2.msra.mxu1 %v241_v21  ;;  %v41_v21 = vld [vmem:[%s2376_s0 + $0xd8] sm:$0xff] }
  0x2b   :  { %295 = vmatprep.subr.mxu0 %v1089_v0  ;;  %1045 = vmatprep.subr.mxu1 %v1089_v0 }
  0x2c   :  { %296 = vmatpush2.msra.mxu0 %v240_v22  ;;  %1077 = vmatpush2.msra.mxu1 %v240_v22  ;;  %v141_v22 = vld [vmem:[%s2376_s0 + $0x3f8] sm:$0xff] }
  0x2d   :  { %297 = vmatprep.subr.mxu0 %v1089_v0  ;;  %1046 = vmatprep.subr.mxu1 %v1089_v0 }
  0x2e   :  { %298 = vmatpush2.msra.mxu0 %v239_v23  ;;  %1078 = vmatpush2.msra.mxu1 %v239_v23  ;;  %v40_v23 = vld [vmem:[%s2376_s0 + $0xd0] sm:$0xff] }
  0x2f   :  { %299 = vmatprep.subr.mxu0 %v1089_v0  ;;  %1047 = vmatprep.subr.mxu1 %v1089_v0 }
  0x30   :  { %300 = vmatpush2.msra.mxu0 %v238_v24  ;;  %1079 = vmatpush2.msra.mxu1 %v238_v24  ;;  %v140_v24 = vld [vmem:[%s2376_s0 + $0x3f0] sm:$0xff] }
  0x31   :  { %301 = vmatprep.subr.mxu0 %v1089_v0  ;;  %1048 = vmatprep.subr.mxu1 %v1089_v0 }
  0x32   :  { %302 = vmatpush2.msra.mxu0 %v237_v25  ;;  %1080 = vmatpush2.msra.mxu1 %v237_v25  ;;  %v43_v25 = vld [vmem:[%s2376_s0 + $0xe8] sm:$0xff] }
  0x33   :  { %303 = vmatprep.subr.mxu0 %v1089_v0  ;;  %1049 = vmatprep.subr.mxu1 %v1089_v0 }
  0x34   :  { %304 = vmatpush2.msra.mxu0 %v236_v26  ;;  %1081 = vmatpush2.msra.mxu1 %v236_v26  ;;  %v143_v26 = vld [vmem:[%s2376_s0 + $0x408] sm:$0xff] }
  0x35   :  { %305 = vmatprep.subr.mxu0 %v1089_v0  ;;  %1050 = vmatprep.subr.mxu1 %v1089_v0 }
  0x36   :  { %306 = vmatpush2.msra.mxu0 %v235_v27  ;;  %1082 = vmatpush2.msra.mxu1 %v235_v27  ;;  %v42_v27 = vld [vmem:[%s2376_s0 + $0xe0] sm:$0xff] }
  0x37   :  { %307 = vmatprep.subr.mxu0 %v1089_v0  ;;  %1051 = vmatprep.subr.mxu1 %v1089_v0 }
  0x38   :  { %308 = vmatpush2.msra.mxu0 %v234_v28  ;;  %1083 = vmatpush2.msra.mxu1 %v234_v28  ;;  %v142_v28 = vld [vmem:[%s2376_s0 + $0x400] sm:$0xff] }
  0x39   :  { %309 = vmatprep.subr.mxu0 %v1089_v0  ;;  %1052 = vmatprep.subr.mxu1 %v1089_v0 }
  0x3a   :  { %310 = vmatpush2.msra.mxu0 %v233_v29  ;;  %1084 = vmatpush2.msra.mxu1 %v233_v29  ;;  %v45_v29 = vld [vmem:[%s2376_s0 + $0xf8] sm:$0xff] }
  0x3b   :  { %311 = vmatprep.subr.mxu0 %v1089_v0  ;;  %1053 = vmatprep.subr.mxu1 %v1089_v0 }
  0x3c   :  { %312 = vmatpush2.msra.mxu0 %v232_v30  ;;  %1085 = vmatpush2.msra.mxu1 %v232_v30  ;;  %v145_v30 = vld [vmem:[%s2376_s0 + $0x418] sm:$0xff] }
  0x3d   :  { %313 = vmatprep.subr.mxu0 %v1089_v0  ;;  %1054 = vmatprep.subr.mxu1 %v1089_v0 }
  0x3e   :  { %314 = vmatpush2.msra.mxu0 %v231_v31  ;;  %1086 = vmatpush2.msra.mxu1 %v231_v31  ;;  %v44_v31 = vld [vmem:[%s2376_s0 + $0xf0] sm:$0xff] }
  0x3f   :  { %315 = vmatprep.subr.mxu0 %v1089_v0  ;;  %1055 = vmatprep.subr.mxu1 %v1089_v0  ;;  %v128_v0 = vld [vmem:[%s2376_s0 + $0x390] sm:$0xff] }
  0x40   :  { %316 = vmatpush2.msra.mxu0 %v230_v32  ;;  %1087 = vmatpush2.msra.mxu1 %v230_v32  ;;  %v144_v32 = vld [vmem:[%s2376_s0 + $0x410] sm:$0xff] }
  0x41   :  { %317 = vmatprep.mubr.f32.mxu0 %v15_v33  ;;  %567 = vmatprep.mubr.f32.mxu1 %v115_v34  ;;  %v47_v33 = vld [vmem:[%s2376_s0 + $0x108] sm:$0xff] }
  0x42   :  { %318 = vmatmul.mubr.f32.vlgmr.msra.gmra.mxu0 %v14_v35  ;;  %568 = vmatmul.mubr.f32.vlgmr.msra.gmra.mxu1 %v114_v36  ;;  %v147_v34 = vld [vmem:[%s2376_s0 + $0x428] sm:$0xff]  ;;  %v46_v35 = vld [vmem:[%s2376_s0 + $0x100] sm:$0xff] }
  0x43   :  { %322 = vmatprep.mubr.f32.mxu0 %v17_v37  ;;  %572 = vmatprep.mubr.f32.mxu1 %v117_v38  ;;  %v146_v36 = vld [vmem:[%s2376_s0 + $0x420] sm:$0xff]  ;;  %v49_v37 = vld [vmem:[%s2376_s0 + $0x118] sm:$0xff] }
  0x44   :  { %v149_v38 = vld [vmem:[%s2376_s0 + $0x438] sm:$0xff] }
  0x46   :  { %323 = vmatmul.mubr.f32.gmra.mxu0 %v16_v39  ;;  %573 = vmatmul.mubr.f32.gmra.mxu1 %v116_v40  ;;  %v48_v39 = vld [vmem:[%s2376_s0 + $0x110] sm:$0xff] }
  0x47   :  { %327 = vmatprep.mubr.f32.mxu0 %v19_v41  ;;  %577 = vmatprep.mubr.f32.mxu1 %v119_v42  ;;  %v148_v40 = vld [vmem:[%s2376_s0 + $0x430] sm:$0xff]  ;;  %v51_v41 = vld [vmem:[%s2376_s0 + $0x128] sm:$0xff] }
  0x48   :  { %v151_v42 = vld [vmem:[%s2376_s0 + $0x448] sm:$0xff] }
  0x4a   :  { %328 = vmatmul.mubr.f32.gmra.mxu0 %v18_v43  ;;  %578 = vmatmul.mubr.f32.gmra.mxu1 %v118_v44  ;;  %v50_v43 = vld [vmem:[%s2376_s0 + $0x120] sm:$0xff] }
  0x4b   :  { %332 = vmatprep.mubr.f32.mxu0 %v21_v45  ;;  %582 = vmatprep.mubr.f32.mxu1 %v121_v46  ;;  %v150_v44 = vld [vmem:[%s2376_s0 + $0x440] sm:$0xff]  ;;  %v53_v45 = vld [vmem:[%s2376_s0 + $0x138] sm:$0xff] }
  0x4c   :  { %v153_v46 = vld [vmem:[%s2376_s0 + $0x458] sm:$0xff] }
  0x4e   :  { %333 = vmatmul.mubr.f32.gmra.mxu0 %v20_v47  ;;  %583 = vmatmul.mubr.f32.gmra.mxu1 %v120_v48  ;;  %v52_v47 = vld [vmem:[%s2376_s0 + $0x130] sm:$0xff] }
  0x4f   :  { %337 = vmatprep.mubr.f32.mxu0 %v23_v49  ;;  %587 = vmatprep.mubr.f32.mxu1 %v123_v50  ;;  %v152_v48 = vld [vmem:[%s2376_s0 + $0x450] sm:$0xff]  ;;  %v55_v49 = vld [vmem:[%s2376_s0 + $0x148] sm:$0xff] }
  0x50   :  { %v155_v50 = vld [vmem:[%s2376_s0 + $0x468] sm:$0xff] }
  0x52   :  { %338 = vmatmul.mubr.f32.gmra.mxu0 %v22_v51  ;;  %588 = vmatmul.mubr.f32.gmra.mxu1 %v122_v52  ;;  %v54_v51 = vld [vmem:[%s2376_s0 + $0x140] sm:$0xff] }
  0x53   :  { %342 = vmatprep.mubr.f32.mxu0 %v25_v53  ;;  %592 = vmatprep.mubr.f32.mxu1 %v125_v54  ;;  %v154_v52 = vld [vmem:[%s2376_s0 + $0x460] sm:$0xff]  ;;  %v57_v53 = vld [vmem:[%s2376_s0 + $0x158] sm:$0xff] }
  0x54   :  { %v157_v54 = vld [vmem:[%s2376_s0 + $0x478] sm:$0xff] }
  0x56   :  { %343 = vmatmul.mubr.f32.gmra.mxu0 %v24_v55  ;;  %593 = vmatmul.mubr.f32.gmra.mxu1 %v124_v56  ;;  %v56_v55 = vld [vmem:[%s2376_s0 + $0x150] sm:$0xff] }
  0x57   :  { %347 = vmatprep.mubr.f32.mxu0 %v27_v57  ;;  %597 = vmatprep.mubr.f32.mxu1 %v127_v58  ;;  %v156_v56 = vld [vmem:[%s2376_s0 + $0x470] sm:$0xff]  ;;  %v59_v57 = vld [vmem:[%s2376_s0 + $0x168] sm:$0xff] }
  0x58   :  { %v159_v58 = vld [vmem:[%s2376_s0 + $0x488] sm:$0xff] }
  0x5a   :  { %348 = vmatmul.mubr.f32.gmra.mxu0 %v26_v59  ;;  %598 = vmatmul.mubr.f32.gmra.mxu1 %v126_v60  ;;  %v58_v59 = vld [vmem:[%s2376_s0 + $0x160] sm:$0xff] }
  0x5b   :  { %352 = vmatprep.mubr.f32.mxu0 %v29_v61  ;;  %602 = vmatprep.mubr.f32.mxu1 %v129_v62  ;;  %v158_v60 = vld [vmem:[%s2376_s0 + $0x480] sm:$0xff]  ;;  %v61_v61 = vld [vmem:[%s2376_s0 + $0x178] sm:$0xff] }
  0x5c   :  { %v161_v62 = vld [vmem:[%s2376_s0 + $0x498] sm:$0xff] }
  0x5e   :  { %353 = vmatmul.mubr.f32.gmra.mxu0 %v28_v63  ;;  %603 = vmatmul.mubr.f32.gmra.mxu1 %v128_v0  ;;  %v60_v63 = vld [vmem:[%s2376_s0 + $0x170] sm:$0xff] }
  0x5f   :  { %357 = vmatprep.mubr.f32.mxu0 %v31_v1  ;;  %607 = vmatprep.mubr.f32.mxu1 %v131_v2  ;;  %v160_v0 = vld [vmem:[%s2376_s0 + $0x490] sm:$0xff]  ;;  %v63_v1 = vld [vmem:[%s2376_s0 + $0x188] sm:$0xff] }
  0x60   :  { %v163_v2 = vld [vmem:[%s2376_s0 + $0x4a8] sm:$0xff] }
  0x62   :  { %358 = vmatmul.mubr.f32.gmra.mxu0 %v30_v3  ;;  %608 = vmatmul.mubr.f32.gmra.mxu1 %v130_v4  ;;  %v62_v3 = vld [vmem:[%s2376_s0 + $0x180] sm:$0xff] }
  0x63   :  { %362 = vmatprep.mubr.f32.mxu0 %v33_v5  ;;  %612 = vmatprep.mubr.f32.mxu1 %v133_v6  ;;  %v162_v4 = vld [vmem:[%s2376_s0 + $0x4a0] sm:$0xff]  ;;  %v65_v5 = vld [vmem:[%s2376_s0 + $0x198] sm:$0xff] }
  0x64   :  { %v165_v6 = vld [vmem:[%s2376_s0 + $0x4b8] sm:$0xff] }
  0x66   :  { %363 = vmatmul.mubr.f32.gmra.mxu0 %v32_v7  ;;  %613 = vmatmul.mubr.f32.gmra.mxu1 %v132_v8  ;;  %v64_v7 = vld [vmem:[%s2376_s0 + $0x190] sm:$0xff] }
  0x67   :  { %367 = vmatprep.mubr.f32.mxu0 %v35_v9  ;;  %617 = vmatprep.mubr.f32.mxu1 %v135_v10  ;;  %v164_v8 = vld [vmem:[%s2376_s0 + $0x4b0] sm:$0xff]  ;;  %v67_v9 = vld [vmem:[%s2376_s0 + $0x1a8] sm:$0xff] }
  0x68   :  { %v167_v10 = vld [vmem:[%s2376_s0 + $0x4c8] sm:$0xff] }
  0x6a   :  { %368 = vmatmul.mubr.f32.gmra.mxu0 %v34_v11  ;;  %618 = vmatmul.mubr.f32.gmra.mxu1 %v134_v12  ;;  %v66_v11 = vld [vmem:[%s2376_s0 + $0x1a0] sm:$0xff] }
  0x6b   :  { %372 = vmatprep.mubr.f32.mxu0 %v37_v13  ;;  %622 = vmatprep.mubr.f32.mxu1 %v137_v14  ;;  %v166_v12 = vld [vmem:[%s2376_s0 + $0x4c0] sm:$0xff]  ;;  %v69_v13 = vld [vmem:[%s2376_s0 + $0x1b8] sm:$0xff] }
  0x6c   :  { %v169_v14 = vld [vmem:[%s2376_s0 + $0x4d8] sm:$0xff] }
  0x6e   :  { %373 = vmatmul.mubr.f32.gmra.mxu0 %v36_v15  ;;  %623 = vmatmul.mubr.f32.gmra.mxu1 %v136_v16  ;;  %v68_v15 = vld [vmem:[%s2376_s0 + $0x1b0] sm:$0xff] }
  0x6f   :  { %377 = vmatprep.mubr.f32.mxu0 %v39_v17  ;;  %627 = vmatprep.mubr.f32.mxu1 %v139_v18  ;;  %v168_v16 = vld [vmem:[%s2376_s0 + $0x4d0] sm:$0xff]  ;;  %v71_v17 = vld [vmem:[%s2376_s0 + $0x1c8] sm:$0xff] }
  0x70   :  { %v171_v18 = vld [vmem:[%s2376_s0 + $0x4e8] sm:$0xff] }
  0x72   :  { %378 = vmatmul.mubr.f32.gmra.mxu0 %v38_v19  ;;  %628 = vmatmul.mubr.f32.gmra.mxu1 %v138_v20  ;;  %v70_v19 = vld [vmem:[%s2376_s0 + $0x1c0] sm:$0xff] }
  0x73   :  { %382 = vmatprep.mubr.f32.mxu0 %v41_v21  ;;  %632 = vmatprep.mubr.f32.mxu1 %v141_v22  ;;  %v170_v20 = vld [vmem:[%s2376_s0 + $0x4e0] sm:$0xff]  ;;  %v73_v21 = vld [vmem:[%s2376_s0 + $0x1d8] sm:$0xff] }
  0x74   :  { %v173_v22 = vld [vmem:[%s2376_s0 + $0x4f8] sm:$0xff] }
  0x76   :  { %383 = vmatmul.mubr.f32.gmra.mxu0 %v40_v23  ;;  %633 = vmatmul.mubr.f32.gmra.mxu1 %v140_v24  ;;  %v72_v23 = vld [vmem:[%s2376_s0 + $0x1d0] sm:$0xff] }
  0x77   :  { %387 = vmatprep.mubr.f32.mxu0 %v43_v25  ;;  %637 = vmatprep.mubr.f32.mxu1 %v143_v26  ;;  %v172_v24 = vld [vmem:[%s2376_s0 + $0x4f0] sm:$0xff]  ;;  %v75_v25 = vld [vmem:[%s2376_s0 + $0x1e8] sm:$0xff] }
  0x78   :  { %v175_v26 = vld [vmem:[%s2376_s0 + $0x508] sm:$0xff] }
  0x7a   :  { %388 = vmatmul.mubr.f32.gmra.mxu0 %v42_v27  ;;  %638 = vmatmul.mubr.f32.gmra.mxu1 %v142_v28  ;;  %v74_v27 = vld [vmem:[%s2376_s0 + $0x1e0] sm:$0xff] }
  0x7b   :  { %392 = vmatprep.mubr.f32.mxu0 %v45_v29  ;;  %642 = vmatprep.mubr.f32.mxu1 %v145_v30  ;;  %v174_v28 = vld [vmem:[%s2376_s0 + $0x500] sm:$0xff]  ;;  %v77_v29 = vld [vmem:[%s2376_s0 + $0x1f8] sm:$0xff] }
  0x7c   :  { %v177_v30 = vld [vmem:[%s2376_s0 + $0x518] sm:$0xff] }
  0x7e   :  { %393 = vmatmul.mubr.f32.gmra.mxu0 %v44_v31  ;;  %643 = vmatmul.mubr.f32.gmra.mxu1 %v144_v32  ;;  %v76_v31 = vld [vmem:[%s2376_s0 + $0x1f0] sm:$0xff] }
  0x7f   :  { %397 = vmatprep.mubr.f32.mxu0 %v47_v33  ;;  %647 = vmatprep.mubr.f32.mxu1 %v147_v34  ;;  %v176_v32 = vld [vmem:[%s2376_s0 + $0x510] sm:$0xff]  ;;  %v79_v33 = vld [vmem:[%s2376_s0 + $0x208] sm:$0xff] }
  0x80   :  { %v179_v34 = vld [vmem:[%s2376_s0 + $0x528] sm:$0xff] }
  0x82   :  { %398 = vmatmul.mubr.f32.gmra.mxu0 %v46_v35  ;;  %648 = vmatmul.mubr.f32.gmra.mxu1 %v146_v36  ;;  %v78_v35 = vld [vmem:[%s2376_s0 + $0x200] sm:$0xff] }
  0x83   :  { %402 = vmatprep.mubr.f32.mxu0 %v49_v37  ;;  %652 = vmatprep.mubr.f32.mxu1 %v149_v38  ;;  %v178_v36 = vld [vmem:[%s2376_s0 + $0x520] sm:$0xff]  ;;  %v81_v37 = vld [vmem:[%s2376_s0 + $0x218] sm:$0xff] }
  0x84   :  { %v181_v38 = vld [vmem:[%s2376_s0 + $0x538] sm:$0xff] }
  0x86   :  { %403 = vmatmul.mubr.f32.gmra.mxu0 %v48_v39  ;;  %653 = vmatmul.mubr.f32.gmra.mxu1 %v148_v40  ;;  %v80_v39 = vld [vmem:[%s2376_s0 + $0x210] sm:$0xff] }
  0x87   :  { %407 = vmatprep.mubr.f32.mxu0 %v51_v41  ;;  %657 = vmatprep.mubr.f32.mxu1 %v151_v42  ;;  %v180_v40 = vld [vmem:[%s2376_s0 + $0x530] sm:$0xff]  ;;  %v83_v41 = vld [vmem:[%s2376_s0 + $0x228] sm:$0xff] }
  0x88   :  { %v183_v42 = vld [vmem:[%s2376_s0 + $0x548] sm:$0xff] }
  0x8a   :  { %408 = vmatmul.mubr.f32.gmra.mxu0 %v50_v43  ;;  %658 = vmatmul.mubr.f32.gmra.mxu1 %v150_v44  ;;  %v82_v43 = vld [vmem:[%s2376_s0 + $0x220] sm:$0xff] }
  0x8b   :  { %412 = vmatprep.mubr.f32.mxu0 %v53_v45  ;;  %662 = vmatprep.mubr.f32.mxu1 %v153_v46  ;;  %v182_v44 = vld [vmem:[%s2376_s0 + $0x540] sm:$0xff]  ;;  %v85_v45 = vld [vmem:[%s2376_s0 + $0x238] sm:$0xff] }
  0x8c   :  { %v185_v46 = vld [vmem:[%s2376_s0 + $0x558] sm:$0xff] }
  0x8e   :  { %413 = vmatmul.mubr.f32.gmra.mxu0 %v52_v47  ;;  %663 = vmatmul.mubr.f32.gmra.mxu1 %v152_v48  ;;  %v84_v47 = vld [vmem:[%s2376_s0 + $0x230] sm:$0xff] }
  0x8f   :  { %417 = vmatprep.mubr.f32.mxu0 %v55_v49  ;;  %667 = vmatprep.mubr.f32.mxu1 %v155_v50  ;;  %v184_v48 = vld [vmem:[%s2376_s0 + $0x550] sm:$0xff]  ;;  %v87_v49 = vld [vmem:[%s2376_s0 + $0x248] sm:$0xff] }
  0x90   :  { %v187_v50 = vld [vmem:[%s2376_s0 + $0x568] sm:$0xff] }
  0x92   :  { %418 = vmatmul.mubr.f32.gmra.mxu0 %v54_v51  ;;  %668 = vmatmul.mubr.f32.gmra.mxu1 %v154_v52  ;;  %v86_v51 = vld [vmem:[%s2376_s0 + $0x240] sm:$0xff] }
  0x93   :  { %422 = vmatprep.mubr.f32.mxu0 %v57_v53  ;;  %672 = vmatprep.mubr.f32.mxu1 %v157_v54  ;;  %v186_v52 = vld [vmem:[%s2376_s0 + $0x560] sm:$0xff]  ;;  %v89_v53 = vld [vmem:[%s2376_s0 + $0x258] sm:$0xff] }
  0x94   :  { %v189_v54 = vld [vmem:[%s2376_s0 + $0x578] sm:$0xff] }
  0x96   :  { %423 = vmatmul.mubr.f32.gmra.mxu0 %v56_v55  ;;  %673 = vmatmul.mubr.f32.gmra.mxu1 %v156_v56  ;;  %v88_v55 = vld [vmem:[%s2376_s0 + $0x250] sm:$0xff] }
  0x97   :  { %427 = vmatprep.mubr.f32.mxu0 %v59_v57  ;;  %677 = vmatprep.mubr.f32.mxu1 %v159_v58  ;;  %v188_v56 = vld [vmem:[%s2376_s0 + $0x570] sm:$0xff]  ;;  %v91_v57 = vld [vmem:[%s2376_s0 + $0x268] sm:$0xff] }
  0x98   :  { %v191_v58 = vld [vmem:[%s2376_s0 + $0x588] sm:$0xff] }
  0x9a   :  { %428 = vmatmul.mubr.f32.gmra.mxu0 %v58_v59  ;;  %678 = vmatmul.mubr.f32.gmra.mxu1 %v158_v60  ;;  %v90_v59 = vld [vmem:[%s2376_s0 + $0x260] sm:$0xff] }
  0x9b   :  { %432 = vmatprep.mubr.f32.mxu0 %v61_v61  ;;  %682 = vmatprep.mubr.f32.mxu1 %v161_v62  ;;  %v190_v60 = vld [vmem:[%s2376_s0 + $0x580] sm:$0xff]  ;;  %v93_v61 = vld [vmem:[%s2376_s0 + $0x278] sm:$0xff] }
  0x9c   :  { %v193_v62 = vld [vmem:[%s2376_s0 + $0x598] sm:$0xff] }
  0x9e   :  { %433 = vmatmul.mubr.f32.gmra.mxu0 %v60_v63  ;;  %683 = vmatmul.mubr.f32.gmra.mxu1 %v160_v0  ;;  %v92_v63 = vld [vmem:[%s2376_s0 + $0x270] sm:$0xff] }
  0x9f   :  { %437 = vmatprep.mubr.f32.mxu0 %v63_v1  ;;  %687 = vmatprep.mubr.f32.mxu1 %v163_v2  ;;  %v192_v0 = vld [vmem:[%s2376_s0 + $0x590] sm:$0xff]  ;;  %v95_v1 = vld [vmem:[%s2376_s0 + $0x288] sm:$0xff] }
  0xa0   :  { %v195_v2 = vld [vmem:[%s2376_s0 + $0x5a8] sm:$0xff] }
  0xa2   :  { %438 = vmatmul.mubr.f32.gmra.mxu0 %v62_v3  ;;  %688 = vmatmul.mubr.f32.gmra.mxu1 %v162_v4  ;;  %v94_v3 = vld [vmem:[%s2376_s0 + $0x280] sm:$0xff] }
  0xa3   :  { %442 = vmatprep.mubr.f32.mxu0 %v65_v5  ;;  %692 = vmatprep.mubr.f32.mxu1 %v165_v6  ;;  %v194_v4 = vld [vmem:[%s2376_s0 + $0x5a0] sm:$0xff]  ;;  %v97_v5 = vld [vmem:[%s2376_s0 + $0x298] sm:$0xff] }
  0xa4   :  { %v197_v6 = vld [vmem:[%s2376_s0 + $0x5b8] sm:$0xff] }
  0xa6   :  { %443 = vmatmul.mubr.f32.gmra.mxu0 %v64_v7  ;;  %693 = vmatmul.mubr.f32.gmra.mxu1 %v164_v8  ;;  %v96_v7 = vld [vmem:[%s2376_s0 + $0x290] sm:$0xff] }
  0xa7   :  { %447 = vmatprep.mubr.f32.mxu0 %v67_v9  ;;  %697 = vmatprep.mubr.f32.mxu1 %v167_v10  ;;  %v196_v8 = vld [vmem:[%s2376_s0 + $0x5b0] sm:$0xff]  ;;  %v99_v9 = vld [vmem:[%s2376_s0 + $0x2a8] sm:$0xff] }
  0xa8   :  { %v199_v10 = vld [vmem:[%s2376_s0 + $0x5c8] sm:$0xff] }
  0xaa   :  { %448 = vmatmul.mubr.f32.gmra.mxu0 %v66_v11  ;;  %698 = vmatmul.mubr.f32.gmra.mxu1 %v166_v12  ;;  %v98_v11 = vld [vmem:[%s2376_s0 + $0x2a0] sm:$0xff] }
  0xab   :  { %452 = vmatprep.mubr.f32.mxu0 %v69_v13  ;;  %702 = vmatprep.mubr.f32.mxu1 %v169_v14  ;;  %v198_v12 = vld [vmem:[%s2376_s0 + $0x5c0] sm:$0xff]  ;;  %v101_v13 = vld [vmem:[%s2376_s0 + $0x2b8] sm:$0xff] }
  0xac   :  { %v201_v14 = vld [vmem:[%s2376_s0 + $0x5d8] sm:$0xff] }
  0xae   :  { %453 = vmatmul.mubr.f32.gmra.mxu0 %v68_v15  ;;  %703 = vmatmul.mubr.f32.gmra.mxu1 %v168_v16  ;;  %v100_v15 = vld [vmem:[%s2376_s0 + $0x2b0] sm:$0xff] }
  0xaf   :  { %457 = vmatprep.mubr.f32.mxu0 %v71_v17  ;;  %707 = vmatprep.mubr.f32.mxu1 %v171_v18  ;;  %v200_v16 = vld [vmem:[%s2376_s0 + $0x5d0] sm:$0xff]  ;;  %v103_v17 = vld [vmem:[%s2376_s0 + $0x2c8] sm:$0xff] }
  0xb0   :  { %v203_v18 = vld [vmem:[%s2376_s0 + $0x5e8] sm:$0xff] }
  0xb2   :  { %458 = vmatmul.mubr.f32.gmra.mxu0 %v70_v19  ;;  %708 = vmatmul.mubr.f32.gmra.mxu1 %v170_v20  ;;  %v102_v19 = vld [vmem:[%s2376_s0 + $0x2c0] sm:$0xff] }
  0xb3   :  { %462 = vmatprep.mubr.f32.mxu0 %v73_v21  ;;  %712 = vmatprep.mubr.f32.mxu1 %v173_v22  ;;  %v202_v20 = vld [vmem:[%s2376_s0 + $0x5e0] sm:$0xff]  ;;  %v105_v21 = vld [vmem:[%s2376_s0 + $0x2d8] sm:$0xff] }
  0xb4   :  { %v205_v22 = vld [vmem:[%s2376_s0 + $0x5f8] sm:$0xff] }
  0xb6   :  { %463 = vmatmul.mubr.f32.gmra.mxu0 %v72_v23  ;;  %713 = vmatmul.mubr.f32.gmra.mxu1 %v172_v24  ;;  %v104_v23 = vld [vmem:[%s2376_s0 + $0x2d0] sm:$0xff] }
  0xb7   :  { %467 = vmatprep.mubr.f32.mxu0 %v75_v25  ;;  %717 = vmatprep.mubr.f32.mxu1 %v175_v26  ;;  %v204_v24 = vld [vmem:[%s2376_s0 + $0x5f0] sm:$0xff]  ;;  %v107_v25 = vld [vmem:[%s2376_s0 + $0x2e8] sm:$0xff] }
  0xb8   :  { %v207_v26 = vld [vmem:[%s2376_s0 + $0x608] sm:$0xff] }
  0xba   :  { %468 = vmatmul.mubr.f32.gmra.mxu0 %v74_v27  ;;  %718 = vmatmul.mubr.f32.gmra.mxu1 %v174_v28  ;;  %v106_v27 = vld [vmem:[%s2376_s0 + $0x2e0] sm:$0xff] }
  0xbb   :  { %472 = vmatprep.mubr.f32.mxu0 %v77_v29  ;;  %722 = vmatprep.mubr.f32.mxu1 %v177_v30  ;;  %v206_v28 = vld [vmem:[%s2376_s0 + $0x600] sm:$0xff]  ;;  %v109_v29 = vld [vmem:[%s2376_s0 + $0x2f8] sm:$0xff] }
  0xbc   :  { %v209_v30 = vld [vmem:[%s2376_s0 + $0x618] sm:$0xff] }
  0xbe   :  { %473 = vmatmul.mubr.f32.gmra.mxu0 %v76_v31  ;;  %723 = vmatmul.mubr.f32.gmra.mxu1 %v176_v32  ;;  %v108_v31 = vld [vmem:[%s2376_s0 + $0x2f0] sm:$0xff] }
  0xbf   :  { %477 = vmatprep.mubr.f32.mxu0 %v79_v33  ;;  %727 = vmatprep.mubr.f32.mxu1 %v179_v34  ;;  %v208_v32 = vld [vmem:[%s2376_s0 + $0x610] sm:$0xff]  ;;  %v111_v33 = vld [vmem:[%s2376_s0 + $0x308] sm:$0xff] }
  0xc0   :  { %v211_v34 = vld [vmem:[%s2376_s0 + $0x628] sm:$0xff] }
  0xc2   :  { %478 = vmatmul.mubr.f32.gmra.mxu0 %v78_v35  ;;  %728 = vmatmul.mubr.f32.gmra.mxu1 %v178_v36  ;;  %v110_v35 = vld [vmem:[%s2376_s0 + $0x300] sm:$0xff] }
  0xc3   :  { %482 = vmatprep.mubr.f32.mxu0 %v81_v37  ;;  %732 = vmatprep.mubr.f32.mxu1 %v181_v38  ;;  %v210_v36 = vld [vmem:[%s2376_s0 + $0x620] sm:$0xff]  ;;  %v113_v38 = vld [vmem:[%s2376_s0 + $0x318] sm:$0xff] }
  0xc4   :  { %v1861_v37 = vld [vmem:[%s2377_s2] ss:$0 sm:$0xff] }
  0xc6   :  { %483 = vmatmul.mubr.f32.gmra.mxu0 %v80_v39  ;;  %733 = vmatmul.mubr.f32.gmra.mxu1 %v180_v40  ;;  %v213_v39 = vld [vmem:[%s2376_s0 + $0x638] sm:$0xff] }
  0xc7   :  { %487 = vmatprep.mubr.f32.mxu0 %v83_v41  ;;  %737 = vmatprep.mubr.f32.mxu1 %v183_v42 }
  0xca   :  { %488 = vmatmul.mubr.f32.gmra.mxu0 %v82_v43  ;;  %738 = vmatmul.mubr.f32.gmra.mxu1 %v182_v44  ;;  %v112_v44 = vld [vmem:[%s2376_s0 + $0x310] sm:$0xff] }
  0xcb   :  { %492 = vmatprep.mubr.f32.mxu0 %v85_v45  ;;  %742 = vmatprep.mubr.f32.mxu1 %v185_v46  ;;  %v212_v45 = vld [vmem:[%s2376_s0 + $0x630] sm:$0xff] }
  0xce   :  { %493 = vmatmul.mubr.f32.gmra.mxu0 %v84_v47  ;;  %743 = vmatmul.mubr.f32.gmra.mxu1 %v184_v48 }
  0xcf   :  { %497 = vmatprep.mubr.f32.mxu0 %v87_v49  ;;  %747 = vmatprep.mubr.f32.mxu1 %v187_v50 }
  0xd2   :  { %498 = vmatmul.mubr.f32.gmra.mxu0 %v86_v51  ;;  %748 = vmatmul.mubr.f32.gmra.mxu1 %v186_v52 }
  0xd3   :  { %502 = vmatprep.mubr.f32.mxu0 %v89_v53  ;;  %752 = vmatprep.mubr.f32.mxu1 %v189_v54 }
  0xd6   :  { %503 = vmatmul.mubr.f32.gmra.mxu0 %v88_v55  ;;  %753 = vmatmul.mubr.f32.gmra.mxu1 %v188_v56 }
  0xd7   :  { %507 = vmatprep.mubr.f32.mxu0 %v91_v57  ;;  %757 = vmatprep.mubr.f32.mxu1 %v191_v58 }
  0xda   :  { %508 = vmatmul.mubr.f32.gmra.mxu0 %v90_v59  ;;  %758 = vmatmul.mubr.f32.gmra.mxu1 %v190_v60 }
  0xdb   :  { %512 = vmatprep.mubr.f32.mxu0 %v93_v61  ;;  %762 = vmatprep.mubr.f32.mxu1 %v193_v62 }
  0xde   :  { %513 = vmatmul.mubr.f32.gmra.mxu0 %v92_v63  ;;  %763 = vmatmul.mubr.f32.gmra.mxu1 %v192_v0 }
  0xdf   :  { %517 = vmatprep.mubr.f32.mxu0 %v95_v1  ;;  %767 = vmatprep.mubr.f32.mxu1 %v195_v2 }
  0xe2   :  { %518 = vmatmul.mubr.f32.gmra.mxu0 %v94_v3  ;;  %768 = vmatmul.mubr.f32.gmra.mxu1 %v194_v4 }
  0xe3   :  { %522 = vmatprep.mubr.f32.mxu0 %v97_v5  ;;  %772 = vmatprep.mubr.f32.mxu1 %v197_v6 }
  0xe6   :  { %523 = vmatmul.mubr.f32.gmra.mxu0 %v96_v7  ;;  %773 = vmatmul.mubr.f32.gmra.mxu1 %v196_v8 }
  0xe7   :  { %527 = vmatprep.mubr.f32.mxu0 %v99_v9  ;;  %777 = vmatprep.mubr.f32.mxu1 %v199_v10 }
  0xea   :  { %528 = vmatmul.mubr.f32.gmra.mxu0 %v98_v11  ;;  %778 = vmatmul.mubr.f32.gmra.mxu1 %v198_v12 }
  0xeb   :  { %532 = vmatprep.mubr.f32.mxu0 %v101_v13  ;;  %782 = vmatprep.mubr.f32.mxu1 %v201_v14 }
  0xee   :  { %533 = vmatmul.mubr.f32.gmra.mxu0 %v100_v15  ;;  %783 = vmatmul.mubr.f32.gmra.mxu1 %v200_v16 }
  0xef   :  { %537 = vmatprep.mubr.f32.mxu0 %v103_v17  ;;  %787 = vmatprep.mubr.f32.mxu1 %v203_v18 }
  0xf2   :  { %538 = vmatmul.mubr.f32.gmra.mxu0 %v102_v19  ;;  %788 = vmatmul.mubr.f32.gmra.mxu1 %v202_v20 }
  0xf3   :  { %542 = vmatprep.mubr.f32.mxu0 %v105_v21  ;;  %792 = vmatprep.mubr.f32.mxu1 %v205_v22 }
  0xf6   :  { %543 = vmatmul.mubr.f32.gmra.mxu0 %v104_v23  ;;  %793 = vmatmul.mubr.f32.gmra.mxu1 %v204_v24 }
  0xf7   :  { %547 = vmatprep.mubr.f32.mxu0 %v107_v25  ;;  %797 = vmatprep.mubr.f32.mxu1 %v207_v26 }
  0xfa   :  { %548 = vmatmul.mubr.f32.gmra.mxu0 %v106_v27  ;;  %798 = vmatmul.mubr.f32.gmra.mxu1 %v206_v28 }
  0xfb   :  { %552 = vmatprep.mubr.f32.mxu0 %v109_v29  ;;  %802 = vmatprep.mubr.f32.mxu1 %v209_v30 }
  0xfe   :  { %553 = vmatmul.mubr.f32.gmra.mxu0 %v108_v31  ;;  %803 = vmatmul.mubr.f32.gmra.mxu1 %v208_v32 }
  0xff   :  { %557 = vmatprep.mubr.f32.mxu0 %v111_v33  ;;  %807 = vmatprep.mubr.f32.mxu1 %v211_v34 }
 0x102   :  { %v319_v40 = vpop.f32.mrf.mxu0  ;;  %558 = vmatmul.mubr.f32.gmra.mxu0 %v110_v35  ;;  %v569_v41 = vpop.f32.mrf.mxu1  ;;  %808 = vmatmul.mubr.f32.gmra.mxu1 %v210_v36 }
 0x103   :  { %v320_v42 = vadd.f32 %v1861_v37, %v319_v40  ;;  %v570_v43 = vadd.f32 %v1861_v37, %v569_v41  ;;  %562 = vmatprep.mubr.f32.mxu0 %v113_v38  ;;  %812 = vmatprep.mubr.f32.mxu1 %v213_v39 }
 0x104   :  { %v321_v46 = vpop.f32.mrf.mxu0  ;;  %v571_v47 = vpop.f32.mrf.mxu1 }
 0x105   :  { %v818_v48 = vmax.f32 %v320_v42, 0.0  ;;  %v868_v49 = vmax.f32 %v570_v43, 0.0 }
 0x106   :  { %v324_v50 = vpop.f32.mrf.mxu0  ;;  %563 = vmatmul.mubr.f32.gmra.mxu0 %v112_v44  ;;  %v574_v51 = vpop.f32.mrf.mxu1  ;;  %813 = vmatmul.mubr.f32.gmra.mxu1 %v212_v45 }
 0x107   :  { %919 = vst.msk [vmem:[%s2378_s3] sm:$0xff] %vm918_vm0, %v818_v48  ;;  %969 = vst.msk [vmem:[%s2378_s3 + $0x190] sm:$0xff] %vm918_vm0, %v868_v49  ;;  %v325_v52 = vadd.f32 %v1861_v37, %v324_v50  ;;  %v575_v53 = vadd.f32 %v1861_v37, %v574_v51 }
 0x108   :  { %v326_v54 = vpop.f32.mrf.mxu0  ;;  %v576_v55 = vpop.f32.mrf.mxu1 }
 0x109   :  { %v819_v56 = vmax.f32 %v325_v52, 0.0  ;;  %v869_v57 = vmax.f32 %v575_v53, 0.0 }
 0x10a   :  { %v329_v58 = vpop.f32.mrf.mxu0  ;;  %v579_v59 = vpop.f32.mrf.mxu1 }
 0x10b   :  { %920 = vst.msk [vmem:[%s2378_s3 + $0x8] sm:$0xff] %vm918_vm0, %v819_v56  ;;  %970 = vst.msk [vmem:[%s2378_s3 + $0x198] sm:$0xff] %vm918_vm0, %v869_v57  ;;  %v330_v60 = vadd.f32 %v1861_v37, %v329_v58  ;;  %v580_v61 = vadd.f32 %v1861_v37, %v579_v59 }
 0x10c   :  { %v331_v62 = vpop.f32.mrf.mxu0  ;;  %v581_v63 = vpop.f32.mrf.mxu1 }
 0x10d   :  { %v820_v0 = vmax.f32 %v330_v60, 0.0  ;;  %v870_v1 = vmax.f32 %v580_v61, 0.0 }
 0x10e   :  { %v334_v2 = vpop.f32.mrf.mxu0  ;;  %v584_v3 = vpop.f32.mrf.mxu1 }
 0x10f   :  { %921 = vst.msk [vmem:[%s2378_s3 + $0x10] sm:$0xff] %vm918_vm0, %v820_v0  ;;  %971 = vst.msk [vmem:[%s2378_s3 + $0x1a0] sm:$0xff] %vm918_vm0, %v870_v1  ;;  %v335_v4 = vadd.f32 %v1861_v37, %v334_v2  ;;  %v585_v5 = vadd.f32 %v1861_v37, %v584_v3 }
 0x110   :  { %v336_v6 = vpop.f32.mrf.mxu0  ;;  %v586_v7 = vpop.f32.mrf.mxu1 }
 0x111   :  { %v821_v8 = vmax.f32 %v335_v4, 0.0  ;;  %v871_v9 = vmax.f32 %v585_v5, 0.0 }
 0x112   :  { %v339_v10 = vpop.f32.mrf.mxu0  ;;  %v589_v11 = vpop.f32.mrf.mxu1 }
 0x113   :  { %922 = vst.msk [vmem:[%s2378_s3 + $0x18] sm:$0xff] %vm918_vm0, %v821_v8  ;;  %972 = vst.msk [vmem:[%s2378_s3 + $0x1a8] sm:$0xff] %vm918_vm0, %v871_v9  ;;  %v340_v12 = vadd.f32 %v1861_v37, %v339_v10  ;;  %v590_v13 = vadd.f32 %v1861_v37, %v589_v11 }
 0x114   :  { %v341_v14 = vpop.f32.mrf.mxu0  ;;  %v591_v15 = vpop.f32.mrf.mxu1 }
 0x115   :  { %v822_v16 = vmax.f32 %v340_v12, 0.0  ;;  %v872_v17 = vmax.f32 %v590_v13, 0.0 }
 0x116   :  { %v344_v18 = vpop.f32.mrf.mxu0  ;;  %v594_v19 = vpop.f32.mrf.mxu1 }
 0x117   :  { %923 = vst.msk [vmem:[%s2378_s3 + $0x20] sm:$0xff] %vm918_vm0, %v822_v16  ;;  %973 = vst.msk [vmem:[%s2378_s3 + $0x1b0] sm:$0xff] %vm918_vm0, %v872_v17  ;;  %v345_v20 = vadd.f32 %v1861_v37, %v344_v18  ;;  %v595_v21 = vadd.f32 %v1861_v37, %v594_v19 }
 0x118   :  { %v346_v22 = vpop.f32.mrf.mxu0  ;;  %v596_v23 = vpop.f32.mrf.mxu1 }
 0x119   :  { %v823_v24 = vmax.f32 %v345_v20, 0.0  ;;  %v873_v25 = vmax.f32 %v595_v21, 0.0 }
 0x11a   :  { %v349_v26 = vpop.f32.mrf.mxu0  ;;  %v599_v27 = vpop.f32.mrf.mxu1 }
 0x11b   :  { %924 = vst.msk [vmem:[%s2378_s3 + $0x28] sm:$0xff] %vm918_vm0, %v823_v24  ;;  %974 = vst.msk [vmem:[%s2378_s3 + $0x1b8] sm:$0xff] %vm918_vm0, %v873_v25  ;;  %v350_v28 = vadd.f32 %v1861_v37, %v349_v26  ;;  %v600_v29 = vadd.f32 %v1861_v37, %v599_v27 }
 0x11c   :  { %v351_v30 = vpop.f32.mrf.mxu0  ;;  %v601_v31 = vpop.f32.mrf.mxu1 }
 0x11d   :  { %v824_v32 = vmax.f32 %v350_v28, 0.0  ;;  %v874_v33 = vmax.f32 %v600_v29, 0.0 }
 0x11e   :  { %v354_v34 = vpop.f32.mrf.mxu0  ;;  %v604_v35 = vpop.f32.mrf.mxu1 }
 0x11f   :  { %925 = vst.msk [vmem:[%s2378_s3 + $0x30] sm:$0xff] %vm918_vm0, %v824_v32  ;;  %975 = vst.msk [vmem:[%s2378_s3 + $0x1c0] sm:$0xff] %vm918_vm0, %v874_v33  ;;  %v355_v36 = vadd.f32 %v1861_v37, %v354_v34  ;;  %v605_v38 = vadd.f32 %v1861_v37, %v604_v35 }
 0x120   :  { %v356_v39 = vpop.f32.mrf.mxu0  ;;  %v606_v40 = vpop.f32.mrf.mxu1 }
 0x121   :  { %v825_v41 = vmax.f32 %v355_v36, 0.0  ;;  %v875_v42 = vmax.f32 %v605_v38, 0.0 }
 0x122   :  { %v359_v43 = vpop.f32.mrf.mxu0  ;;  %v609_v44 = vpop.f32.mrf.mxu1 }
 0x123   :  { %926 = vst.msk [vmem:[%s2378_s3 + $0x38] sm:$0xff] %vm918_vm0, %v825_v41  ;;  %976 = vst.msk [vmem:[%s2378_s3 + $0x1c8] sm:$0xff] %vm918_vm0, %v875_v42  ;;  %v360_v45 = vadd.f32 %v1861_v37, %v359_v43  ;;  %v610_v46 = vadd.f32 %v1861_v37, %v609_v44 }
 0x124   :  { %v361_v47 = vpop.f32.mrf.mxu0  ;;  %v611_v48 = vpop.f32.mrf.mxu1 }
 0x125   :  { %v826_v49 = vmax.f32 %v360_v45, 0.0  ;;  %v876_v50 = vmax.f32 %v610_v46, 0.0 }
 0x126   :  { %v364_v51 = vpop.f32.mrf.mxu0  ;;  %v614_v52 = vpop.f32.mrf.mxu1 }
 0x127   :  { %927 = vst.msk [vmem:[%s2378_s3 + $0x40] sm:$0xff] %vm918_vm0, %v826_v49  ;;  %977 = vst.msk [vmem:[%s2378_s3 + $0x1d0] sm:$0xff] %vm918_vm0, %v876_v50  ;;  %v365_v53 = vadd.f32 %v1861_v37, %v364_v51  ;;  %v615_v54 = vadd.f32 %v1861_v37, %v614_v52 }
 0x128   :  { %v366_v55 = vpop.f32.mrf.mxu0  ;;  %v616_v56 = vpop.f32.mrf.mxu1 }
 0x129   :  { %v827_v57 = vmax.f32 %v365_v53, 0.0  ;;  %v877_v58 = vmax.f32 %v615_v54, 0.0 }
 0x12a   :  { %v369_v59 = vpop.f32.mrf.mxu0  ;;  %v619_v60 = vpop.f32.mrf.mxu1 }
 0x12b   :  { %928 = vst.msk [vmem:[%s2378_s3 + $0x48] sm:$0xff] %vm918_vm0, %v827_v57  ;;  %978 = vst.msk [vmem:[%s2378_s3 + $0x1d8] sm:$0xff] %vm918_vm0, %v877_v58  ;;  %v370_v61 = vadd.f32 %v1861_v37, %v369_v59  ;;  %v620_v62 = vadd.f32 %v1861_v37, %v619_v60 }
 0x12c   :  { %v371_v63 = vpop.f32.mrf.mxu0  ;;  %v621_v0 = vpop.f32.mrf.mxu1 }
 0x12d   :  { %v828_v1 = vmax.f32 %v370_v61, 0.0  ;;  %v878_v2 = vmax.f32 %v620_v62, 0.0 }
 0x12e   :  { %v374_v3 = vpop.f32.mrf.mxu0  ;;  %v624_v4 = vpop.f32.mrf.mxu1 }
 0x12f   :  { %929 = vst.msk [vmem:[%s2378_s3 + $0x50] sm:$0xff] %vm918_vm0, %v828_v1  ;;  %979 = vst.msk [vmem:[%s2378_s3 + $0x1e0] sm:$0xff] %vm918_vm0, %v878_v2  ;;  %v375_v5 = vadd.f32 %v1861_v37, %v374_v3  ;;  %v625_v6 = vadd.f32 %v1861_v37, %v624_v4 }
 0x130   :  { %v376_v7 = vpop.f32.mrf.mxu0  ;;  %v626_v8 = vpop.f32.mrf.mxu1 }
 0x131   :  { %v829_v9 = vmax.f32 %v375_v5, 0.0  ;;  %v879_v10 = vmax.f32 %v625_v6, 0.0 }
 0x132   :  { %v379_v11 = vpop.f32.mrf.mxu0  ;;  %v629_v12 = vpop.f32.mrf.mxu1 }
 0x133   :  { %930 = vst.msk [vmem:[%s2378_s3 + $0x58] sm:$0xff] %vm918_vm0, %v829_v9  ;;  %980 = vst.msk [vmem:[%s2378_s3 + $0x1e8] sm:$0xff] %vm918_vm0, %v879_v10  ;;  %v380_v13 = vadd.f32 %v1861_v37, %v379_v11  ;;  %v630_v14 = vadd.f32 %v1861_v37, %v629_v12 }
 0x134   :  { %v381_v15 = vpop.f32.mrf.mxu0  ;;  %v631_v16 = vpop.f32.mrf.mxu1 }
 0x135   :  { %v830_v17 = vmax.f32 %v380_v13, 0.0  ;;  %v880_v18 = vmax.f32 %v630_v14, 0.0 }
 0x136   :  { %v384_v19 = vpop.f32.mrf.mxu0  ;;  %v634_v20 = vpop.f32.mrf.mxu1 }
 0x137   :  { %931 = vst.msk [vmem:[%s2378_s3 + $0x60] sm:$0xff] %vm918_vm0, %v830_v17  ;;  %981 = vst.msk [vmem:[%s2378_s3 + $0x1f0] sm:$0xff] %vm918_vm0, %v880_v18  ;;  %v385_v21 = vadd.f32 %v1861_v37, %v384_v19  ;;  %v635_v22 = vadd.f32 %v1861_v37, %v634_v20 }
 0x138   :  { %v386_v23 = vpop.f32.mrf.mxu0  ;;  %v636_v24 = vpop.f32.mrf.mxu1 }
 0x139   :  { %v831_v25 = vmax.f32 %v385_v21, 0.0  ;;  %v881_v26 = vmax.f32 %v635_v22, 0.0 }
 0x13a   :  { %v389_v27 = vpop.f32.mrf.mxu0  ;;  %v639_v28 = vpop.f32.mrf.mxu1 }
 0x13b   :  { %932 = vst.msk [vmem:[%s2378_s3 + $0x68] sm:$0xff] %vm918_vm0, %v831_v25  ;;  %982 = vst.msk [vmem:[%s2378_s3 + $0x1f8] sm:$0xff] %vm918_vm0, %v881_v26  ;;  %v390_v29 = vadd.f32 %v1861_v37, %v389_v27  ;;  %v640_v30 = vadd.f32 %v1861_v37, %v639_v28 }
 0x13c   :  { %v391_v31 = vpop.f32.mrf.mxu0  ;;  %v641_v32 = vpop.f32.mrf.mxu1 }
 0x13d   :  { %v832_v33 = vmax.f32 %v390_v29, 0.0  ;;  %v882_v34 = vmax.f32 %v640_v30, 0.0 }
 0x13e   :  { %v394_v35 = vpop.f32.mrf.mxu0  ;;  %v644_v36 = vpop.f32.mrf.mxu1 }
 0x13f   :  { %933 = vst.msk [vmem:[%s2378_s3 + $0x70] sm:$0xff] %vm918_vm0, %v832_v33  ;;  %983 = vst.msk [vmem:[%s2378_s3 + $0x200] sm:$0xff] %vm918_vm0, %v882_v34  ;;  %v395_v38 = vadd.f32 %v1861_v37, %v394_v35  ;;  %v645_v39 = vadd.f32 %v1861_v37, %v644_v36 }
 0x140   :  { %v396_v40 = vpop.f32.mrf.mxu0  ;;  %v646_v41 = vpop.f32.mrf.mxu1 }
 0x141   :  { %v833_v42 = vmax.f32 %v395_v38, 0.0  ;;  %v883_v43 = vmax.f32 %v645_v39, 0.0 }
 0x142   :  { %v399_v44 = vpop.f32.mrf.mxu0  ;;  %v649_v45 = vpop.f32.mrf.mxu1 }
 0x143   :  { %934 = vst.msk [vmem:[%s2378_s3 + $0x78] sm:$0xff] %vm918_vm0, %v833_v42  ;;  %984 = vst.msk [vmem:[%s2378_s3 + $0x208] sm:$0xff] %vm918_vm0, %v883_v43  ;;  %v400_v46 = vadd.f32 %v1861_v37, %v399_v44  ;;  %v650_v47 = vadd.f32 %v1861_v37, %v649_v45 }
 0x144   :  { %v401_v48 = vpop.f32.mrf.mxu0  ;;  %v651_v49 = vpop.f32.mrf.mxu1 }
 0x145   :  { %v834_v50 = vmax.f32 %v400_v46, 0.0  ;;  %v884_v51 = vmax.f32 %v650_v47, 0.0 }
 0x146   :  { %v404_v52 = vpop.f32.mrf.mxu0  ;;  %v654_v53 = vpop.f32.mrf.mxu1 }
 0x147   :  { %935 = vst.msk [vmem:[%s2378_s3 + $0x80] sm:$0xff] %vm918_vm0, %v834_v50  ;;  %985 = vst.msk [vmem:[%s2378_s3 + $0x210] sm:$0xff] %vm918_vm0, %v884_v51  ;;  %v405_v54 = vadd.f32 %v1861_v37, %v404_v52  ;;  %v655_v55 = vadd.f32 %v1861_v37, %v654_v53 }
 0x148   :  { %v406_v56 = vpop.f32.mrf.mxu0  ;;  %v656_v57 = vpop.f32.mrf.mxu1 }
 0x149   :  { %v835_v58 = vmax.f32 %v405_v54, 0.0  ;;  %v885_v59 = vmax.f32 %v655_v55, 0.0 }
 0x14a   :  { %v409_v60 = vpop.f32.mrf.mxu0  ;;  %v659_v61 = vpop.f32.mrf.mxu1 }
 0x14b   :  { %936 = vst.msk [vmem:[%s2378_s3 + $0x88] sm:$0xff] %vm918_vm0, %v835_v58  ;;  %986 = vst.msk [vmem:[%s2378_s3 + $0x218] sm:$0xff] %vm918_vm0, %v885_v59  ;;  %v410_v62 = vadd.f32 %v1861_v37, %v409_v60  ;;  %v660_v63 = vadd.f32 %v1861_v37, %v659_v61 }
 0x14c   :  { %v411_v0 = vpop.f32.mrf.mxu0  ;;  %v661_v1 = vpop.f32.mrf.mxu1 }
 0x14d   :  { %v836_v2 = vmax.f32 %v410_v62, 0.0  ;;  %v886_v3 = vmax.f32 %v660_v63, 0.0 }
 0x14e   :  { %v414_v4 = vpop.f32.mrf.mxu0  ;;  %v664_v5 = vpop.f32.mrf.mxu1 }
 0x14f   :  { %937 = vst.msk [vmem:[%s2378_s3 + $0x90] sm:$0xff] %vm918_vm0, %v836_v2  ;;  %987 = vst.msk [vmem:[%s2378_s3 + $0x220] sm:$0xff] %vm918_vm0, %v886_v3  ;;  %v415_v6 = vadd.f32 %v1861_v37, %v414_v4  ;;  %v665_v7 = vadd.f32 %v1861_v37, %v664_v5 }
 0x150   :  { %v416_v8 = vpop.f32.mrf.mxu0  ;;  %v666_v9 = vpop.f32.mrf.mxu1 }
 0x151   :  { %v837_v10 = vmax.f32 %v415_v6, 0.0  ;;  %v887_v11 = vmax.f32 %v665_v7, 0.0 }
 0x152   :  { %v419_v12 = vpop.f32.mrf.mxu0  ;;  %v669_v13 = vpop.f32.mrf.mxu1 }
 0x153   :  { %938 = vst.msk [vmem:[%s2378_s3 + $0x98] sm:$0xff] %vm918_vm0, %v837_v10  ;;  %988 = vst.msk [vmem:[%s2378_s3 + $0x228] sm:$0xff] %vm918_vm0, %v887_v11  ;;  %v420_v14 = vadd.f32 %v1861_v37, %v419_v12  ;;  %v670_v15 = vadd.f32 %v1861_v37, %v669_v13 }
 0x154   :  { %v421_v16 = vpop.f32.mrf.mxu0  ;;  %v671_v17 = vpop.f32.mrf.mxu1 }
 0x155   :  { %v838_v18 = vmax.f32 %v420_v14, 0.0  ;;  %v888_v19 = vmax.f32 %v670_v15, 0.0 }
 0x156   :  { %v424_v20 = vpop.f32.mrf.mxu0  ;;  %v674_v21 = vpop.f32.mrf.mxu1 }
 0x157   :  { %939 = vst.msk [vmem:[%s2378_s3 + $0xa0] sm:$0xff] %vm918_vm0, %v838_v18  ;;  %989 = vst.msk [vmem:[%s2378_s3 + $0x230] sm:$0xff] %vm918_vm0, %v888_v19  ;;  %v425_v22 = vadd.f32 %v1861_v37, %v424_v20  ;;  %v675_v23 = vadd.f32 %v1861_v37, %v674_v21 }
 0x158   :  { %v426_v24 = vpop.f32.mrf.mxu0  ;;  %v676_v25 = vpop.f32.mrf.mxu1 }
 0x159   :  { %v839_v26 = vmax.f32 %v425_v22, 0.0  ;;  %v889_v27 = vmax.f32 %v675_v23, 0.0 }
 0x15a   :  { %v429_v28 = vpop.f32.mrf.mxu0  ;;  %v679_v29 = vpop.f32.mrf.mxu1 }
 0x15b   :  { %940 = vst.msk [vmem:[%s2378_s3 + $0xa8] sm:$0xff] %vm918_vm0, %v839_v26  ;;  %990 = vst.msk [vmem:[%s2378_s3 + $0x238] sm:$0xff] %vm918_vm0, %v889_v27  ;;  %v430_v30 = vadd.f32 %v1861_v37, %v429_v28  ;;  %v680_v31 = vadd.f32 %v1861_v37, %v679_v29 }
 0x15c   :  { %v431_v32 = vpop.f32.mrf.mxu0  ;;  %v681_v33 = vpop.f32.mrf.mxu1 }
 0x15d   :  { %v840_v34 = vmax.f32 %v430_v30, 0.0  ;;  %v890_v35 = vmax.f32 %v680_v31, 0.0 }
 0x15e   :  { %v434_v36 = vpop.f32.mrf.mxu0  ;;  %v684_v38 = vpop.f32.mrf.mxu1 }
 0x15f   :  { %941 = vst.msk [vmem:[%s2378_s3 + $0xb0] sm:$0xff] %vm918_vm0, %v840_v34  ;;  %991 = vst.msk [vmem:[%s2378_s3 + $0x240] sm:$0xff] %vm918_vm0, %v890_v35  ;;  %v435_v39 = vadd.f32 %v1861_v37, %v434_v36  ;;  %v685_v40 = vadd.f32 %v1861_v37, %v684_v38 }
 0x160   :  { %v436_v41 = vpop.f32.mrf.mxu0  ;;  %v686_v42 = vpop.f32.mrf.mxu1 }
 0x161   :  { %v841_v43 = vmax.f32 %v435_v39, 0.0  ;;  %v891_v44 = vmax.f32 %v685_v40, 0.0 }
 0x162   :  { %v439_v45 = vpop.f32.mrf.mxu0  ;;  %v689_v46 = vpop.f32.mrf.mxu1 }
 0x163   :  { %942 = vst.msk [vmem:[%s2378_s3 + $0xb8] sm:$0xff] %vm918_vm0, %v841_v43  ;;  %992 = vst.msk [vmem:[%s2378_s3 + $0x248] sm:$0xff] %vm918_vm0, %v891_v44  ;;  %v440_v47 = vadd.f32 %v1861_v37, %v439_v45  ;;  %v690_v48 = vadd.f32 %v1861_v37, %v689_v46 }
 0x164   :  { %v441_v49 = vpop.f32.mrf.mxu0  ;;  %v691_v50 = vpop.f32.mrf.mxu1 }
 0x165   :  { %v842_v51 = vmax.f32 %v440_v47, 0.0  ;;  %v892_v52 = vmax.f32 %v690_v48, 0.0 }
 0x166   :  { %v444_v53 = vpop.f32.mrf.mxu0  ;;  %v694_v54 = vpop.f32.mrf.mxu1 }
 0x167   :  { %943 = vst.msk [vmem:[%s2378_s3 + $0xc0] sm:$0xff] %vm918_vm0, %v842_v51  ;;  %993 = vst.msk [vmem:[%s2378_s3 + $0x250] sm:$0xff] %vm918_vm0, %v892_v52  ;;  %v445_v55 = vadd.f32 %v1861_v37, %v444_v53  ;;  %v695_v56 = vadd.f32 %v1861_v37, %v694_v54 }
 0x168   :  { %v446_v57 = vpop.f32.mrf.mxu0  ;;  %v696_v58 = vpop.f32.mrf.mxu1 }
 0x169   :  { %v843_v59 = vmax.f32 %v445_v55, 0.0  ;;  %v893_v60 = vmax.f32 %v695_v56, 0.0 }
 0x16a   :  { %v449_v61 = vpop.f32.mrf.mxu0  ;;  %v699_v62 = vpop.f32.mrf.mxu1 }
 0x16b   :  { %944 = vst.msk [vmem:[%s2378_s3 + $0xc8] sm:$0xff] %vm918_vm0, %v843_v59  ;;  %994 = vst.msk [vmem:[%s2378_s3 + $0x258] sm:$0xff] %vm918_vm0, %v893_v60  ;;  %v450_v63 = vadd.f32 %v1861_v37, %v449_v61  ;;  %v700_v0 = vadd.f32 %v1861_v37, %v699_v62 }
 0x16c   :  { %v451_v1 = vpop.f32.mrf.mxu0  ;;  %v701_v2 = vpop.f32.mrf.mxu1 }
 0x16d   :  { %v844_v3 = vmax.f32 %v450_v63, 0.0  ;;  %v894_v4 = vmax.f32 %v700_v0, 0.0 }
 0x16e   :  { %v454_v5 = vpop.f32.mrf.mxu0  ;;  %v704_v6 = vpop.f32.mrf.mxu1 }
 0x16f   :  { %945 = vst.msk [vmem:[%s2378_s3 + $0xd0] sm:$0xff] %vm918_vm0, %v844_v3  ;;  %995 = vst.msk [vmem:[%s2378_s3 + $0x260] sm:$0xff] %vm918_vm0, %v894_v4  ;;  %v455_v7 = vadd.f32 %v1861_v37, %v454_v5  ;;  %v705_v8 = vadd.f32 %v1861_v37, %v704_v6 }
 0x170   :  { %v456_v9 = vpop.f32.mrf.mxu0  ;;  %v706_v10 = vpop.f32.mrf.mxu1 }
 0x171   :  { %v845_v11 = vmax.f32 %v455_v7, 0.0  ;;  %v895_v12 = vmax.f32 %v705_v8, 0.0 }
 0x172   :  { %v459_v13 = vpop.f32.mrf.mxu0  ;;  %v709_v14 = vpop.f32.mrf.mxu1 }
 0x173   :  { %946 = vst.msk [vmem:[%s2378_s3 + $0xd8] sm:$0xff] %vm918_vm0, %v845_v11  ;;  %996 = vst.msk [vmem:[%s2378_s3 + $0x268] sm:$0xff] %vm918_vm0, %v895_v12  ;;  %v460_v15 = vadd.f32 %v1861_v37, %v459_v13  ;;  %v710_v16 = vadd.f32 %v1861_v37, %v709_v14 }
 0x174   :  { %v461_v17 = vpop.f32.mrf.mxu0  ;;  %v711_v18 = vpop.f32.mrf.mxu1 }
 0x175   :  { %v846_v19 = vmax.f32 %v460_v15, 0.0  ;;  %v896_v20 = vmax.f32 %v710_v16, 0.0 }
 0x176   :  { %v464_v21 = vpop.f32.mrf.mxu0  ;;  %v714_v22 = vpop.f32.mrf.mxu1 }
 0x177   :  { %947 = vst.msk [vmem:[%s2378_s3 + $0xe0] sm:$0xff] %vm918_vm0, %v846_v19  ;;  %997 = vst.msk [vmem:[%s2378_s3 + $0x270] sm:$0xff] %vm918_vm0, %v896_v20  ;;  %v465_v23 = vadd.f32 %v1861_v37, %v464_v21  ;;  %v715_v24 = vadd.f32 %v1861_v37, %v714_v22 }
 0x178   :  { %v466_v25 = vpop.f32.mrf.mxu0  ;;  %v716_v26 = vpop.f32.mrf.mxu1 }
 0x179   :  { %v847_v27 = vmax.f32 %v465_v23, 0.0  ;;  %v897_v28 = vmax.f32 %v715_v24, 0.0 }
 0x17a   :  { %v469_v29 = vpop.f32.mrf.mxu0  ;;  %v719_v30 = vpop.f32.mrf.mxu1 }
 0x17b   :  { %948 = vst.msk [vmem:[%s2378_s3 + $0xe8] sm:$0xff] %vm918_vm0, %v847_v27  ;;  %998 = vst.msk [vmem:[%s2378_s3 + $0x278] sm:$0xff] %vm918_vm0, %v897_v28  ;;  %v470_v31 = vadd.f32 %v1861_v37, %v469_v29  ;;  %v720_v32 = vadd.f32 %v1861_v37, %v719_v30 }
 0x17c   :  { %v471_v33 = vpop.f32.mrf.mxu0  ;;  %v721_v34 = vpop.f32.mrf.mxu1 }
 0x17d   :  { %v848_v35 = vmax.f32 %v470_v31, 0.0  ;;  %v898_v36 = vmax.f32 %v720_v32, 0.0 }
 0x17e   :  { %v474_v38 = vpop.f32.mrf.mxu0  ;;  %v724_v39 = vpop.f32.mrf.mxu1 }
 0x17f   :  { %949 = vst.msk [vmem:[%s2378_s3 + $0xf0] sm:$0xff] %vm918_vm0, %v848_v35  ;;  %999 = vst.msk [vmem:[%s2378_s3 + $0x280] sm:$0xff] %vm918_vm0, %v898_v36  ;;  %v475_v40 = vadd.f32 %v1861_v37, %v474_v38  ;;  %v725_v41 = vadd.f32 %v1861_v37, %v724_v39 }
 0x180   :  { %v476_v42 = vpop.f32.mrf.mxu0  ;;  %v726_v43 = vpop.f32.mrf.mxu1 }
 0x181   :  { %v849_v44 = vmax.f32 %v475_v40, 0.0  ;;  %v899_v45 = vmax.f32 %v725_v41, 0.0 }
 0x182   :  { %v479_v46 = vpop.f32.mrf.mxu0  ;;  %v729_v47 = vpop.f32.mrf.mxu1 }
 0x183   :  { %950 = vst.msk [vmem:[%s2378_s3 + $0xf8] sm:$0xff] %vm918_vm0, %v849_v44  ;;  %1000 = vst.msk [vmem:[%s2378_s3 + $0x288] sm:$0xff] %vm918_vm0, %v899_v45  ;;  %v480_v48 = vadd.f32 %v1861_v37, %v479_v46  ;;  %v730_v49 = vadd.f32 %v1861_v37, %v729_v47 }
 0x184   :  { %v481_v50 = vpop.f32.mrf.mxu0  ;;  %v731_v51 = vpop.f32.mrf.mxu1 }
 0x185   :  { %v850_v52 = vmax.f32 %v480_v48, 0.0  ;;  %v900_v53 = vmax.f32 %v730_v49, 0.0 }
 0x186   :  { %v484_v54 = vpop.f32.mrf.mxu0  ;;  %v734_v55 = vpop.f32.mrf.mxu1 }
 0x187   :  { %951 = vst.msk [vmem:[%s2378_s3 + $0x100] sm:$0xff] %vm918_vm0, %v850_v52  ;;  %1001 = vst.msk [vmem:[%s2378_s3 + $0x290] sm:$0xff] %vm918_vm0, %v900_v53  ;;  %v485_v56 = vadd.f32 %v1861_v37, %v484_v54  ;;  %v735_v57 = vadd.f32 %v1861_v37, %v734_v55 }
 0x188   :  { %v486_v58 = vpop.f32.mrf.mxu0  ;;  %v736_v59 = vpop.f32.mrf.mxu1 }
 0x189   :  { %v851_v60 = vmax.f32 %v485_v56, 0.0  ;;  %v901_v61 = vmax.f32 %v735_v57, 0.0 }
 0x18a   :  { %v489_v62 = vpop.f32.mrf.mxu0  ;;  %v739_v63 = vpop.f32.mrf.mxu1 }
 0x18b   :  { %952 = vst.msk [vmem:[%s2378_s3 + $0x108] sm:$0xff] %vm918_vm0, %v851_v60  ;;  %1002 = vst.msk [vmem:[%s2378_s3 + $0x298] sm:$0xff] %vm918_vm0, %v901_v61  ;;  %v490_v0 = vadd.f32 %v1861_v37, %v489_v62  ;;  %v740_v1 = vadd.f32 %v1861_v37, %v739_v63 }
 0x18c   :  { %v491_v2 = vpop.f32.mrf.mxu0  ;;  %v741_v3 = vpop.f32.mrf.mxu1 }
 0x18d   :  { %v852_v4 = vmax.f32 %v490_v0, 0.0  ;;  %v902_v5 = vmax.f32 %v740_v1, 0.0 }
 0x18e   :  { %v494_v6 = vpop.f32.mrf.mxu0  ;;  %v744_v7 = vpop.f32.mrf.mxu1 }
 0x18f   :  { %953 = vst.msk [vmem:[%s2378_s3 + $0x110] sm:$0xff] %vm918_vm0, %v852_v4  ;;  %1003 = vst.msk [vmem:[%s2378_s3 + $0x2a0] sm:$0xff] %vm918_vm0, %v902_v5  ;;  %v495_v8 = vadd.f32 %v1861_v37, %v494_v6  ;;  %v745_v9 = vadd.f32 %v1861_v37, %v744_v7 }
 0x190   :  { %v496_v10 = vpop.f32.mrf.mxu0  ;;  %v746_v11 = vpop.f32.mrf.mxu1 }
 0x191   :  { %v853_v12 = vmax.f32 %v495_v8, 0.0  ;;  %v903_v13 = vmax.f32 %v745_v9, 0.0 }
 0x192   :  { %v499_v14 = vpop.f32.mrf.mxu0  ;;  %v749_v15 = vpop.f32.mrf.mxu1 }
 0x193   :  { %954 = vst.msk [vmem:[%s2378_s3 + $0x118] sm:$0xff] %vm918_vm0, %v853_v12  ;;  %1004 = vst.msk [vmem:[%s2378_s3 + $0x2a8] sm:$0xff] %vm918_vm0, %v903_v13  ;;  %v500_v16 = vadd.f32 %v1861_v37, %v499_v14  ;;  %v750_v17 = vadd.f32 %v1861_v37, %v749_v15 }
 0x194   :  { %v501_v18 = vpop.f32.mrf.mxu0  ;;  %v751_v19 = vpop.f32.mrf.mxu1 }
 0x195   :  { %v854_v20 = vmax.f32 %v500_v16, 0.0  ;;  %v904_v21 = vmax.f32 %v750_v17, 0.0 }
 0x196   :  { %v504_v22 = vpop.f32.mrf.mxu0  ;;  %v754_v23 = vpop.f32.mrf.mxu1 }
 0x197   :  { %955 = vst.msk [vmem:[%s2378_s3 + $0x120] sm:$0xff] %vm918_vm0, %v854_v20  ;;  %1005 = vst.msk [vmem:[%s2378_s3 + $0x2b0] sm:$0xff] %vm918_vm0, %v904_v21  ;;  %v505_v24 = vadd.f32 %v1861_v37, %v504_v22  ;;  %v755_v25 = vadd.f32 %v1861_v37, %v754_v23 }
 0x198   :  { %v506_v26 = vpop.f32.mrf.mxu0  ;;  %v756_v27 = vpop.f32.mrf.mxu1 }
 0x199   :  { %v855_v28 = vmax.f32 %v505_v24, 0.0  ;;  %v905_v29 = vmax.f32 %v755_v25, 0.0 }
 0x19a   :  { %v509_v30 = vpop.f32.mrf.mxu0  ;;  %v759_v31 = vpop.f32.mrf.mxu1 }
 0x19b   :  { %956 = vst.msk [vmem:[%s2378_s3 + $0x128] sm:$0xff] %vm918_vm0, %v855_v28  ;;  %1006 = vst.msk [vmem:[%s2378_s3 + $0x2b8] sm:$0xff] %vm918_vm0, %v905_v29  ;;  %v510_v32 = vadd.f32 %v1861_v37, %v509_v30  ;;  %v760_v33 = vadd.f32 %v1861_v37, %v759_v31 }
 0x19c   :  { %v511_v34 = vpop.f32.mrf.mxu0  ;;  %v761_v35 = vpop.f32.mrf.mxu1 }
 0x19d   :  { %v856_v36 = vmax.f32 %v510_v32, 0.0  ;;  %v906_v38 = vmax.f32 %v760_v33, 0.0 }
 0x19e   :  { %v514_v39 = vpop.f32.mrf.mxu0  ;;  %v764_v40 = vpop.f32.mrf.mxu1 }
 0x19f   :  { %957 = vst.msk [vmem:[%s2378_s3 + $0x130] sm:$0xff] %vm918_vm0, %v856_v36  ;;  %1007 = vst.msk [vmem:[%s2378_s3 + $0x2c0] sm:$0xff] %vm918_vm0, %v906_v38  ;;  %v515_v41 = vadd.f32 %v1861_v37, %v514_v39  ;;  %v765_v42 = vadd.f32 %v1861_v37, %v764_v40 }
 0x1a0   :  { %v516_v43 = vpop.f32.mrf.mxu0  ;;  %v766_v44 = vpop.f32.mrf.mxu1 }
 0x1a1   :  { %v857_v45 = vmax.f32 %v515_v41, 0.0  ;;  %v907_v46 = vmax.f32 %v765_v42, 0.0 }
 0x1a2   :  { %v519_v47 = vpop.f32.mrf.mxu0  ;;  %v769_v48 = vpop.f32.mrf.mxu1 }
 0x1a3   :  { %958 = vst.msk [vmem:[%s2378_s3 + $0x138] sm:$0xff] %vm918_vm0, %v857_v45  ;;  %1008 = vst.msk [vmem:[%s2378_s3 + $0x2c8] sm:$0xff] %vm918_vm0, %v907_v46  ;;  %v520_v49 = vadd.f32 %v1861_v37, %v519_v47  ;;  %v770_v50 = vadd.f32 %v1861_v37, %v769_v48 }
 0x1a4   :  { %v521_v51 = vpop.f32.mrf.mxu0  ;;  %v771_v52 = vpop.f32.mrf.mxu1 }
 0x1a5   :  { %v858_v53 = vmax.f32 %v520_v49, 0.0  ;;  %v908_v54 = vmax.f32 %v770_v50, 0.0 }
 0x1a6   :  { %v524_v55 = vpop.f32.mrf.mxu0  ;;  %v774_v56 = vpop.f32.mrf.mxu1 }
 0x1a7   :  { %959 = vst.msk [vmem:[%s2378_s3 + $0x140] sm:$0xff] %vm918_vm0, %v858_v53  ;;  %1009 = vst.msk [vmem:[%s2378_s3 + $0x2d0] sm:$0xff] %vm918_vm0, %v908_v54  ;;  %v525_v57 = vadd.f32 %v1861_v37, %v524_v55  ;;  %v775_v58 = vadd.f32 %v1861_v37, %v774_v56 }
 0x1a8   :  { %v526_v59 = vpop.f32.mrf.mxu0  ;;  %v776_v60 = vpop.f32.mrf.mxu1 }
 0x1a9   :  { %v859_v61 = vmax.f32 %v525_v57, 0.0  ;;  %v909_v62 = vmax.f32 %v775_v58, 0.0 }
 0x1aa   :  { %v529_v63 = vpop.f32.mrf.mxu0  ;;  %v779_v0 = vpop.f32.mrf.mxu1 }
 0x1ab   :  { %960 = vst.msk [vmem:[%s2378_s3 + $0x148] sm:$0xff] %vm918_vm0, %v859_v61  ;;  %1010 = vst.msk [vmem:[%s2378_s3 + $0x2d8] sm:$0xff] %vm918_vm0, %v909_v62  ;;  %v530_v1 = vadd.f32 %v1861_v37, %v529_v63  ;;  %v780_v2 = vadd.f32 %v1861_v37, %v779_v0 }
 0x1ac   :  { %v531_v3 = vpop.f32.mrf.mxu0  ;;  %v781_v4 = vpop.f32.mrf.mxu1 }
 0x1ad   :  { %v860_v5 = vmax.f32 %v530_v1, 0.0  ;;  %v910_v6 = vmax.f32 %v780_v2, 0.0 }
 0x1ae   :  { %v534_v7 = vpop.f32.mrf.mxu0  ;;  %v784_v8 = vpop.f32.mrf.mxu1 }
 0x1af   :  { %961 = vst.msk [vmem:[%s2378_s3 + $0x150] sm:$0xff] %vm918_vm0, %v860_v5  ;;  %1011 = vst.msk [vmem:[%s2378_s3 + $0x2e0] sm:$0xff] %vm918_vm0, %v910_v6  ;;  %v535_v9 = vadd.f32 %v1861_v37, %v534_v7  ;;  %v785_v10 = vadd.f32 %v1861_v37, %v784_v8 }
 0x1b0   :  { %v536_v11 = vpop.f32.mrf.mxu0  ;;  %v786_v12 = vpop.f32.mrf.mxu1 }
 0x1b1   :  { %v861_v13 = vmax.f32 %v535_v9, 0.0  ;;  %v911_v14 = vmax.f32 %v785_v10, 0.0 }
 0x1b2   :  { %v539_v15 = vpop.f32.mrf.mxu0  ;;  %v789_v16 = vpop.f32.mrf.mxu1 }
 0x1b3   :  { %962 = vst.msk [vmem:[%s2378_s3 + $0x158] sm:$0xff] %vm918_vm0, %v861_v13  ;;  %1012 = vst.msk [vmem:[%s2378_s3 + $0x2e8] sm:$0xff] %vm918_vm0, %v911_v14  ;;  %v540_v17 = vadd.f32 %v1861_v37, %v539_v15  ;;  %v790_v18 = vadd.f32 %v1861_v37, %v789_v16 }
 0x1b4   :  { %v541_v19 = vpop.f32.mrf.mxu0  ;;  %v791_v20 = vpop.f32.mrf.mxu1 }
 0x1b5   :  { %v862_v21 = vmax.f32 %v540_v17, 0.0  ;;  %v912_v22 = vmax.f32 %v790_v18, 0.0 }
 0x1b6   :  { %v544_v23 = vpop.f32.mrf.mxu0  ;;  %v794_v24 = vpop.f32.mrf.mxu1 }
 0x1b7   :  { %963 = vst.msk [vmem:[%s2378_s3 + $0x160] sm:$0xff] %vm918_vm0, %v862_v21  ;;  %1013 = vst.msk [vmem:[%s2378_s3 + $0x2f0] sm:$0xff] %vm918_vm0, %v912_v22  ;;  %v545_v25 = vadd.f32 %v1861_v37, %v544_v23  ;;  %v795_v26 = vadd.f32 %v1861_v37, %v794_v24 }
 0x1b8   :  { %v546_v27 = vpop.f32.mrf.mxu0  ;;  %v796_v28 = vpop.f32.mrf.mxu1 }
 0x1b9   :  { %v863_v29 = vmax.f32 %v545_v25, 0.0  ;;  %v913_v30 = vmax.f32 %v795_v26, 0.0 }
 0x1ba   :  { %v549_v31 = vpop.f32.mrf.mxu0  ;;  %v799_v32 = vpop.f32.mrf.mxu1 }
 0x1bb   :  { %964 = vst.msk [vmem:[%s2378_s3 + $0x168] sm:$0xff] %vm918_vm0, %v863_v29  ;;  %1014 = vst.msk [vmem:[%s2378_s3 + $0x2f8] sm:$0xff] %vm918_vm0, %v913_v30  ;;  %v550_v33 = vadd.f32 %v1861_v37, %v549_v31  ;;  %v800_v34 = vadd.f32 %v1861_v37, %v799_v32 }
 0x1bc   :  { %v551_v35 = vpop.f32.mrf.mxu0  ;;  %v801_v36 = vpop.f32.mrf.mxu1 }
 0x1bd   :  { %v864_v38 = vmax.f32 %v550_v33, 0.0  ;;  %v914_v39 = vmax.f32 %v800_v34, 0.0 }
 0x1be   :  { %v554_v40 = vpop.f32.mrf.mxu0  ;;  %v804_v41 = vpop.f32.mrf.mxu1 }
 0x1bf   :  { %965 = vst.msk [vmem:[%s2378_s3 + $0x170] sm:$0xff] %vm918_vm0, %v864_v38  ;;  %1015 = vst.msk [vmem:[%s2378_s3 + $0x300] sm:$0xff] %vm918_vm0, %v914_v39  ;;  %v555_v42 = vadd.f32 %v1861_v37, %v554_v40  ;;  %v805_v43 = vadd.f32 %v1861_v37, %v804_v41 }
 0x1c0   :  { %v556_v44 = vpop.f32.mrf.mxu0  ;;  %v806_v45 = vpop.f32.mrf.mxu1 }
 0x1c1   :  { %v865_v46 = vmax.f32 %v555_v42, 0.0  ;;  %v915_v47 = vmax.f32 %v805_v43, 0.0 }
 0x1c2   :  { %v559_v48 = vpop.f32.mrf.mxu0  ;;  %v809_v49 = vpop.f32.mrf.mxu1 }
 0x1c3   :  { %966 = vst.msk [vmem:[%s2378_s3 + $0x178] sm:$0xff] %vm918_vm0, %v865_v46  ;;  %1016 = vst.msk [vmem:[%s2378_s3 + $0x308] sm:$0xff] %vm918_vm0, %v915_v47  ;;  %v560_v50 = vadd.f32 %v1861_v37, %v559_v48  ;;  %v810_v51 = vadd.f32 %v1861_v37, %v809_v49 }
 0x1c4   :  { %v561_v52 = vpop.f32.mrf.mxu0  ;;  %v811_v53 = vpop.f32.mrf.mxu1 }
 0x1c5   :  { %v866_v54 = vmax.f32 %v560_v50, 0.0  ;;  %v916_v55 = vmax.f32 %v810_v51, 0.0 }
 0x1c6   :  { %v564_v56 = vpop.f32.mrf.mxu0  ;;  %v814_v57 = vpop.f32.mrf.mxu1 }
 0x1c7   :  { %967 = vst.msk [vmem:[%s2378_s3 + $0x180] sm:$0xff] %vm918_vm0, %v866_v54  ;;  %1017 = vst.msk [vmem:[%s2378_s3 + $0x310] sm:$0xff] %vm918_vm0, %v916_v55  ;;  %v565_v58 = vadd.f32 %v1861_v37, %v564_v56  ;;  %v815_v59 = vadd.f32 %v1861_v37, %v814_v57 }
 0x1c8   :  { %v566_v60 = vpop.f32.mrf.mxu0  ;;  %v816_v61 = vpop.f32.mrf.mxu1 }
 0x1c9   :  { %v867_v62 = vmax.f32 %v565_v58, 0.0  ;;  %v917_v63 = vmax.f32 %v815_v59, 0.0 }
 0x1cb   :  { %968 = vst.msk [vmem:[%s2378_s3 + $0x188] sm:$0xff] %vm918_vm0, %v867_v62  ;;  %1018 = vst.msk [vmem:[%s2378_s3 + $0x318] sm:$0xff] %vm918_vm0, %v917_v63 }

// kernel: actor_forward.4
= control target key start
LH: loop header
LB: loop body
LE: loop exit
PB: predicated region body
PF: predicated region fallthrough
CT: control target
= control target key end

     0   :  { %v2071_v0 = vmov 0.0   ;;  %vm2072_vm0 = vmmov 0   ;;  %vm300_vm1 = vcmask 261120   ;;  %s3867_s1 = inlined_call_operand.vmem [shape: f32[288,32], index: 1, kind: input, shape index: {}]   ;;  %s3868_s0 = inlined_call_operand.vmem [shape: f32[648,288], index: 0, kind: input, shape index: {}]   ;;  %s3869_s2 = inlined_call_operand.vmem [shape: f32[1,32], index: 2, kind: input, shape index: {}]   ;;  %s3870_s3 = inlined_call_operand.vmem [shape: f32[648,32], index: 3, kind: output, shape index: {}]  }
   0x1   :  { %544 = vmatprep.subr.mxu0 %v2071_v0  ;;  %v272_v1 = vld [vmem:[%s3867_s1 + $0x78] sm:$0xff]  ;;  %v271_v2 = vld [vmem:[%s3867_s1 + $0x70] sm:$0xff]  ;;  %1817 = vmatprep.subr.mxu1 %v2071_v0  ;;  %v270_v3 = vld [vmem:[%s3867_s1 + $0x68] sm:$0xff] }
   0x2   :  { %545 = vmatpush1.msra.mxu0 %v272_v1  ;;  %1825 = vmatprep.mubr.msk.f32.mxu1 %vm2072_vm0, %v2071_v0  ;;  %v269_v4 = vld [vmem:[%s3867_s1 + $0x60] sm:$0xff]  ;;  %v268_v5 = vld [vmem:[%s3867_s1 + $0x58] sm:$0xff]  ;;  %v267_v6 = vld [vmem:[%s3867_s1 + $0x50] sm:$0xff] }
   0x3   :  { %546 = vmatprep.subr.mxu0 %v2071_v0  ;;  %v292_v7 = vld [vmem:[%s3867_s1 + $0x118] sm:$0xff]  ;;  %v266_v8 = vld [vmem:[%s3867_s1 + $0x48] sm:$0xff]  ;;  %v291_v9 = vld [vmem:[%s3867_s1 + $0x110] sm:$0xff] }
   0x4   :  { %547 = vmatpush1.msra.mxu0 %v271_v2  ;;  %1818 = vmatpush3.msra.mxu1 %v292_v7  ;;  %v290_v10 = vld [vmem:[%s3867_s1 + $0x108] sm:$0xff]  ;;  %v265_v11 = vld [vmem:[%s3867_s1 + $0x40] sm:$0xff]  ;;  %v264_v13 = vld [vmem:[%s3867_s1 + $0x38] sm:$0xff] }
   0x5   :  { %548 = vmatprep.subr.mxu0 %v2071_v0  ;;  %1819 = vmatprep.subr.mxu1 %v2071_v0  ;;  %v15_v12 = vld [vmem:[%s3868_s0 + $0x8] sm:$0xff]  ;;  %v289_v14 = vld [vmem:[%s3867_s1 + $0x100] sm:$0xff]  ;;  %v16_v15 = vld [vmem:[%s3868_s0 + $0x10] sm:$0xff] }
   0x6   :  { %549 = vmatpush1.msra.mxu0 %v270_v3  ;;  %1820 = vmatpush3.msra.mxu1 %v291_v9  ;;  %v263_v16 = vld [vmem:[%s3867_s1 + $0x30] sm:$0xff]  ;;  %v262_v17 = vld [vmem:[%s3867_s1 + $0x28] sm:$0xff]  ;;  %v261_v19 = vld [vmem:[%s3867_s1 + $0x20] sm:$0xff] }
   0x7   :  { %550 = vmatprep.subr.mxu0 %v2071_v0  ;;  %1821 = vmatprep.subr.mxu1 %v2071_v0  ;;  %v19_v18 = vld [vmem:[%s3868_s0 + $0x28] sm:$0xff]  ;;  %v260_v20 = vld [vmem:[%s3867_s1 + $0x18] sm:$0xff]  ;;  %v22_v21 = vld [vmem:[%s3868_s0 + $0x40] sm:$0xff] }
   0x8   :  { %551 = vmatpush1.msra.mxu0 %v269_v4  ;;  %1822 = vmatpush3.msra.mxu1 %v290_v10  ;;  %v259_v22 = vld [vmem:[%s3867_s1 + $0x10] sm:$0xff]  ;;  %v258_v23 = vld [vmem:[%s3867_s1 + $0x8] sm:$0xff]  ;;  %v25_v24 = vld [vmem:[%s3868_s0 + $0x58] sm:$0xff] }
   0x9   :  { %552 = vmatprep.subr.mxu0 %v2071_v0  ;;  %1823 = vmatprep.subr.mxu1 %v2071_v0  ;;  %v257_v25 = vld [vmem:[%s3867_s1] sm:$0xff]  ;;  %v288_v26 = vld [vmem:[%s3867_s1 + $0xf8] sm:$0xff]  ;;  %v28_v27 = vld [vmem:[%s3868_s0 + $0x70] sm:$0xff] }
   0xa   :  { %553 = vmatpush1.msra.mxu0 %v268_v5  ;;  %608 = vmatprep.mubr.f32.mxu0 %v15_v12  ;;  %v287_v28 = vld [vmem:[%s3867_s1 + $0xf0] sm:$0xff]  ;;  %v286_v29 = vld [vmem:[%s3867_s1 + $0xe8] sm:$0xff]  ;;  %v285_v31 = vld [vmem:[%s3867_s1 + $0xe0] sm:$0xff] }
   0xb   :  { %554 = vmatprep.subr.mxu0 %v2071_v0  ;;  %1824 = vmatpush3.msra.mxu1 %v289_v14  ;;  %v31_v30 = vld [vmem:[%s3868_s0 + $0x88] sm:$0xff]  ;;  %v284_v32 = vld [vmem:[%s3867_s1 + $0xd8] sm:$0xff]  ;;  %v34_v33 = vld [vmem:[%s3868_s0 + $0xa0] sm:$0xff] }
   0xc   :  { %555 = vmatpush1.msra.mxu0 %v267_v6  ;;  %1826 = vmatmul.mubr.msk.f32.vlgmr.msra.gmra.mxu1 %vm300_vm1, %v16_v15  ;;  %v283_v34 = vld [vmem:[%s3867_s1 + $0xd0] sm:$0xff]  ;;  %v282_v35 = vld [vmem:[%s3867_s1 + $0xc8] sm:$0xff]  ;;  %v37_v36 = vld [vmem:[%s3868_s0 + $0xb8] sm:$0xff] }
   0xd   :  { %556 = vmatprep.subr.mxu0 %v2071_v0  ;;  %1828 = vmatprep.mubr.msk.f32.mxu1 %vm2072_vm0, %v2071_v0  ;;  %v281_v37 = vld [vmem:[%s3867_s1 + $0xc0] sm:$0xff]  ;;  %v280_v38 = vld [vmem:[%s3867_s1 + $0xb8] sm:$0xff]  ;;  %v40_v39 = vld [vmem:[%s3868_s0 + $0xd0] sm:$0xff] }
   0xe   :  { %557 = vmatpush1.msra.mxu0 %v266_v8  ;;  %v279_v40 = vld [vmem:[%s3867_s1 + $0xb0] sm:$0xff]  ;;  %v278_v41 = vld [vmem:[%s3867_s1 + $0xa8] sm:$0xff]  ;;  %v277_v43 = vld [vmem:[%s3867_s1 + $0xa0] sm:$0xff] }
   0xf   :  { %558 = vmatprep.subr.mxu0 %v2071_v0  ;;  %v43_v42 = vld [vmem:[%s3868_s0 + $0xe8] sm:$0xff]  ;;  %v276_v44 = vld [vmem:[%s3867_s1 + $0x98] sm:$0xff]  ;;  %v46_v45 = vld [vmem:[%s3868_s0 + $0x100] sm:$0xff] }
  0x10   :  { %559 = vmatpush1.msra.mxu0 %v265_v11  ;;  %1829 = vmatmul.mubr.msk.f32.gmra.mxu1 %vm300_vm1, %v19_v18  ;;  %v275_v46 = vld [vmem:[%s3867_s1 + $0x90] sm:$0xff]  ;;  %v274_v47 = vld [vmem:[%s3867_s1 + $0x88] sm:$0xff]  ;;  %v49_v48 = vld [vmem:[%s3868_s0 + $0x118] sm:$0xff] }
  0x11   :  { %560 = vmatprep.subr.mxu0 %v2071_v0  ;;  %1831 = vmatprep.mubr.msk.f32.mxu1 %vm2072_vm0, %v2071_v0  ;;  %v273_v49 = vld [vmem:[%s3867_s1 + $0x80] sm:$0xff]  ;;  %v52_v52 = vld [vmem:[%s3868_s0 + $0x130] sm:$0xff]  ;;  %v17_v53 = vld [vmem:[%s3868_s0 + $0x18] sm:$0xff] }
  0x12   :  { %561 = vmatpush1.msra.mxu0 %v264_v13  ;;  %v14_v50 = vld [vmem:[%s3868_s0] sm:$0xff]  ;;  %v21_v54 = vld [vmem:[%s3868_s0 + $0x38] sm:$0xff]  ;;  %v55_v55 = vld [vmem:[%s3868_s0 + $0x148] sm:$0xff] }
  0x13   :  { %562 = vmatprep.subr.mxu0 %v2071_v0  ;;  %v18_v51 = vld [vmem:[%s3868_s0 + $0x20] sm:$0xff]  ;;  %v20_v56 = vld [vmem:[%s3868_s0 + $0x30] sm:$0xff]  ;;  %v23_v59 = vld [vmem:[%s3868_s0 + $0x48] sm:$0xff] }
  0x14   :  { %563 = vmatpush1.msra.mxu0 %v263_v16  ;;  %1832 = vmatmul.mubr.msk.f32.gmra.mxu1 %vm300_vm1, %v22_v21  ;;  %v24_v57 = vld [vmem:[%s3868_s0 + $0x50] sm:$0xff]  ;;  %v58_v58 = vld [vmem:[%s3868_s0 + $0x160] sm:$0xff]  ;;  %v27_v60 = vld [vmem:[%s3868_s0 + $0x68] sm:$0xff] }
  0x15   :  { %564 = vmatprep.subr.mxu0 %v2071_v0  ;;  %1834 = vmatprep.mubr.msk.f32.mxu1 %vm2072_vm0, %v2071_v0  ;;  %v61_v61 = vld [vmem:[%s3868_s0 + $0x178] sm:$0xff]  ;;  %v26_v62 = vld [vmem:[%s3868_s0 + $0x60] sm:$0xff]  ;;  %v64_v1 = vld [vmem:[%s3868_s0 + $0x190] sm:$0xff] }
  0x16   :  { %565 = vmatpush1.msra.mxu0 %v262_v17  ;;  %v30_v63 = vld [vmem:[%s3868_s0 + $0x80] sm:$0xff]  ;;  %v29_v2 = vld [vmem:[%s3868_s0 + $0x78] sm:$0xff]  ;;  %v67_v4 = vld [vmem:[%s3868_s0 + $0x1a8] sm:$0xff] }
  0x17   :  { %566 = vmatprep.subr.mxu0 %v2071_v0  ;;  %v33_v3 = vld [vmem:[%s3868_s0 + $0x98] sm:$0xff]  ;;  %v32_v5 = vld [vmem:[%s3868_s0 + $0x90] sm:$0xff]  ;;  %v70_v7 = vld [vmem:[%s3868_s0 + $0x1c0] sm:$0xff] }
  0x18   :  { %567 = vmatpush1.msra.mxu0 %v261_v19  ;;  %1835 = vmatmul.mubr.msk.f32.gmra.mxu1 %vm300_vm1, %v25_v24  ;;  %v36_v6 = vld [vmem:[%s3868_s0 + $0xb0] sm:$0xff]  ;;  %v35_v8 = vld [vmem:[%s3868_s0 + $0xa8] sm:$0xff]  ;;  %v73_v10 = vld [vmem:[%s3868_s0 + $0x1d8] sm:$0xff] }
  0x19   :  { %568 = vmatprep.subr.mxu0 %v2071_v0  ;;  %1837 = vmatprep.mubr.msk.f32.mxu1 %vm2072_vm0, %v2071_v0  ;;  %v39_v9 = vld [vmem:[%s3868_s0 + $0xc8] sm:$0xff]  ;;  %v38_v11 = vld [vmem:[%s3868_s0 + $0xc0] sm:$0xff]  ;;  %v76_v13 = vld [vmem:[%s3868_s0 + $0x1f0] sm:$0xff] }
  0x1a   :  { %569 = vmatpush1.msra.mxu0 %v260_v20  ;;  %v42_v12 = vld [vmem:[%s3868_s0 + $0xe0] sm:$0xff]  ;;  %v41_v14 = vld [vmem:[%s3868_s0 + $0xd8] sm:$0xff]  ;;  %v79_v16 = vld [vmem:[%s3868_s0 + $0x208] sm:$0xff] }
  0x1b   :  { %570 = vmatprep.subr.mxu0 %v2071_v0  ;;  %v45_v15 = vld [vmem:[%s3868_s0 + $0xf8] sm:$0xff]  ;;  %v44_v17 = vld [vmem:[%s3868_s0 + $0xf0] sm:$0xff]  ;;  %v82_v19 = vld [vmem:[%s3868_s0 + $0x220] sm:$0xff] }
  0x1c   :  { %571 = vmatpush1.msra.mxu0 %v259_v22  ;;  %1838 = vmatmul.mubr.msk.f32.gmra.mxu1 %vm300_vm1, %v28_v27  ;;  %v48_v18 = vld [vmem:[%s3868_s0 + $0x110] sm:$0xff]  ;;  %v47_v20 = vld [vmem:[%s3868_s0 + $0x108] sm:$0xff]  ;;  %v85_v22 = vld [vmem:[%s3868_s0 + $0x238] sm:$0xff] }
  0x1d   :  { %572 = vmatprep.subr.mxu0 %v2071_v0  ;;  %1840 = vmatprep.mubr.msk.f32.mxu1 %vm2072_vm0, %v2071_v0  ;;  %v51_v21 = vld [vmem:[%s3868_s0 + $0x128] sm:$0xff]  ;;  %v54_v24 = vld [vmem:[%s3868_s0 + $0x140] sm:$0xff]  ;;  %v57_v27 = vld [vmem:[%s3868_s0 + $0x158] sm:$0xff] }
  0x1e   :  { %573 = vmatpush1.msra.mxu0 %v258_v23  ;;  %v50_v23 = vld [vmem:[%s3868_s0 + $0x120] sm:$0xff] }
  0x1f   :  { %574 = vmatprep.subr.mxu0 %v2071_v0 }
  0x20   :  { %575 = vmatpush1.msra.mxu0 %v257_v25  ;;  %1841 = vmatmul.mubr.msk.f32.gmra.mxu1 %vm300_vm1, %v31_v30  ;;  %v88_v25 = vld [vmem:[%s3868_s0 + $0x250] sm:$0xff] }
  0x21   :  { %576 = vmatprep.subr.mxu0 %v2071_v0  ;;  %1843 = vmatprep.mubr.msk.f32.mxu1 %vm2072_vm0, %v2071_v0  ;;  %v60_v30 = vld [vmem:[%s3868_s0 + $0x170] sm:$0xff] }
  0x22   :  { %577 = vmatpush2.msra.mxu0 %v288_v26  ;;  %v53_v26 = vld [vmem:[%s3868_s0 + $0x138] sm:$0xff] }
  0x23   :  { %578 = vmatprep.subr.mxu0 %v2071_v0 }
  0x24   :  { %579 = vmatpush2.msra.mxu0 %v287_v28  ;;  %1844 = vmatmul.mubr.msk.f32.gmra.mxu1 %vm300_vm1, %v34_v33  ;;  %v91_v28 = vld [vmem:[%s3868_s0 + $0x268] sm:$0xff] }
  0x25   :  { %580 = vmatprep.subr.mxu0 %v2071_v0  ;;  %1846 = vmatprep.mubr.msk.f32.mxu1 %vm2072_vm0, %v2071_v0  ;;  %v63_v33 = vld [vmem:[%s3868_s0 + $0x188] sm:$0xff] }
  0x26   :  { %581 = vmatpush2.msra.mxu0 %v286_v29  ;;  %v56_v29 = vld [vmem:[%s3868_s0 + $0x150] sm:$0xff] }
  0x27   :  { %582 = vmatprep.subr.mxu0 %v2071_v0 }
  0x28   :  { %583 = vmatpush2.msra.mxu0 %v285_v31  ;;  %1847 = vmatmul.mubr.msk.f32.gmra.mxu1 %vm300_vm1, %v37_v36  ;;  %v94_v31 = vld [vmem:[%s3868_s0 + $0x280] sm:$0xff] }
  0x29   :  { %584 = vmatprep.subr.mxu0 %v2071_v0  ;;  %1849 = vmatprep.mubr.msk.f32.mxu1 %vm2072_vm0, %v2071_v0  ;;  %v66_v36 = vld [vmem:[%s3868_s0 + $0x1a0] sm:$0xff] }
  0x2a   :  { %585 = vmatpush2.msra.mxu0 %v284_v32  ;;  %v59_v32 = vld [vmem:[%s3868_s0 + $0x168] sm:$0xff] }
  0x2b   :  { %586 = vmatprep.subr.mxu0 %v2071_v0 }
  0x2c   :  { %587 = vmatpush2.msra.mxu0 %v283_v34  ;;  %1850 = vmatmul.mubr.msk.f32.gmra.mxu1 %vm300_vm1, %v40_v39  ;;  %v97_v34 = vld [vmem:[%s3868_s0 + $0x298] sm:$0xff] }
  0x2d   :  { %588 = vmatprep.subr.mxu0 %v2071_v0  ;;  %1852 = vmatprep.mubr.msk.f32.mxu1 %vm2072_vm0, %v2071_v0  ;;  %v69_v39 = vld [vmem:[%s3868_s0 + $0x1b8] sm:$0xff] }
  0x2e   :  { %589 = vmatpush2.msra.mxu0 %v282_v35  ;;  %v62_v35 = vld [vmem:[%s3868_s0 + $0x180] sm:$0xff] }
  0x2f   :  { %590 = vmatprep.subr.mxu0 %v2071_v0 }
  0x30   :  { %591 = vmatpush2.msra.mxu0 %v281_v37  ;;  %1853 = vmatmul.mubr.msk.f32.gmra.mxu1 %vm300_vm1, %v43_v42  ;;  %v100_v37 = vld [vmem:[%s3868_s0 + $0x2b0] sm:$0xff] }
  0x31   :  { %592 = vmatprep.subr.mxu0 %v2071_v0  ;;  %1855 = vmatprep.mubr.msk.f32.mxu1 %vm2072_vm0, %v2071_v0  ;;  %v72_v42 = vld [vmem:[%s3868_s0 + $0x1d0] sm:$0xff] }
  0x32   :  { %593 = vmatpush2.msra.mxu0 %v280_v38  ;;  %v65_v38 = vld [vmem:[%s3868_s0 + $0x198] sm:$0xff] }
  0x33   :  { %594 = vmatprep.subr.mxu0 %v2071_v0 }
  0x34   :  { %595 = vmatpush2.msra.mxu0 %v279_v40  ;;  %1856 = vmatmul.mubr.msk.f32.gmra.mxu1 %vm300_vm1, %v46_v45  ;;  %v103_v40 = vld [vmem:[%s3868_s0 + $0x2c8] sm:$0xff] }
  0x35   :  { %596 = vmatprep.subr.mxu0 %v2071_v0  ;;  %1858 = vmatprep.mubr.msk.f32.mxu1 %vm2072_vm0, %v2071_v0  ;;  %v75_v45 = vld [vmem:[%s3868_s0 + $0x1e8] sm:$0xff] }
  0x36   :  { %597 = vmatpush2.msra.mxu0 %v278_v41  ;;  %v68_v41 = vld [vmem:[%s3868_s0 + $0x1b0] sm:$0xff] }
  0x37   :  { %598 = vmatprep.subr.mxu0 %v2071_v0 }
  0x38   :  { %599 = vmatpush2.msra.mxu0 %v277_v43  ;;  %1859 = vmatmul.mubr.msk.f32.gmra.mxu1 %vm300_vm1, %v49_v48  ;;  %v106_v43 = vld [vmem:[%s3868_s0 + $0x2e0] sm:$0xff] }
  0x39   :  { %600 = vmatprep.subr.mxu0 %v2071_v0  ;;  %1861 = vmatprep.mubr.msk.f32.mxu1 %vm2072_vm0, %v2071_v0  ;;  %v78_v48 = vld [vmem:[%s3868_s0 + $0x200] sm:$0xff] }
  0x3a   :  { %601 = vmatpush2.msra.mxu0 %v276_v44  ;;  %v71_v44 = vld [vmem:[%s3868_s0 + $0x1c8] sm:$0xff] }
  0x3b   :  { %602 = vmatprep.subr.mxu0 %v2071_v0 }
  0x3c   :  { %603 = vmatpush2.msra.mxu0 %v275_v46  ;;  %1862 = vmatmul.mubr.msk.f32.gmra.mxu1 %vm300_vm1, %v52_v52  ;;  %v109_v46 = vld [vmem:[%s3868_s0 + $0x2f8] sm:$0xff]  ;;  %v115_v52 = vld [vmem:[%s3868_s0 + $0x328] sm:$0xff] }
  0x3d   :  { %604 = vmatprep.subr.mxu0 %v2071_v0  ;;  %1864 = vmatprep.mubr.msk.f32.mxu1 %vm2072_vm0, %v2071_v0 }
  0x3e   :  { %605 = vmatpush2.msra.mxu0 %v274_v47  ;;  %v74_v47 = vld [vmem:[%s3868_s0 + $0x1e0] sm:$0xff] }
  0x3f   :  { %606 = vmatprep.subr.mxu0 %v2071_v0 }
  0x40   :  { %607 = vmatpush2.msra.mxu0 %v273_v49  ;;  %1865 = vmatmul.mubr.msk.f32.gmra.mxu1 %vm300_vm1, %v55_v55  ;;  %v112_v49 = vld [vmem:[%s3868_s0 + $0x310] sm:$0xff]  ;;  %v118_v55 = vld [vmem:[%s3868_s0 + $0x340] sm:$0xff] }
  0x41   :  { %609 = vmatmul.mubr.f32.vlgmr.msra.gmra.mxu0 %v14_v50  ;;  %1867 = vmatprep.mubr.msk.f32.mxu1 %vm2072_vm0, %v2071_v0  ;;  %v77_v50 = vld [vmem:[%s3868_s0 + $0x1f8] sm:$0xff] }
  0x42   :  { %613 = vmatprep.mubr.f32.mxu0 %v18_v51  ;;  %v81_v51 = vld [vmem:[%s3868_s0 + $0x218] sm:$0xff] }
  0x44   :  { %1868 = vmatmul.mubr.msk.f32.gmra.mxu1 %vm300_vm1, %v58_v58  ;;  %v121_v58 = vld [vmem:[%s3868_s0 + $0x358] sm:$0xff] }
  0x45   :  { %614 = vmatmul.mubr.f32.gmra.mxu0 %v17_v53  ;;  %1870 = vmatprep.mubr.msk.f32.mxu1 %vm2072_vm0, %v2071_v0  ;;  %v80_v53 = vld [vmem:[%s3868_s0 + $0x210] sm:$0xff] }
  0x46   :  { %618 = vmatprep.mubr.f32.mxu0 %v21_v54  ;;  %v84_v54 = vld [vmem:[%s3868_s0 + $0x230] sm:$0xff] }
  0x48   :  { %1871 = vmatmul.mubr.msk.f32.gmra.mxu1 %vm300_vm1, %v61_v61  ;;  %v124_v61 = vld [vmem:[%s3868_s0 + $0x370] sm:$0xff] }
  0x49   :  { %619 = vmatmul.mubr.f32.gmra.mxu0 %v20_v56  ;;  %1873 = vmatprep.mubr.msk.f32.mxu1 %vm2072_vm0, %v2071_v0  ;;  %v83_v56 = vld [vmem:[%s3868_s0 + $0x228] sm:$0xff] }
  0x4a   :  { %623 = vmatprep.mubr.f32.mxu0 %v24_v57  ;;  %v87_v57 = vld [vmem:[%s3868_s0 + $0x248] sm:$0xff] }
  0x4c   :  { %1874 = vmatmul.mubr.msk.f32.gmra.mxu1 %vm300_vm1, %v64_v1  ;;  %v127_v1 = vld [vmem:[%s3868_s0 + $0x388] sm:$0xff] }
  0x4d   :  { %624 = vmatmul.mubr.f32.gmra.mxu0 %v23_v59  ;;  %1876 = vmatprep.mubr.msk.f32.mxu1 %vm2072_vm0, %v2071_v0  ;;  %v86_v59 = vld [vmem:[%s3868_s0 + $0x240] sm:$0xff] }
  0x4e   :  { %628 = vmatprep.mubr.f32.mxu0 %v27_v60  ;;  %v90_v60 = vld [vmem:[%s3868_s0 + $0x260] sm:$0xff] }
  0x50   :  { %1877 = vmatmul.mubr.msk.f32.gmra.mxu1 %vm300_vm1, %v67_v4  ;;  %v130_v4 = vld [vmem:[%s3868_s0 + $0x3a0] sm:$0xff] }
  0x51   :  { %629 = vmatmul.mubr.f32.gmra.mxu0 %v26_v62  ;;  %1879 = vmatprep.mubr.msk.f32.mxu1 %vm2072_vm0, %v2071_v0  ;;  %v89_v62 = vld [vmem:[%s3868_s0 + $0x258] sm:$0xff] }
  0x52   :  { %633 = vmatprep.mubr.f32.mxu0 %v30_v63  ;;  %v93_v63 = vld [vmem:[%s3868_s0 + $0x278] sm:$0xff] }
  0x54   :  { %1880 = vmatmul.mubr.msk.f32.gmra.mxu1 %vm300_vm1, %v70_v7  ;;  %v133_v7 = vld [vmem:[%s3868_s0 + $0x3b8] sm:$0xff] }
  0x55   :  { %634 = vmatmul.mubr.f32.gmra.mxu0 %v29_v2  ;;  %1882 = vmatprep.mubr.msk.f32.mxu1 %vm2072_vm0, %v2071_v0  ;;  %v92_v2 = vld [vmem:[%s3868_s0 + $0x270] sm:$0xff] }
  0x56   :  { %638 = vmatprep.mubr.f32.mxu0 %v33_v3  ;;  %v96_v3 = vld [vmem:[%s3868_s0 + $0x290] sm:$0xff] }
  0x58   :  { %1883 = vmatmul.mubr.msk.f32.gmra.mxu1 %vm300_vm1, %v73_v10  ;;  %v136_v10 = vld [vmem:[%s3868_s0 + $0x3d0] sm:$0xff] }
  0x59   :  { %639 = vmatmul.mubr.f32.gmra.mxu0 %v32_v5  ;;  %1885 = vmatprep.mubr.msk.f32.mxu1 %vm2072_vm0, %v2071_v0  ;;  %v95_v5 = vld [vmem:[%s3868_s0 + $0x288] sm:$0xff] }
  0x5a   :  { %643 = vmatprep.mubr.f32.mxu0 %v36_v6  ;;  %v99_v6 = vld [vmem:[%s3868_s0 + $0x2a8] sm:$0xff] }
  0x5c   :  { %1886 = vmatmul.mubr.msk.f32.gmra.mxu1 %vm300_vm1, %v76_v13  ;;  %v139_v13 = vld [vmem:[%s3868_s0 + $0x3e8] sm:$0xff] }
  0x5d   :  { %644 = vmatmul.mubr.f32.gmra.mxu0 %v35_v8  ;;  %1888 = vmatprep.mubr.msk.f32.mxu1 %vm2072_vm0, %v2071_v0  ;;  %v98_v8 = vld [vmem:[%s3868_s0 + $0x2a0] sm:$0xff] }
  0x5e   :  { %648 = vmatprep.mubr.f32.mxu0 %v39_v9  ;;  %v102_v9 = vld [vmem:[%s3868_s0 + $0x2c0] sm:$0xff] }
  0x60   :  { %1889 = vmatmul.mubr.msk.f32.gmra.mxu1 %vm300_vm1, %v79_v16  ;;  %v142_v16 = vld [vmem:[%s3868_s0 + $0x400] sm:$0xff] }
  0x61   :  { %649 = vmatmul.mubr.f32.gmra.mxu0 %v38_v11  ;;  %1891 = vmatprep.mubr.msk.f32.mxu1 %vm2072_vm0, %v2071_v0  ;;  %v101_v11 = vld [vmem:[%s3868_s0 + $0x2b8] sm:$0xff] }
  0x62   :  { %653 = vmatprep.mubr.f32.mxu0 %v42_v12  ;;  %v105_v12 = vld [vmem:[%s3868_s0 + $0x2d8] sm:$0xff] }
  0x64   :  { %1892 = vmatmul.mubr.msk.f32.gmra.mxu1 %vm300_vm1, %v82_v19  ;;  %v145_v19 = vld [vmem:[%s3868_s0 + $0x418] sm:$0xff] }
  0x65   :  { %654 = vmatmul.mubr.f32.gmra.mxu0 %v41_v14  ;;  %1894 = vmatprep.mubr.msk.f32.mxu1 %vm2072_vm0, %v2071_v0  ;;  %v104_v14 = vld [vmem:[%s3868_s0 + $0x2d0] sm:$0xff] }
  0x66   :  { %658 = vmatprep.mubr.f32.mxu0 %v45_v15  ;;  %v108_v15 = vld [vmem:[%s3868_s0 + $0x2f0] sm:$0xff] }
  0x68   :  { %1895 = vmatmul.mubr.msk.f32.gmra.mxu1 %vm300_vm1, %v85_v22  ;;  %v148_v22 = vld [vmem:[%s3868_s0 + $0x430] sm:$0xff] }
  0x69   :  { %659 = vmatmul.mubr.f32.gmra.mxu0 %v44_v17  ;;  %1897 = vmatprep.mubr.msk.f32.mxu1 %vm2072_vm0, %v2071_v0  ;;  %v107_v17 = vld [vmem:[%s3868_s0 + $0x2e8] sm:$0xff] }
  0x6a   :  { %663 = vmatprep.mubr.f32.mxu0 %v48_v18  ;;  %v111_v18 = vld [vmem:[%s3868_s0 + $0x308] sm:$0xff] }
  0x6c   :  { %1898 = vmatmul.mubr.msk.f32.gmra.mxu1 %vm300_vm1, %v88_v25  ;;  %v151_v25 = vld [vmem:[%s3868_s0 + $0x448] sm:$0xff] }
  0x6d   :  { %664 = vmatmul.mubr.f32.gmra.mxu0 %v47_v20  ;;  %1900 = vmatprep.mubr.msk.f32.mxu1 %vm2072_vm0, %v2071_v0  ;;  %v110_v20 = vld [vmem:[%s3868_s0 + $0x300] sm:$0xff] }
  0x6e   :  { %668 = vmatprep.mubr.f32.mxu0 %v51_v21  ;;  %v114_v21 = vld [vmem:[%s3868_s0 + $0x320] sm:$0xff] }
  0x70   :  { %1901 = vmatmul.mubr.msk.f32.gmra.mxu1 %vm300_vm1, %v91_v28  ;;  %v154_v28 = vld [vmem:[%s3868_s0 + $0x460] sm:$0xff] }
  0x71   :  { %669 = vmatmul.mubr.f32.gmra.mxu0 %v50_v23  ;;  %1903 = vmatprep.mubr.msk.f32.mxu1 %vm2072_vm0, %v2071_v0  ;;  %v113_v23 = vld [vmem:[%s3868_s0 + $0x318] sm:$0xff] }
  0x72   :  { %673 = vmatprep.mubr.f32.mxu0 %v54_v24  ;;  %v117_v24 = vld [vmem:[%s3868_s0 + $0x338] sm:$0xff] }
  0x74   :  { %1904 = vmatmul.mubr.msk.f32.gmra.mxu1 %vm300_vm1, %v94_v31  ;;  %v157_v31 = vld [vmem:[%s3868_s0 + $0x478] sm:$0xff] }
  0x75   :  { %674 = vmatmul.mubr.f32.gmra.mxu0 %v53_v26  ;;  %1906 = vmatprep.mubr.msk.f32.mxu1 %vm2072_vm0, %v2071_v0  ;;  %v116_v26 = vld [vmem:[%s3868_s0 + $0x330] sm:$0xff] }
  0x76   :  { %678 = vmatprep.mubr.f32.mxu0 %v57_v27  ;;  %v120_v27 = vld [vmem:[%s3868_s0 + $0x350] sm:$0xff] }
  0x78   :  { %1907 = vmatmul.mubr.msk.f32.gmra.mxu1 %vm300_vm1, %v97_v34  ;;  %v160_v34 = vld [vmem:[%s3868_s0 + $0x490] sm:$0xff] }
  0x79   :  { %679 = vmatmul.mubr.f32.gmra.mxu0 %v56_v29  ;;  %1909 = vmatprep.mubr.msk.f32.mxu1 %vm2072_vm0, %v2071_v0  ;;  %v119_v29 = vld [vmem:[%s3868_s0 + $0x348] sm:$0xff] }
  0x7a   :  { %683 = vmatprep.mubr.f32.mxu0 %v60_v30  ;;  %v123_v30 = vld [vmem:[%s3868_s0 + $0x368] sm:$0xff] }
  0x7c   :  { %1910 = vmatmul.mubr.msk.f32.gmra.mxu1 %vm300_vm1, %v100_v37 }
  0x7d   :  { %684 = vmatmul.mubr.f32.gmra.mxu0 %v59_v32  ;;  %1912 = vmatprep.mubr.msk.f32.mxu1 %vm2072_vm0, %v2071_v0  ;;  %v122_v32 = vld [vmem:[%s3868_s0 + $0x360] sm:$0xff] }
  0x7e   :  { %688 = vmatprep.mubr.f32.mxu0 %v63_v33  ;;  %v126_v33 = vld [vmem:[%s3868_s0 + $0x380] sm:$0xff] }
  0x80   :  { %1913 = vmatmul.mubr.msk.f32.gmra.mxu1 %vm300_vm1, %v103_v40  ;;  %v128_v40 = vld [vmem:[%s3868_s0 + $0x390] sm:$0xff] }
  0x81   :  { %689 = vmatmul.mubr.f32.gmra.mxu0 %v62_v35  ;;  %1915 = vmatprep.mubr.msk.f32.mxu1 %vm2072_vm0, %v2071_v0  ;;  %v125_v35 = vld [vmem:[%s3868_s0 + $0x378] sm:$0xff] }
  0x82   :  { %693 = vmatprep.mubr.f32.mxu0 %v66_v36  ;;  %v129_v36 = vld [vmem:[%s3868_s0 + $0x398] sm:$0xff] }
  0x84   :  { %1916 = vmatmul.mubr.msk.f32.gmra.mxu1 %vm300_vm1, %v106_v43  ;;  %v166_v43 = vld [vmem:[%s3868_s0 + $0x4c0] sm:$0xff] }
  0x85   :  { %694 = vmatmul.mubr.f32.gmra.mxu0 %v65_v38  ;;  %1918 = vmatprep.mubr.msk.f32.mxu1 %vm2072_vm0, %v2071_v0  ;;  %v163_v38 = vld [vmem:[%s3868_s0 + $0x4a8] sm:$0xff] }
  0x86   :  { %698 = vmatprep.mubr.f32.mxu0 %v69_v39 }
  0x88   :  { %1919 = vmatmul.mubr.msk.f32.gmra.mxu1 %vm300_vm1, %v109_v46  ;;  %v135_v46 = vld [vmem:[%s3868_s0 + $0x3c8] sm:$0xff] }
  0x89   :  { %699 = vmatmul.mubr.f32.gmra.mxu0 %v68_v41  ;;  %1921 = vmatprep.mubr.msk.f32.mxu1 %vm2072_vm0, %v2071_v0  ;;  %v132_v41 = vld [vmem:[%s3868_s0 + $0x3b0] sm:$0xff] }
  0x8a   :  { %703 = vmatprep.mubr.f32.mxu0 %v72_v42 }
  0x8c   :  { %1922 = vmatmul.mubr.msk.f32.gmra.mxu1 %vm300_vm1, %v112_v49 }
  0x8d   :  { %704 = vmatmul.mubr.f32.gmra.mxu0 %v71_v44  ;;  %1924 = vmatprep.mubr.msk.f32.mxu1 %vm2072_vm0, %v2071_v0 }
  0x8e   :  { %708 = vmatprep.mubr.f32.mxu0 %v75_v45  ;;  %v131_v45 = vld [vmem:[%s3868_s0 + $0x3a8] sm:$0xff] }
  0x90   :  { %1925 = vmatmul.mubr.msk.f32.gmra.mxu1 %vm300_vm1, %v115_v52 }
  0x91   :  { %709 = vmatmul.mubr.f32.gmra.mxu0 %v74_v47  ;;  %1927 = vmatprep.mubr.msk.f32.mxu1 %vm2072_vm0, %v2071_v0 }
  0x92   :  { %713 = vmatprep.mubr.f32.mxu0 %v78_v48  ;;  %v169_v48 = vld [vmem:[%s3868_s0 + $0x4d8] sm:$0xff] }
  0x94   :  { %1928 = vmatmul.mubr.msk.f32.gmra.mxu1 %vm300_vm1, %v118_v55  ;;  %v137_v55 = vld [vmem:[%s3868_s0 + $0x3d8] sm:$0xff] }
  0x95   :  { %714 = vmatmul.mubr.f32.gmra.mxu0 %v77_v50  ;;  %1930 = vmatprep.mubr.msk.f32.mxu1 %vm2072_vm0, %v2071_v0  ;;  %v134_v50 = vld [vmem:[%s3868_s0 + $0x3c0] sm:$0xff] }
  0x96   :  { %718 = vmatprep.mubr.f32.mxu0 %v81_v51  ;;  %v138_v51 = vld [vmem:[%s3868_s0 + $0x3e0] sm:$0xff] }
  0x98   :  { %1931 = vmatmul.mubr.msk.f32.gmra.mxu1 %vm300_vm1, %v121_v58  ;;  %v175_v58 = vld [vmem:[%s3868_s0 + $0x508] sm:$0xff] }
  0x99   :  { %719 = vmatmul.mubr.f32.gmra.mxu0 %v80_v53  ;;  %1933 = vmatprep.mubr.msk.f32.mxu1 %vm2072_vm0, %v2071_v0  ;;  %v172_v53 = vld [vmem:[%s3868_s0 + $0x4f0] sm:$0xff] }
  0x9a   :  { %723 = vmatprep.mubr.f32.mxu0 %v84_v54 }
  0x9c   :  { %1934 = vmatmul.mubr.msk.f32.gmra.mxu1 %vm300_vm1, %v124_v61  ;;  %v144_v61 = vld [vmem:[%s3868_s0 + $0x410] sm:$0xff] }
  0x9d   :  { %724 = vmatmul.mubr.f32.gmra.mxu0 %v83_v56  ;;  %1936 = vmatprep.mubr.msk.f32.mxu1 %vm2072_vm0, %v2071_v0  ;;  %v141_v56 = vld [vmem:[%s3868_s0 + $0x3f8] sm:$0xff] }
  0x9e   :  { %728 = vmatprep.mubr.f32.mxu0 %v87_v57 }
  0xa0   :  { %1937 = vmatmul.mubr.msk.f32.gmra.mxu1 %vm300_vm1, %v127_v1 }
  0xa1   :  { %729 = vmatmul.mubr.f32.gmra.mxu0 %v86_v59  ;;  %1939 = vmatprep.mubr.msk.f32.mxu1 %vm2072_vm0, %v2071_v0 }
  0xa2   :  { %733 = vmatprep.mubr.f32.mxu0 %v90_v60  ;;  %v140_v60 = vld [vmem:[%s3868_s0 + $0x3f0] sm:$0xff] }
  0xa4   :  { %1940 = vmatmul.mubr.msk.f32.gmra.mxu1 %vm300_vm1, %v130_v4 }
  0xa5   :  { %734 = vmatmul.mubr.f32.gmra.mxu0 %v89_v62  ;;  %1942 = vmatprep.mubr.msk.f32.mxu1 %vm2072_vm0, %v2071_v0 }
  0xa6   :  { %738 = vmatprep.mubr.f32.mxu0 %v93_v63  ;;  %v178_v63 = vld [vmem:[%s3868_s0 + $0x520] sm:$0xff] }
  0xa8   :  { %1943 = vmatmul.mubr.msk.f32.gmra.mxu1 %vm300_vm1, %v133_v7  ;;  %v146_v7 = vld [vmem:[%s3868_s0 + $0x420] sm:$0xff] }
  0xa9   :  { %739 = vmatmul.mubr.f32.gmra.mxu0 %v92_v2  ;;  %1945 = vmatprep.mubr.msk.f32.mxu1 %vm2072_vm0, %v2071_v0  ;;  %v143_v2 = vld [vmem:[%s3868_s0 + $0x408] sm:$0xff] }
  0xaa   :  { %743 = vmatprep.mubr.f32.mxu0 %v96_v3  ;;  %v147_v3 = vld [vmem:[%s3868_s0 + $0x428] sm:$0xff] }
  0xac   :  { %1946 = vmatmul.mubr.msk.f32.gmra.mxu1 %vm300_vm1, %v136_v10  ;;  %v184_v10 = vld [vmem:[%s3868_s0 + $0x550] sm:$0xff] }
  0xad   :  { %744 = vmatmul.mubr.f32.gmra.mxu0 %v95_v5  ;;  %1948 = vmatprep.mubr.msk.f32.mxu1 %vm2072_vm0, %v2071_v0  ;;  %v181_v5 = vld [vmem:[%s3868_s0 + $0x538] sm:$0xff] }
  0xae   :  { %748 = vmatprep.mubr.f32.mxu0 %v99_v6 }
  0xb0   :  { %1949 = vmatmul.mubr.msk.f32.gmra.mxu1 %vm300_vm1, %v139_v13  ;;  %v153_v13 = vld [vmem:[%s3868_s0 + $0x458] sm:$0xff] }
  0xb1   :  { %749 = vmatmul.mubr.f32.gmra.mxu0 %v98_v8  ;;  %1951 = vmatprep.mubr.msk.f32.mxu1 %vm2072_vm0, %v2071_v0  ;;  %v150_v8 = vld [vmem:[%s3868_s0 + $0x440] sm:$0xff] }
  0xb2   :  { %753 = vmatprep.mubr.f32.mxu0 %v102_v9 }
  0xb4   :  { %1952 = vmatmul.mubr.msk.f32.gmra.mxu1 %vm300_vm1, %v142_v16 }
  0xb5   :  { %754 = vmatmul.mubr.f32.gmra.mxu0 %v101_v11  ;;  %1954 = vmatprep.mubr.msk.f32.mxu1 %vm2072_vm0, %v2071_v0 }
  0xb6   :  { %758 = vmatprep.mubr.f32.mxu0 %v105_v12  ;;  %v149_v12 = vld [vmem:[%s3868_s0 + $0x438] sm:$0xff] }
  0xb8   :  { %1955 = vmatmul.mubr.msk.f32.gmra.mxu1 %vm300_vm1, %v145_v19 }
  0xb9   :  { %759 = vmatmul.mubr.f32.gmra.mxu0 %v104_v14  ;;  %1957 = vmatprep.mubr.msk.f32.mxu1 %vm2072_vm0, %v2071_v0 }
  0xba   :  { %763 = vmatprep.mubr.f32.mxu0 %v108_v15  ;;  %v187_v15 = vld [vmem:[%s3868_s0 + $0x568] sm:$0xff] }
  0xbc   :  { %1958 = vmatmul.mubr.msk.f32.gmra.mxu1 %vm300_vm1, %v148_v22  ;;  %v155_v22 = vld [vmem:[%s3868_s0 + $0x468] sm:$0xff] }
  0xbd   :  { %764 = vmatmul.mubr.f32.gmra.mxu0 %v107_v17  ;;  %1960 = vmatprep.mubr.msk.f32.mxu1 %vm2072_vm0, %v2071_v0  ;;  %v152_v17 = vld [vmem:[%s3868_s0 + $0x450] sm:$0xff] }
  0xbe   :  { %768 = vmatprep.mubr.f32.mxu0 %v111_v18  ;;  %v156_v18 = vld [vmem:[%s3868_s0 + $0x470] sm:$0xff] }
  0xc0   :  { %1961 = vmatmul.mubr.msk.f32.gmra.mxu1 %vm300_vm1, %v151_v25  ;;  %v193_v25 = vld [vmem:[%s3868_s0 + $0x598] sm:$0xff] }
  0xc1   :  { %769 = vmatmul.mubr.f32.gmra.mxu0 %v110_v20  ;;  %1963 = vmatprep.mubr.msk.f32.mxu1 %vm2072_vm0, %v2071_v0  ;;  %v190_v20 = vld [vmem:[%s3868_s0 + $0x580] sm:$0xff] }
  0xc2   :  { %773 = vmatprep.mubr.f32.mxu0 %v114_v21 }
  0xc4   :  { %1964 = vmatmul.mubr.msk.f32.gmra.mxu1 %vm300_vm1, %v154_v28  ;;  %v2915_v28 = vld [vmem:[%s3869_s2] ss:$0 sm:$0xff] }
  0xc5   :  { %774 = vmatmul.mubr.f32.gmra.mxu0 %v113_v23  ;;  %1966 = vmatprep.mubr.msk.f32.mxu1 %vm2072_vm0, %v2071_v0  ;;  %v159_v23 = vld [vmem:[%s3868_s0 + $0x488] sm:$0xff] }
  0xc6   :  { %778 = vmatprep.mubr.f32.mxu0 %v117_v24 }
  0xc8   :  { %1967 = vmatmul.mubr.msk.f32.gmra.mxu1 %vm300_vm1, %v157_v31  ;;  %v196_v31 = vld [vmem:[%s3868_s0 + $0x5b0] sm:$0xff] }
  0xc9   :  { %779 = vmatmul.mubr.f32.gmra.mxu0 %v116_v26  ;;  %1969 = vmatprep.mubr.msk.f32.mxu1 %vm2072_vm0, %v2071_v0 }
  0xca   :  { %783 = vmatprep.mubr.f32.mxu0 %v120_v27  ;;  %v158_v27 = vld [vmem:[%s3868_s0 + $0x480] sm:$0xff] }
  0xcc   :  { %v2761_v37 = vpop.f32.mrf.mxu1  ;;  %1970 = vmatmul.mubr.msk.f32.gmra.mxu1 %vm300_vm1, %v160_v34 }
  0xcd   :  { %784 = vmatmul.mubr.f32.gmra.mxu0 %v119_v29  ;;  %1972 = vmatprep.mubr.msk.f32.mxu1 %vm2072_vm0, %v2071_v0  ;;  %v162_v29 = vld [vmem:[%s3868_s0 + $0x4a0] sm:$0xff] }
  0xce   :  { %788 = vmatprep.mubr.f32.mxu0 %v123_v30  ;;  %v1827_v39 = vpop.f32.mrf.mxu1 }
  0xd0   :  { %v2775_v42 = vpop.f32.mrf.mxu1  ;;  %1973 = vmatmul.mubr.msk.f32.gmra.mxu1 %vm300_vm1, %v163_v38  ;;  %v165_v38 = vld [vmem:[%s3868_s0 + $0x4b8] sm:$0xff] }
  0xd1   :  { %789 = vmatmul.mubr.f32.gmra.mxu0 %v122_v32  ;;  %1975 = vmatprep.mubr.msk.f32.mxu1 %vm2072_vm0, %v2071_v0 }
  0xd2   :  { %793 = vmatprep.mubr.f32.mxu0 %v126_v33  ;;  %v1830_v44 = vpop.f32.mrf.mxu1 }
  0xd4   :  { %v2789_v47 = vpop.f32.mrf.mxu1  ;;  %1976 = vmatmul.mubr.msk.f32.gmra.mxu1 %vm300_vm1, %v166_v43 }
  0xd5   :  { %794 = vmatmul.mubr.f32.gmra.mxu0 %v125_v35  ;;  %1978 = vmatprep.mubr.msk.f32.mxu1 %vm2072_vm0, %v2071_v0  ;;  %v161_v35 = vld [vmem:[%s3868_s0 + $0x498] sm:$0xff] }
  0xd6   :  { %798 = vmatprep.mubr.f32.mxu0 %v129_v36  ;;  %v1833_v49 = vpop.f32.mrf.mxu1 }
  0xd8   :  { %v2803_v52 = vpop.f32.mrf.mxu1  ;;  %1979 = vmatmul.mubr.msk.f32.gmra.mxu1 %vm300_vm1, %v169_v48  ;;  %v164_v48 = vld [vmem:[%s3868_s0 + $0x4b0] sm:$0xff] }
  0xd9   :  { %799 = vmatmul.mubr.f32.gmra.mxu0 %v128_v40  ;;  %1981 = vmatprep.mubr.msk.f32.mxu1 %vm2072_vm0, %v2071_v0 }
  0xda   :  { %803 = vmatprep.mubr.f32.mxu0 %v132_v41  ;;  %v1836_v54 = vpop.f32.mrf.mxu1  ;;  %v199_v41 = vld [vmem:[%s3868_s0 + $0x5c8] sm:$0xff] }
  0xdc   :  { %v2817_v57 = vpop.f32.mrf.mxu1  ;;  %1982 = vmatmul.mubr.msk.f32.gmra.mxu1 %vm300_vm1, %v172_v53  ;;  %v202_v53 = vld [vmem:[%s3868_s0 + $0x5e0] sm:$0xff] }
  0xdd   :  { %804 = vmatmul.mubr.f32.gmra.mxu0 %v131_v45  ;;  %1984 = vmatprep.mubr.msk.f32.mxu1 %vm2072_vm0, %v2071_v0 }
  0xde   :  { %808 = vmatprep.mubr.f32.mxu0 %v135_v46  ;;  %v1839_v59 = vpop.f32.mrf.mxu1 }
  0xdf   :  { %v167_v59 = vld [vmem:[%s3868_s0 + $0x4c8] sm:$0xff] }
  0xe0   :  { %v2831_v62 = vpop.f32.mrf.mxu1  ;;  %1985 = vmatmul.mubr.msk.f32.gmra.mxu1 %vm300_vm1, %v175_v58 }
  0xe1   :  { %809 = vmatmul.mubr.f32.gmra.mxu0 %v134_v50  ;;  %1987 = vmatprep.mubr.msk.f32.mxu1 %vm2072_vm0, %v2071_v0 }
  0xe2   :  { %813 = vmatprep.mubr.f32.mxu0 %v138_v51  ;;  %v1842_v1 = vpop.f32.mrf.mxu1 }
  0xe3   :  { %v205_v1 = vld [vmem:[%s3868_s0 + $0x5f8] sm:$0xff] }
  0xe4   :  { %v2845_v4 = vpop.f32.mrf.mxu1  ;;  %1988 = vmatmul.mubr.msk.f32.gmra.mxu1 %vm300_vm1, %v178_v63 }
  0xe5   :  { %814 = vmatmul.mubr.f32.gmra.mxu0 %v137_v55  ;;  %1990 = vmatprep.mubr.msk.f32.mxu1 %vm2072_vm0, %v2071_v0 }
  0xe6   :  { %818 = vmatprep.mubr.f32.mxu0 %v141_v56  ;;  %v1845_v6 = vpop.f32.mrf.mxu1 }
  0xe8   :  { %v2859_v9 = vpop.f32.mrf.mxu1  ;;  %1991 = vmatmul.mubr.msk.f32.gmra.mxu1 %vm300_vm1, %v181_v5 }
  0xe9   :  { %819 = vmatmul.mubr.f32.gmra.mxu0 %v140_v60  ;;  %1993 = vmatprep.mubr.msk.f32.mxu1 %vm2072_vm0, %v2071_v0 }
  0xea   :  { %823 = vmatprep.mubr.f32.mxu0 %v144_v61  ;;  %v1848_v11 = vpop.f32.mrf.mxu1 }
  0xec   :  { %v2873_v14 = vpop.f32.mrf.mxu1  ;;  %1994 = vmatmul.mubr.msk.f32.gmra.mxu1 %vm300_vm1, %v184_v10 }
  0xed   :  { %824 = vmatmul.mubr.f32.gmra.mxu0 %v143_v2  ;;  %1996 = vmatprep.mubr.msk.f32.mxu1 %vm2072_vm0, %v2071_v0 }
  0xee   :  { %828 = vmatprep.mubr.f32.mxu0 %v147_v3  ;;  %v1851_v16 = vpop.f32.mrf.mxu1 }
  0xf0   :  { %v2887_v19 = vpop.f32.mrf.mxu1  ;;  %1997 = vmatmul.mubr.msk.f32.gmra.mxu1 %vm300_vm1, %v187_v15 }
  0xf1   :  { %829 = vmatmul.mubr.f32.gmra.mxu0 %v146_v7  ;;  %1999 = vmatprep.mubr.msk.f32.mxu1 %vm2072_vm0, %v2071_v0  ;;  %v170_v7 = vld [vmem:[%s3868_s0 + $0x4e0] sm:$0xff] }
  0xf2   :  { %833 = vmatprep.mubr.f32.mxu0 %v150_v8  ;;  %v1854_v21 = vpop.f32.mrf.mxu1 }
  0xf4   :  { %v2901_v24 = vpop.f32.mrf.mxu1  ;;  %2000 = vmatmul.mubr.msk.f32.gmra.mxu1 %vm300_vm1, %v190_v20 }
  0xf5   :  { %834 = vmatmul.mubr.f32.gmra.mxu0 %v149_v12  ;;  %2002 = vmatprep.mubr.msk.f32.mxu1 %vm2072_vm0, %v2071_v0  ;;  %v208_v12 = vld [vmem:[%s3868_s0 + $0x610] sm:$0xff] }
  0xf6   :  { %838 = vmatprep.mubr.f32.mxu0 %v153_v13  ;;  %v1857_v26 = vpop.f32.mrf.mxu1 }
  0xf8   :  { %v2920_v30 = vpop.f32.mrf.mxu1  ;;  %2003 = vmatmul.mubr.msk.f32.gmra.mxu1 %vm300_vm1, %v193_v25 }
  0xf9   :  { %839 = vmatmul.mubr.f32.gmra.mxu0 %v152_v17  ;;  %2005 = vmatprep.mubr.msk.f32.mxu1 %vm2072_vm0, %v2071_v0 }
  0xfa   :  { %843 = vmatprep.mubr.f32.mxu0 %v156_v18  ;;  %v1860_v33 = vpop.f32.mrf.mxu1  ;;  %v173_v18 = vld [vmem:[%s3868_s0 + $0x4f8] sm:$0xff] }
  0xfc   :  { %v2935_v39 = vpop.f32.mrf.mxu1  ;;  %2006 = vmatmul.mubr.msk.f32.gmra.mxu1 %vm300_vm1, %v196_v31  ;;  %v176_v31 = vld [vmem:[%s3868_s0 + $0x510] sm:$0xff] }
  0xfd   :  { %844 = vmatmul.mubr.f32.gmra.mxu0 %v155_v22  ;;  %2008 = vmatprep.mubr.msk.f32.mxu1 %vm2072_vm0, %v2071_v0 }
  0xfe   :  { %848 = vmatprep.mubr.f32.mxu0 %v159_v23  ;;  %v1863_v44 = vpop.f32.mrf.mxu1  ;;  %v211_v23 = vld [vmem:[%s3868_s0 + $0x628] sm:$0xff] }
 0x100   :  { %v2951_v50 = vpop.f32.mrf.mxu1  ;;  %2009 = vmatmul.mubr.msk.f32.gmra.mxu1 %vm300_vm1, %v199_v41 }
 0x101   :  { %v610_v32 = vpop.f32.mrf.mxu0  ;;  %849 = vmatmul.mubr.f32.gmra.mxu0 %v158_v27  ;;  %2011 = vmatprep.mubr.msk.f32.mxu1 %vm2072_vm0, %v2071_v0 }
 0x102   :  { %v611_v34 = vadd.f32 %v2915_v28, %v610_v32  ;;  %853 = vmatprep.mubr.f32.mxu0 %v162_v29  ;;  %v1866_v55 = vpop.f32.mrf.mxu1 }
 0x103   :  { %v612_v36 = vpop.f32.mrf.mxu0 }
 0x104   :  { %v1081_v40 = vadd.f32 %v2761_v37, %v611_v34  ;;  %v168_v37 = vld [vmem:[%s3868_s0 + $0x4d0] sm:$0xff]  ;;  %v2971_v61 = vpop.f32.mrf.mxu1  ;;  %2012 = vmatmul.mubr.msk.f32.gmra.mxu1 %vm300_vm1, %v202_v53 }
 0x105   :  { %v615_v43 = vpop.f32.mrf.mxu0  ;;  %854 = vmatmul.mubr.f32.gmra.mxu0 %v161_v35  ;;  %2014 = vmatprep.mubr.msk.f32.mxu1 %vm2072_vm0, %v2071_v0  ;;  %v214_v35 = vld [vmem:[%s3868_s0 + $0x640] sm:$0xff] }
 0x106   :  { %v1484_v45 = vmax.f32 %v1081_v40, 0.0  ;;  %v616_v46 = vadd.f32 %v2915_v28, %v615_v43  ;;  %858 = vmatprep.mubr.f32.mxu0 %v165_v38  ;;  %v1869_v3 = vpop.f32.mrf.mxu1  ;;  %v179_v43 = vld [vmem:[%s3868_s0 + $0x528] sm:$0xff] }
 0x107   :  { %v617_v49 = vpop.f32.mrf.mxu0 }
 0x108   :  { %1565 = vst.msk [vmem:[%s3870_s3] sm:$0xff] %vm300_vm1, %v1484_v45  ;;  %v1086_v51 = vadd.f32 %v2775_v42, %v616_v46  ;;  %v171_v42 = vld [vmem:[%s3868_s0 + $0x4e8] sm:$0xff]  ;;  %v2991_v10 = vpop.f32.mrf.mxu1  ;;  %2015 = vmatmul.mubr.msk.f32.gmra.mxu1 %vm300_vm1, %v205_v1 }
 0x109   :  { %v620_v54 = vpop.f32.mrf.mxu0  ;;  %859 = vmatmul.mubr.f32.gmra.mxu0 %v164_v48  ;;  %2017 = vmatprep.mubr.msk.f32.mxu1 %vm2072_vm0, %v2071_v0  ;;  %v217_v48 = vld [vmem:[%s3868_s0 + $0x658] sm:$0xff] }
 0x10a   :  { %v1485_v56 = vmax.f32 %v1086_v51, 0.0  ;;  %v621_v58 = vadd.f32 %v2915_v28, %v620_v54  ;;  %863 = vmatprep.mubr.f32.mxu0 %v168_v37  ;;  %v1872_v15 = vpop.f32.mrf.mxu1  ;;  %v182_v54 = vld [vmem:[%s3868_s0 + $0x540] sm:$0xff] }
 0x10b   :  { %v622_v60 = vpop.f32.mrf.mxu0 }
 0x10c   :  { %1566 = vst.msk [vmem:[%s3870_s3 + $0x8] sm:$0xff] %vm300_vm1, %v1485_v56  ;;  %v1091_v63 = vadd.f32 %v2789_v47, %v621_v58  ;;  %v174_v47 = vld [vmem:[%s3868_s0 + $0x500] sm:$0xff]  ;;  %v3011_v21 = vpop.f32.mrf.mxu1  ;;  %2018 = vmatmul.mubr.msk.f32.gmra.mxu1 %vm300_vm1, %v208_v12 }
 0x10d   :  { %v625_v2 = vpop.f32.mrf.mxu0  ;;  %864 = vmatmul.mubr.f32.gmra.mxu0 %v167_v59  ;;  %2020 = vmatprep.mubr.msk.f32.mxu1 %vm2072_vm0, %v2071_v0  ;;  %v220_v59 = vld [vmem:[%s3868_s0 + $0x670] sm:$0xff] }
 0x10e   :  { %v1486_v5 = vmax.f32 %v1091_v63, 0.0  ;;  %v626_v6 = vadd.f32 %v2915_v28, %v625_v2  ;;  %868 = vmatprep.mubr.f32.mxu0 %v171_v42  ;;  %v1875_v26 = vpop.f32.mrf.mxu1  ;;  %v185_v2 = vld [vmem:[%s3868_s0 + $0x558] sm:$0xff] }
 0x10f   :  { %v627_v8 = vpop.f32.mrf.mxu0 }
 0x110   :  { %1567 = vst.msk [vmem:[%s3870_s3 + $0x10] sm:$0xff] %vm300_vm1, %v1486_v5  ;;  %v1096_v11 = vadd.f32 %v2803_v52, %v626_v6  ;;  %v177_v52 = vld [vmem:[%s3868_s0 + $0x518] sm:$0xff]  ;;  %v3031_v33 = vpop.f32.mrf.mxu1  ;;  %2021 = vmatmul.mubr.msk.f32.gmra.mxu1 %vm300_vm1, %v211_v23 }
 0x111   :  { %v630_v13 = vpop.f32.mrf.mxu0  ;;  %869 = vmatmul.mubr.f32.gmra.mxu0 %v170_v7  ;;  %2023 = vmatprep.mubr.msk.f32.mxu1 %vm2072_vm0, %v2071_v0  ;;  %v223_v7 = vld [vmem:[%s3868_s0 + $0x688] sm:$0xff] }
 0x112   :  { %v1487_v16 = vmax.f32 %v1096_v11, 0.0  ;;  %v631_v17 = vadd.f32 %v2915_v28, %v630_v13  ;;  %873 = vmatprep.mubr.f32.mxu0 %v174_v47  ;;  %v1878_v38 = vpop.f32.mrf.mxu1  ;;  %v188_v13 = vld [vmem:[%s3868_s0 + $0x570] sm:$0xff] }
 0x113   :  { %v632_v20 = vpop.f32.mrf.mxu0 }
 0x114   :  { %1568 = vst.msk [vmem:[%s3870_s3 + $0x18] sm:$0xff] %vm300_vm1, %v1487_v16  ;;  %v1101_v22 = vadd.f32 %v2817_v57, %v631_v17  ;;  %v180_v57 = vld [vmem:[%s3868_s0 + $0x530] sm:$0xff]  ;;  %v3051_v45 = vpop.f32.mrf.mxu1  ;;  %2024 = vmatmul.mubr.msk.f32.gmra.mxu1 %vm300_vm1, %v214_v35 }
 0x115   :  { %v635_v25 = vpop.f32.mrf.mxu0  ;;  %874 = vmatmul.mubr.f32.gmra.mxu0 %v173_v18  ;;  %2026 = vmatprep.mubr.msk.f32.mxu1 %vm2072_vm0, %v2071_v0  ;;  %v226_v18 = vld [vmem:[%s3868_s0 + $0x6a0] sm:$0xff] }
 0x116   :  { %v1488_v27 = vmax.f32 %v1101_v22, 0.0  ;;  %v636_v29 = vadd.f32 %v2915_v28, %v635_v25  ;;  %878 = vmatprep.mubr.f32.mxu0 %v177_v52  ;;  %v1881_v37 = vpop.f32.mrf.mxu1  ;;  %v191_v25 = vld [vmem:[%s3868_s0 + $0x588] sm:$0xff] }
 0x117   :  { %v637_v32 = vpop.f32.mrf.mxu0 }
 0x118   :  { %1569 = vst.msk [vmem:[%s3870_s3 + $0x20] sm:$0xff] %vm300_vm1, %v1488_v27  ;;  %v1106_v34 = vadd.f32 %v2831_v62, %v636_v29  ;;  %v183_v62 = vld [vmem:[%s3868_s0 + $0x548] sm:$0xff]  ;;  %v3071_v56 = vpop.f32.mrf.mxu1  ;;  %2027 = vmatmul.mubr.msk.f32.gmra.mxu1 %vm300_vm1, %v217_v48 }
 0x119   :  { %v640_v36 = vpop.f32.mrf.mxu0  ;;  %879 = vmatmul.mubr.f32.gmra.mxu0 %v176_v31  ;;  %2029 = vmatprep.mubr.msk.f32.mxu1 %vm2072_vm0, %v2071_v0  ;;  %v229_v31 = vld [vmem:[%s3868_s0 + $0x6b8] sm:$0xff] }
 0x11a   :  { %v1489_v40 = vmax.f32 %v1106_v34, 0.0  ;;  %v641_v41 = vadd.f32 %v2915_v28, %v640_v36  ;;  %883 = vmatprep.mubr.f32.mxu0 %v180_v57  ;;  %v1884_v42 = vpop.f32.mrf.mxu1  ;;  %v194_v36 = vld [vmem:[%s3868_s0 + $0x5a0] sm:$0xff] }
 0x11b   :  { %v642_v44 = vpop.f32.mrf.mxu0 }
 0x11c   :  { %1570 = vst.msk [vmem:[%s3870_s3 + $0x28] sm:$0xff] %vm300_vm1, %v1489_v40  ;;  %v1111_v46 = vadd.f32 %v2845_v4, %v641_v41  ;;  %v186_v4 = vld [vmem:[%s3868_s0 + $0x560] sm:$0xff]  ;;  %v3091_v5 = vpop.f32.mrf.mxu1  ;;  %2030 = vmatmul.mubr.msk.f32.gmra.mxu1 %vm300_vm1, %v220_v59 }
 0x11d   :  { %v645_v49 = vpop.f32.mrf.mxu0  ;;  %884 = vmatmul.mubr.f32.gmra.mxu0 %v179_v43  ;;  %2032 = vmatprep.mubr.msk.f32.mxu1 %vm2072_vm0, %v2071_v0  ;;  %v232_v43 = vld [vmem:[%s3868_s0 + $0x6d0] sm:$0xff] }
 0x11e   :  { %v1490_v51 = vmax.f32 %v1111_v46, 0.0  ;;  %v646_v53 = vadd.f32 %v2915_v28, %v645_v49  ;;  %888 = vmatprep.mubr.f32.mxu0 %v183_v62  ;;  %v1887_v47 = vpop.f32.mrf.mxu1  ;;  %v197_v49 = vld [vmem:[%s3868_s0 + $0x5b8] sm:$0xff] }
 0x11f   :  { %v647_v55 = vpop.f32.mrf.mxu0 }
 0x120   :  { %1571 = vst.msk [vmem:[%s3870_s3 + $0x30] sm:$0xff] %vm300_vm1, %v1490_v51  ;;  %v1116_v58 = vadd.f32 %v2859_v9, %v646_v53  ;;  %v189_v9 = vld [vmem:[%s3868_s0 + $0x578] sm:$0xff]  ;;  %v3111_v16 = vpop.f32.mrf.mxu1  ;;  %2033 = vmatmul.mubr.msk.f32.gmra.mxu1 %vm300_vm1, %v223_v7 }
 0x121   :  { %v650_v60 = vpop.f32.mrf.mxu0  ;;  %889 = vmatmul.mubr.f32.gmra.mxu0 %v182_v54  ;;  %2035 = vmatprep.mubr.msk.f32.mxu1 %vm2072_vm0, %v2071_v0  ;;  %v235_v54 = vld [vmem:[%s3868_s0 + $0x6e8] sm:$0xff] }
 0x122   :  { %v1491_v63 = vmax.f32 %v1116_v58, 0.0  ;;  %v651_v1 = vadd.f32 %v2915_v28, %v650_v60  ;;  %893 = vmatprep.mubr.f32.mxu0 %v186_v4  ;;  %v1890_v52 = vpop.f32.mrf.mxu1  ;;  %v200_v60 = vld [vmem:[%s3868_s0 + $0x5d0] sm:$0xff] }
 0x123   :  { %v652_v3 = vpop.f32.mrf.mxu0 }
 0x124   :  { %1572 = vst.msk [vmem:[%s3870_s3 + $0x38] sm:$0xff] %vm300_vm1, %v1491_v63  ;;  %v1121_v6 = vadd.f32 %v2873_v14, %v651_v1  ;;  %v192_v14 = vld [vmem:[%s3868_s0 + $0x590] sm:$0xff]  ;;  %v3131_v27 = vpop.f32.mrf.mxu1  ;;  %2036 = vmatmul.mubr.msk.f32.gmra.mxu1 %vm300_vm1, %v226_v18 }
 0x125   :  { %v655_v8 = vpop.f32.mrf.mxu0  ;;  %894 = vmatmul.mubr.f32.gmra.mxu0 %v185_v2  ;;  %2038 = vmatprep.mubr.msk.f32.mxu1 %vm2072_vm0, %v2071_v0  ;;  %v238_v2 = vld [vmem:[%s3868_s0 + $0x700] sm:$0xff] }
 0x126   :  { %v1492_v11 = vmax.f32 %v1121_v6, 0.0  ;;  %v656_v12 = vadd.f32 %v2915_v28, %v655_v8  ;;  %898 = vmatprep.mubr.f32.mxu0 %v189_v9  ;;  %v1893_v57 = vpop.f32.mrf.mxu1  ;;  %v203_v8 = vld [vmem:[%s3868_s0 + $0x5e8] sm:$0xff] }
 0x127   :  { %v657_v15 = vpop.f32.mrf.mxu0 }
 0x128   :  { %1573 = vst.msk [vmem:[%s3870_s3 + $0x40] sm:$0xff] %vm300_vm1, %v1492_v11  ;;  %v1126_v17 = vadd.f32 %v2887_v19, %v656_v12  ;;  %v195_v19 = vld [vmem:[%s3868_s0 + $0x5a8] sm:$0xff]  ;;  %v3151_v40 = vpop.f32.mrf.mxu1  ;;  %2039 = vmatmul.mubr.msk.f32.gmra.mxu1 %vm300_vm1, %v229_v31 }
 0x129   :  { %v660_v20 = vpop.f32.mrf.mxu0  ;;  %899 = vmatmul.mubr.f32.gmra.mxu0 %v188_v13  ;;  %2041 = vmatprep.mubr.msk.f32.mxu1 %vm2072_vm0, %v2071_v0  ;;  %v241_v13 = vld [vmem:[%s3868_s0 + $0x718] sm:$0xff] }
 0x12a   :  { %v1493_v22 = vmax.f32 %v1126_v17, 0.0  ;;  %v661_v23 = vadd.f32 %v2915_v28, %v660_v20  ;;  %903 = vmatprep.mubr.f32.mxu0 %v192_v14  ;;  %v1896_v62 = vpop.f32.mrf.mxu1  ;;  %v206_v20 = vld [vmem:[%s3868_s0 + $0x600] sm:$0xff] }
 0x12b   :  { %v662_v26 = vpop.f32.mrf.mxu0 }
 0x12c   :  { %1574 = vst.msk [vmem:[%s3870_s3 + $0x48] sm:$0xff] %vm300_vm1, %v1493_v22  ;;  %v1131_v29 = vadd.f32 %v2901_v24, %v661_v23  ;;  %v198_v24 = vld [vmem:[%s3868_s0 + $0x5c0] sm:$0xff]  ;;  %v3171_v51 = vpop.f32.mrf.mxu1  ;;  %2042 = vmatmul.mubr.msk.f32.gmra.mxu1 %vm300_vm1, %v232_v43 }
 0x12d   :  { %v665_v32 = vpop.f32.mrf.mxu0  ;;  %904 = vmatmul.mubr.f32.gmra.mxu0 %v191_v25  ;;  %2044 = vmatprep.mubr.msk.f32.mxu1 %vm2072_vm0, %v2071_v0  ;;  %v244_v25 = vld [vmem:[%s3868_s0 + $0x730] sm:$0xff] }
 0x12e   :  { %v1494_v34 = vmax.f32 %v1131_v29, 0.0  ;;  %v666_v35 = vadd.f32 %v2915_v28, %v665_v32  ;;  %908 = vmatprep.mubr.f32.mxu0 %v195_v19  ;;  %v1899_v4 = vpop.f32.mrf.mxu1  ;;  %v209_v32 = vld [vmem:[%s3868_s0 + $0x618] sm:$0xff] }
 0x12f   :  { %v667_v38 = vpop.f32.mrf.mxu0 }
 0x130   :  { %1575 = vst.msk [vmem:[%s3870_s3 + $0x50] sm:$0xff] %vm300_vm1, %v1494_v34  ;;  %v1136_v41 = vadd.f32 %v2920_v30, %v666_v35  ;;  %v201_v30 = vld [vmem:[%s3868_s0 + $0x5d8] sm:$0xff]  ;;  %v3191_v63 = vpop.f32.mrf.mxu1  ;;  %2045 = vmatmul.mubr.msk.f32.gmra.mxu1 %vm300_vm1, %v235_v54 }
 0x131   :  { %v670_v44 = vpop.f32.mrf.mxu0  ;;  %909 = vmatmul.mubr.f32.gmra.mxu0 %v194_v36  ;;  %2047 = vmatprep.mubr.msk.f32.mxu1 %vm2072_vm0, %v2071_v0  ;;  %v247_v36 = vld [vmem:[%s3868_s0 + $0x748] sm:$0xff] }
 0x132   :  { %v1495_v46 = vmax.f32 %v1136_v41, 0.0  ;;  %v671_v48 = vadd.f32 %v2915_v28, %v670_v44  ;;  %913 = vmatprep.mubr.f32.mxu0 %v198_v24  ;;  %v1902_v9 = vpop.f32.mrf.mxu1  ;;  %v212_v44 = vld [vmem:[%s3868_s0 + $0x630] sm:$0xff] }
 0x133   :  { %v672_v37 = vpop.f32.mrf.mxu0 }
 0x134   :  { %1576 = vst.msk [vmem:[%s3870_s3 + $0x58] sm:$0xff] %vm300_vm1, %v1495_v46  ;;  %v1141_v53 = vadd.f32 %v2935_v39, %v671_v48  ;;  %v204_v39 = vld [vmem:[%s3868_s0 + $0x5f0] sm:$0xff]  ;;  %v3211_v11 = vpop.f32.mrf.mxu1  ;;  %2048 = vmatmul.mubr.msk.f32.gmra.mxu1 %vm300_vm1, %v238_v2 }
 0x135   :  { %v675_v55 = vpop.f32.mrf.mxu0  ;;  %914 = vmatmul.mubr.f32.gmra.mxu0 %v197_v49  ;;  %2050 = vmatprep.mubr.msk.f32.mxu1 %vm2072_vm0, %v2071_v0  ;;  %v250_v49 = vld [vmem:[%s3868_s0 + $0x760] sm:$0xff] }
 0x136   :  { %v1496_v58 = vmax.f32 %v1141_v53, 0.0  ;;  %v676_v59 = vadd.f32 %v2915_v28, %v675_v55  ;;  %918 = vmatprep.mubr.f32.mxu0 %v201_v30  ;;  %v1905_v14 = vpop.f32.mrf.mxu1  ;;  %v215_v55 = vld [vmem:[%s3868_s0 + $0x648] sm:$0xff] }
 0x137   :  { %v677_v42 = vpop.f32.mrf.mxu0 }
 0x138   :  { %1577 = vst.msk [vmem:[%s3870_s3 + $0x60] sm:$0xff] %vm300_vm1, %v1496_v58  ;;  %v1146_v1 = vadd.f32 %v2951_v50, %v676_v59  ;;  %v207_v50 = vld [vmem:[%s3868_s0 + $0x608] sm:$0xff]  ;;  %v3231_v22 = vpop.f32.mrf.mxu1  ;;  %2051 = vmatmul.mubr.msk.f32.gmra.mxu1 %vm300_vm1, %v241_v13 }
 0x139   :  { %v680_v3 = vpop.f32.mrf.mxu0  ;;  %919 = vmatmul.mubr.f32.gmra.mxu0 %v200_v60  ;;  %2053 = vmatprep.mubr.msk.f32.mxu1 %vm2072_vm0, %v2071_v0  ;;  %v253_v60 = vld [vmem:[%s3868_s0 + $0x778] sm:$0xff] }
 0x13a   :  { %v1497_v6 = vmax.f32 %v1146_v1, 0.0  ;;  %v681_v7 = vadd.f32 %v2915_v28, %v680_v3  ;;  %923 = vmatprep.mubr.f32.mxu0 %v204_v39  ;;  %v1908_v19 = vpop.f32.mrf.mxu1  ;;  %v218_v3 = vld [vmem:[%s3868_s0 + $0x660] sm:$0xff] }
 0x13b   :  { %v682_v47 = vpop.f32.mrf.mxu0 }
 0x13c   :  { %1578 = vst.msk [vmem:[%s3870_s3 + $0x68] sm:$0xff] %vm300_vm1, %v1497_v6  ;;  %v1151_v12 = vadd.f32 %v2971_v61, %v681_v7  ;;  %v210_v61 = vld [vmem:[%s3868_s0 + $0x620] sm:$0xff]  ;;  %v3251_v34 = vpop.f32.mrf.mxu1  ;;  %2054 = vmatmul.mubr.msk.f32.gmra.mxu1 %vm300_vm1, %v244_v25 }
 0x13d   :  { %v685_v15 = vpop.f32.mrf.mxu0  ;;  %924 = vmatmul.mubr.f32.gmra.mxu0 %v203_v8  ;;  %2056 = vmatprep.mubr.msk.f32.mxu1 %vm2072_vm0, %v2071_v0  ;;  %v256_v8 = vld [vmem:[%s3868_s0 + $0x790] sm:$0xff] }
 0x13e   :  { %v1498_v17 = vmax.f32 %v1151_v12, 0.0  ;;  %v686_v18 = vadd.f32 %v2915_v28, %v685_v15  ;;  %928 = vmatprep.mubr.f32.mxu0 %v207_v50  ;;  %v1911_v24 = vpop.f32.mrf.mxu1  ;;  %v221_v15 = vld [vmem:[%s3868_s0 + $0x678] sm:$0xff] }
 0x13f   :  { %v687_v52 = vpop.f32.mrf.mxu0 }
 0x140   :  { %1579 = vst.msk [vmem:[%s3870_s3 + $0x70] sm:$0xff] %vm300_vm1, %v1498_v17  ;;  %v1156_v23 = vadd.f32 %v2991_v10, %v686_v18  ;;  %v213_v10 = vld [vmem:[%s3868_s0 + $0x638] sm:$0xff]  ;;  %v3271_v46 = vpop.f32.mrf.mxu1  ;;  %2057 = vmatmul.mubr.msk.f32.gmra.mxu1 %vm300_vm1, %v247_v36  ;;  %v231_v36 = vld [vmem:[%s3868_s0 + $0x6c8] sm:$0xff] }
 0x141   :  { %v690_v26 = vpop.f32.mrf.mxu0  ;;  %929 = vmatmul.mubr.f32.gmra.mxu0 %v206_v20  ;;  %2059 = vmatprep.mubr.msk.f32.mxu1 %vm2072_vm0, %v2071_v0 }
 0x142   :  { %v1499_v29 = vmax.f32 %v1156_v23, 0.0  ;;  %v691_v31 = vadd.f32 %v2915_v28, %v690_v26  ;;  %933 = vmatprep.mubr.f32.mxu0 %v210_v61  ;;  %v1914_v30 = vpop.f32.mrf.mxu1  ;;  %v224_v23 = vld [vmem:[%s3868_s0 + $0x690] sm:$0xff] }
 0x143   :  { %v692_v57 = vpop.f32.mrf.mxu0  ;;  %v228_v26 = vld [vmem:[%s3868_s0 + $0x6b0] sm:$0xff] }
 0x144   :  { %1580 = vst.msk [vmem:[%s3870_s3 + $0x78] sm:$0xff] %vm300_vm1, %v1499_v29  ;;  %v1161_v35 = vadd.f32 %v3011_v21, %v691_v31  ;;  %v216_v21 = vld [vmem:[%s3868_s0 + $0x650] sm:$0xff]  ;;  %v3291_v58 = vpop.f32.mrf.mxu1  ;;  %2060 = vmatmul.mubr.msk.f32.gmra.mxu1 %vm300_vm1, %v250_v49 }
 0x145   :  { %v695_v38 = vpop.f32.mrf.mxu0  ;;  %934 = vmatmul.mubr.f32.gmra.mxu0 %v209_v32  ;;  %2062 = vmatprep.mubr.msk.f32.mxu1 %vm2072_vm0, %v2071_v0 }
 0x146   :  { %v1500_v41 = vmax.f32 %v1161_v35, 0.0  ;;  %v696_v43 = vadd.f32 %v2915_v28, %v695_v38  ;;  %938 = vmatprep.mubr.f32.mxu0 %v213_v10  ;;  %v1917_v39 = vpop.f32.mrf.mxu1  ;;  %v227_v10 = vld [vmem:[%s3868_s0 + $0x6a8] sm:$0xff] }
 0x147   :  { %v697_v62 = vpop.f32.mrf.mxu0 }
 0x148   :  { %1581 = vst.msk [vmem:[%s3870_s3 + $0x80] sm:$0xff] %vm300_vm1, %v1500_v41  ;;  %v1166_v48 = vadd.f32 %v3031_v33, %v696_v43  ;;  %v219_v33 = vld [vmem:[%s3868_s0 + $0x668] sm:$0xff]  ;;  %v3311_v6 = vpop.f32.mrf.mxu1  ;;  %2063 = vmatmul.mubr.msk.f32.gmra.mxu1 %vm300_vm1, %v253_v60  ;;  %v230_v62 = vld [vmem:[%s3868_s0 + $0x6c0] sm:$0xff] }
 0x149   :  { %v700_v37 = vpop.f32.mrf.mxu0  ;;  %939 = vmatmul.mubr.f32.gmra.mxu0 %v212_v44  ;;  %2065 = vmatprep.mubr.msk.f32.mxu1 %vm2072_vm0, %v2071_v0  ;;  %v225_v0 = vld [vmem:[%s3868_s0 + $0x698] sm:$0xff] }
 0x14a   :  { %v1501_v53 = vmax.f32 %v1166_v48, 0.0  ;;  %v701_v54 = vadd.f32 %v2915_v28, %v700_v37  ;;  %943 = vmatprep.mubr.f32.mxu0 %v216_v21  ;;  %v1920_v50 = vpop.f32.mrf.mxu1  ;;  %v234_v48 = vld [vmem:[%s3868_s0 + $0x6e0] sm:$0xff] }
 0x14b   :  { %v702_v4 = vpop.f32.mrf.mxu0 }
 0x14c   :  { %1582 = vst.msk [vmem:[%s3870_s3 + $0x88] sm:$0xff] %vm300_vm1, %v1501_v53  ;;  %v1171_v59 = vadd.f32 %v3051_v45, %v701_v54  ;;  %v222_v45 = vld [vmem:[%s3868_s0 + $0x680] sm:$0xff]  ;;  %2066 = vmatmul.mubr.msk.f32.gmra.mxu1 %vm300_vm1, %v256_v8 }
 0x14d   :  { %v705_v42 = vpop.f32.mrf.mxu0  ;;  %944 = vmatmul.mubr.f32.gmra.mxu0 %v215_v55  ;;  %v233_v55 = vld [vmem:[%s3868_s0 + $0x6d8] sm:$0xff] }
 0x14e   :  { %v1502_v1 = vmax.f32 %v1171_v59, 0.0  ;;  %v706_v2 = vadd.f32 %v2915_v28, %v705_v42  ;;  %948 = vmatprep.mubr.f32.mxu0 %v219_v33  ;;  %v237_v33 = vld [vmem:[%s3868_s0 + $0x6f8] sm:$0xff] }
 0x14f   :  { %v707_v9 = vpop.f32.mrf.mxu0 }
 0x150   :  { %1583 = vst.msk [vmem:[%s3870_s3 + $0x90] sm:$0xff] %vm300_vm1, %v1502_v1  ;;  %v1176_v7 = vadd.f32 %v3071_v56, %v706_v2  ;;  %v3331_v56 = vpop.f32.mrf.mxu1  ;;  %v236_v2 = vld [vmem:[%s3868_s0 + $0x6f0] sm:$0xff] }
 0x151   :  { %v710_v47 = vpop.f32.mrf.mxu0  ;;  %949 = vmatmul.mubr.f32.gmra.mxu0 %v218_v3  ;;  %v240_v9 = vld [vmem:[%s3868_s0 + $0x710] sm:$0xff] }
 0x152   :  { %v1503_v12 = vmax.f32 %v1176_v7, 0.0  ;;  %v711_v13 = vadd.f32 %v2915_v28, %v710_v47  ;;  %953 = vmatprep.mubr.f32.mxu0 %v222_v45  ;;  %v1923_v20 = vpop.f32.mrf.mxu1 }
 0x153   :  { %v712_v14 = vpop.f32.mrf.mxu0 }
 0x154   :  { %1584 = vst.msk [vmem:[%s3870_s3 + $0x98] sm:$0xff] %vm300_vm1, %v1503_v12  ;;  %v1181_v17 = vadd.f32 %v3091_v5, %v711_v13  ;;  %v3346_v19 = vpop.f32.mrf.mxu1  ;;  %v239_v12 = vld [vmem:[%s3868_s0 + $0x708] sm:$0xff] }
 0x155   :  { %v715_v18 = vpop.f32.mrf.mxu0  ;;  %954 = vmatmul.mubr.f32.gmra.mxu0 %v221_v15  ;;  %v243_v15 = vld [vmem:[%s3868_s0 + $0x728] sm:$0xff] }
 0x156   :  { %v1504_v52 = vmax.f32 %v1181_v17, 0.0  ;;  %v716_v61 = vadd.f32 %v2915_v28, %v715_v18  ;;  %958 = vmatprep.mubr.f32.mxu0 %v225_v0  ;;  %v1926_v31 = vpop.f32.mrf.mxu1 }
 0x157   :  { %v717_v25 = vpop.f32.mrf.mxu0 }
 0x158   :  { %1585 = vst.msk [vmem:[%s3870_s3 + $0xa0] sm:$0xff] %vm300_vm1, %v1504_v52  ;;  %v1186_v5 = vadd.f32 %v3111_v16, %v716_v61  ;;  %v3360_v38 = vpop.f32.mrf.mxu1  ;;  %v242_v52 = vld [vmem:[%s3868_s0 + $0x720] sm:$0xff] }
 0x159   :  { %v720_v29 = vpop.f32.mrf.mxu0  ;;  %959 = vmatmul.mubr.f32.gmra.mxu0 %v224_v23  ;;  %v246_v23 = vld [vmem:[%s3868_s0 + $0x740] sm:$0xff] }
 0x15a   :  { %v1505_v32 = vmax.f32 %v1186_v5, 0.0  ;;  %v721_v57 = vadd.f32 %v2915_v28, %v720_v29  ;;  %963 = vmatprep.mubr.f32.mxu0 %v228_v26  ;;  %v1929_v41 = vpop.f32.mrf.mxu1 }
 0x15b   :  { %v722_v35 = vpop.f32.mrf.mxu0 }
 0x15c   :  { %1586 = vst.msk [vmem:[%s3870_s3 + $0xa8] sm:$0xff] %vm300_vm1, %v1505_v32  ;;  %v1191_v16 = vadd.f32 %v3131_v27, %v721_v57  ;;  %v3374_v49 = vpop.f32.mrf.mxu1  ;;  %v245_v32 = vld [vmem:[%s3868_s0 + $0x738] sm:$0xff] }
 0x15d   :  { %v725_v24 = vpop.f32.mrf.mxu0  ;;  %964 = vmatmul.mubr.f32.gmra.mxu0 %v227_v10  ;;  %v249_v10 = vld [vmem:[%s3868_s0 + $0x758] sm:$0xff] }
 0x15e   :  { %v1506_v43 = vmax.f32 %v1191_v16, 0.0  ;;  %v726_v44 = vadd.f32 %v2915_v28, %v725_v24  ;;  %968 = vmatprep.mubr.f32.mxu0 %v231_v36  ;;  %v1932_v30 = vpop.f32.mrf.mxu1 }
 0x15f   :  { %v727_v21 = vpop.f32.mrf.mxu0 }
 0x160   :  { %1587 = vst.msk [vmem:[%s3870_s3 + $0xb0] sm:$0xff] %vm300_vm1, %v1506_v43  ;;  %v1196_v27 = vadd.f32 %v3151_v40, %v726_v44  ;;  %v3388_v59 = vpop.f32.mrf.mxu1  ;;  %v248_v43 = vld [vmem:[%s3868_s0 + $0x750] sm:$0xff] }
 0x161   :  { %v730_v37 = vpop.f32.mrf.mxu0  ;;  %969 = vmatmul.mubr.f32.gmra.mxu0 %v230_v62  ;;  %v252_v62 = vld [vmem:[%s3868_s0 + $0x770] sm:$0xff] }
 0x162   :  { %v1507_v53 = vmax.f32 %v1196_v27, 0.0  ;;  %v731_v54 = vadd.f32 %v2915_v28, %v730_v37  ;;  %973 = vmatprep.mubr.f32.mxu0 %v234_v48  ;;  %v1935_v42 = vpop.f32.mrf.mxu1 }
 0x163   :  { %v732_v4 = vpop.f32.mrf.mxu0 }
 0x164   :  { %1588 = vst.msk [vmem:[%s3870_s3 + $0xb8] sm:$0xff] %vm300_vm1, %v1507_v53  ;;  %v1201_v40 = vadd.f32 %v3171_v51, %v731_v54  ;;  %v3402_v45 = vpop.f32.mrf.mxu1  ;;  %v251_v53 = vld [vmem:[%s3868_s0 + $0x768] sm:$0xff] }
 0x165   :  { %v735_v60 = vpop.f32.mrf.mxu0  ;;  %974 = vmatmul.mubr.f32.gmra.mxu0 %v233_v55  ;;  %v255_v55 = vld [vmem:[%s3868_s0 + $0x788] sm:$0xff] }
 0x166   :  { %v1508_v39 = vmax.f32 %v1201_v40, 0.0  ;;  %v736_v1 = vadd.f32 %v2915_v28, %v735_v60  ;;  %978 = vmatprep.mubr.f32.mxu0 %v237_v33  ;;  %v1938_v8 = vpop.f32.mrf.mxu1 }
 0x167   :  { %v737_v3 = vpop.f32.mrf.mxu0 }
 0x168   :  { %1589 = vst.msk [vmem:[%s3870_s3 + $0xc0] sm:$0xff] %vm300_vm1, %v1508_v39  ;;  %v1206_v51 = vadd.f32 %v3191_v63, %v736_v1  ;;  %v3416_v14 = vpop.f32.mrf.mxu1  ;;  %v254_v39 = vld [vmem:[%s3868_s0 + $0x780] sm:$0xff] }
 0x169   :  { %v740_v7 = vpop.f32.mrf.mxu0  ;;  %979 = vmatmul.mubr.f32.gmra.mxu0 %v236_v2 }
 0x16a   :  { %v1509_v47 = vmax.f32 %v1206_v51, 0.0  ;;  %v741_v50 = vadd.f32 %v2915_v28, %v740_v7  ;;  %983 = vmatprep.mubr.f32.mxu0 %v240_v9  ;;  %v1941_v17 = vpop.f32.mrf.mxu1 }
 0x16b   :  { %v742_v13 = vpop.f32.mrf.mxu0 }
 0x16c   :  { %1590 = vst.msk [vmem:[%s3870_s3 + $0xc8] sm:$0xff] %vm300_vm1, %v1509_v47  ;;  %v1211_v63 = vadd.f32 %v3211_v11, %v741_v50  ;;  %v3430_v25 = vpop.f32.mrf.mxu1 }
 0x16d   :  { %v745_v0 = vpop.f32.mrf.mxu0  ;;  %984 = vmatmul.mubr.f32.gmra.mxu0 %v239_v12 }
 0x16e   :  { %v1510_v18 = vmax.f32 %v1211_v63, 0.0  ;;  %v746_v20 = vadd.f32 %v2915_v28, %v745_v0  ;;  %988 = vmatprep.mubr.f32.mxu0 %v243_v15  ;;  %v1944_v5 = vpop.f32.mrf.mxu1 }
 0x16f   :  { %v747_v61 = vpop.f32.mrf.mxu0 }
 0x170   :  { %1591 = vst.msk [vmem:[%s3870_s3 + $0xd0] sm:$0xff] %vm300_vm1, %v1510_v18  ;;  %v1216_v11 = vadd.f32 %v3231_v22, %v746_v20  ;;  %v3444_v35 = vpop.f32.mrf.mxu1 }
 0x171   :  { %v750_v26 = vpop.f32.mrf.mxu0  ;;  %989 = vmatmul.mubr.f32.gmra.mxu0 %v242_v52 }
 0x172   :  { %v1511_v29 = vmax.f32 %v1216_v11, 0.0  ;;  %v751_v31 = vadd.f32 %v2915_v28, %v750_v26  ;;  %993 = vmatprep.mubr.f32.mxu0 %v246_v23  ;;  %v1947_v16 = vpop.f32.mrf.mxu1 }
 0x173   :  { %v752_v57 = vpop.f32.mrf.mxu0 }
 0x174   :  { %1592 = vst.msk [vmem:[%s3870_s3 + $0xd8] sm:$0xff] %vm300_vm1, %v1511_v29  ;;  %v1221_v22 = vadd.f32 %v3251_v34, %v751_v31  ;;  %v3458_v21 = vpop.f32.mrf.mxu1 }
 0x175   :  { %v755_v36 = vpop.f32.mrf.mxu0  ;;  %994 = vmatmul.mubr.f32.gmra.mxu0 %v245_v32 }
 0x176   :  { %v1512_v24 = vmax.f32 %v1221_v22, 0.0  ;;  %v756_v41 = vadd.f32 %v2915_v28, %v755_v36  ;;  %998 = vmatprep.mubr.f32.mxu0 %v249_v10  ;;  %v1950_v27 = vpop.f32.mrf.mxu1 }
 0x177   :  { %v757_v44 = vpop.f32.mrf.mxu0 }
 0x178   :  { %1593 = vst.msk [vmem:[%s3870_s3 + $0xe0] sm:$0xff] %vm300_vm1, %v1512_v24  ;;  %v1226_v34 = vadd.f32 %v3271_v46, %v756_v41  ;;  %v3472_v4 = vpop.f32.mrf.mxu1 }
 0x179   :  { %v760_v48 = vpop.f32.mrf.mxu0  ;;  %999 = vmatmul.mubr.f32.gmra.mxu0 %v248_v43 }
 0x17a   :  { %v1513_v37 = vmax.f32 %v1226_v34, 0.0  ;;  %v761_v30 = vadd.f32 %v2915_v28, %v760_v48  ;;  %1003 = vmatprep.mubr.f32.mxu0 %v252_v62  ;;  %v1953_v40 = vpop.f32.mrf.mxu1 }
 0x17b   :  { %v762_v54 = vpop.f32.mrf.mxu0 }
 0x17c   :  { %1594 = vst.msk [vmem:[%s3870_s3 + $0xe8] sm:$0xff] %vm300_vm1, %v1513_v37  ;;  %v1231_v46 = vadd.f32 %v3291_v58, %v761_v30  ;;  %v3483_v2 = vpop.f32.mrf.mxu1 }
 0x17d   :  { %v765_v33 = vpop.f32.mrf.mxu0  ;;  %1004 = vmatmul.mubr.f32.gmra.mxu0 %v251_v53 }
 0x17e   :  { %v1514_v60 = vmax.f32 %v1231_v46, 0.0  ;;  %v766_v42 = vadd.f32 %v2915_v28, %v765_v33  ;;  %1008 = vmatprep.mubr.f32.mxu0 %v255_v55  ;;  %v1956_v9 = vpop.f32.mrf.mxu1 }
 0x17f   :  { %v767_v1 = vpop.f32.mrf.mxu0 }
 0x180   :  { %1595 = vst.msk [vmem:[%s3870_s3 + $0xf0] sm:$0xff] %vm300_vm1, %v1514_v60  ;;  %v1236_v58 = vadd.f32 %v3311_v6, %v766_v42  ;;  %v3491_v47 = vpop.f32.mrf.mxu1 }
 0x181   :  { %v770_v3 = vpop.f32.mrf.mxu0  ;;  %1009 = vmatmul.mubr.f32.gmra.mxu0 %v254_v39 }
 0x182   :  { %v1515_v51 = vmax.f32 %v1236_v58, 0.0  ;;  %v771_v7 = vadd.f32 %v2915_v28, %v770_v3  ;;  %v1959_v13 = vpop.f32.mrf.mxu1 }
 0x183   :  { %v772_v8 = vpop.f32.mrf.mxu0 }
 0x184   :  { %1596 = vst.msk [vmem:[%s3870_s3 + $0xf8] sm:$0xff] %vm300_vm1, %v1515_v51  ;;  %v1241_v50 = vadd.f32 %v3331_v56, %v771_v7  ;;  %v3499_v0 = vpop.f32.mrf.mxu1 }
 0x185   :  { %v775_v12 = vpop.f32.mrf.mxu0 }
 0x186   :  { %v1516_v15 = vmax.f32 %v1241_v50, 0.0  ;;  %v776_v6 = vadd.f32 %v2915_v28, %v775_v12  ;;  %v1962_v20 = vpop.f32.mrf.mxu1 }
 0x187   :  { %v777_v63 = vpop.f32.mrf.mxu0 }
 0x188   :  { %1597 = vst.msk [vmem:[%s3870_s3 + $0x100] sm:$0xff] %vm300_vm1, %v1516_v15  ;;  %v1246_v17 = vadd.f32 %v3346_v19, %v776_v6  ;;  %v3507_v23 = vpop.f32.mrf.mxu1 }
 0x189   :  { %v780_v18 = vpop.f32.mrf.mxu0 }
 0x18a   :  { %v1517_v52 = vmax.f32 %v1246_v17, 0.0  ;;  %v781_v56 = vadd.f32 %v2915_v28, %v780_v18  ;;  %v1965_v5 = vpop.f32.mrf.mxu1 }
 0x18b   :  { %v782_v61 = vpop.f32.mrf.mxu0 }
 0x18c   :  { %1598 = vst.msk [vmem:[%s3870_s3 + $0x108] sm:$0xff] %vm300_vm1, %v1517_v52  ;;  %v1251_v11 = vadd.f32 %v3360_v38, %v781_v56  ;;  %v3515_v32 = vpop.f32.mrf.mxu1 }
 0x18d   :  { %v785_v26 = vpop.f32.mrf.mxu0 }
 0x18e   :  { %v1518_v29 = vmax.f32 %v1251_v11, 0.0  ;;  %v786_v19 = vadd.f32 %v2915_v28, %v785_v26  ;;  %v1968_v22 = vpop.f32.mrf.mxu1 }
 0x18f   :  { %v787_v31 = vpop.f32.mrf.mxu0 }
 0x190   :  { %1599 = vst.msk [vmem:[%s3870_s3 + $0x110] sm:$0xff] %vm300_vm1, %v1518_v29  ;;  %v1256_v57 = vadd.f32 %v3374_v49, %v786_v19  ;;  %v3523_v24 = vpop.f32.mrf.mxu1 }
 0x191   :  { %v790_v10 = vpop.f32.mrf.mxu0 }
 0x192   :  { %v1519_v36 = vmax.f32 %v1256_v57, 0.0  ;;  %v791_v38 = vadd.f32 %v2915_v28, %v790_v10  ;;  %v1971_v44 = vpop.f32.mrf.mxu1 }
 0x193   :  { %v792_v16 = vpop.f32.mrf.mxu0 }
 0x194   :  { %1600 = vst.msk [vmem:[%s3870_s3 + $0x118] sm:$0xff] %vm300_vm1, %v1519_v36  ;;  %v1261_v41 = vadd.f32 %v3388_v59, %v791_v38  ;;  %v3531_v48 = vpop.f32.mrf.mxu1 }
 0x195   :  { %v795_v43 = vpop.f32.mrf.mxu0 }
 0x196   :  { %v1520_v62 = vmax.f32 %v1261_v41, 0.0  ;;  %v796_v49 = vadd.f32 %v2915_v28, %v795_v43  ;;  %v1974_v30 = vpop.f32.mrf.mxu1 }
 0x197   :  { %v797_v34 = vpop.f32.mrf.mxu0 }
 0x198   :  { %1601 = vst.msk [vmem:[%s3870_s3 + $0x120] sm:$0xff] %vm300_vm1, %v1520_v62  ;;  %v1266_v27 = vadd.f32 %v3402_v45, %v796_v49  ;;  %v3539_v55 = vpop.f32.mrf.mxu1 }
 0x199   :  { %v800_v37 = vpop.f32.mrf.mxu0 }
 0x19a   :  { %v1521_v53 = vmax.f32 %v1266_v27, 0.0  ;;  %v801_v59 = vadd.f32 %v2915_v28, %v800_v37  ;;  %v1977_v40 = vpop.f32.mrf.mxu1 }
 0x19b   :  { %v802_v54 = vpop.f32.mrf.mxu0 }
 0x19c   :  { %1602 = vst.msk [vmem:[%s3870_s3 + $0x128] sm:$0xff] %vm300_vm1, %v1521_v53  ;;  %v1271_v46 = vadd.f32 %v3416_v14, %v801_v59  ;;  %v3547_v39 = vpop.f32.mrf.mxu1  ;;  %v3557_v14 = vld [vmem:[%s3869_s2] ss:$0 sm:$0xff] }
 0x19d   :  { %v805_v33 = vpop.f32.mrf.mxu0 }
 0x19e   :  { %v1522_v60 = vmax.f32 %v1271_v46, 0.0  ;;  %v806_v45 = vadd.f32 %v2915_v28, %v805_v33  ;;  %v1980_v3 = vpop.f32.mrf.mxu1 }
 0x19f   :  { %v807_v42 = vpop.f32.mrf.mxu0 }
 0x1a0   :  { %1603 = vst.msk [vmem:[%s3870_s3 + $0x130] sm:$0xff] %vm300_vm1, %v1522_v60  ;;  %v1276_v1 = vadd.f32 %v3430_v25, %v806_v45  ;;  %v3560_v7 = vpop.f32.mrf.mxu1 }
 0x1a1   :  { %v810_v58 = vpop.f32.mrf.mxu0 }
 0x1a2   :  { %v1523_v9 = vmax.f32 %v1276_v1, 0.0  ;;  %v811_v28 = vadd.f32 %v3557_v14, %v810_v58  ;;  %v1983_v50 = vpop.f32.mrf.mxu1 }
 0x1a3   :  { %v812_v51 = vpop.f32.mrf.mxu0 }
 0x1a4   :  { %1604 = vst.msk [vmem:[%s3870_s3 + $0x138] sm:$0xff] %vm300_vm1, %v1523_v9  ;;  %v1281_v25 = vadd.f32 %v3444_v35, %v811_v28  ;;  %v3568_v6 = vpop.f32.mrf.mxu1 }
 0x1a5   :  { %v815_v8 = vpop.f32.mrf.mxu0 }
 0x1a6   :  { %v1524_v12 = vmax.f32 %v1281_v25, 0.0  ;;  %v816_v13 = vadd.f32 %v3557_v14, %v815_v8  ;;  %v1986_v18 = vpop.f32.mrf.mxu1 }
 0x1a7   :  { %v817_v15 = vpop.f32.mrf.mxu0 }
 0x1a8   :  { %1605 = vst.msk [vmem:[%s3870_s3 + $0x140] sm:$0xff] %vm300_vm1, %v1524_v12  ;;  %v1286_v63 = vadd.f32 %v3458_v21, %v816_v13  ;;  %v3576_v56 = vpop.f32.mrf.mxu1 }
 0x1a9   :  { %v820_v17 = vpop.f32.mrf.mxu0 }
 0x1aa   :  { %v1525_v20 = vmax.f32 %v1286_v63, 0.0  ;;  %v821_v35 = vadd.f32 %v3557_v14, %v820_v17  ;;  %v1989_v26 = vpop.f32.mrf.mxu1 }
 0x1ab   :  { %v822_v52 = vpop.f32.mrf.mxu0 }
 0x1ac   :  { %1606 = vst.msk [vmem:[%s3870_s3 + $0x148] sm:$0xff] %vm300_vm1, %v1525_v20  ;;  %v1291_v61 = vadd.f32 %v3472_v4, %v821_v35  ;;  %v3584_v19 = vpop.f32.mrf.mxu1 }
 0x1ad   :  { %v825_v11 = vpop.f32.mrf.mxu0 }
 0x1ae   :  { %v1526_v5 = vmax.f32 %v1291_v61, 0.0  ;;  %v826_v21 = vadd.f32 %v3557_v14, %v825_v11  ;;  %v1992_v10 = vpop.f32.mrf.mxu1 }
 0x1af   :  { %v827_v29 = vpop.f32.mrf.mxu0 }
 0x1b0   :  { %1607 = vst.msk [vmem:[%s3870_s3 + $0x150] sm:$0xff] %vm300_vm1, %v1526_v5  ;;  %v1296_v31 = vadd.f32 %v3483_v2, %v826_v21  ;;  %v3592_v38 = vpop.f32.mrf.mxu1 }
 0x1b1   :  { %v830_v57 = vpop.f32.mrf.mxu0 }
 0x1b2   :  { %v1527_v22 = vmax.f32 %v1296_v31, 0.0  ;;  %v831_v4 = vadd.f32 %v3557_v14, %v830_v57  ;;  %v1995_v43 = vpop.f32.mrf.mxu1 }
 0x1b3   :  { %v832_v36 = vpop.f32.mrf.mxu0 }
 0x1b4   :  { %1608 = vst.msk [vmem:[%s3870_s3 + $0x158] sm:$0xff] %vm300_vm1, %v1527_v22  ;;  %v1301_v16 = vadd.f32 %v3491_v47, %v831_v4  ;;  %v3600_v49 = vpop.f32.mrf.mxu1 }
 0x1b5   :  { %v835_v41 = vpop.f32.mrf.mxu0 }
 0x1b6   :  { %v1528_v44 = vmax.f32 %v1301_v16, 0.0  ;;  %v836_v2 = vadd.f32 %v3557_v14, %v835_v41  ;;  %v1998_v37 = vpop.f32.mrf.mxu1 }
 0x1b7   :  { %v837_v62 = vpop.f32.mrf.mxu0 }
 0x1b8   :  { %1609 = vst.msk [vmem:[%s3870_s3 + $0x160] sm:$0xff] %vm300_vm1, %v1528_v44  ;;  %v1306_v34 = vadd.f32 %v3499_v0, %v836_v2  ;;  %v3608_v59 = vpop.f32.mrf.mxu1 }
 0x1b9   :  { %v840_v27 = vpop.f32.mrf.mxu0 }
 0x1ba   :  { %v1529_v30 = vmax.f32 %v1306_v34, 0.0  ;;  %v841_v47 = vadd.f32 %v3557_v14, %v840_v27  ;;  %v2001_v33 = vpop.f32.mrf.mxu1 }
 0x1bb   :  { %v842_v53 = vpop.f32.mrf.mxu0 }
 0x1bc   :  { %1610 = vst.msk [vmem:[%s3870_s3 + $0x168] sm:$0xff] %vm300_vm1, %v1529_v30  ;;  %v1311_v54 = vadd.f32 %v3507_v23, %v841_v47  ;;  %v3616_v45 = vpop.f32.mrf.mxu1 }
 0x1bd   :  { %v845_v46 = vpop.f32.mrf.mxu0 }
 0x1be   :  { %v1530_v40 = vmax.f32 %v1311_v54, 0.0  ;;  %v846_v0 = vadd.f32 %v3557_v14, %v845_v46  ;;  %v2004_v58 = vpop.f32.mrf.mxu1 }
 0x1bf   :  { %v847_v60 = vpop.f32.mrf.mxu0 }
 0x1c0   :  { %1611 = vst.msk [vmem:[%s3870_s3 + $0x170] sm:$0xff] %vm300_vm1, %v1530_v40  ;;  %v1316_v42 = vadd.f32 %v3515_v32, %v846_v0  ;;  %v3624_v28 = vpop.f32.mrf.mxu1 }
 0x1c1   :  { %v850_v1 = vpop.f32.mrf.mxu0 }
 0x1c2   :  { %v1531_v3 = vmax.f32 %v1316_v42, 0.0  ;;  %v851_v23 = vadd.f32 %v3557_v14, %v850_v1  ;;  %v2007_v8 = vpop.f32.mrf.mxu1 }
 0x1c3   :  { %v852_v9 = vpop.f32.mrf.mxu0 }
 0x1c4   :  { %1612 = vst.msk [vmem:[%s3870_s3 + $0x178] sm:$0xff] %vm300_vm1, %v1531_v3  ;;  %v1321_v51 = vadd.f32 %v3523_v24, %v851_v23  ;;  %v3632_v13 = vpop.f32.mrf.mxu1 }
 0x1c5   :  { %v855_v25 = vpop.f32.mrf.mxu0 }
 0x1c6   :  { %v1532_v50 = vmax.f32 %v1321_v51, 0.0  ;;  %v856_v32 = vadd.f32 %v3557_v14, %v855_v25  ;;  %v2010_v17 = vpop.f32.mrf.mxu1 }
 0x1c7   :  { %v857_v12 = vpop.f32.mrf.mxu0 }
 0x1c8   :  { %1613 = vst.msk [vmem:[%s3870_s3 + $0x180] sm:$0xff] %vm300_vm1, %v1532_v50  ;;  %v1326_v15 = vadd.f32 %v3531_v48, %v856_v32  ;;  %v3640_v35 = vpop.f32.mrf.mxu1 }
 0x1c9   :  { %v860_v63 = vpop.f32.mrf.mxu0 }
 0x1ca   :  { %v1533_v18 = vmax.f32 %v1326_v15, 0.0  ;;  %v861_v24 = vadd.f32 %v3557_v14, %v860_v63  ;;  %v2013_v11 = vpop.f32.mrf.mxu1 }
 0x1cb   :  { %v862_v20 = vpop.f32.mrf.mxu0 }
 0x1cc   :  { %1614 = vst.msk [vmem:[%s3870_s3 + $0x188] sm:$0xff] %vm300_vm1, %v1533_v18  ;;  %v1331_v52 = vadd.f32 %v3539_v55, %v861_v24  ;;  %v3648_v21 = vpop.f32.mrf.mxu1 }
 0x1cd   :  { %v865_v61 = vpop.f32.mrf.mxu0 }
 0x1ce   :  { %v1534_v26 = vmax.f32 %v1331_v52, 0.0  ;;  %v866_v48 = vadd.f32 %v3557_v14, %v865_v61  ;;  %v2016_v57 = vpop.f32.mrf.mxu1 }
 0x1cf   :  { %v867_v5 = vpop.f32.mrf.mxu0 }
 0x1d0   :  { %1615 = vst.msk [vmem:[%s3870_s3 + $0x190] sm:$0xff] %vm300_vm1, %v1534_v26  ;;  %v1336_v29 = vadd.f32 %v3547_v39, %v866_v48  ;;  %v3656_v4 = vpop.f32.mrf.mxu1 }
 0x1d1   :  { %v870_v31 = vpop.f32.mrf.mxu0 }
 0x1d2   :  { %v1535_v10 = vmax.f32 %v1336_v29, 0.0  ;;  %v871_v55 = vadd.f32 %v3557_v14, %v870_v31  ;;  %v2019_v41 = vpop.f32.mrf.mxu1 }
 0x1d3   :  { %v872_v22 = vpop.f32.mrf.mxu0 }
 0x1d4   :  { %1616 = vst.msk [vmem:[%s3870_s3 + $0x198] sm:$0xff] %vm300_vm1, %v1535_v10  ;;  %v1341_v36 = vadd.f32 %v3560_v7, %v871_v55  ;;  %v3664_v2 = vpop.f32.mrf.mxu1 }
 0x1d5   :  { %v875_v16 = vpop.f32.mrf.mxu0 }
 0x1d6   :  { %v1536_v43 = vmax.f32 %v1341_v36, 0.0  ;;  %v876_v39 = vadd.f32 %v3557_v14, %v875_v16  ;;  %v2022_v27 = vpop.f32.mrf.mxu1 }
 0x1d7   :  { %v877_v44 = vpop.f32.mrf.mxu0 }
 0x1d8   :  { %1617 = vst.msk [vmem:[%s3870_s3 + $0x1a0] sm:$0xff] %vm300_vm1, %v1536_v43  ;;  %v1346_v62 = vadd.f32 %v3568_v6, %v876_v39  ;;  %v3672_v47 = vpop.f32.mrf.mxu1 }
 0x1d9   :  { %v880_v34 = vpop.f32.mrf.mxu0 }
 0x1da   :  { %v1537_v37 = vmax.f32 %v1346_v62, 0.0  ;;  %v881_v7 = vadd.f32 %v3557_v14, %v880_v34  ;;  %v2025_v46 = vpop.f32.mrf.mxu1 }
 0x1db   :  { %v882_v30 = vpop.f32.mrf.mxu0 }
 0x1dc   :  { %1618 = vst.msk [vmem:[%s3870_s3 + $0x1a8] sm:$0xff] %vm300_vm1, %v1537_v37  ;;  %v1351_v53 = vadd.f32 %v3576_v56, %v881_v7  ;;  %v3680_v0 = vpop.f32.mrf.mxu1 }
 0x1dd   :  { %v885_v54 = vpop.f32.mrf.mxu0 }
 0x1de   :  { %v1538_v33 = vmax.f32 %v1351_v53, 0.0  ;;  %v886_v6 = vadd.f32 %v3557_v14, %v885_v54  ;;  %v2028_v1 = vpop.f32.mrf.mxu1 }
 0x1df   :  { %v887_v40 = vpop.f32.mrf.mxu0 }
 0x1e0   :  { %1619 = vst.msk [vmem:[%s3870_s3 + $0x1b0] sm:$0xff] %vm300_vm1, %v1538_v33  ;;  %v1356_v60 = vadd.f32 %v3584_v19, %v886_v6  ;;  %v3688_v23 = vpop.f32.mrf.mxu1 }
 0x1e1   :  { %v890_v42 = vpop.f32.mrf.mxu0 }
 0x1e2   :  { %v1539_v58 = vmax.f32 %v1356_v60, 0.0  ;;  %v891_v56 = vadd.f32 %v3557_v14, %v890_v42  ;;  %v2031_v25 = vpop.f32.mrf.mxu1 }
 0x1e3   :  { %v892_v3 = vpop.f32.mrf.mxu0 }
 0x1e4   :  { %1620 = vst.msk [vmem:[%s3870_s3 + $0x1b8] sm:$0xff] %vm300_vm1, %v1539_v58  ;;  %v1361_v9 = vadd.f32 %v3592_v38, %v891_v56  ;;  %v3696_v32 = vpop.f32.mrf.mxu1 }
 0x1e5   :  { %v895_v51 = vpop.f32.mrf.mxu0 }
 0x1e6   :  { %v1540_v8 = vmax.f32 %v1361_v9, 0.0  ;;  %v896_v19 = vadd.f32 %v3557_v14, %v895_v51  ;;  %v2034_v63 = vpop.f32.mrf.mxu1 }
 0x1e7   :  { %v897_v50 = vpop.f32.mrf.mxu0 }
 0x1e8   :  { %1621 = vst.msk [vmem:[%s3870_s3 + $0x1c0] sm:$0xff] %vm300_vm1, %v1540_v8  ;;  %v1366_v12 = vadd.f32 %v3600_v49, %v896_v19  ;;  %v3704_v24 = vpop.f32.mrf.mxu1 }
 0x1e9   :  { %v900_v15 = vpop.f32.mrf.mxu0 }
 0x1ea   :  { %v1541_v17 = vmax.f32 %v1366_v12, 0.0  ;;  %v901_v38 = vadd.f32 %v3557_v14, %v900_v15  ;;  %v2037_v61 = vpop.f32.mrf.mxu1 }
 0x1eb   :  { %v902_v18 = vpop.f32.mrf.mxu0 }
 0x1ec   :  { %1622 = vst.msk [vmem:[%s3870_s3 + $0x1c8] sm:$0xff] %vm300_vm1, %v1541_v17  ;;  %v1371_v20 = vadd.f32 %v3608_v59, %v901_v38  ;;  %v3712_v48 = vpop.f32.mrf.mxu1 }
 0x1ed   :  { %v905_v52 = vpop.f32.mrf.mxu0 }
 0x1ee   :  { %v1542_v11 = vmax.f32 %v1371_v20, 0.0  ;;  %v906_v49 = vadd.f32 %v3557_v14, %v905_v52  ;;  %v2040_v31 = vpop.f32.mrf.mxu1 }
 0x1ef   :  { %v907_v26 = vpop.f32.mrf.mxu0 }
 0x1f0   :  { %1623 = vst.msk [vmem:[%s3870_s3 + $0x1d0] sm:$0xff] %vm300_vm1, %v1542_v11  ;;  %v1376_v5 = vadd.f32 %v3616_v45, %v906_v49  ;;  %v3720_v55 = vpop.f32.mrf.mxu1 }
 0x1f1   :  { %v910_v29 = vpop.f32.mrf.mxu0 }
 0x1f2   :  { %v1543_v57 = vmax.f32 %v1376_v5, 0.0  ;;  %v911_v59 = vadd.f32 %v3557_v14, %v910_v29  ;;  %v2043_v16 = vpop.f32.mrf.mxu1 }
 0x1f3   :  { %v912_v10 = vpop.f32.mrf.mxu0 }
 0x1f4   :  { %1624 = vst.msk [vmem:[%s3870_s3 + $0x1d8] sm:$0xff] %vm300_vm1, %v1543_v57  ;;  %v1381_v22 = vadd.f32 %v3624_v28, %v911_v59  ;;  %v3728_v39 = vpop.f32.mrf.mxu1 }
 0x1f5   :  { %v915_v36 = vpop.f32.mrf.mxu0 }
 0x1f6   :  { %v1544_v41 = vmax.f32 %v1381_v22, 0.0  ;;  %v916_v45 = vadd.f32 %v3557_v14, %v915_v36  ;;  %v2046_v34 = vpop.f32.mrf.mxu1 }
 0x1f7   :  { %v917_v43 = vpop.f32.mrf.mxu0 }
 0x1f8   :  { %1625 = vst.msk [vmem:[%s3870_s3 + $0x1e0] sm:$0xff] %vm300_vm1, %v1544_v41  ;;  %v1386_v44 = vadd.f32 %v3632_v13, %v916_v45  ;;  %v3736_v7 = vpop.f32.mrf.mxu1 }
 0x1f9   :  { %v920_v62 = vpop.f32.mrf.mxu0 }
 0x1fa   :  { %v1545_v27 = vmax.f32 %v1386_v44, 0.0  ;;  %v921_v28 = vadd.f32 %v3557_v14, %v920_v62  ;;  %v2049_v54 = vpop.f32.mrf.mxu1 }
 0x1fb   :  { %v922_v37 = vpop.f32.mrf.mxu0 }
 0x1fc   :  { %1626 = vst.msk [vmem:[%s3870_s3 + $0x1e8] sm:$0xff] %vm300_vm1, %v1545_v27  ;;  %v1391_v30 = vadd.f32 %v3640_v35, %v921_v28  ;;  %v3744_v6 = vpop.f32.mrf.mxu1 }
 0x1fd   :  { %v925_v53 = vpop.f32.mrf.mxu0 }
 0x1fe   :  { %v1546_v46 = vmax.f32 %v1391_v30, 0.0  ;;  %v926_v13 = vadd.f32 %v3557_v14, %v925_v53  ;;  %v2052_v42 = vpop.f32.mrf.mxu1 }
 0x1ff   :  { %v927_v33 = vpop.f32.mrf.mxu0 }
 0x200   :  { %1627 = vst.msk [vmem:[%s3870_s3 + $0x1f0] sm:$0xff] %vm300_vm1, %v1546_v46  ;;  %v1396_v40 = vadd.f32 %v3648_v21, %v926_v13  ;;  %v3752_v56 = vpop.f32.mrf.mxu1 }
 0x201   :  { %v930_v60 = vpop.f32.mrf.mxu0 }
 0x202   :  { %v1547_v1 = vmax.f32 %v1396_v40, 0.0  ;;  %v931_v35 = vadd.f32 %v3557_v14, %v930_v60  ;;  %v2055_v51 = vpop.f32.mrf.mxu1 }
 0x203   :  { %v932_v58 = vpop.f32.mrf.mxu0 }
 0x204   :  { %1628 = vst.msk [vmem:[%s3870_s3 + $0x1f8] sm:$0xff] %vm300_vm1, %v1547_v1  ;;  %v1401_v3 = vadd.f32 %v3656_v4, %v931_v35  ;;  %v3760_v19 = vpop.f32.mrf.mxu1 }
 0x205   :  { %v935_v9 = vpop.f32.mrf.mxu0 }
 0x206   :  { %v1548_v25 = vmax.f32 %v1401_v3, 0.0  ;;  %v936_v21 = vadd.f32 %v3557_v14, %v935_v9  ;;  %v2058_v15 = vpop.f32.mrf.mxu1 }
 0x207   :  { %v937_v8 = vpop.f32.mrf.mxu0 }
 0x208   :  { %1629 = vst.msk [vmem:[%s3870_s3 + $0x200] sm:$0xff] %vm300_vm1, %v1548_v25  ;;  %v1406_v50 = vadd.f32 %v3664_v2, %v936_v21  ;;  %v3768_v38 = vpop.f32.mrf.mxu1 }
 0x209   :  { %v940_v12 = vpop.f32.mrf.mxu0 }
 0x20a   :  { %v1549_v63 = vmax.f32 %v1406_v50, 0.0  ;;  %v941_v4 = vadd.f32 %v3557_v14, %v940_v12  ;;  %v2061_v52 = vpop.f32.mrf.mxu1 }
 0x20b   :  { %v942_v17 = vpop.f32.mrf.mxu0 }
 0x20c   :  { %1630 = vst.msk [vmem:[%s3870_s3 + $0x208] sm:$0xff] %vm300_vm1, %v1549_v63  ;;  %v1411_v18 = vadd.f32 %v3672_v47, %v941_v4  ;;  %v3776_v49 = vpop.f32.mrf.mxu1 }
 0x20d   :  { %v945_v20 = vpop.f32.mrf.mxu0 }
 0x20e   :  { %v1550_v61 = vmax.f32 %v1411_v18, 0.0  ;;  %v946_v2 = vadd.f32 %v3557_v14, %v945_v20  ;;  %v2064_v29 = vpop.f32.mrf.mxu1 }
 0x20f   :  { %v947_v11 = vpop.f32.mrf.mxu0 }
 0x210   :  { %1631 = vst.msk [vmem:[%s3870_s3 + $0x210] sm:$0xff] %vm300_vm1, %v1550_v61  ;;  %v1416_v26 = vadd.f32 %v3680_v0, %v946_v2  ;;  %v3784_v59 = vpop.f32.mrf.mxu1 }
 0x211   :  { %v950_v5 = vpop.f32.mrf.mxu0 }
 0x212   :  { %v1551_v31 = vmax.f32 %v1416_v26, 0.0  ;;  %v951_v47 = vadd.f32 %v3557_v14, %v950_v5  ;;  %v2067_v36 = vpop.f32.mrf.mxu1 }
 0x213   :  { %v952_v57 = vpop.f32.mrf.mxu0 }
 0x214   :  { %1632 = vst.msk [vmem:[%s3870_s3 + $0x218] sm:$0xff] %vm300_vm1, %v1551_v31  ;;  %v1421_v10 = vadd.f32 %v3688_v23, %v951_v47 }
 0x215   :  { %v955_v22 = vpop.f32.mrf.mxu0 }
 0x216   :  { %v1552_v16 = vmax.f32 %v1421_v10, 0.0  ;;  %v956_v0 = vadd.f32 %v3557_v14, %v955_v22 }
 0x217   :  { %v957_v41 = vpop.f32.mrf.mxu0 }
 0x218   :  { %1633 = vst.msk [vmem:[%s3870_s3 + $0x220] sm:$0xff] %vm300_vm1, %v1552_v16  ;;  %v1426_v45 = vadd.f32 %v3696_v32, %v956_v0 }
 0x219   :  { %v960_v43 = vpop.f32.mrf.mxu0 }
 0x21a   :  { %v1553_v44 = vmax.f32 %v1426_v45, 0.0  ;;  %v961_v62 = vadd.f32 %v3557_v14, %v960_v43 }
 0x21b   :  { %v962_v34 = vpop.f32.mrf.mxu0 }
 0x21c   :  { %1634 = vst.msk [vmem:[%s3870_s3 + $0x228] sm:$0xff] %vm300_vm1, %v1553_v44  ;;  %v1431_v23 = vadd.f32 %v3704_v24, %v961_v62 }
 0x21d   :  { %v965_v27 = vpop.f32.mrf.mxu0 }
 0x21e   :  { %v1554_v28 = vmax.f32 %v1431_v23, 0.0  ;;  %v966_v37 = vadd.f32 %v3557_v14, %v965_v27 }
 0x21f   :  { %v967_v30 = vpop.f32.mrf.mxu0 }
 0x220   :  { %1635 = vst.msk [vmem:[%s3870_s3 + $0x230] sm:$0xff] %vm300_vm1, %v1554_v28  ;;  %v1436_v32 = vadd.f32 %v3712_v48, %v966_v37 }
 0x221   :  { %v970_v53 = vpop.f32.mrf.mxu0 }
 0x222   :  { %v1555_v54 = vmax.f32 %v1436_v32, 0.0  ;;  %v971_v46 = vadd.f32 %v3557_v14, %v970_v53 }
 0x223   :  { %v972_v13 = vpop.f32.mrf.mxu0 }
 0x224   :  { %1636 = vst.msk [vmem:[%s3870_s3 + $0x238] sm:$0xff] %vm300_vm1, %v1555_v54  ;;  %v1441_v24 = vadd.f32 %v3720_v55, %v971_v46 }
 0x225   :  { %v975_v33 = vpop.f32.mrf.mxu0 }
 0x226   :  { %v1556_v40 = vmax.f32 %v1441_v24, 0.0  ;;  %v976_v60 = vadd.f32 %v3557_v14, %v975_v33 }
 0x227   :  { %v977_v42 = vpop.f32.mrf.mxu0 }
 0x228   :  { %1637 = vst.msk [vmem:[%s3870_s3 + $0x240] sm:$0xff] %vm300_vm1, %v1556_v40  ;;  %v1446_v48 = vadd.f32 %v3728_v39, %v976_v60 }
 0x229   :  { %v980_v1 = vpop.f32.mrf.mxu0 }
 0x22a   :  { %v1557_v35 = vmax.f32 %v1446_v48, 0.0  ;;  %v981_v58 = vadd.f32 %v3557_v14, %v980_v1 }
 0x22b   :  { %v982_v3 = vpop.f32.mrf.mxu0 }
 0x22c   :  { %1638 = vst.msk [vmem:[%s3870_s3 + $0x248] sm:$0xff] %vm300_vm1, %v1557_v35  ;;  %v1451_v55 = vadd.f32 %v3736_v7, %v981_v58 }
 0x22d   :  { %v985_v9 = vpop.f32.mrf.mxu0 }
 0x22e   :  { %v1558_v51 = vmax.f32 %v1451_v55, 0.0  ;;  %v986_v25 = vadd.f32 %v3557_v14, %v985_v9 }
 0x22f   :  { %v987_v21 = vpop.f32.mrf.mxu0 }
 0x230   :  { %1639 = vst.msk [vmem:[%s3870_s3 + $0x250] sm:$0xff] %vm300_vm1, %v1558_v51  ;;  %v1456_v39 = vadd.f32 %v3744_v6, %v986_v25 }
 0x231   :  { %v990_v8 = vpop.f32.mrf.mxu0 }
 0x232   :  { %v1559_v50 = vmax.f32 %v1456_v39, 0.0  ;;  %v991_v12 = vadd.f32 %v3557_v14, %v990_v8 }
 0x233   :  { %v992_v15 = vpop.f32.mrf.mxu0 }
 0x234   :  { %1640 = vst.msk [vmem:[%s3870_s3 + $0x258] sm:$0xff] %vm300_vm1, %v1559_v50  ;;  %v1461_v7 = vadd.f32 %v3752_v56, %v991_v12 }
 0x235   :  { %v995_v63 = vpop.f32.mrf.mxu0 }
 0x236   :  { %v1560_v4 = vmax.f32 %v1461_v7, 0.0  ;;  %v996_v17 = vadd.f32 %v3557_v14, %v995_v63 }
 0x237   :  { %v997_v18 = vpop.f32.mrf.mxu0 }
 0x238   :  { %1641 = vst.msk [vmem:[%s3870_s3 + $0x260] sm:$0xff] %vm300_vm1, %v1560_v4  ;;  %v1466_v6 = vadd.f32 %v3760_v19, %v996_v17 }
 0x239   :  { %v1000_v20 = vpop.f32.mrf.mxu0 }
 0x23a   :  { %v1561_v52 = vmax.f32 %v1466_v6, 0.0  ;;  %v1001_v61 = vadd.f32 %v3557_v14, %v1000_v20 }
 0x23b   :  { %v1002_v2 = vpop.f32.mrf.mxu0 }
 0x23c   :  { %1642 = vst.msk [vmem:[%s3870_s3 + $0x268] sm:$0xff] %vm300_vm1, %v1561_v52  ;;  %v1471_v56 = vadd.f32 %v3768_v38, %v1001_v61 }
 0x23d   :  { %v1005_v11 = vpop.f32.mrf.mxu0 }
 0x23e   :  { %v1562_v26 = vmax.f32 %v1471_v56, 0.0  ;;  %v1006_v5 = vadd.f32 %v3557_v14, %v1005_v11 }
 0x23f   :  { %v1007_v29 = vpop.f32.mrf.mxu0 }
 0x240   :  { %1643 = vst.msk [vmem:[%s3870_s3 + $0x270] sm:$0xff] %vm300_vm1, %v1562_v26  ;;  %v1476_v19 = vadd.f32 %v3776_v49, %v1006_v5 }
 0x241   :  { %v1010_v31 = vpop.f32.mrf.mxu0 }
 0x242   :  { %v1563_v47 = vmax.f32 %v1476_v19, 0.0  ;;  %v1011_v57 = vadd.f32 %v3557_v14, %v1010_v31 }
 0x243   :  { %v1012_v10 = vpop.f32.mrf.mxu0 }
 0x244   :  { %1644 = vst.msk [vmem:[%s3870_s3 + $0x278] sm:$0xff] %vm300_vm1, %v1563_v47  ;;  %v1481_v38 = vadd.f32 %v3784_v59, %v1011_v57 }
 0x246   :  { %v1564_v22 = vmax.f32 %v1481_v38, 0.0 }
 0x248   :  { %1645 = vst.msk [vmem:[%s3870_s3 + $0x280] sm:$0xff] %vm300_vm1, %v1564_v22 }

// kernel: actor_forward.5
= control target key start
LH: loop header
LB: loop body
LE: loop exit
PB: predicated region body
PF: predicated region fallthrough
CT: control target
= control target key end

     0   :  { %12 = vsyncpa [#allocation4], 0  ;;  %s10728_s24 = smov 0   ;;  %s12321_s0 = inlined_call_operand.vmem [shape: f32[2,10368], index: 0, kind: input, shape index: {}]   ;;  %s12322_s1 = inlined_call_operand.vmem [shape: bf16[10368,512], index: 1, kind: input, shape index: {}]   ;;  %s12323_s2 = inlined_call_operand.vmem [shape: f32[1,512], index: 2, kind: input, shape index: {}]   ;;  %s12324_s3 = inlined_call_operand.vmem [shape: bf16[512,384], index: 3, kind: input, shape index: {}]   ;;  %s12325_s4 = inlined_call_operand.vmem [shape: f32[1,384], index: 4, kind: input, shape index: {}]   ;;  %s12326_s5 = inlined_call_operand.vmem [shape: bf16[384,128], index: 5, kind: input, shape index: {}]   ;;  %s12327_s6 = inlined_call_operand.vmem [shape: f32[1,128], index: 6, kind: input, shape index: {}]   ;;  %s12328_s7 = inlined_call_operand.hbm [shape: f32[2,128], index: 7, kind: output, shape index: {}]  }
   0x1 LB: > { %s10734_s25 = sadd.s32 4294967295, %s10680_s24   ;;  %p8078_p0 = scmp.ge.s32.totalorder %s10680_s24, 1  ;;  %s10680_s24 = sphi %s10728_s24, %s18_s24  }
   0x2   : > { %p246_p1 = scmp.lt.s32.totalorder %s10680_s24, 4 }
   0x4   : > { %p247_p2 = pnand %p8078_p0, %p246_p1 }
   0x5   : > { %s279_s26 = smul.u32 (!%p247_p2), 27, %s10734_s25  ;;  %p8082_p5 = scmp.ne.s32.totalorder (!%p247_p2), %s10734_s25, 0 }
   0x6   : > { %250 = sbr.rel (%p247_p2) target bundleno = 1624 (0x658), region = 48 }
   0x7   : > { %s285_s27 = smul.u32 (!%p247_p2), 432, %s10734_s25  ;;  %p280_p3 = scmp.lt.s32.totalorder (!%p247_p2), %s279_s26, 80 }
   0x9   : > { %p286_p4 = scmp.lt.s32.totalorder (!%p247_p2), %s285_s27, 1295 }
   0xb   : > { %s12330_s26 = smov (!%p280_p3, %s279_s26), 80  ;;  %s12332_s27 = smov (!%p286_p4, %s285_s27), 1295 }
   0xc   : > { %s8079_s28 = sshll.u32 %s12330_s26, 1  ;;  %s9073_s9 = sshll.u32 %s12332_s27, 4 }
   0xd   : > { %s10743_s8 = scalar_lea.vmem %s12321_s0, %s8079_s28  ;;  %s10748_s12 = scalar_lea.vmem %s12322_s1, %s9073_s9 }
   0xe   : > { %296 = sbr.rel (%p8082_p5) target bundleno = 21 (0x15), region = 52 }
  0x13   : > { %v10682_v0 = vmov 0.0  }
  0x14   : > { %297 = vst [vmem:[#allocation2] sm:$0xff] %v10682_v0 }
  0x15 PF: > { %v9189_v1 = vld [vmem:[%s10748_s12 + $0xe4] ss:$16 sps:$4 sm:$0xff]   ;;  %v9193_v3 = vld [vmem:[%s10748_s12 + $0xe0] ss:$16 sps:$4 sm:$0xff]   ;;  %v10683_v37 = vmov 1983009808   ;;  %v316_v39 = vlaneseq }
  0x16   : > { %v9191_v2 = vld [vmem:[%s10748_s12 + $0x2e4] ss:$16 sps:$4 sm:$0xff]   ;;  %5669 = vmatprep.subr.bf16.mxu0 %v9189_v1  ;;  %v9194_v4 = vld [vmem:[%s10748_s12 + $0x2e0] ss:$16 sps:$4 sm:$0xff]   ;;  %v314_v38 = vunpack.c.l.s4 %v10683_v37  ;;  %p8947_p6 = scmp.ne.s32.totalorder %s10734_s25, 2 }
  0x17   : > { %5710 = vmatprep.subr.bf16.mxu1 %v9191_v2  ;;  %v9195_v5 = vld [vmem:[%s10748_s12 + $0xc4] ss:$16 sps:$4 sm:$0xff]   ;;  %5670 = vmatpush1.bf16.msra.mxu0 %v9193_v3  ;;  %v9199_v7 = vld [vmem:[%s10748_s12 + $0xc0] ss:$16 sps:$4 sm:$0xff]   ;;  %v10790_v44 = vshrl.u32 %v316_v39, 7 }
  0x18   : > { %5711 = vmatpush1.bf16.msra.mxu1 %v9194_v4  ;;  %v9197_v6 = vld [vmem:[%s10748_s12 + $0x2c4] ss:$16 sps:$4 sm:$0xff]   ;;  %5671 = vmatprep.subr.bf16.mxu0 %v9195_v5  ;;  %v9200_v8 = vld [vmem:[%s10748_s12 + $0x2c0] ss:$16 sps:$4 sm:$0xff]   ;;  %v315_v43 = vunpack.c.0.s8 %v314_v38 }
  0x19   : > { %5712 = vmatprep.subr.bf16.mxu1 %v9197_v6  ;;  %v9201_v9 = vld [vmem:[%s10748_s12 + $0xa4] ss:$16 sps:$4 sm:$0xff]   ;;  %v9205_v11 = vld [vmem:[%s10748_s12 + $0xa0] ss:$16 sps:$4 sm:$0xff]  }
  0x1a   : > { %v9203_v10 = vld [vmem:[%s10748_s12 + $0x2a4] ss:$16 sps:$4 sm:$0xff]   ;;  %v9206_v12 = vld [vmem:[%s10748_s12 + $0x2a0] ss:$16 sps:$4 sm:$0xff]   ;;  %v10798_v50 = vsub.s32 %v315_v43, %v10790_v44  ;;  %v299_v43 = vld [vmem:[%s10743_s8 + $0x8] sm:$0xff] }
  0x1b   : > { %5672 = vmatpush1.bf16.msra.mxu0 %v9199_v7  ;;  %v9207_v13 = vld [vmem:[%s10748_s12 + $0x84] ss:$16 sps:$4 sm:$0xff]   ;;  %v9211_v15 = vld [vmem:[%s10748_s12 + $0x80] ss:$16 sps:$4 sm:$0xff]  }
  0x1c   : > { %5713 = vmatpush1.bf16.msra.mxu1 %v9200_v8  ;;  %5673 = vmatprep.subr.bf16.mxu0 %v9201_v9  ;;  %v9209_v14 = vld [vmem:[%s10748_s12 + $0x284] ss:$16 sps:$4 sm:$0xff]   ;;  %v9212_v16 = vld [vmem:[%s10748_s12 + $0x280] ss:$16 sps:$4 sm:$0xff]  }
  0x1d   : > { %5714 = vmatprep.subr.bf16.mxu1 %v9203_v10  ;;  %v9213_v17 = vld [vmem:[%s10748_s12 + $0x64] ss:$16 sps:$4 sm:$0xff]   ;;  %v9217_v19 = vld [vmem:[%s10748_s12 + $0x60] ss:$16 sps:$4 sm:$0xff]  }
  0x1e   : > { %v9215_v18 = vld [vmem:[%s10748_s12 + $0x264] ss:$16 sps:$4 sm:$0xff]   ;;  %v9218_v20 = vld [vmem:[%s10748_s12 + $0x260] ss:$16 sps:$4 sm:$0xff]  }
  0x1f   : > { %5674 = vmatpush1.bf16.msra.mxu0 %v9205_v11  ;;  %v9219_v21 = vld [vmem:[%s10748_s12 + $0x44] ss:$16 sps:$4 sm:$0xff]   ;;  %v9223_v23 = vld [vmem:[%s10748_s12 + $0x40] ss:$16 sps:$4 sm:$0xff]  }
  0x20   : > { %5715 = vmatpush1.bf16.msra.mxu1 %v9206_v12  ;;  %5675 = vmatprep.subr.bf16.mxu0 %v9207_v13  ;;  %v9221_v22 = vld [vmem:[%s10748_s12 + $0x244] ss:$16 sps:$4 sm:$0xff]   ;;  %v9224_v24 = vld [vmem:[%s10748_s12 + $0x240] ss:$16 sps:$4 sm:$0xff]  }
  0x21   : > { %5716 = vmatprep.subr.bf16.mxu1 %v9209_v14  ;;  %v9225_v25 = vld [vmem:[%s10748_s12 + $0x24] ss:$16 sps:$4 sm:$0xff]   ;;  %v9229_v27 = vld [vmem:[%s10748_s12 + $0x20] ss:$16 sps:$4 sm:$0xff]  }
  0x22   : > { %v9227_v26 = vld [vmem:[%s10748_s12 + $0x224] ss:$16 sps:$4 sm:$0xff]   ;;  %v9230_v28 = vld [vmem:[%s10748_s12 + $0x220] ss:$16 sps:$4 sm:$0xff]  }
  0x23   : > { %5676 = vmatpush1.bf16.msra.mxu0 %v9211_v15  ;;  %v9231_v29 = vld [vmem:[%s10748_s12 + $0x4] ss:$16 sps:$4 sm:$0xff]   ;;  %v9235_v31 = vld [vmem:[%s10748_s12] ss:$16 sps:$4 sm:$0xff]  }
  0x24   : > { %5717 = vmatpush1.bf16.msra.mxu1 %v9212_v16  ;;  %5677 = vmatprep.subr.bf16.mxu0 %v9213_v17  ;;  %v9233_v30 = vld [vmem:[%s10748_s12 + $0x204] ss:$16 sps:$4 sm:$0xff]   ;;  %v9236_v32 = vld [vmem:[%s10748_s12 + $0x200] ss:$16 sps:$4 sm:$0xff]  }
  0x25   : > { %5718 = vmatprep.subr.bf16.mxu1 %v9215_v18  ;;  %v9237_v33 = vld [vmem:[%s10748_s12 + $0x1e4] ss:$16 sps:$4 sm:$0xff]   ;;  %v9241_v35 = vld [vmem:[%s10748_s12 + $0x1e0] ss:$16 sps:$4 sm:$0xff]  }
  0x26   : > { %v9239_v34 = vld [vmem:[%s10748_s12 + $0x3e4] ss:$16 sps:$4 sm:$0xff]   ;;  %v9242_v36 = vld [vmem:[%s10748_s12 + $0x3e0] ss:$16 sps:$4 sm:$0xff]  }
  0x27   : > { %5678 = vmatpush1.bf16.msra.mxu0 %v9217_v19  ;;  %v9243_v40 = vld [vmem:[%s10748_s12 + $0x1c4] ss:$16 sps:$4 sm:$0xff]   ;;  %v9247_v42 = vld [vmem:[%s10748_s12 + $0x1c0] ss:$16 sps:$4 sm:$0xff]  }
  0x28   : > { %5719 = vmatpush1.bf16.msra.mxu1 %v9218_v20  ;;  %5679 = vmatprep.subr.bf16.mxu0 %v9219_v21  ;;  %v9245_v41 = vld [vmem:[%s10748_s12 + $0x3c4] ss:$16 sps:$4 sm:$0xff]   ;;  %v9248_v45 = vld [vmem:[%s10748_s12 + $0x3c0] ss:$16 sps:$4 sm:$0xff]  }
  0x29   : > { %5720 = vmatprep.subr.bf16.mxu1 %v9221_v22  ;;  %v9249_v46 = vld [vmem:[%s10748_s12 + $0x1a4] ss:$16 sps:$4 sm:$0xff]   ;;  %v9253_v48 = vld [vmem:[%s10748_s12 + $0x1a0] ss:$16 sps:$4 sm:$0xff]  }
  0x2a   : > { %v9251_v47 = vld [vmem:[%s10748_s12 + $0x3a4] ss:$16 sps:$4 sm:$0xff]   ;;  %v9254_v49 = vld [vmem:[%s10748_s12 + $0x3a0] ss:$16 sps:$4 sm:$0xff]  }
  0x2b   : > { %5680 = vmatpush1.bf16.msra.mxu0 %v9223_v23  ;;  %v9255_v51 = vld [vmem:[%s10748_s12 + $0x184] ss:$16 sps:$4 sm:$0xff]   ;;  %v9259_v54 = vld [vmem:[%s10748_s12 + $0x180] ss:$16 sps:$4 sm:$0xff]  }
  0x2c   : > { %5721 = vmatpush1.bf16.msra.mxu1 %v9224_v24  ;;  %5681 = vmatprep.subr.bf16.mxu0 %v9225_v25  ;;  %v9257_v52 = vld [vmem:[%s10748_s12 + $0x384] ss:$16 sps:$4 sm:$0xff]   ;;  %v9260_v57 = vld [vmem:[%s10748_s12 + $0x380] ss:$16 sps:$4 sm:$0xff]  }
  0x2d   : > { %5722 = vmatprep.subr.bf16.mxu1 %v9227_v26  ;;  %v298_v53 = vld [vmem:[%s10743_s8] sm:$0xff] }
  0x2e   : > { %v319_v55 = vrot.slane %v298_v53, %v10798_v50  ;;  %v312_v56 = vcombine.high %v298_v53, %v298_v53  ;;  %v9261_v58 = vld [vmem:[%s10748_s12 + $0x164] ss:$16 sps:$4 sm:$0xff]   ;;  %v9265_v62 = vld [vmem:[%s10748_s12 + $0x160] ss:$16 sps:$4 sm:$0xff]  }
  0x2f   : > { %5682 = vmatpush1.bf16.msra.mxu0 %v9229_v27  ;;  %v9263_v59 = vld [vmem:[%s10748_s12 + $0x364] ss:$16 sps:$4 sm:$0xff]   ;;  %v9266_v1 = vld [vmem:[%s10748_s12 + $0x360] ss:$16 sps:$4 sm:$0xff]  }
  0x30   : > { %5723 = vmatpush1.bf16.msra.mxu1 %v9230_v28  ;;  %5683 = vmatprep.subr.bf16.mxu0 %v9231_v29  ;;  %v327_v60 = vcombine.high %v319_v55, %v319_v55  ;;  %v326_v61 = vrot.slane %v312_v56, %v10798_v50  ;;  %v9267_v2 = vld [vmem:[%s10748_s12 + $0x144] ss:$16 sps:$4 sm:$0xff]   ;;  %v9271_v5 = vld [vmem:[%s10748_s12 + $0x140] ss:$16 sps:$4 sm:$0xff]   ;;  %v10831_v17 = vpack.c.bf16 %v319_v55, %v319_v55 }
  0x31   : > { %5724 = vmatprep.subr.bf16.mxu1 %v9233_v30  ;;  %v9269_v3 = vld [vmem:[%s10748_s12 + $0x344] ss:$16 sps:$4 sm:$0xff]   ;;  %v9272_v6 = vld [vmem:[%s10748_s12 + $0x340] ss:$16 sps:$4 sm:$0xff]  }
  0x32   : > { %v10810_v63 = vpack.c.bf16 %v327_v60, %v327_v60  ;;  %v328_v0 = vcombine.high %v326_v61, %v326_v61  ;;  %v9273_v7 = vld [vmem:[%s10748_s12 + $0x124] ss:$16 sps:$4 sm:$0xff]   ;;  %v9277_v9 = vld [vmem:[%s10748_s12 + $0x120] ss:$16 sps:$4 sm:$0xff]   ;;  %v10833_v18 = vpack.c.bf16 %v326_v61, %v326_v61 }
  0x33   : > { %5684 = vmatpush1.bf16.msra.mxu0 %v9235_v31  ;;  %v9275_v8 = vld [vmem:[%s10748_s12 + $0x324] ss:$16 sps:$4 sm:$0xff]   ;;  %v9278_v10 = vld [vmem:[%s10748_s12 + $0x320] ss:$16 sps:$4 sm:$0xff]  }
  0x34   : > { %5725 = vmatpush1.bf16.msra.mxu1 %v9236_v32  ;;  %5685 = vmatprep.subr.bf16.mxu0 %v9237_v33  ;;  %v10815_v4 = vpack.c.bf16 %v328_v0, %v328_v0  ;;  %v9279_v11 = vld [vmem:[%s10748_s12 + $0x104] ss:$16 sps:$4 sm:$0xff]   ;;  %v9283_v13 = vld [vmem:[%s10748_s12 + $0x100] ss:$16 sps:$4 sm:$0xff]  }
  0x35   : > { %5726 = vmatprep.subr.bf16.mxu1 %v9239_v34  ;;  %5701 = vmatprep.mubr.bf16.mxu0 %v10810_v63  ;;  %v9281_v12 = vld [vmem:[%s10748_s12 + $0x304] ss:$16 sps:$4 sm:$0xff]   ;;  %v9284_v14 = vld [vmem:[%s10748_s12 + $0x300] ss:$16 sps:$4 sm:$0xff]  }
  0x36   : > { %5742 = vmatprep.mubr.bf16.mxu1 %v10815_v4  ;;  %v9288_v15 = vld [vmem:[%s10748_s12 + $0x4e4] ss:$16 sps:$4 sm:$0xff]   ;;  %v9286_v19 = vld [vmem:[%s10748_s12 + $0x4e0] ss:$16 sps:$4 sm:$0xff]  }
  0x37   : > { %5686 = vmatpush2.bf16.msra.mxu0 %v9241_v35  ;;  %v9291_v16 = vld [vmem:[%s10748_s12 + $0x6e4] ss:$16 sps:$4 sm:$0xff]   ;;  %v9289_v20 = vld [vmem:[%s10748_s12 + $0x6e0] ss:$16 sps:$4 sm:$0xff]  }
  0x38   : > { %5727 = vmatpush2.bf16.msra.mxu1 %v9242_v36  ;;  %5687 = vmatprep.subr.bf16.mxu0 %v9243_v40  ;;  %v9294_v21 = vld [vmem:[%s10748_s12 + $0x4c4] ss:$16 sps:$4 sm:$0xff]   ;;  %v9292_v23 = vld [vmem:[%s10748_s12 + $0x4c0] ss:$16 sps:$4 sm:$0xff]  }
  0x39   : > { %5728 = vmatprep.subr.bf16.mxu1 %v9245_v41  ;;  %v9297_v22 = vld [vmem:[%s10748_s12 + $0x6c4] ss:$16 sps:$4 sm:$0xff]   ;;  %v9295_v24 = vld [vmem:[%s10748_s12 + $0x6c0] ss:$16 sps:$4 sm:$0xff]  }
  0x3a   : > { %v9300_v25 = vld [vmem:[%s10748_s12 + $0x4a4] ss:$16 sps:$4 sm:$0xff]   ;;  %v9298_v27 = vld [vmem:[%s10748_s12 + $0x4a0] ss:$16 sps:$4 sm:$0xff]  }
  0x3b   : > { %5688 = vmatpush2.bf16.msra.mxu0 %v9247_v42  ;;  %v9303_v26 = vld [vmem:[%s10748_s12 + $0x6a4] ss:$16 sps:$4 sm:$0xff]   ;;  %v9301_v28 = vld [vmem:[%s10748_s12 + $0x6a0] ss:$16 sps:$4 sm:$0xff]  }
  0x3c   : > { %5729 = vmatpush2.bf16.msra.mxu1 %v9248_v45  ;;  %5689 = vmatprep.subr.bf16.mxu0 %v9249_v46  ;;  %v9306_v29 = vld [vmem:[%s10748_s12 + $0x484] ss:$16 sps:$4 sm:$0xff]   ;;  %v9304_v31 = vld [vmem:[%s10748_s12 + $0x480] ss:$16 sps:$4 sm:$0xff]   ;;  %v10863_v45 = vrot.slane %v299_v43, %v10798_v50  ;;  %v329_v46 = vcombine.high %v299_v43, %v299_v43 }
  0x3d   : > { %5730 = vmatprep.subr.bf16.mxu1 %v9251_v47  ;;  %v9309_v30 = vld [vmem:[%s10748_s12 + $0x684] ss:$16 sps:$4 sm:$0xff]   ;;  %v9307_v32 = vld [vmem:[%s10748_s12 + $0x680] ss:$16 sps:$4 sm:$0xff]  }
  0x3e   : > { %v9312_v33 = vld [vmem:[%s10748_s12 + $0x464] ss:$16 sps:$4 sm:$0xff]   ;;  %v9310_v35 = vld [vmem:[%s10748_s12 + $0x460] ss:$16 sps:$4 sm:$0xff]  }
  0x3f   : > { %5690 = vmatpush2.bf16.msra.mxu0 %v9253_v48  ;;  %v9315_v34 = vld [vmem:[%s10748_s12 + $0x664] ss:$16 sps:$4 sm:$0xff]   ;;  %v9313_v36 = vld [vmem:[%s10748_s12 + $0x660] ss:$16 sps:$4 sm:$0xff]  }
  0x40   : > { %5731 = vmatpush2.bf16.msra.mxu1 %v9254_v49  ;;  %5691 = vmatprep.subr.bf16.mxu0 %v9255_v51  ;;  %v9318_v37 = vld [vmem:[%s10748_s12 + $0x444] ss:$16 sps:$4 sm:$0xff]   ;;  %v9316_v39 = vld [vmem:[%s10748_s12 + $0x440] ss:$16 sps:$4 sm:$0xff]   ;;  %v344_v49 = vcombine.high %v10863_v45, %v10863_v45  ;;  %v10870_v51 = vrot.slane %v329_v46, %v10798_v50 }
  0x41   : > { %5732 = vmatprep.subr.bf16.mxu1 %v9257_v52  ;;  %v9321_v38 = vld [vmem:[%s10748_s12 + $0x644] ss:$16 sps:$4 sm:$0xff]   ;;  %v9319_v40 = vld [vmem:[%s10748_s12 + $0x640] ss:$16 sps:$4 sm:$0xff]  }
  0x42   : > { %v9324_v41 = vld [vmem:[%s10748_s12 + $0x424] ss:$16 sps:$4 sm:$0xff]   ;;  %v9322_v47 = vld [vmem:[%s10748_s12 + $0x420] ss:$16 sps:$4 sm:$0xff]   ;;  %v345_v55 = vcombine.high %v10870_v51, %v10870_v51 }
  0x43   : > { %5692 = vmatpush2.bf16.msra.mxu0 %v9259_v54  ;;  %v9327_v42 = vld [vmem:[%s10748_s12 + $0x624] ss:$16 sps:$4 sm:$0xff]   ;;  %v9325_v48 = vld [vmem:[%s10748_s12 + $0x620] ss:$16 sps:$4 sm:$0xff]   ;;  %v10874_v54 = vpack.c.bf16 %v344_v49, %v344_v49 }
  0x44   : > { %5733 = vmatpush2.bf16.msra.mxu1 %v9260_v57  ;;  %5693 = vmatprep.subr.bf16.mxu0 %v9261_v58  ;;  %v9330_v52 = vld [vmem:[%s10748_s12 + $0x404] ss:$16 sps:$4 sm:$0xff]   ;;  %v9328_v56 = vld [vmem:[%s10748_s12 + $0x400] ss:$16 sps:$4 sm:$0xff]   ;;  %v10880_v58 = vpack.c.bf16 %v345_v55, %v345_v55 }
  0x45   : > { %5734 = vmatprep.subr.bf16.mxu1 %v9263_v59  ;;  %v9333_v53 = vld [vmem:[%s10748_s12 + $0x604] ss:$16 sps:$4 sm:$0xff]   ;;  %v9331_v57 = vld [vmem:[%s10748_s12 + $0x600] ss:$16 sps:$4 sm:$0xff]  }
  0x46   : > { %v9336_v59 = vld [vmem:[%s10748_s12 + $0x5e4] ss:$16 sps:$4 sm:$0xff]   ;;  %v9334_v61 = vld [vmem:[%s10748_s12 + $0x5e0] ss:$16 sps:$4 sm:$0xff]  }
  0x47   : > { %5694 = vmatpush2.bf16.msra.mxu0 %v9265_v62  ;;  %v9339_v60 = vld [vmem:[%s10748_s12 + $0x7e4] ss:$16 sps:$4 sm:$0xff]   ;;  %v9337_v62 = vld [vmem:[%s10748_s12 + $0x7e0] ss:$16 sps:$4 sm:$0xff]  }
  0x48   : > { %5735 = vmatpush2.bf16.msra.mxu1 %v9266_v1  ;;  %5695 = vmatprep.subr.bf16.mxu0 %v9267_v2  ;;  %v9342_v0 = vld [vmem:[%s10748_s12 + $0x5c4] ss:$16 sps:$4 sm:$0xff]   ;;  %v9340_v2 = vld [vmem:[%s10748_s12 + $0x5c0] ss:$16 sps:$4 sm:$0xff]  }
  0x49   : > { %5736 = vmatprep.subr.bf16.mxu1 %v9269_v3  ;;  %v9345_v1 = vld [vmem:[%s10748_s12 + $0x7c4] ss:$16 sps:$4 sm:$0xff]   ;;  %v9343_v3 = vld [vmem:[%s10748_s12 + $0x7c0] ss:$16 sps:$4 sm:$0xff]  }
  0x4a   : > { %v9392_v46 = vld [vmem:[%s10748_s12 + $0xac0] ss:$16 sps:$4 sm:$0xff]  }
  0x4b   : > { %5696 = vmatpush2.bf16.msra.mxu0 %v9271_v5  ;;  %v9348_v5 = vld [vmem:[%s10748_s12 + $0x5a4] ss:$16 sps:$4 sm:$0xff]   ;;  %v9398_v55 = vld [vmem:[%s10748_s12 + $0xaa0] ss:$16 sps:$4 sm:$0xff]  }
  0x4c   : > { %5737 = vmatpush2.bf16.msra.mxu1 %v9272_v6  ;;  %5697 = vmatprep.subr.bf16.mxu0 %v9273_v7  ;;  %v9351_v6 = vld [vmem:[%s10748_s12 + $0x7a4] ss:$16 sps:$4 sm:$0xff]   ;;  %v9346_v7 = vld [vmem:[%s10748_s12 + $0x5a0] ss:$16 sps:$4 sm:$0xff]  }
  0x4d   : > { %5738 = vmatprep.subr.bf16.mxu1 %v9275_v8  ;;  %v9349_v8 = vld [vmem:[%s10748_s12 + $0x7a0] ss:$16 sps:$4 sm:$0xff]  }
  0x4f   : > { %5698 = vmatpush2.bf16.msra.mxu0 %v9277_v9  ;;  %v9354_v9 = vld [vmem:[%s10748_s12 + $0x584] ss:$16 sps:$4 sm:$0xff]  }
  0x50   : > { %5739 = vmatpush2.bf16.msra.mxu1 %v9278_v10  ;;  %5699 = vmatprep.subr.bf16.mxu0 %v9279_v11  ;;  %v9357_v10 = vld [vmem:[%s10748_s12 + $0x784] ss:$16 sps:$4 sm:$0xff]   ;;  %v9352_v11 = vld [vmem:[%s10748_s12 + $0x580] ss:$16 sps:$4 sm:$0xff]  }
  0x51   : > { %5740 = vmatprep.subr.bf16.mxu1 %v9281_v12  ;;  %v9355_v12 = vld [vmem:[%s10748_s12 + $0x780] ss:$16 sps:$4 sm:$0xff]  }
  0x53   : > { %5700 = vmatpush2.bf16.msra.mxu0 %v9283_v13  ;;  %v9360_v13 = vld [vmem:[%s10748_s12 + $0x564] ss:$16 sps:$4 sm:$0xff]  }
  0x54   : > { %5741 = vmatpush2.bf16.msra.mxu1 %v9284_v14  ;;  %5751 = vmatprep.subr.bf16.mxu0 %v9288_v15  ;;  %v9363_v14 = vld [vmem:[%s10748_s12 + $0x764] ss:$16 sps:$4 sm:$0xff]   ;;  %v9358_v15 = vld [vmem:[%s10748_s12 + $0x560] ss:$16 sps:$4 sm:$0xff]  }
  0x55   : > { %5792 = vmatprep.subr.bf16.mxu1 %v9291_v16  ;;  %v9361_v16 = vld [vmem:[%s10748_s12 + $0x760] ss:$16 sps:$4 sm:$0xff]  }
  0x56   : > { %5702 = vmatmul.mubr.bf16.vlgmr.msra.gmra.mxu0 %v10831_v17 }
  0x57   : > { %5743 = vmatmul.mubr.bf16.vlgmr.msra.gmra.mxu1 %v10833_v18  ;;  %5752 = vmatpush1.bf16.msra.mxu0 %v9286_v19  ;;  %v9366_v19 = vld [vmem:[%s10748_s12 + $0x544] ss:$16 sps:$4 sm:$0xff]  }
  0x58   : > { %5793 = vmatpush1.bf16.msra.mxu1 %v9289_v20  ;;  %5753 = vmatprep.subr.bf16.mxu0 %v9294_v21  ;;  %v9369_v20 = vld [vmem:[%s10748_s12 + $0x744] ss:$16 sps:$4 sm:$0xff]   ;;  %v9364_v21 = vld [vmem:[%s10748_s12 + $0x540] ss:$16 sps:$4 sm:$0xff]  }
  0x59   : > { %5794 = vmatprep.subr.bf16.mxu1 %v9297_v22  ;;  %5783 = vmatprep.mubr.bf16.mxu0 %v10874_v54  ;;  %v9367_v22 = vld [vmem:[%s10748_s12 + $0x740] ss:$16 sps:$4 sm:$0xff]  }
  0x5a   : > { %5824 = vmatprep.mubr.bf16.mxu1 %v10880_v58 }
  0x5b   : > { %5754 = vmatpush1.bf16.msra.mxu0 %v9292_v23  ;;  %v9372_v23 = vld [vmem:[%s10748_s12 + $0x524] ss:$16 sps:$4 sm:$0xff]  }
  0x5c   : > { %5795 = vmatpush1.bf16.msra.mxu1 %v9295_v24  ;;  %5755 = vmatprep.subr.bf16.mxu0 %v9300_v25  ;;  %v9375_v24 = vld [vmem:[%s10748_s12 + $0x724] ss:$16 sps:$4 sm:$0xff]   ;;  %v9370_v25 = vld [vmem:[%s10748_s12 + $0x520] ss:$16 sps:$4 sm:$0xff]  }
  0x5d   : > { %5796 = vmatprep.subr.bf16.mxu1 %v9303_v26  ;;  %v9373_v26 = vld [vmem:[%s10748_s12 + $0x720] ss:$16 sps:$4 sm:$0xff]  }
  0x5f   : > { %5756 = vmatpush1.bf16.msra.mxu0 %v9298_v27  ;;  %v9378_v27 = vld [vmem:[%s10748_s12 + $0x504] ss:$16 sps:$4 sm:$0xff]  }
  0x60   : > { %5797 = vmatpush1.bf16.msra.mxu1 %v9301_v28  ;;  %5757 = vmatprep.subr.bf16.mxu0 %v9306_v29  ;;  %v9381_v28 = vld [vmem:[%s10748_s12 + $0x704] ss:$16 sps:$4 sm:$0xff]   ;;  %v9376_v29 = vld [vmem:[%s10748_s12 + $0x500] ss:$16 sps:$4 sm:$0xff]  }
  0x61   : > { %5798 = vmatprep.subr.bf16.mxu1 %v9309_v30  ;;  %v9379_v30 = vld [vmem:[%s10748_s12 + $0x700] ss:$16 sps:$4 sm:$0xff]  }
  0x63   : > { %5758 = vmatpush1.bf16.msra.mxu0 %v9304_v31  ;;  %v9385_v31 = vld [vmem:[%s10748_s12 + $0x8e4] ss:$16 sps:$4 sm:$0xff]  }
  0x64   : > { %5799 = vmatpush1.bf16.msra.mxu1 %v9307_v32  ;;  %5759 = vmatprep.subr.bf16.mxu0 %v9312_v33  ;;  %v9388_v32 = vld [vmem:[%s10748_s12 + $0xae4] ss:$16 sps:$4 sm:$0xff]   ;;  %v10920_v33 = vpack.c.bf16 %v10863_v45, %v10863_v45 }
  0x65   : > { %5800 = vmatprep.subr.bf16.mxu1 %v9315_v34  ;;  %v10924_v34 = vpack.c.bf16 %v10870_v51, %v10870_v51 }
  0x67   : > { %5760 = vmatpush1.bf16.msra.mxu0 %v9310_v35  ;;  %v9383_v35 = vld [vmem:[%s10748_s12 + $0x8e0] ss:$16 sps:$4 sm:$0xff]  }
  0x68   : > { %5801 = vmatpush1.bf16.msra.mxu1 %v9313_v36  ;;  %5761 = vmatprep.subr.bf16.mxu0 %v9318_v37  ;;  %v9386_v36 = vld [vmem:[%s10748_s12 + $0xae0] ss:$16 sps:$4 sm:$0xff]   ;;  %v9391_v37 = vld [vmem:[%s10748_s12 + $0x8c4] ss:$16 sps:$4 sm:$0xff]  }
  0x69   : > { %5802 = vmatprep.subr.bf16.mxu1 %v9321_v38  ;;  %v300_v38 = vld [vmem:[%s10743_s8 + $0x10] sm:$0xff] }
  0x6b   : > { %5762 = vmatpush1.bf16.msra.mxu0 %v9316_v39  ;;  %v9394_v39 = vld [vmem:[%s10748_s12 + $0xac4] ss:$16 sps:$4 sm:$0xff]  }
  0x6c   : > { %5803 = vmatpush1.bf16.msra.mxu1 %v9319_v40  ;;  %5763 = vmatprep.subr.bf16.mxu0 %v9324_v41  ;;  %v10932_v40 = vrot.slane %v300_v38, %v10798_v50  ;;  %v346_v41 = vcombine.high %v300_v38, %v300_v38  ;;  %v9458_v38 = vld [vmem:[%s10748_s12 + $0xb60] ss:$16 sps:$4 sm:$0xff]  }
  0x6d   : > { %5804 = vmatprep.subr.bf16.mxu1 %v9327_v42  ;;  %v9389_v42 = vld [vmem:[%s10748_s12 + $0x8c0] ss:$16 sps:$4 sm:$0xff]  }
  0x6e   : > { %v361_v43 = vcombine.high %v10932_v40, %v10932_v40  ;;  %v10940_v45 = vrot.slane %v346_v41, %v10798_v50  ;;  %v9466_v41 = vld [vmem:[%s10748_s12 + $0xb44] ss:$16 sps:$4 sm:$0xff]  }
  0x6f   : > { %5764 = vmatpush1.bf16.msra.mxu0 %v9322_v47  ;;  %v9397_v47 = vld [vmem:[%s10748_s12 + $0x8a4] ss:$16 sps:$4 sm:$0xff]  }
  0x70   : > { %5805 = vmatpush1.bf16.msra.mxu1 %v9325_v48  ;;  %5765 = vmatprep.subr.bf16.mxu0 %v9330_v52  ;;  %v9400_v48 = vld [vmem:[%s10748_s12 + $0xaa4] ss:$16 sps:$4 sm:$0xff]   ;;  %v10945_v49 = vpack.c.bf16 %v361_v43, %v361_v43  ;;  %v362_v51 = vcombine.high %v10940_v45, %v10940_v45  ;;  %v9395_v52 = vld [vmem:[%s10748_s12 + $0x8a0] ss:$16 sps:$4 sm:$0xff]  }
  0x71   : > { %5806 = vmatprep.subr.bf16.mxu1 %v9333_v53  ;;  %v9464_v43 = vld [vmem:[%s10748_s12 + $0xb40] ss:$16 sps:$4 sm:$0xff]  }
  0x72   : > { %v10951_v53 = vpack.c.bf16 %v362_v51, %v362_v51 }
  0x73   : > { %5766 = vmatpush1.bf16.msra.mxu0 %v9328_v56  ;;  %v9403_v56 = vld [vmem:[%s10748_s12 + $0x884] ss:$16 sps:$4 sm:$0xff]  }
  0x74   : > { %5807 = vmatpush1.bf16.msra.mxu1 %v9331_v57  ;;  %5767 = vmatprep.subr.bf16.mxu0 %v9336_v59  ;;  %v9406_v57 = vld [vmem:[%s10748_s12 + $0xa84] ss:$16 sps:$4 sm:$0xff]   ;;  %v9401_v59 = vld [vmem:[%s10748_s12 + $0x880] ss:$16 sps:$4 sm:$0xff]  }
  0x75   : > { %5808 = vmatprep.subr.bf16.mxu1 %v9339_v60  ;;  %v9404_v60 = vld [vmem:[%s10748_s12 + $0xa80] ss:$16 sps:$4 sm:$0xff]  }
  0x77   : > { %5768 = vmatpush2.bf16.msra.mxu0 %v9334_v61  ;;  %v9409_v61 = vld [vmem:[%s10748_s12 + $0x864] ss:$16 sps:$4 sm:$0xff]  }
  0x78   : > { %5809 = vmatpush2.bf16.msra.mxu1 %v9337_v62  ;;  %5769 = vmatprep.subr.bf16.mxu0 %v9342_v0  ;;  %v9412_v62 = vld [vmem:[%s10748_s12 + $0xa64] ss:$16 sps:$4 sm:$0xff]   ;;  %v9407_v0 = vld [vmem:[%s10748_s12 + $0x860] ss:$16 sps:$4 sm:$0xff]  }
  0x79   : > { %5810 = vmatprep.subr.bf16.mxu1 %v9345_v1  ;;  %v9410_v1 = vld [vmem:[%s10748_s12 + $0xa60] ss:$16 sps:$4 sm:$0xff]  }
  0x7b   : > { %5770 = vmatpush2.bf16.msra.mxu0 %v9340_v2  ;;  %v9415_v2 = vld [vmem:[%s10748_s12 + $0x844] ss:$16 sps:$4 sm:$0xff]  }
  0x7c   : > { %5811 = vmatpush2.bf16.msra.mxu1 %v9343_v3  ;;  %5771 = vmatprep.subr.bf16.mxu0 %v9348_v5  ;;  %v9418_v3 = vld [vmem:[%s10748_s12 + $0xa44] ss:$16 sps:$4 sm:$0xff]   ;;  %v9413_v5 = vld [vmem:[%s10748_s12 + $0x840] ss:$16 sps:$4 sm:$0xff]  }
  0x7d   : > { %5812 = vmatprep.subr.bf16.mxu1 %v9351_v6  ;;  %v9416_v6 = vld [vmem:[%s10748_s12 + $0xa40] ss:$16 sps:$4 sm:$0xff]  }
  0x7f   : > { %5772 = vmatpush2.bf16.msra.mxu0 %v9346_v7  ;;  %v9421_v7 = vld [vmem:[%s10748_s12 + $0x824] ss:$16 sps:$4 sm:$0xff]  }
  0x80   : > { %5813 = vmatpush2.bf16.msra.mxu1 %v9349_v8  ;;  %5773 = vmatprep.subr.bf16.mxu0 %v9354_v9  ;;  %v9424_v8 = vld [vmem:[%s10748_s12 + $0xa24] ss:$16 sps:$4 sm:$0xff]   ;;  %v9419_v9 = vld [vmem:[%s10748_s12 + $0x820] ss:$16 sps:$4 sm:$0xff]  }
  0x81   : > { %5814 = vmatprep.subr.bf16.mxu1 %v9357_v10  ;;  %v9422_v10 = vld [vmem:[%s10748_s12 + $0xa20] ss:$16 sps:$4 sm:$0xff]  }
  0x83   : > { %5774 = vmatpush2.bf16.msra.mxu0 %v9352_v11  ;;  %v9427_v11 = vld [vmem:[%s10748_s12 + $0x804] ss:$16 sps:$4 sm:$0xff]  }
  0x84   : > { %5815 = vmatpush2.bf16.msra.mxu1 %v9355_v12  ;;  %5775 = vmatprep.subr.bf16.mxu0 %v9360_v13  ;;  %v9430_v12 = vld [vmem:[%s10748_s12 + $0xa04] ss:$16 sps:$4 sm:$0xff]   ;;  %v9425_v13 = vld [vmem:[%s10748_s12 + $0x800] ss:$16 sps:$4 sm:$0xff]  }
  0x85   : > { %5816 = vmatprep.subr.bf16.mxu1 %v9363_v14  ;;  %v9428_v14 = vld [vmem:[%s10748_s12 + $0xa00] ss:$16 sps:$4 sm:$0xff]  }
  0x87   : > { %5776 = vmatpush2.bf16.msra.mxu0 %v9358_v15  ;;  %v9433_v15 = vld [vmem:[%s10748_s12 + $0x9e4] ss:$16 sps:$4 sm:$0xff]  }
  0x88   : > { %5817 = vmatpush2.bf16.msra.mxu1 %v9361_v16  ;;  %5777 = vmatprep.subr.bf16.mxu0 %v9366_v19  ;;  %v9436_v16 = vld [vmem:[%s10748_s12 + $0xbe4] ss:$16 sps:$4 sm:$0xff]   ;;  %v9431_v19 = vld [vmem:[%s10748_s12 + $0x9e0] ss:$16 sps:$4 sm:$0xff]  }
  0x89   : > { %5818 = vmatprep.subr.bf16.mxu1 %v9369_v20  ;;  %v9434_v20 = vld [vmem:[%s10748_s12 + $0xbe0] ss:$16 sps:$4 sm:$0xff]  }
  0x8b   : > { %5778 = vmatpush2.bf16.msra.mxu0 %v9364_v21  ;;  %v9439_v21 = vld [vmem:[%s10748_s12 + $0x9c4] ss:$16 sps:$4 sm:$0xff]  }
  0x8c   : > { %5819 = vmatpush2.bf16.msra.mxu1 %v9367_v22  ;;  %5779 = vmatprep.subr.bf16.mxu0 %v9372_v23  ;;  %v9442_v22 = vld [vmem:[%s10748_s12 + $0xbc4] ss:$16 sps:$4 sm:$0xff]   ;;  %v9437_v23 = vld [vmem:[%s10748_s12 + $0x9c0] ss:$16 sps:$4 sm:$0xff]  }
  0x8d   : > { %5820 = vmatprep.subr.bf16.mxu1 %v9375_v24  ;;  %v9440_v24 = vld [vmem:[%s10748_s12 + $0xbc0] ss:$16 sps:$4 sm:$0xff]  }
  0x8f   : > { %5780 = vmatpush2.bf16.msra.mxu0 %v9370_v25  ;;  %v9445_v25 = vld [vmem:[%s10748_s12 + $0x9a4] ss:$16 sps:$4 sm:$0xff]  }
  0x90   : > { %5821 = vmatpush2.bf16.msra.mxu1 %v9373_v26  ;;  %5781 = vmatprep.subr.bf16.mxu0 %v9378_v27  ;;  %v9448_v26 = vld [vmem:[%s10748_s12 + $0xba4] ss:$16 sps:$4 sm:$0xff]   ;;  %v9443_v27 = vld [vmem:[%s10748_s12 + $0x9a0] ss:$16 sps:$4 sm:$0xff]  }
  0x91   : > { %5822 = vmatprep.subr.bf16.mxu1 %v9381_v28  ;;  %v9446_v28 = vld [vmem:[%s10748_s12 + $0xba0] ss:$16 sps:$4 sm:$0xff]  }
  0x93   : > { %5782 = vmatpush2.bf16.msra.mxu0 %v9376_v29  ;;  %v9451_v29 = vld [vmem:[%s10748_s12 + $0x984] ss:$16 sps:$4 sm:$0xff]  }
  0x94   : > { %5823 = vmatpush2.bf16.msra.mxu1 %v9379_v30  ;;  %5833 = vmatprep.subr.bf16.mxu0 %v9385_v31  ;;  %v9454_v30 = vld [vmem:[%s10748_s12 + $0xb84] ss:$16 sps:$4 sm:$0xff]   ;;  %v9449_v31 = vld [vmem:[%s10748_s12 + $0x980] ss:$16 sps:$4 sm:$0xff]  }
  0x95   : > { %5874 = vmatprep.subr.bf16.mxu1 %v9388_v32  ;;  %v9452_v32 = vld [vmem:[%s10748_s12 + $0xb80] ss:$16 sps:$4 sm:$0xff]  }
  0x96   : > { %5784 = vmatmul.mubr.bf16.vlgmr.msra.gmra.mxu0 %v10920_v33 }
  0x97   : > { %5825 = vmatmul.mubr.bf16.vlgmr.msra.gmra.mxu1 %v10924_v34  ;;  %5834 = vmatpush1.bf16.msra.mxu0 %v9383_v35  ;;  %v9457_v35 = vld [vmem:[%s10748_s12 + $0x964] ss:$16 sps:$4 sm:$0xff]  }
  0x98   : > { %5875 = vmatpush1.bf16.msra.mxu1 %v9386_v36  ;;  %5835 = vmatprep.subr.bf16.mxu0 %v9391_v37  ;;  %v9460_v36 = vld [vmem:[%s10748_s12 + $0xb64] ss:$16 sps:$4 sm:$0xff]   ;;  %v9455_v37 = vld [vmem:[%s10748_s12 + $0x960] ss:$16 sps:$4 sm:$0xff]  }
  0x99   : > { %5876 = vmatprep.subr.bf16.mxu1 %v9394_v39  ;;  %5865 = vmatprep.mubr.bf16.mxu0 %v10945_v49  ;;  %v9463_v39 = vld [vmem:[%s10748_s12 + $0x944] ss:$16 sps:$4 sm:$0xff]  }
  0x9a   : > { %5906 = vmatprep.mubr.bf16.mxu1 %v10951_v53 }
  0x9b   : > { %5836 = vmatpush1.bf16.msra.mxu0 %v9389_v42  ;;  %v9461_v42 = vld [vmem:[%s10748_s12 + $0x940] ss:$16 sps:$4 sm:$0xff]  }
  0x9c   : > { %5877 = vmatpush1.bf16.msra.mxu1 %v9392_v46  ;;  %5837 = vmatprep.subr.bf16.mxu0 %v9397_v47  ;;  %v301_v46 = vld [vmem:[%s10743_s8 + $0x18] sm:$0xff]  ;;  %v9469_v47 = vld [vmem:[%s10748_s12 + $0x924] ss:$16 sps:$4 sm:$0xff]  }
  0x9d   : > { %5878 = vmatprep.subr.bf16.mxu1 %v9400_v48  ;;  %v9472_v48 = vld [vmem:[%s10748_s12 + $0xb24] ss:$16 sps:$4 sm:$0xff]   ;;  %v363_v51 = vcombine.high %v301_v46, %v301_v46 }
  0x9f   : > { %5838 = vmatpush1.bf16.msra.mxu0 %v9395_v52  ;;  %v9467_v52 = vld [vmem:[%s10748_s12 + $0x920] ss:$16 sps:$4 sm:$0xff]  }
  0xa0   : > { %5879 = vmatpush1.bf16.msra.mxu1 %v9398_v55  ;;  %5839 = vmatprep.subr.bf16.mxu0 %v9403_v56  ;;  %v9470_v55 = vld [vmem:[%s10748_s12 + $0xb20] ss:$16 sps:$4 sm:$0xff]   ;;  %v9475_v56 = vld [vmem:[%s10748_s12 + $0x904] ss:$16 sps:$4 sm:$0xff]  }
  0xa1   : > { %5880 = vmatprep.subr.bf16.mxu1 %v9406_v57  ;;  %v9478_v57 = vld [vmem:[%s10748_s12 + $0xb04] ss:$16 sps:$4 sm:$0xff]  }
  0xa3   : > { %5840 = vmatpush1.bf16.msra.mxu0 %v9401_v59  ;;  %v11007_v59 = vrot.slane %v301_v46, %v10798_v50  ;;  %v9528_v46 = vld [vmem:[%s10748_s12 + $0xde0] ss:$16 sps:$4 sm:$0xff]  }
  0xa4   : > { %5881 = vmatpush1.bf16.msra.mxu1 %v9404_v60  ;;  %5841 = vmatprep.subr.bf16.mxu0 %v9409_v61  ;;  %v11010_v60 = vrot.slane %v363_v51, %v10798_v50  ;;  %v9473_v61 = vld [vmem:[%s10748_s12 + $0x900] ss:$16 sps:$4 sm:$0xff]   ;;  %v9539_v51 = vld [vmem:[%s10748_s12 + $0xfc4] ss:$16 sps:$4 sm:$0xff]  }
  0xa5   : > { %5882 = vmatprep.subr.bf16.mxu1 %v9412_v62  ;;  %v9476_v62 = vld [vmem:[%s10748_s12 + $0xb00] ss:$16 sps:$4 sm:$0xff]  }
  0xa7   : > { %5842 = vmatpush1.bf16.msra.mxu0 %v9407_v0  ;;  %v9482_v0 = vld [vmem:[%s10748_s12 + $0xce4] ss:$16 sps:$4 sm:$0xff]  }
  0xa8   : > { %5883 = vmatpush1.bf16.msra.mxu1 %v9410_v1  ;;  %5843 = vmatprep.subr.bf16.mxu0 %v9415_v2  ;;  %v9485_v1 = vld [vmem:[%s10748_s12 + $0xee4] ss:$16 sps:$4 sm:$0xff]   ;;  %v378_v2 = vcombine.high %v11007_v59, %v11007_v59 }
  0xa9   : > { %5884 = vmatprep.subr.bf16.mxu1 %v9418_v3  ;;  %v379_v3 = vcombine.high %v11010_v60, %v11010_v60 }
  0xab   : > { %5844 = vmatpush1.bf16.msra.mxu0 %v9413_v5  ;;  %v11022_v5 = vpack.c.bf16 %v10932_v40, %v10932_v40  ;;  %v11034_v40 = vpack.c.bf16 %v379_v3, %v379_v3  ;;  %v9549_v3 = vld [vmem:[%s10748_s12 + $0xf80] ss:$16 sps:$4 sm:$0xff]  }
  0xac   : > { %5885 = vmatpush1.bf16.msra.mxu1 %v9416_v6  ;;  %5845 = vmatprep.subr.bf16.mxu0 %v9421_v7  ;;  %v11026_v6 = vpack.c.bf16 %v10940_v45, %v10940_v45  ;;  %v9480_v7 = vld [vmem:[%s10748_s12 + $0xce0] ss:$16 sps:$4 sm:$0xff]  }
  0xad   : > { %5886 = vmatprep.subr.bf16.mxu1 %v9424_v8  ;;  %v9483_v8 = vld [vmem:[%s10748_s12 + $0xee0] ss:$16 sps:$4 sm:$0xff]  }
  0xae   : > { %v9486_v45 = vld [vmem:[%s10748_s12 + $0xcc0] ss:$16 sps:$4 sm:$0xff]  }
  0xaf   : > { %5846 = vmatpush1.bf16.msra.mxu0 %v9419_v9  ;;  %v9488_v9 = vld [vmem:[%s10748_s12 + $0xcc4] ss:$16 sps:$4 sm:$0xff]  }
  0xb0   : > { %5887 = vmatpush1.bf16.msra.mxu1 %v9422_v10  ;;  %5847 = vmatprep.subr.bf16.mxu0 %v9427_v11  ;;  %v9491_v10 = vld [vmem:[%s10748_s12 + $0xec4] ss:$16 sps:$4 sm:$0xff]   ;;  %v11032_v11 = vpack.c.bf16 %v378_v2, %v378_v2  ;;  %v9546_v2 = vld [vmem:[%s10748_s12 + $0xd80] ss:$16 sps:$4 sm:$0xff]  }
  0xb1   : > { %5888 = vmatprep.subr.bf16.mxu1 %v9430_v12  ;;  %v9489_v12 = vld [vmem:[%s10748_s12 + $0xec0] ss:$16 sps:$4 sm:$0xff]  }
  0xb3   : > { %5848 = vmatpush1.bf16.msra.mxu0 %v9425_v13  ;;  %v9494_v13 = vld [vmem:[%s10748_s12 + $0xca4] ss:$16 sps:$4 sm:$0xff]  }
  0xb4   : > { %5889 = vmatpush1.bf16.msra.mxu1 %v9428_v14  ;;  %5849 = vmatprep.subr.bf16.mxu0 %v9433_v15  ;;  %v9497_v14 = vld [vmem:[%s10748_s12 + $0xea4] ss:$16 sps:$4 sm:$0xff]   ;;  %v9492_v15 = vld [vmem:[%s10748_s12 + $0xca0] ss:$16 sps:$4 sm:$0xff]  }
  0xb5   : > { %5890 = vmatprep.subr.bf16.mxu1 %v9436_v16  ;;  %v9495_v16 = vld [vmem:[%s10748_s12 + $0xea0] ss:$16 sps:$4 sm:$0xff]  }
  0xb7   : > { %5850 = vmatpush2.bf16.msra.mxu0 %v9431_v19  ;;  %v9500_v19 = vld [vmem:[%s10748_s12 + $0xc84] ss:$16 sps:$4 sm:$0xff]  }
  0xb8   : > { %5891 = vmatpush2.bf16.msra.mxu1 %v9434_v20  ;;  %5851 = vmatprep.subr.bf16.mxu0 %v9439_v21  ;;  %v9503_v20 = vld [vmem:[%s10748_s12 + $0xe84] ss:$16 sps:$4 sm:$0xff]   ;;  %v9498_v21 = vld [vmem:[%s10748_s12 + $0xc80] ss:$16 sps:$4 sm:$0xff]  }
  0xb9   : > { %5892 = vmatprep.subr.bf16.mxu1 %v9442_v22  ;;  %v9501_v22 = vld [vmem:[%s10748_s12 + $0xe80] ss:$16 sps:$4 sm:$0xff]  }
  0xbb   : > { %5852 = vmatpush2.bf16.msra.mxu0 %v9437_v23  ;;  %v9506_v23 = vld [vmem:[%s10748_s12 + $0xc64] ss:$16 sps:$4 sm:$0xff]  }
  0xbc   : > { %5893 = vmatpush2.bf16.msra.mxu1 %v9440_v24  ;;  %5853 = vmatprep.subr.bf16.mxu0 %v9445_v25  ;;  %v9509_v24 = vld [vmem:[%s10748_s12 + $0xe64] ss:$16 sps:$4 sm:$0xff]   ;;  %v9504_v25 = vld [vmem:[%s10748_s12 + $0xc60] ss:$16 sps:$4 sm:$0xff]  }
  0xbd   : > { %5894 = vmatprep.subr.bf16.mxu1 %v9448_v26  ;;  %v9507_v26 = vld [vmem:[%s10748_s12 + $0xe60] ss:$16 sps:$4 sm:$0xff]  }
  0xbf   : > { %5854 = vmatpush2.bf16.msra.mxu0 %v9443_v27  ;;  %v9512_v27 = vld [vmem:[%s10748_s12 + $0xc44] ss:$16 sps:$4 sm:$0xff]  }
  0xc0   : > { %5895 = vmatpush2.bf16.msra.mxu1 %v9446_v28  ;;  %5855 = vmatprep.subr.bf16.mxu0 %v9451_v29  ;;  %v9515_v28 = vld [vmem:[%s10748_s12 + $0xe44] ss:$16 sps:$4 sm:$0xff]   ;;  %v9510_v29 = vld [vmem:[%s10748_s12 + $0xc40] ss:$16 sps:$4 sm:$0xff]  }
  0xc1   : > { %5896 = vmatprep.subr.bf16.mxu1 %v9454_v30  ;;  %v9513_v30 = vld [vmem:[%s10748_s12 + $0xe40] ss:$16 sps:$4 sm:$0xff]  }
  0xc3   : > { %5856 = vmatpush2.bf16.msra.mxu0 %v9449_v31  ;;  %v9518_v31 = vld [vmem:[%s10748_s12 + $0xc24] ss:$16 sps:$4 sm:$0xff]  }
  0xc4   : > { %5897 = vmatpush2.bf16.msra.mxu1 %v9452_v32  ;;  %5857 = vmatprep.subr.bf16.mxu0 %v9457_v35  ;;  %v9521_v32 = vld [vmem:[%s10748_s12 + $0xe24] ss:$16 sps:$4 sm:$0xff]   ;;  %v9516_v35 = vld [vmem:[%s10748_s12 + $0xc20] ss:$16 sps:$4 sm:$0xff]  }
  0xc5   : > { %5898 = vmatprep.subr.bf16.mxu1 %v9460_v36  ;;  %v9519_v36 = vld [vmem:[%s10748_s12 + $0xe20] ss:$16 sps:$4 sm:$0xff]  }
  0xc7   : > { %5858 = vmatpush2.bf16.msra.mxu0 %v9455_v37  ;;  %v9524_v37 = vld [vmem:[%s10748_s12 + $0xc04] ss:$16 sps:$4 sm:$0xff]  }
  0xc8   : > { %5899 = vmatpush2.bf16.msra.mxu1 %v9458_v38  ;;  %5859 = vmatprep.subr.bf16.mxu0 %v9463_v39  ;;  %v9527_v38 = vld [vmem:[%s10748_s12 + $0xe04] ss:$16 sps:$4 sm:$0xff]   ;;  %v9522_v39 = vld [vmem:[%s10748_s12 + $0xc00] ss:$16 sps:$4 sm:$0xff]  }
  0xc9   : > { %5900 = vmatprep.subr.bf16.mxu1 %v9466_v41  ;;  %v9525_v41 = vld [vmem:[%s10748_s12 + $0xe00] ss:$16 sps:$4 sm:$0xff]  }
  0xcb   : > { %5860 = vmatpush2.bf16.msra.mxu0 %v9461_v42  ;;  %v9530_v42 = vld [vmem:[%s10748_s12 + $0xde4] ss:$16 sps:$4 sm:$0xff]  }
  0xcc   : > { %5901 = vmatpush2.bf16.msra.mxu1 %v9464_v43  ;;  %5861 = vmatprep.subr.bf16.mxu0 %v9469_v47  ;;  %v9533_v43 = vld [vmem:[%s10748_s12 + $0xfe4] ss:$16 sps:$4 sm:$0xff]   ;;  %v9531_v47 = vld [vmem:[%s10748_s12 + $0xfe0] ss:$16 sps:$4 sm:$0xff]  }
  0xcd   : > { %5902 = vmatprep.subr.bf16.mxu1 %v9472_v48  ;;  %v9536_v48 = vld [vmem:[%s10748_s12 + $0xdc4] ss:$16 sps:$4 sm:$0xff]  }
  0xcf   : > { %5862 = vmatpush2.bf16.msra.mxu0 %v9467_v52  ;;  %v9534_v52 = vld [vmem:[%s10748_s12 + $0xdc0] ss:$16 sps:$4 sm:$0xff]  }
  0xd0   : > { %5903 = vmatpush2.bf16.msra.mxu1 %v9470_v55  ;;  %5863 = vmatprep.subr.bf16.mxu0 %v9475_v56  ;;  %v9537_v55 = vld [vmem:[%s10748_s12 + $0xfc0] ss:$16 sps:$4 sm:$0xff]   ;;  %v9542_v56 = vld [vmem:[%s10748_s12 + $0xda4] ss:$16 sps:$4 sm:$0xff]  }
  0xd1   : > { %5904 = vmatprep.subr.bf16.mxu1 %v9478_v57  ;;  %v9545_v57 = vld [vmem:[%s10748_s12 + $0xfa4] ss:$16 sps:$4 sm:$0xff]  }
  0xd3   : > { %5864 = vmatpush2.bf16.msra.mxu0 %v9473_v61  ;;  %v9540_v61 = vld [vmem:[%s10748_s12 + $0xda0] ss:$16 sps:$4 sm:$0xff]  }
  0xd4   : > { %5905 = vmatpush2.bf16.msra.mxu1 %v9476_v62  ;;  %5915 = vmatprep.subr.bf16.mxu0 %v9482_v0  ;;  %v9543_v62 = vld [vmem:[%s10748_s12 + $0xfa0] ss:$16 sps:$4 sm:$0xff]   ;;  %v9548_v0 = vld [vmem:[%s10748_s12 + $0xd84] ss:$16 sps:$4 sm:$0xff]  }
  0xd5   : > { %5956 = vmatprep.subr.bf16.mxu1 %v9485_v1  ;;  %v9551_v1 = vld [vmem:[%s10748_s12 + $0xf84] ss:$16 sps:$4 sm:$0xff]  }
  0xd6   : > { %5866 = vmatmul.mubr.bf16.vlgmr.msra.gmra.mxu0 %v11022_v5 }
  0xd7   : > { %5907 = vmatmul.mubr.bf16.vlgmr.msra.gmra.mxu1 %v11026_v6  ;;  %5916 = vmatpush1.bf16.msra.mxu0 %v9480_v7  ;;  %v9554_v7 = vld [vmem:[%s10748_s12 + $0xd64] ss:$16 sps:$4 sm:$0xff]  }
  0xd8   : > { %5957 = vmatpush1.bf16.msra.mxu1 %v9483_v8  ;;  %5917 = vmatprep.subr.bf16.mxu0 %v9488_v9  ;;  %v9557_v8 = vld [vmem:[%s10748_s12 + $0xf64] ss:$16 sps:$4 sm:$0xff]   ;;  %v9552_v9 = vld [vmem:[%s10748_s12 + $0xd60] ss:$16 sps:$4 sm:$0xff]  }
  0xd9   : > { %5958 = vmatprep.subr.bf16.mxu1 %v9491_v10  ;;  %5947 = vmatprep.mubr.bf16.mxu0 %v11032_v11  ;;  %v9555_v10 = vld [vmem:[%s10748_s12 + $0xf60] ss:$16 sps:$4 sm:$0xff]  }
  0xda   : > { %5988 = vmatprep.mubr.bf16.mxu1 %v11034_v40 }
  0xdb   : > { %5918 = vmatpush1.bf16.msra.mxu0 %v9486_v45  ;;  %v9560_v45 = vld [vmem:[%s10748_s12 + $0xd44] ss:$16 sps:$4 sm:$0xff]  }
  0xdc   : > { %5959 = vmatpush1.bf16.msra.mxu1 %v9489_v12  ;;  %5919 = vmatprep.subr.bf16.mxu0 %v9494_v13  ;;  %v9563_v12 = vld [vmem:[%s10748_s12 + $0xf44] ss:$16 sps:$4 sm:$0xff]   ;;  %v9558_v13 = vld [vmem:[%s10748_s12 + $0xd40] ss:$16 sps:$4 sm:$0xff]  }
  0xdd   : > { %5960 = vmatprep.subr.bf16.mxu1 %v9497_v14  ;;  %v302_v14 = vld [vmem:[%s10743_s8 + $0x20] sm:$0xff] }
  0xdf   : > { %5920 = vmatpush1.bf16.msra.mxu0 %v9492_v15  ;;  %v9561_v15 = vld [vmem:[%s10748_s12 + $0xf40] ss:$16 sps:$4 sm:$0xff]  }
  0xe0   : > { %5961 = vmatpush1.bf16.msra.mxu1 %v9495_v16  ;;  %5921 = vmatprep.subr.bf16.mxu0 %v9500_v19  ;;  %v9566_v16 = vld [vmem:[%s10748_s12 + $0xd24] ss:$16 sps:$4 sm:$0xff]  }
  0xe1   : > { %5962 = vmatprep.subr.bf16.mxu1 %v9503_v20  ;;  %v9569_v19 = vld [vmem:[%s10748_s12 + $0xf24] ss:$16 sps:$4 sm:$0xff]   ;;  %v380_v20 = vcombine.high %v302_v14, %v302_v14 }
  0xe3   : > { %5922 = vmatpush1.bf16.msra.mxu0 %v9498_v21  ;;  %v9564_v21 = vld [vmem:[%s10748_s12 + $0xd20] ss:$16 sps:$4 sm:$0xff]  }
  0xe4   : > { %5963 = vmatpush1.bf16.msra.mxu1 %v9501_v22  ;;  %5923 = vmatprep.subr.bf16.mxu0 %v9506_v23  ;;  %v9567_v22 = vld [vmem:[%s10748_s12 + $0xf20] ss:$16 sps:$4 sm:$0xff]   ;;  %v9572_v23 = vld [vmem:[%s10748_s12 + $0xd04] ss:$16 sps:$4 sm:$0xff]  }
  0xe5   : > { %5964 = vmatprep.subr.bf16.mxu1 %v9509_v24  ;;  %v9575_v24 = vld [vmem:[%s10748_s12 + $0xf04] ss:$16 sps:$4 sm:$0xff]  }
  0xe7   : > { %5924 = vmatpush1.bf16.msra.mxu0 %v9504_v25  ;;  %v11098_v25 = vrot.slane %v302_v14, %v10798_v50  ;;  %v9604_v14 = vld [vmem:[%s10748_s12 + $0x1260] ss:$16 sps:$4 sm:$0xff]  }
  0xe8   : > { %5965 = vmatpush1.bf16.msra.mxu1 %v9507_v26  ;;  %5925 = vmatprep.subr.bf16.mxu0 %v9512_v27  ;;  %v11101_v26 = vrot.slane %v380_v20, %v10798_v50  ;;  %v9570_v27 = vld [vmem:[%s10748_s12 + $0xd00] ss:$16 sps:$4 sm:$0xff]  }
  0xe9   : > { %5966 = vmatprep.subr.bf16.mxu1 %v9515_v28  ;;  %v9573_v28 = vld [vmem:[%s10748_s12 + $0xf00] ss:$16 sps:$4 sm:$0xff]  }
  0xea   : > { %v9610_v20 = vld [vmem:[%s10748_s12 + $0x1240] ss:$16 sps:$4 sm:$0xff]  }
  0xeb   : > { %5926 = vmatpush1.bf16.msra.mxu0 %v9510_v29  ;;  %v9579_v29 = vld [vmem:[%s10748_s12 + $0x10e4] ss:$16 sps:$4 sm:$0xff]  }
  0xec   : > { %5967 = vmatpush1.bf16.msra.mxu1 %v9513_v30  ;;  %5927 = vmatprep.subr.bf16.mxu0 %v9518_v31  ;;  %v9582_v30 = vld [vmem:[%s10748_s12 + $0x12e4] ss:$16 sps:$4 sm:$0xff]   ;;  %v395_v31 = vcombine.high %v11098_v25, %v11098_v25 }
  0xed   : > { %5968 = vmatprep.subr.bf16.mxu1 %v9521_v32  ;;  %v396_v32 = vcombine.high %v11101_v26, %v11101_v26 }
  0xef   : > { %5928 = vmatpush1.bf16.msra.mxu0 %v9516_v35  ;;  %v11113_v35 = vpack.c.bf16 %v11007_v59, %v11007_v59  ;;  %v11125_v59 = vpack.c.bf16 %v396_v32, %v396_v32  ;;  %v9630_v32 = vld [vmem:[%s10748_s12 + $0x13e4] ss:$16 sps:$4 sm:$0xff]  }
  0xf0   : > { %5969 = vmatpush1.bf16.msra.mxu1 %v9519_v36  ;;  %5929 = vmatprep.subr.bf16.mxu0 %v9524_v37  ;;  %v11117_v36 = vpack.c.bf16 %v11010_v60, %v11010_v60  ;;  %v9577_v37 = vld [vmem:[%s10748_s12 + $0x10e0] ss:$16 sps:$4 sm:$0xff]  }
  0xf1   : > { %5970 = vmatprep.subr.bf16.mxu1 %v9527_v38  ;;  %v9580_v38 = vld [vmem:[%s10748_s12 + $0x12e0] ss:$16 sps:$4 sm:$0xff]  }
  0xf2   : > { %v9583_v60 = vld [vmem:[%s10748_s12 + $0x10c0] ss:$16 sps:$4 sm:$0xff]  }
  0xf3   : > { %5930 = vmatpush1.bf16.msra.mxu0 %v9522_v39  ;;  %v9585_v39 = vld [vmem:[%s10748_s12 + $0x10c4] ss:$16 sps:$4 sm:$0xff]  }
  0xf4   : > { %5971 = vmatpush1.bf16.msra.mxu1 %v9525_v41  ;;  %5931 = vmatprep.subr.bf16.mxu0 %v9530_v42  ;;  %v9588_v41 = vld [vmem:[%s10748_s12 + $0x12c4] ss:$16 sps:$4 sm:$0xff]   ;;  %v11123_v42 = vpack.c.bf16 %v395_v31, %v395_v31 }
  0xf5   : > { %5972 = vmatprep.subr.bf16.mxu1 %v9533_v43  ;;  %v9627_v31 = vld [vmem:[%s10748_s12 + $0x11e4] ss:$16 sps:$4 sm:$0xff]  }
  0xf7   : > { %5932 = vmatpush2.bf16.msra.mxu0 %v9528_v46 }
  0xf8   : > { %5973 = vmatpush2.bf16.msra.mxu1 %v9531_v47  ;;  %5933 = vmatprep.subr.bf16.mxu0 %v9536_v48  ;;  %v9586_v48 = vld [vmem:[%s10748_s12 + $0x12c0] ss:$16 sps:$4 sm:$0xff]  }
  0xf9   : > { %5974 = vmatprep.subr.bf16.mxu1 %v9539_v51  ;;  %v9591_v51 = vld [vmem:[%s10748_s12 + $0x10a4] ss:$16 sps:$4 sm:$0xff]  }
  0xfb   : > { %5934 = vmatpush2.bf16.msra.mxu0 %v9534_v52 }
  0xfc   : > { %5975 = vmatpush2.bf16.msra.mxu1 %v9537_v55  ;;  %5935 = vmatprep.subr.bf16.mxu0 %v9542_v56  ;;  %v9594_v56 = vld [vmem:[%s10748_s12 + $0x12a4] ss:$16 sps:$4 sm:$0xff]  }
  0xfd   : > { %5976 = vmatprep.subr.bf16.mxu1 %v9545_v57 }
  0xff   : > { %5936 = vmatpush2.bf16.msra.mxu0 %v9540_v61  ;;  %v9589_v61 = vld [vmem:[%s10748_s12 + $0x10a0] ss:$16 sps:$4 sm:$0xff]  }
 0x100   : > { %5977 = vmatpush2.bf16.msra.mxu1 %v9543_v62  ;;  %5937 = vmatprep.subr.bf16.mxu0 %v9548_v0 }
 0x101   : > { %5978 = vmatprep.subr.bf16.mxu1 %v9551_v1  ;;  %v9592_v1 = vld [vmem:[%s10748_s12 + $0x12a0] ss:$16 sps:$4 sm:$0xff]  }
 0x103   : > { %5938 = vmatpush2.bf16.msra.mxu0 %v9546_v2 }
 0x104   : > { %5979 = vmatpush2.bf16.msra.mxu1 %v9549_v3  ;;  %5939 = vmatprep.subr.bf16.mxu0 %v9554_v7  ;;  %v9597_v7 = vld [vmem:[%s10748_s12 + $0x1084] ss:$16 sps:$4 sm:$0xff]  }
 0x105   : > { %5980 = vmatprep.subr.bf16.mxu1 %v9557_v8  ;;  %v9600_v8 = vld [vmem:[%s10748_s12 + $0x1284] ss:$16 sps:$4 sm:$0xff]  }
 0x107   : > { %5940 = vmatpush2.bf16.msra.mxu0 %v9552_v9  ;;  %v9595_v9 = vld [vmem:[%s10748_s12 + $0x1080] ss:$16 sps:$4 sm:$0xff]  }
 0x108   : > { %5981 = vmatpush2.bf16.msra.mxu1 %v9555_v10  ;;  %5941 = vmatprep.subr.bf16.mxu0 %v9560_v45  ;;  %v9598_v10 = vld [vmem:[%s10748_s12 + $0x1280] ss:$16 sps:$4 sm:$0xff]   ;;  %v9603_v45 = vld [vmem:[%s10748_s12 + $0x1064] ss:$16 sps:$4 sm:$0xff]  }
 0x109   : > { %5982 = vmatprep.subr.bf16.mxu1 %v9563_v12  ;;  %v9606_v12 = vld [vmem:[%s10748_s12 + $0x1264] ss:$16 sps:$4 sm:$0xff]  }
 0x10b   : > { %5942 = vmatpush2.bf16.msra.mxu0 %v9558_v13  ;;  %v9601_v13 = vld [vmem:[%s10748_s12 + $0x1060] ss:$16 sps:$4 sm:$0xff]  }
 0x10c   : > { %5983 = vmatpush2.bf16.msra.mxu1 %v9561_v15  ;;  %5943 = vmatprep.subr.bf16.mxu0 %v9566_v16  ;;  %v9609_v15 = vld [vmem:[%s10748_s12 + $0x1044] ss:$16 sps:$4 sm:$0xff]  }
 0x10d   : > { %5984 = vmatprep.subr.bf16.mxu1 %v9569_v19  ;;  %v9612_v16 = vld [vmem:[%s10748_s12 + $0x1244] ss:$16 sps:$4 sm:$0xff]   ;;  %v9607_v19 = vld [vmem:[%s10748_s12 + $0x1040] ss:$16 sps:$4 sm:$0xff]  }
 0x10f   : > { %5944 = vmatpush2.bf16.msra.mxu0 %v9564_v21  ;;  %v9615_v21 = vld [vmem:[%s10748_s12 + $0x1024] ss:$16 sps:$4 sm:$0xff]  }
 0x110   : > { %5985 = vmatpush2.bf16.msra.mxu1 %v9567_v22  ;;  %5945 = vmatprep.subr.bf16.mxu0 %v9572_v23  ;;  %v9618_v22 = vld [vmem:[%s10748_s12 + $0x1224] ss:$16 sps:$4 sm:$0xff]   ;;  %v9613_v23 = vld [vmem:[%s10748_s12 + $0x1020] ss:$16 sps:$4 sm:$0xff]  }
 0x111   : > { %5986 = vmatprep.subr.bf16.mxu1 %v9575_v24  ;;  %v9616_v24 = vld [vmem:[%s10748_s12 + $0x1220] ss:$16 sps:$4 sm:$0xff]  }
 0x113   : > { %5946 = vmatpush2.bf16.msra.mxu0 %v9570_v27  ;;  %v9621_v27 = vld [vmem:[%s10748_s12 + $0x1004] ss:$16 sps:$4 sm:$0xff]  }
 0x114   : > { %5987 = vmatpush2.bf16.msra.mxu1 %v9573_v28  ;;  %5997 = vmatprep.subr.bf16.mxu0 %v9579_v29  ;;  %v9624_v28 = vld [vmem:[%s10748_s12 + $0x1204] ss:$16 sps:$4 sm:$0xff]   ;;  %v9619_v29 = vld [vmem:[%s10748_s12 + $0x1000] ss:$16 sps:$4 sm:$0xff]  }
 0x115   : > { %6038 = vmatprep.subr.bf16.mxu1 %v9582_v30  ;;  %v9622_v30 = vld [vmem:[%s10748_s12 + $0x1200] ss:$16 sps:$4 sm:$0xff]  }
 0x116   : > { %v5703_v43 = vpop.f32.mrf.mxu0  ;;  %5948 = vmatmul.mubr.bf16.vlgmr.msra.gmra.mxu0 %v11113_v35 }
 0x117   : > { %v5744_v46 = vpop.f32.mrf.mxu1  ;;  %5989 = vmatmul.mubr.bf16.vlgmr.msra.gmra.mxu1 %v11117_v36  ;;  %5998 = vmatpush1.bf16.msra.mxu0 %v9577_v37  ;;  %v9625_v37 = vld [vmem:[%s10748_s12 + $0x11e0] ss:$16 sps:$4 sm:$0xff]  }
 0x118   : > { %v11130_v47 = vadd.f32 %v5744_v46, %v5703_v43  ;;  %6039 = vmatpush1.bf16.msra.mxu1 %v9580_v38  ;;  %v5705_v52 = vpop.f32.mrf.mxu0  ;;  %5999 = vmatprep.subr.bf16.mxu0 %v9585_v39  ;;  %v9628_v38 = vld [vmem:[%s10748_s12 + $0x13e0] ss:$16 sps:$4 sm:$0xff]   ;;  %v9633_v39 = vld [vmem:[%s10748_s12 + $0x11c4] ss:$16 sps:$4 sm:$0xff]  }
 0x119   : > { %v5746_v55 = vpop.f32.mrf.mxu1  ;;  %6040 = vmatprep.subr.bf16.mxu1 %v9588_v41  ;;  %6029 = vmatprep.mubr.bf16.mxu0 %v11123_v42  ;;  %v9636_v41 = vld [vmem:[%s10748_s12 + $0x13c4] ss:$16 sps:$4 sm:$0xff]   ;;  %v9631_v43 = vld [vmem:[%s10748_s12 + $0x11c0] ss:$16 sps:$4 sm:$0xff]  }
 0x11a   : > { %v11135_v57 = vadd.f32 %v5746_v55, %v5705_v52  ;;  %6070 = vmatprep.mubr.bf16.mxu1 %v11125_v59  ;;  %v5707_v62 = vpop.f32.mrf.mxu0  ;;  %v9634_v46 = vld [vmem:[%s10748_s12 + $0x13c0] ss:$16 sps:$4 sm:$0xff]   ;;  %v9645_v55 = vld [vmem:[%s10748_s12 + $0x1184] ss:$16 sps:$4 sm:$0xff]  }
 0x11b   : > { %v5748_v0 = vpop.f32.mrf.mxu1  ;;  %6000 = vmatpush1.bf16.msra.mxu0 %v9583_v60  ;;  %v9639_v60 = vld [vmem:[%s10748_s12 + $0x11a4] ss:$16 sps:$4 sm:$0xff]   ;;  %v9640_v52 = vld [vmem:[%s10748_s12 + $0x13a0] ss:$16 sps:$4 sm:$0xff]  }
 0x11c   : > { %6041 = vmatpush1.bf16.msra.mxu1 %v9586_v48  ;;  %v5708_v2 = vpop.f32.mrf.mxu0  ;;  %6001 = vmatprep.subr.bf16.mxu0 %v9591_v51  ;;  %v9642_v48 = vld [vmem:[%s10748_s12 + $0x13a4] ss:$16 sps:$4 sm:$0xff]   ;;  %v9637_v51 = vld [vmem:[%s10748_s12 + $0x11a0] ss:$16 sps:$4 sm:$0xff]  }
 0x11d   : > { %v5749_v3 = vpop.f32.mrf.mxu1  ;;  %6042 = vmatprep.subr.bf16.mxu1 %v9594_v56  ;;  %v9648_v56 = vld [vmem:[%s10748_s12 + $0x1384] ss:$16 sps:$4 sm:$0xff]   ;;  %v9646_v62 = vld [vmem:[%s10748_s12 + $0x1380] ss:$16 sps:$4 sm:$0xff]  }
 0x11e   : > { %v9651_v0 = vld [vmem:[%s10748_s12 + $0x1164] ss:$16 sps:$4 sm:$0xff]   ;;  %v9649_v2 = vld [vmem:[%s10748_s12 + $0x1160] ss:$16 sps:$4 sm:$0xff]  }
 0x11f   : > { %6002 = vmatpush1.bf16.msra.mxu0 %v9589_v61  ;;  %v9643_v61 = vld [vmem:[%s10748_s12 + $0x1180] ss:$16 sps:$4 sm:$0xff]  }
 0x120   : > { %6043 = vmatpush1.bf16.msra.mxu1 %v9592_v1  ;;  %6003 = vmatprep.subr.bf16.mxu0 %v9597_v7  ;;  %v9654_v1 = vld [vmem:[%s10748_s12 + $0x1364] ss:$16 sps:$4 sm:$0xff]   ;;  %v9652_v3 = vld [vmem:[%s10748_s12 + $0x1360] ss:$16 sps:$4 sm:$0xff]  }
 0x121   : > { %6044 = vmatprep.subr.bf16.mxu1 %v9600_v8  ;;  %v9657_v7 = vld [vmem:[%s10748_s12 + $0x1144] ss:$16 sps:$4 sm:$0xff]  }
 0x122   : > { %v9660_v8 = vld [vmem:[%s10748_s12 + $0x1344] ss:$16 sps:$4 sm:$0xff]  }
 0x123   : > { %6004 = vmatpush1.bf16.msra.mxu0 %v9595_v9  ;;  %v303_v9 = vld [vmem:[%s10743_s8 + $0x28] sm:$0xff] }
 0x124   : > { %6045 = vmatpush1.bf16.msra.mxu1 %v9598_v10  ;;  %6005 = vmatprep.subr.bf16.mxu0 %v9603_v45  ;;  %v9655_v10 = vld [vmem:[%s10748_s12 + $0x1140] ss:$16 sps:$4 sm:$0xff]  }
 0x125   : > { %6046 = vmatprep.subr.bf16.mxu1 %v9606_v12  ;;  %v9658_v45 = vld [vmem:[%s10748_s12 + $0x1340] ss:$16 sps:$4 sm:$0xff]   ;;  %v9663_v12 = vld [vmem:[%s10748_s12 + $0x1124] ss:$16 sps:$4 sm:$0xff]  }
 0x127   : > { %6006 = vmatpush1.bf16.msra.mxu0 %v9601_v13  ;;  %v9666_v13 = vld [vmem:[%s10748_s12 + $0x1324] ss:$16 sps:$4 sm:$0xff]  }
 0x128   : > { %6047 = vmatpush1.bf16.msra.mxu1 %v9604_v14  ;;  %6007 = vmatprep.subr.bf16.mxu0 %v9609_v15  ;;  %v397_v14 = vcombine.high %v303_v9, %v303_v9  ;;  %v9661_v15 = vld [vmem:[%s10748_s12 + $0x1120] ss:$16 sps:$4 sm:$0xff]  }
 0x129   : > { %6048 = vmatprep.subr.bf16.mxu1 %v9612_v16  ;;  %v9664_v16 = vld [vmem:[%s10748_s12 + $0x1320] ss:$16 sps:$4 sm:$0xff]  }
 0x12b   : > { %6008 = vmatpush1.bf16.msra.mxu0 %v9607_v19  ;;  %v9669_v19 = vld [vmem:[%s10748_s12 + $0x1104] ss:$16 sps:$4 sm:$0xff]  }
 0x12c   : > { %6049 = vmatpush1.bf16.msra.mxu1 %v9610_v20  ;;  %6009 = vmatprep.subr.bf16.mxu0 %v9615_v21  ;;  %v9672_v20 = vld [vmem:[%s10748_s12 + $0x1304] ss:$16 sps:$4 sm:$0xff]   ;;  %v11193_v21 = vrot.slane %v303_v9, %v10798_v50 }
 0x12d   : > { %6050 = vmatprep.subr.bf16.mxu1 %v9618_v22  ;;  %v11196_v22 = vrot.slane %v397_v14, %v10798_v50  ;;  %v9703_v14 = vld [vmem:[%s10748_s12 + $0x1664] ss:$16 sps:$4 sm:$0xff]  }
 0x12f   : > { %6010 = vmatpush1.bf16.msra.mxu0 %v9613_v23  ;;  %v9667_v23 = vld [vmem:[%s10748_s12 + $0x1100] ss:$16 sps:$4 sm:$0xff]  }
 0x130   : > { %6051 = vmatpush1.bf16.msra.mxu1 %v9616_v24  ;;  %6011 = vmatprep.subr.bf16.mxu0 %v9621_v27  ;;  %v9670_v24 = vld [vmem:[%s10748_s12 + $0x1300] ss:$16 sps:$4 sm:$0xff]   ;;  %v9676_v27 = vld [vmem:[%s10748_s12 + $0x14e4] ss:$16 sps:$4 sm:$0xff]  }
 0x131   : > { %6052 = vmatprep.subr.bf16.mxu1 %v9624_v28  ;;  %v9679_v28 = vld [vmem:[%s10748_s12 + $0x16e4] ss:$16 sps:$4 sm:$0xff]  }
 0x133   : > { %6012 = vmatpush1.bf16.msra.mxu0 %v9619_v29  ;;  %v9674_v29 = vld [vmem:[%s10748_s12 + $0x14e0] ss:$16 sps:$4 sm:$0xff]  }
 0x134   : > { %6053 = vmatpush1.bf16.msra.mxu1 %v9622_v30  ;;  %6013 = vmatprep.subr.bf16.mxu0 %v9627_v31  ;;  %v9677_v30 = vld [vmem:[%s10748_s12 + $0x16e0] ss:$16 sps:$4 sm:$0xff]   ;;  %v412_v31 = vcombine.high %v11193_v21, %v11193_v21 }
 0x135   : > { %6054 = vmatprep.subr.bf16.mxu1 %v9630_v32  ;;  %v413_v32 = vcombine.high %v11196_v22, %v11196_v22 }
 0x137   : > { %6014 = vmatpush2.bf16.msra.mxu0 %v9625_v37  ;;  %v11210_v37 = vpack.c.bf16 %v11098_v25, %v11098_v25 }
 0x138   : > { %6055 = vmatpush2.bf16.msra.mxu1 %v9628_v38  ;;  %6015 = vmatprep.subr.bf16.mxu0 %v9633_v39  ;;  %v11214_v38 = vpack.c.bf16 %v11101_v26, %v11101_v26  ;;  %v9682_v39 = vld [vmem:[%s10748_s12 + $0x14c4] ss:$16 sps:$4 sm:$0xff]  }
 0x139   : > { %6056 = vmatprep.subr.bf16.mxu1 %v9636_v41  ;;  %v9685_v41 = vld [vmem:[%s10748_s12 + $0x16c4] ss:$16 sps:$4 sm:$0xff]  }
 0x13b   : > { %6016 = vmatpush2.bf16.msra.mxu0 %v9631_v43  ;;  %v9680_v43 = vld [vmem:[%s10748_s12 + $0x14c0] ss:$16 sps:$4 sm:$0xff]  }
 0x13c   : > { %6057 = vmatpush2.bf16.msra.mxu1 %v9634_v46  ;;  %6017 = vmatprep.subr.bf16.mxu0 %v9639_v60  ;;  %v9683_v46 = vld [vmem:[%s10748_s12 + $0x16c0] ss:$16 sps:$4 sm:$0xff]   ;;  %v11220_v60 = vpack.c.bf16 %v412_v31, %v412_v31  ;;  %v9718_v31 = vld [vmem:[%s10748_s12 + $0x1404] ss:$16 sps:$4 sm:$0xff]  }
 0x13d   : > { %6058 = vmatprep.subr.bf16.mxu1 %v9642_v48  ;;  %v11222_v48 = vpack.c.bf16 %v413_v32, %v413_v32  ;;  %v9721_v32 = vld [vmem:[%s10748_s12 + $0x1604] ss:$16 sps:$4 sm:$0xff]  }
 0x13f   : > { %6018 = vmatpush2.bf16.msra.mxu0 %v9637_v51 }
 0x140   : > { %6059 = vmatpush2.bf16.msra.mxu1 %v9640_v52  ;;  %6019 = vmatprep.subr.bf16.mxu0 %v9645_v55 }
 0x141   : > { %6060 = vmatprep.subr.bf16.mxu1 %v9648_v56  ;;  %v9688_v56 = vld [vmem:[%s10748_s12 + $0x14a4] ss:$16 sps:$4 sm:$0xff]  }
 0x143   : > { %6020 = vmatpush2.bf16.msra.mxu0 %v9643_v61  ;;  %v9691_v61 = vld [vmem:[%s10748_s12 + $0x16a4] ss:$16 sps:$4 sm:$0xff]  }
 0x144   : > { %6061 = vmatpush2.bf16.msra.mxu1 %v9646_v62  ;;  %6021 = vmatprep.subr.bf16.mxu0 %v9651_v0 }
 0x145   : > { %6062 = vmatprep.subr.bf16.mxu1 %v9654_v1  ;;  %v9686_v1 = vld [vmem:[%s10748_s12 + $0x14a0] ss:$16 sps:$4 sm:$0xff]  }
 0x147   : > { %6022 = vmatpush2.bf16.msra.mxu0 %v9649_v2  ;;  %v9689_v2 = vld [vmem:[%s10748_s12 + $0x16a0] ss:$16 sps:$4 sm:$0xff]  }
 0x148   : > { %6063 = vmatpush2.bf16.msra.mxu1 %v9652_v3  ;;  %6023 = vmatprep.subr.bf16.mxu0 %v9657_v7 }
 0x149   : > { %6064 = vmatprep.subr.bf16.mxu1 %v9660_v8 }
 0x14b   : > { %6024 = vmatpush2.bf16.msra.mxu0 %v9655_v10  ;;  %v9697_v10 = vld [vmem:[%s10748_s12 + $0x1684] ss:$16 sps:$4 sm:$0xff]  }
 0x14c   : > { %6065 = vmatpush2.bf16.msra.mxu1 %v9658_v45  ;;  %6025 = vmatprep.subr.bf16.mxu0 %v9663_v12  ;;  %v9692_v45 = vld [vmem:[%s10748_s12 + $0x1480] ss:$16 sps:$4 sm:$0xff]  }
 0x14d   : > { %6066 = vmatprep.subr.bf16.mxu1 %v9666_v13  ;;  %v9695_v12 = vld [vmem:[%s10748_s12 + $0x1680] ss:$16 sps:$4 sm:$0xff]   ;;  %v9700_v13 = vld [vmem:[%s10748_s12 + $0x1464] ss:$16 sps:$4 sm:$0xff]  }
 0x14f   : > { %6026 = vmatpush2.bf16.msra.mxu0 %v9661_v15  ;;  %v9698_v15 = vld [vmem:[%s10748_s12 + $0x1460] ss:$16 sps:$4 sm:$0xff]  }
 0x150   : > { %6067 = vmatpush2.bf16.msra.mxu1 %v9664_v16  ;;  %6027 = vmatprep.subr.bf16.mxu0 %v9669_v19  ;;  %v9701_v16 = vld [vmem:[%s10748_s12 + $0x1660] ss:$16 sps:$4 sm:$0xff]   ;;  %v9706_v19 = vld [vmem:[%s10748_s12 + $0x1444] ss:$16 sps:$4 sm:$0xff]  }
 0x151   : > { %6068 = vmatprep.subr.bf16.mxu1 %v9672_v20  ;;  %v9709_v20 = vld [vmem:[%s10748_s12 + $0x1644] ss:$16 sps:$4 sm:$0xff]  }
 0x153   : > { %6028 = vmatpush2.bf16.msra.mxu0 %v9667_v23  ;;  %v9704_v23 = vld [vmem:[%s10748_s12 + $0x1440] ss:$16 sps:$4 sm:$0xff]  }
 0x154   : > { %6069 = vmatpush2.bf16.msra.mxu1 %v9670_v24  ;;  %6079 = vmatprep.subr.bf16.mxu0 %v9676_v27  ;;  %v9707_v24 = vld [vmem:[%s10748_s12 + $0x1640] ss:$16 sps:$4 sm:$0xff]   ;;  %v9712_v27 = vld [vmem:[%s10748_s12 + $0x1424] ss:$16 sps:$4 sm:$0xff]  }
 0x155   : > { %6120 = vmatprep.subr.bf16.mxu1 %v9679_v28  ;;  %v9715_v28 = vld [vmem:[%s10748_s12 + $0x1624] ss:$16 sps:$4 sm:$0xff]  }
 0x156   : > { %v5785_v25 = vpop.f32.mrf.mxu0  ;;  %6030 = vmatmul.mubr.bf16.vlgmr.msra.gmra.mxu0 %v11210_v37 }
 0x157   : > { %v5826_v51 = vpop.f32.mrf.mxu1  ;;  %6071 = vmatmul.mubr.bf16.vlgmr.msra.gmra.mxu1 %v11214_v38  ;;  %v5786_v26 = vadd.f32 %v5785_v25, %v11130_v47  ;;  %6080 = vmatpush1.bf16.msra.mxu0 %v9674_v29  ;;  %v9710_v29 = vld [vmem:[%s10748_s12 + $0x1420] ss:$16 sps:$4 sm:$0xff]  }
 0x158   : > { %6121 = vmatpush1.bf16.msra.mxu1 %v9677_v30  ;;  %v5787_v52 = vpop.f32.mrf.mxu0  ;;  %6081 = vmatprep.subr.bf16.mxu0 %v9682_v39  ;;  %v9713_v30 = vld [vmem:[%s10748_s12 + $0x1620] ss:$16 sps:$4 sm:$0xff]  }
 0x159   : > { %v5828_v55 = vpop.f32.mrf.mxu1  ;;  %6122 = vmatprep.subr.bf16.mxu1 %v9685_v41  ;;  %v11229_v62 = vadd.f32 %v5826_v51, %v5786_v26  ;;  %v5788_v0 = vadd.f32 %v5787_v52, %v11135_v57  ;;  %6111 = vmatprep.mubr.bf16.mxu0 %v11220_v60  ;;  %v9694_v57 = vld [vmem:[%s10748_s12 + $0x1484] ss:$16 sps:$4 sm:$0xff]   ;;  %v9716_v39 = vld [vmem:[%s10748_s12 + $0x1400] ss:$16 sps:$4 sm:$0xff]  }
 0x15a   : > { %6152 = vmatprep.mubr.bf16.mxu1 %v11222_v48  ;;  %v5789_v47 = vpop.f32.mrf.mxu0  ;;  %v9719_v41 = vld [vmem:[%s10748_s12 + $0x1600] ss:$16 sps:$4 sm:$0xff]   ;;  %v9730_v26 = vld [vmem:[%s10748_s12 + $0x15c4] ss:$16 sps:$4 sm:$0xff]  }
 0x15b   : > { %v5830_v3 = vpop.f32.mrf.mxu1  ;;  %v11236_v7 = vadd.f32 %v5828_v55, %v5788_v0  ;;  %6082 = vmatpush1.bf16.msra.mxu0 %v9680_v43  ;;  %v9724_v43 = vld [vmem:[%s10748_s12 + $0x15e4] ss:$16 sps:$4 sm:$0xff]   ;;  %v9722_v25 = vld [vmem:[%s10748_s12 + $0x15e0] ss:$16 sps:$4 sm:$0xff]  }
 0x15c   : > { %6123 = vmatpush1.bf16.msra.mxu1 %v9683_v46  ;;  %v5790_v8 = vpop.f32.mrf.mxu0  ;;  %6083 = vmatprep.subr.bf16.mxu0 %v9688_v56  ;;  %v9727_v46 = vld [vmem:[%s10748_s12 + $0x17e4] ss:$16 sps:$4 sm:$0xff]   ;;  %v9725_v51 = vld [vmem:[%s10748_s12 + $0x17e0] ss:$16 sps:$4 sm:$0xff]  }
 0x15d   : > { %v5831_v9 = vpop.f32.mrf.mxu1  ;;  %6124 = vmatprep.subr.bf16.mxu1 %v9691_v61  ;;  %v9733_v52 = vld [vmem:[%s10748_s12 + $0x17c4] ss:$16 sps:$4 sm:$0xff]   ;;  %v9728_v55 = vld [vmem:[%s10748_s12 + $0x15c0] ss:$16 sps:$4 sm:$0xff]  }
 0x15e   : > { %v9731_v56 = vld [vmem:[%s10748_s12 + $0x17c0] ss:$16 sps:$4 sm:$0xff]   ;;  %v9736_v61 = vld [vmem:[%s10748_s12 + $0x15a4] ss:$16 sps:$4 sm:$0xff]  }
 0x15f   : > { %6084 = vmatpush1.bf16.msra.mxu0 %v9686_v1  ;;  %v9739_v0 = vld [vmem:[%s10748_s12 + $0x17a4] ss:$16 sps:$4 sm:$0xff]   ;;  %v9734_v1 = vld [vmem:[%s10748_s12 + $0x15a0] ss:$16 sps:$4 sm:$0xff]  }
 0x160   : > { %6125 = vmatpush1.bf16.msra.mxu1 %v9689_v2  ;;  %6085 = vmatprep.subr.bf16.mxu0 %v9694_v57  ;;  %v9737_v2 = vld [vmem:[%s10748_s12 + $0x17a0] ss:$16 sps:$4 sm:$0xff]   ;;  %v9742_v47 = vld [vmem:[%s10748_s12 + $0x1584] ss:$16 sps:$4 sm:$0xff]  }
 0x161   : > { %6126 = vmatprep.subr.bf16.mxu1 %v9697_v10  ;;  %v9745_v3 = vld [vmem:[%s10748_s12 + $0x1784] ss:$16 sps:$4 sm:$0xff]   ;;  %v9740_v8 = vld [vmem:[%s10748_s12 + $0x1580] ss:$16 sps:$4 sm:$0xff]  }
 0x162   : > { %v9743_v9 = vld [vmem:[%s10748_s12 + $0x1780] ss:$16 sps:$4 sm:$0xff]   ;;  %v9748_v57 = vld [vmem:[%s10748_s12 + $0x1564] ss:$16 sps:$4 sm:$0xff]  }
 0x163   : > { %6086 = vmatpush1.bf16.msra.mxu0 %v9692_v45  ;;  %v9751_v10 = vld [vmem:[%s10748_s12 + $0x1764] ss:$16 sps:$4 sm:$0xff]   ;;  %v9746_v45 = vld [vmem:[%s10748_s12 + $0x1560] ss:$16 sps:$4 sm:$0xff]  }
 0x164   : > { %6127 = vmatpush1.bf16.msra.mxu1 %v9695_v12  ;;  %6087 = vmatprep.subr.bf16.mxu0 %v9700_v13  ;;  %v9749_v12 = vld [vmem:[%s10748_s12 + $0x1760] ss:$16 sps:$4 sm:$0xff]   ;;  %v9754_v13 = vld [vmem:[%s10748_s12 + $0x1544] ss:$16 sps:$4 sm:$0xff]  }
 0x165   : > { %6128 = vmatprep.subr.bf16.mxu1 %v9703_v14  ;;  %v9757_v14 = vld [vmem:[%s10748_s12 + $0x1744] ss:$16 sps:$4 sm:$0xff]  }
 0x167   : > { %6088 = vmatpush1.bf16.msra.mxu0 %v9698_v15  ;;  %v9752_v15 = vld [vmem:[%s10748_s12 + $0x1540] ss:$16 sps:$4 sm:$0xff]  }
 0x168   : > { %6129 = vmatpush1.bf16.msra.mxu1 %v9701_v16  ;;  %6089 = vmatprep.subr.bf16.mxu0 %v9706_v19  ;;  %v9755_v16 = vld [vmem:[%s10748_s12 + $0x1740] ss:$16 sps:$4 sm:$0xff]   ;;  %v9760_v19 = vld [vmem:[%s10748_s12 + $0x1524] ss:$16 sps:$4 sm:$0xff]  }
 0x169   : > { %6130 = vmatprep.subr.bf16.mxu1 %v9709_v20  ;;  %v9763_v20 = vld [vmem:[%s10748_s12 + $0x1724] ss:$16 sps:$4 sm:$0xff]  }
 0x16b   : > { %6090 = vmatpush1.bf16.msra.mxu0 %v9704_v23  ;;  %v9758_v23 = vld [vmem:[%s10748_s12 + $0x1520] ss:$16 sps:$4 sm:$0xff]  }
 0x16c   : > { %6131 = vmatpush1.bf16.msra.mxu1 %v9707_v24  ;;  %6091 = vmatprep.subr.bf16.mxu0 %v9712_v27  ;;  %v9761_v24 = vld [vmem:[%s10748_s12 + $0x1720] ss:$16 sps:$4 sm:$0xff]   ;;  %v9766_v27 = vld [vmem:[%s10748_s12 + $0x1504] ss:$16 sps:$4 sm:$0xff]  }
 0x16d   : > { %6132 = vmatprep.subr.bf16.mxu1 %v9715_v28  ;;  %v9769_v28 = vld [vmem:[%s10748_s12 + $0x1704] ss:$16 sps:$4 sm:$0xff]  }
 0x16f   : > { %6092 = vmatpush1.bf16.msra.mxu0 %v9710_v29  ;;  %v11289_v29 = vld [vmem:[%s10743_s8 + $0x30] sm:$0x3f] }
 0x170   : > { %6133 = vmatpush1.bf16.msra.mxu1 %v9713_v30  ;;  %6093 = vmatprep.subr.bf16.mxu0 %v9718_v31  ;;  %v11293_v30 = vrot.slane %v11289_v29, %v10798_v50  ;;  %v9764_v31 = vld [vmem:[%s10748_s12 + $0x1500] ss:$16 sps:$4 sm:$0xff]  }
 0x171   : > { %6134 = vmatprep.subr.bf16.mxu1 %v9721_v32  ;;  %v9767_v32 = vld [vmem:[%s10748_s12 + $0x1700] ss:$16 sps:$4 sm:$0xff]  }
 0x173   : > { %6094 = vmatpush1.bf16.msra.mxu0 %v9716_v39  ;;  %v9773_v39 = vld [vmem:[%s10748_s12 + $0x18e4] ss:$16 sps:$4 sm:$0xff]  }
 0x174   : > { %6135 = vmatpush1.bf16.msra.mxu1 %v9719_v41  ;;  %6095 = vmatprep.subr.bf16.mxu0 %v9724_v43  ;;  %v9776_v41 = vld [vmem:[%s10748_s12 + $0x1ae4] ss:$16 sps:$4 sm:$0xff]   ;;  %v9771_v43 = vld [vmem:[%s10748_s12 + $0x18e0] ss:$16 sps:$4 sm:$0xff]  }
 0x175   : > { %6136 = vmatprep.subr.bf16.mxu1 %v9727_v46  ;;  %v9774_v46 = vld [vmem:[%s10748_s12 + $0x1ae0] ss:$16 sps:$4 sm:$0xff]  }
 0x177   : > { %6096 = vmatpush2.bf16.msra.mxu0 %v9722_v25  ;;  %v429_v25 = vcombine.high %v11293_v30, %v11293_v30 }
 0x178   : > { %6137 = vmatpush2.bf16.msra.mxu1 %v9725_v51  ;;  %6097 = vmatprep.subr.bf16.mxu0 %v9730_v26  ;;  %v11305_v51 = vpack.c.bf16 %v11193_v21, %v11193_v21  ;;  %v11309_v26 = vpack.c.bf16 %v11196_v22, %v11196_v22 }
 0x179   : > { %6138 = vmatprep.subr.bf16.mxu1 %v9733_v52  ;;  %v9779_v52 = vld [vmem:[%s10748_s12 + $0x18c4] ss:$16 sps:$4 sm:$0xff]  }
 0x17b   : > { %6098 = vmatpush2.bf16.msra.mxu0 %v9728_v55  ;;  %v9782_v55 = vld [vmem:[%s10748_s12 + $0x1ac4] ss:$16 sps:$4 sm:$0xff]  }
 0x17c   : > { %6139 = vmatpush2.bf16.msra.mxu1 %v9731_v56  ;;  %6099 = vmatprep.subr.bf16.mxu0 %v9736_v61  ;;  %v9777_v56 = vld [vmem:[%s10748_s12 + $0x18c0] ss:$16 sps:$4 sm:$0xff]  }
 0x17d   : > { %6140 = vmatprep.subr.bf16.mxu1 %v9739_v0  ;;  %v9780_v61 = vld [vmem:[%s10748_s12 + $0x1ac0] ss:$16 sps:$4 sm:$0xff]   ;;  %v11315_v0 = vpack.c.bf16 %v429_v25, %v429_v25  ;;  %v9812_v25 = vld [vmem:[%s10748_s12 + $0x1a24] ss:$16 sps:$4 sm:$0xff]  }
 0x17f   : > { %6100 = vmatpush2.bf16.msra.mxu0 %v9734_v1 }
 0x180   : > { %6141 = vmatpush2.bf16.msra.mxu1 %v9737_v2  ;;  %6101 = vmatprep.subr.bf16.mxu0 %v9742_v47 }
 0x181   : > { %6142 = vmatprep.subr.bf16.mxu1 %v9745_v3  ;;  %v9785_v3 = vld [vmem:[%s10748_s12 + $0x18a4] ss:$16 sps:$4 sm:$0xff]  }
 0x183   : > { %6102 = vmatpush2.bf16.msra.mxu0 %v9740_v8  ;;  %v9788_v8 = vld [vmem:[%s10748_s12 + $0x1aa4] ss:$16 sps:$4 sm:$0xff]  }
 0x184   : > { %6143 = vmatpush2.bf16.msra.mxu1 %v9743_v9  ;;  %6103 = vmatprep.subr.bf16.mxu0 %v9748_v57 }
 0x185   : > { %6144 = vmatprep.subr.bf16.mxu1 %v9751_v10  ;;  %v9783_v10 = vld [vmem:[%s10748_s12 + $0x18a0] ss:$16 sps:$4 sm:$0xff]  }
 0x187   : > { %6104 = vmatpush2.bf16.msra.mxu0 %v9746_v45  ;;  %v9786_v45 = vld [vmem:[%s10748_s12 + $0x1aa0] ss:$16 sps:$4 sm:$0xff]  }
 0x188   : > { %6145 = vmatpush2.bf16.msra.mxu1 %v9749_v12  ;;  %6105 = vmatprep.subr.bf16.mxu0 %v9754_v13  ;;  %v10684_v12 = vmov 0  }
 0x189   : > { %6146 = vmatprep.subr.bf16.mxu1 %v9757_v14 }
 0x18b   : > { %6106 = vmatpush2.bf16.msra.mxu0 %v9752_v15 }
 0x18c   : > { %6147 = vmatpush2.bf16.msra.mxu1 %v9755_v16  ;;  %6107 = vmatprep.subr.bf16.mxu0 %v9760_v19  ;;  %v9791_v16 = vld [vmem:[%s10748_s12 + $0x1884] ss:$16 sps:$4 sm:$0xff]  }
 0x18d   : > { %6148 = vmatprep.subr.bf16.mxu1 %v9763_v20  ;;  %v9794_v19 = vld [vmem:[%s10748_s12 + $0x1a84] ss:$16 sps:$4 sm:$0xff]   ;;  %v9789_v20 = vld [vmem:[%s10748_s12 + $0x1880] ss:$16 sps:$4 sm:$0xff]  }
 0x18f   : > { %6108 = vmatpush2.bf16.msra.mxu0 %v9758_v23  ;;  %v9792_v23 = vld [vmem:[%s10748_s12 + $0x1a80] ss:$16 sps:$4 sm:$0xff]  }
 0x190   : > { %6149 = vmatpush2.bf16.msra.mxu1 %v9761_v24  ;;  %6109 = vmatprep.subr.bf16.mxu0 %v9766_v27  ;;  %v9797_v24 = vld [vmem:[%s10748_s12 + $0x1864] ss:$16 sps:$4 sm:$0xff]  }
 0x191   : > { %6150 = vmatprep.subr.bf16.mxu1 %v9769_v28  ;;  %v9800_v27 = vld [vmem:[%s10748_s12 + $0x1a64] ss:$16 sps:$4 sm:$0xff]   ;;  %v9795_v28 = vld [vmem:[%s10748_s12 + $0x1860] ss:$16 sps:$4 sm:$0xff]  }
 0x193   : > { %6110 = vmatpush2.bf16.msra.mxu0 %v9764_v31  ;;  %v9798_v31 = vld [vmem:[%s10748_s12 + $0x1a60] ss:$16 sps:$4 sm:$0xff]  }
 0x194   : > { %6151 = vmatpush2.bf16.msra.mxu1 %v9767_v32  ;;  %6161 = vmatprep.subr.bf16.mxu0 %v9773_v39  ;;  %v9803_v32 = vld [vmem:[%s10748_s12 + $0x1844] ss:$16 sps:$4 sm:$0xff]  }
 0x195   : > { %6202 = vmatprep.subr.bf16.mxu1 %v9776_v41  ;;  %v9806_v39 = vld [vmem:[%s10748_s12 + $0x1a44] ss:$16 sps:$4 sm:$0xff]   ;;  %v9801_v41 = vld [vmem:[%s10748_s12 + $0x1840] ss:$16 sps:$4 sm:$0xff]  }
 0x196   : > { %v5867_v1 = vpop.f32.mrf.mxu0  ;;  %6112 = vmatmul.mubr.bf16.vlgmr.msra.gmra.mxu0 %v11305_v51 }
 0x197   : > { %v5908_v21 = vpop.f32.mrf.mxu1  ;;  %6153 = vmatmul.mubr.bf16.vlgmr.msra.gmra.mxu1 %v11309_v26  ;;  %v5868_v22 = vadd.f32 %v5867_v1, %v11229_v62  ;;  %6162 = vmatpush1.bf16.msra.mxu0 %v9771_v43  ;;  %v9804_v43 = vld [vmem:[%s10748_s12 + $0x1a40] ss:$16 sps:$4 sm:$0xff]   ;;  %v9818_v1 = vld [vmem:[%s10748_s12 + $0x1a04] ss:$16 sps:$4 sm:$0xff]  }
 0x198   : > { %6203 = vmatpush1.bf16.msra.mxu1 %v9774_v46  ;;  %v5869_v2 = vpop.f32.mrf.mxu0  ;;  %6163 = vmatprep.subr.bf16.mxu0 %v9779_v52  ;;  %v9809_v46 = vld [vmem:[%s10748_s12 + $0x1824] ss:$16 sps:$4 sm:$0xff]   ;;  %v414_v52 = vcombine.high %v11289_v29, %v11289_v29  ;;  %v9816_v29 = vld [vmem:[%s10748_s12 + $0x1a00] ss:$16 sps:$4 sm:$0xff]  }
 0x199   : > { %v5910_v47 = vpop.f32.mrf.mxu1  ;;  %6204 = vmatprep.subr.bf16.mxu1 %v9782_v55  ;;  %v11322_v9 = vadd.f32 %v5908_v21, %v5868_v22  ;;  %v5870_v57 = vadd.f32 %v5869_v2, %v11236_v7  ;;  %6234 = vmatprep.mubr.bf16.mxu1 %v10684_v12  ;;  %v9807_v55 = vld [vmem:[%s10748_s12 + $0x1820] ss:$16 sps:$4 sm:$0xff]   ;;  %v9821_v2 = vld [vmem:[%s10748_s12 + $0x19e4] ss:$16 sps:$4 sm:$0xff]  }
 0x19a   : > { %6193 = vmatprep.mubr.bf16.mxu0 %v11315_v0  ;;  %v5871_v62 = vpop.f32.mrf.mxu0  ;;  %v428_v21 = vrot.slane %v414_v52, %v10798_v50  ;;  %v9813_v22 = vld [vmem:[%s10748_s12 + $0x1800] ss:$16 sps:$4 sm:$0xff]   ;;  %v9861_v52 = vld [vmem:[%s10748_s12 + $0x2c] ss:$16 sps:$4 sm:$0xff]  }
 0x19b   : > { %v5912_v13 = vpop.f32.mrf.mxu1  ;;  %v11329_v14 = vadd.f32 %v5910_v47, %v5870_v57  ;;  %6164 = vmatpush1.bf16.msra.mxu0 %v9777_v56  ;;  %v9810_v56 = vld [vmem:[%s10748_s12 + $0x1a20] ss:$16 sps:$4 sm:$0xff]   ;;  %v9825_v47 = vld [vmem:[%s10748_s12 + $0xec] ss:$16 sps:$4 sm:$0xff]  }
 0x19c   : > { %6205 = vmatpush1.bf16.msra.mxu1 %v9780_v61  ;;  %v5872_v15 = vpop.f32.mrf.mxu0  ;;  %6165 = vmatprep.subr.bf16.mxu0 %v9785_v3  ;;  %v9815_v61 = vld [vmem:[%s10748_s12 + $0x1804] ss:$16 sps:$4 sm:$0xff]   ;;  %v9819_v3 = vld [vmem:[%s10748_s12 + $0x19e0] ss:$16 sps:$4 sm:$0xff]   ;;  %v11358_v57 = vpack.c.bf16 %v428_v21, %v428_v21  ;;  %v9829_v13 = vld [vmem:[%s10748_s12 + $0xc8] ss:$16 sps:$4 sm:$0xff]  }
 0x19d   : > { %v5913_v7 = vpop.f32.mrf.mxu1  ;;  %6206 = vmatprep.subr.bf16.mxu1 %v9788_v8  ;;  %v9823_v8 = vld [vmem:[%s10748_s12 + $0xe8] ss:$16 sps:$4 sm:$0xff]   ;;  %v9826_v62 = vld [vmem:[%s10748_s12 + $0x19c0] ss:$16 sps:$4 sm:$0xff]   ;;  %v9834_v15 = vld [vmem:[%s10748_s12 + $0x19a4] ss:$16 sps:$4 sm:$0xff]  }
 0x19e   : > { %v9837_v7 = vld [vmem:[%s10748_s12 + $0xac] ss:$16 sps:$4 sm:$0xff]   ;;  %v9862_v21 = vld [vmem:[%s10748_s12 + $0x1900] ss:$16 sps:$4 sm:$0xff]  }
 0x19f   : > { %6166 = vmatpush1.bf16.msra.mxu0 %v9783_v10  ;;  %v9828_v10 = vld [vmem:[%s10748_s12 + $0x19c4] ss:$16 sps:$4 sm:$0xff]  }
 0x1a0   : > { %6207 = vmatpush1.bf16.msra.mxu1 %v9786_v45  ;;  %6167 = vmatprep.subr.bf16.mxu0 %v9791_v16  ;;  %v9831_v45 = vld [vmem:[%s10748_s12 + $0xcc] ss:$16 sps:$4 sm:$0xff]   ;;  %v9832_v16 = vld [vmem:[%s10748_s12 + $0x19a0] ss:$16 sps:$4 sm:$0xff]  }
 0x1a1   : > { %6208 = vmatprep.subr.bf16.mxu1 %v9794_v19  ;;  %v9835_v19 = vld [vmem:[%s10748_s12 + $0xa8] ss:$16 sps:$4 sm:$0xff]  }
 0x1a3   : > { %6168 = vmatpush1.bf16.msra.mxu0 %v9789_v20  ;;  %v9840_v20 = vld [vmem:[%s10748_s12 + $0x1984] ss:$16 sps:$4 sm:$0xff]  }
 0x1a4   : > { %6209 = vmatpush1.bf16.msra.mxu1 %v9792_v23  ;;  %6169 = vmatprep.subr.bf16.mxu0 %v9797_v24  ;;  %v9843_v23 = vld [vmem:[%s10748_s12 + $0x8c] ss:$16 sps:$4 sm:$0xff]   ;;  %v9838_v24 = vld [vmem:[%s10748_s12 + $0x1980] ss:$16 sps:$4 sm:$0xff]  }
 0x1a5   : > { %6210 = vmatprep.subr.bf16.mxu1 %v9800_v27  ;;  %v9841_v27 = vld [vmem:[%s10748_s12 + $0x88] ss:$16 sps:$4 sm:$0xff]  }
 0x1a7   : > { %6170 = vmatpush1.bf16.msra.mxu0 %v9795_v28  ;;  %v9849_v28 = vld [vmem:[%s10748_s12 + $0x6c] ss:$16 sps:$4 sm:$0xff]  }
 0x1a8   : > { %6211 = vmatpush1.bf16.msra.mxu1 %v9798_v31  ;;  %6171 = vmatprep.subr.bf16.mxu0 %v9803_v32  ;;  %v9844_v31 = vld [vmem:[%s10748_s12 + $0x1960] ss:$16 sps:$4 sm:$0xff]   ;;  %v9847_v32 = vld [vmem:[%s10748_s12 + $0x68] ss:$16 sps:$4 sm:$0xff]  }
 0x1a9   : > { %6212 = vmatprep.subr.bf16.mxu1 %v9806_v39  ;;  %v9852_v39 = vld [vmem:[%s10748_s12 + $0x1944] ss:$16 sps:$4 sm:$0xff]  }
 0x1ab   : > { %6172 = vmatpush1.bf16.msra.mxu0 %v9801_v41  ;;  %v9855_v41 = vld [vmem:[%s10748_s12 + $0x4c] ss:$16 sps:$4 sm:$0xff]  }
 0x1ac   : > { %6213 = vmatpush1.bf16.msra.mxu1 %v9804_v43  ;;  %6173 = vmatprep.subr.bf16.mxu0 %v9809_v46  ;;  %v9850_v43 = vld [vmem:[%s10748_s12 + $0x1940] ss:$16 sps:$4 sm:$0xff]   ;;  %v9853_v46 = vld [vmem:[%s10748_s12 + $0x48] ss:$16 sps:$4 sm:$0xff]  }
 0x1ad   : > { %6214 = vmatprep.subr.bf16.mxu1 %v9812_v25  ;;  %v9858_v25 = vld [vmem:[%s10748_s12 + $0x1924] ss:$16 sps:$4 sm:$0xff]  }
 0x1af   : > { %6174 = vmatpush1.bf16.msra.mxu0 %v9807_v55  ;;  %v9856_v55 = vld [vmem:[%s10748_s12 + $0x1920] ss:$16 sps:$4 sm:$0xff]  }
 0x1b0   : > { %6215 = vmatpush1.bf16.msra.mxu1 %v9810_v56  ;;  %6175 = vmatprep.subr.bf16.mxu0 %v9815_v61  ;;  %v9859_v56 = vld [vmem:[%s10748_s12 + $0x28] ss:$16 sps:$4 sm:$0xff]   ;;  %v9864_v61 = vld [vmem:[%s10748_s12 + $0x1904] ss:$16 sps:$4 sm:$0xff]  }
 0x1b1   : > { %6216 = vmatprep.subr.bf16.mxu1 %v9818_v1  ;;  %v9867_v1 = vld [vmem:[%s10748_s12 + $0xc] ss:$16 sps:$4 sm:$0xff]  }
 0x1b3   : > { %6176 = vmatpush1.bf16.msra.mxu0 %v9813_v22  ;;  %v9865_v22 = vld [vmem:[%s10748_s12 + $0x8] ss:$16 sps:$4 sm:$0xff]  }
 0x1b4   : > { %6217 = vmatpush1.bf16.msra.mxu1 %v9816_v29  ;;  %6177 = vmatprep.subr.bf16.mxu0 %v9821_v2  ;;  %v9870_v29 = vld [vmem:[%s10748_s12 + $0x1ec] ss:$16 sps:$4 sm:$0xff]  }
 0x1b5   : > { %6243 = vmatprep.subr.bf16.mxu1 %v9825_v47  ;;  %v9873_v2 = vld [vmem:[%s10748_s12 + $0x2ec] ss:$16 sps:$4 sm:$0xff]   ;;  %v9868_v47 = vld [vmem:[%s10748_s12 + $0x1e8] ss:$16 sps:$4 sm:$0xff]  }
 0x1b7   : > { %6235 = vmatmul.mubr.bf16.vlgmr.msra.gmra.mxu1 %v11358_v57  ;;  %6178 = vmatpush2.bf16.msra.mxu0 %v9819_v3  ;;  %v9871_v3 = vld [vmem:[%s10748_s12 + $0x2e8] ss:$16 sps:$4 sm:$0xff]  }
 0x1b8   : > { %6244 = vmatpush1.bf16.msra.mxu1 %v9823_v8  ;;  %6179 = vmatprep.subr.bf16.mxu0 %v9828_v10  ;;  %v11396_v8 = vpack.c.bf16 %v11293_v30, %v11293_v30  ;;  %v9876_v10 = vld [vmem:[%s10748_s12 + $0x1cc] ss:$16 sps:$4 sm:$0xff]  }
 0x1b9   : > { %6245 = vmatprep.subr.bf16.mxu1 %v9831_v45  ;;  %6275 = vmatprep.mubr.bf16.mxu1 %v10810_v63  ;;  %v9846_v63 = vld [vmem:[%s10748_s12 + $0x1964] ss:$16 sps:$4 sm:$0xff]   ;;  %v9879_v45 = vld [vmem:[%s10748_s12 + $0x2cc] ss:$16 sps:$4 sm:$0xff]  }
 0x1bb   : > { %6180 = vmatpush2.bf16.msra.mxu0 %v9826_v62  ;;  %v9874_v62 = vld [vmem:[%s10748_s12 + $0x1c8] ss:$16 sps:$4 sm:$0xff]  }
 0x1bc   : > { %6246 = vmatpush1.bf16.msra.mxu1 %v9829_v13  ;;  %6181 = vmatprep.subr.bf16.mxu0 %v9834_v15  ;;  %v9877_v13 = vld [vmem:[%s10748_s12 + $0x2c8] ss:$16 sps:$4 sm:$0xff]  }
 0x1bd   : > { %6247 = vmatprep.subr.bf16.mxu1 %v9837_v7 }
 0x1bf   : > { %6182 = vmatpush2.bf16.msra.mxu0 %v9832_v16 }
 0x1c0   : > { %6248 = vmatpush1.bf16.msra.mxu1 %v9835_v19  ;;  %6183 = vmatprep.subr.bf16.mxu0 %v9840_v20  ;;  %v9882_v20 = vld [vmem:[%s10748_s12 + $0x1ac] ss:$16 sps:$4 sm:$0xff]  }
 0x1c1   : > { %6249 = vmatprep.subr.bf16.mxu1 %v9843_v23  ;;  %v9885_v23 = vld [vmem:[%s10748_s12 + $0x2ac] ss:$16 sps:$4 sm:$0xff]  }
 0x1c3   : > { %6184 = vmatpush2.bf16.msra.mxu0 %v9838_v24 }
 0x1c4   : > { %6250 = vmatpush1.bf16.msra.mxu1 %v9841_v27  ;;  %6185 = vmatprep.subr.bf16.mxu0 %v9846_v63  ;;  %v9880_v63 = vld [vmem:[%s10748_s12 + $0x1a8] ss:$16 sps:$4 sm:$0xff]  }
 0x1c5   : > { %6251 = vmatprep.subr.bf16.mxu1 %v9849_v28  ;;  %v9883_v28 = vld [vmem:[%s10748_s12 + $0x2a8] ss:$16 sps:$4 sm:$0xff]  }
 0x1c7   : > { %6186 = vmatpush2.bf16.msra.mxu0 %v9844_v31 }
 0x1c8   : > { %6252 = vmatpush1.bf16.msra.mxu1 %v9847_v32  ;;  %6187 = vmatprep.subr.bf16.mxu0 %v9852_v39 }
 0x1c9   : > { %6253 = vmatprep.subr.bf16.mxu1 %v9855_v41 }
 0x1cb   : > { %6188 = vmatpush2.bf16.msra.mxu0 %v9850_v43  ;;  %v9891_v43 = vld [vmem:[%s10748_s12 + $0x28c] ss:$16 sps:$4 sm:$0xff]  }
 0x1cc   : > { %6254 = vmatpush1.bf16.msra.mxu1 %v9853_v46  ;;  %6189 = vmatprep.subr.bf16.mxu0 %v9858_v25  ;;  %v9889_v46 = vld [vmem:[%s10748_s12 + $0x288] ss:$16 sps:$4 sm:$0xff]   ;;  %v9894_v25 = vld [vmem:[%s10748_s12 + $0x16c] ss:$16 sps:$4 sm:$0xff]  }
 0x1cd   : > { %6255 = vmatprep.subr.bf16.mxu1 %v9861_v52  ;;  %v9897_v52 = vld [vmem:[%s10748_s12 + $0x26c] ss:$16 sps:$4 sm:$0xff]  }
 0x1cf   : > { %6190 = vmatpush2.bf16.msra.mxu0 %v9856_v55  ;;  %v9892_v55 = vld [vmem:[%s10748_s12 + $0x168] ss:$16 sps:$4 sm:$0xff]  }
 0x1d0   : > { %6256 = vmatpush1.bf16.msra.mxu1 %v9859_v56  ;;  %6191 = vmatprep.subr.bf16.mxu0 %v9864_v61  ;;  %v9895_v56 = vld [vmem:[%s10748_s12 + $0x268] ss:$16 sps:$4 sm:$0xff]   ;;  %v9900_v61 = vld [vmem:[%s10748_s12 + $0x14c] ss:$16 sps:$4 sm:$0xff]  }
 0x1d1   : > { %6257 = vmatprep.subr.bf16.mxu1 %v9867_v1  ;;  %v9903_v1 = vld [vmem:[%s10748_s12 + $0x24c] ss:$16 sps:$4 sm:$0xff]  }
 0x1d3   : > { %6192 = vmatpush2.bf16.msra.mxu0 %v9862_v21  ;;  %v9898_v21 = vld [vmem:[%s10748_s12 + $0x148] ss:$16 sps:$4 sm:$0xff]  }
 0x1d4   : > { %6258 = vmatpush1.bf16.msra.mxu1 %v9865_v22  ;;  %6284 = vmatprep.subr.bf16.mxu0 %v9873_v2  ;;  %v9901_v22 = vld [vmem:[%s10748_s12 + $0x248] ss:$16 sps:$4 sm:$0xff]   ;;  %v9909_v2 = vld [vmem:[%s10748_s12 + $0x22c] ss:$16 sps:$4 sm:$0xff]  }
 0x1d5   : > { %6259 = vmatprep.subr.bf16.mxu1 %v9870_v29  ;;  %v9906_v29 = vld [vmem:[%s10748_s12 + $0x12c] ss:$16 sps:$4 sm:$0xff]  }
 0x1d6   : > { %v5949_v15 = vpop.f32.mrf.mxu0  ;;  %6194 = vmatmul.mubr.bf16.vlgmr.msra.gmra.mxu0 %v11396_v8 }
 0x1d7   : > { %v5990_v7 = vpop.f32.mrf.mxu1  ;;  %v5950_v16 = vadd.f32 %v5949_v15, %v11322_v9  ;;  %6285 = vmatpush1.bf16.msra.mxu0 %v9871_v3  ;;  %6316 = vmatprep.mubr.bf16.mxu0 %v10815_v4  ;;  %v9886_v4 = vld [vmem:[%s10748_s12 + $0x188] ss:$16 sps:$4 sm:$0xff]   ;;  %v9918_v15 = vld [vmem:[%s10748_s12 + $0x3ec] ss:$16 sps:$4 sm:$0xff]  }
 0x1d8   : > { %6260 = vmatpush2.bf16.msra.mxu1 %v9868_v47  ;;  %v5951_v30 = vpop.f32.mrf.mxu0  ;;  %6286 = vmatprep.subr.bf16.mxu0 %v9879_v45  ;;  %v9904_v47 = vld [vmem:[%s10748_s12 + $0x128] ss:$16 sps:$4 sm:$0xff]   ;;  %v9915_v45 = vld [vmem:[%s10748_s12 + $0x20c] ss:$16 sps:$4 sm:$0xff]  }
 0x1d9   : > { %v5992_v19 = vpop.f32.mrf.mxu1  ;;  %6261 = vmatprep.subr.bf16.mxu1 %v9876_v10  ;;  %v11406_v24 = vadd.f32 %v5990_v7, %v5950_v16  ;;  %v5952_v27 = vadd.f32 %v5951_v30, %v11329_v14  ;;  %v9888_v14 = vld [vmem:[%s10748_s12 + $0x18c] ss:$16 sps:$4 sm:$0xff]   ;;  %v9907_v3 = vld [vmem:[%s10748_s12 + $0x228] ss:$16 sps:$4 sm:$0xff]  }
 0x1da   : > { %v5953_v9 = vpop.f32.mrf.mxu0  ;;  %v9912_v10 = vld [vmem:[%s10748_s12 + $0x10c] ss:$16 sps:$4 sm:$0xff]   ;;  %v9916_v16 = vld [vmem:[%s10748_s12 + $0x3e8] ss:$16 sps:$4 sm:$0xff]  }
 0x1db   : > { %v5994_v31 = vpop.f32.mrf.mxu1  ;;  %v11412_v32 = vadd.f32 %v5992_v19, %v5952_v27  ;;  %6287 = vmatpush1.bf16.msra.mxu0 %v9877_v13  ;;  %v9913_v13 = vld [vmem:[%s10748_s12 + $0x208] ss:$16 sps:$4 sm:$0xff]   ;;  %v9921_v7 = vld [vmem:[%s10748_s12 + $0x4ec] ss:$16 sps:$4 sm:$0xff]  }
 0x1dc   : > { %6262 = vmatpush2.bf16.msra.mxu1 %v9874_v62  ;;  %v5954_v39 = vpop.f32.mrf.mxu0  ;;  %6288 = vmatprep.subr.bf16.mxu0 %v9885_v23  ;;  %v9910_v62 = vld [vmem:[%s10748_s12 + $0x108] ss:$16 sps:$4 sm:$0xff]   ;;  %v9924_v19 = vld [vmem:[%s10748_s12 + $0x3cc] ss:$16 sps:$4 sm:$0xff]  }
 0x1dd   : > { %v5995_v41 = vpop.f32.mrf.mxu1  ;;  %6263 = vmatprep.subr.bf16.mxu1 %v9882_v20  ;;  %v9919_v30 = vld [vmem:[%s10748_s12 + $0x4e8] ss:$16 sps:$4 sm:$0xff]   ;;  %v9927_v20 = vld [vmem:[%s10748_s12 + $0x4cc] ss:$16 sps:$4 sm:$0xff]  }
 0x1de   : > { %v9922_v23 = vld [vmem:[%s10748_s12 + $0x3c8] ss:$16 sps:$4 sm:$0xff]   ;;  %v9939_v39 = vld [vmem:[%s10748_s12 + $0x48c] ss:$16 sps:$4 sm:$0xff]  }
 0x1df   : > { %6289 = vmatpush1.bf16.msra.mxu0 %v9883_v28  ;;  %v9925_v27 = vld [vmem:[%s10748_s12 + $0x4c8] ss:$16 sps:$4 sm:$0xff]   ;;  %v9933_v28 = vld [vmem:[%s10748_s12 + $0x4ac] ss:$16 sps:$4 sm:$0xff]  }
 0x1e0   : > { %6264 = vmatpush2.bf16.msra.mxu1 %v9880_v63  ;;  %6290 = vmatprep.subr.bf16.mxu0 %v9891_v43  ;;  %v9930_v63 = vld [vmem:[%s10748_s12 + $0x3ac] ss:$16 sps:$4 sm:$0xff]   ;;  %v9928_v9 = vld [vmem:[%s10748_s12 + $0x3a8] ss:$16 sps:$4 sm:$0xff]  }
 0x1e1   : > { %6265 = vmatprep.subr.bf16.mxu1 %v9888_v14  ;;  %v9931_v31 = vld [vmem:[%s10748_s12 + $0x4a8] ss:$16 sps:$4 sm:$0xff]   ;;  %v9942_v43 = vld [vmem:[%s10748_s12 + $0x36c] ss:$16 sps:$4 sm:$0xff]  }
 0x1e2   : > { %v9934_v41 = vld [vmem:[%s10748_s12 + $0x388] ss:$16 sps:$4 sm:$0xff]  }
 0x1e3   : > { %6291 = vmatpush1.bf16.msra.mxu0 %v9889_v46  ;;  %v9937_v14 = vld [vmem:[%s10748_s12 + $0x488] ss:$16 sps:$4 sm:$0xff]  }
 0x1e4   : > { %6266 = vmatpush2.bf16.msra.mxu1 %v9886_v4  ;;  %6292 = vmatprep.subr.bf16.mxu0 %v9897_v52  ;;  %v9940_v4 = vld [vmem:[%s10748_s12 + $0x368] ss:$16 sps:$4 sm:$0xff]   ;;  %v9951_v52 = vld [vmem:[%s10748_s12 + $0x44c] ss:$16 sps:$4 sm:$0xff]  }
 0x1e5   : > { %6267 = vmatprep.subr.bf16.mxu1 %v9894_v25  ;;  %v9943_v46 = vld [vmem:[%s10748_s12 + $0x468] ss:$16 sps:$4 sm:$0xff]   ;;  %v9948_v25 = vld [vmem:[%s10748_s12 + $0x34c] ss:$16 sps:$4 sm:$0xff]  }
 0x1e7   : > { %6293 = vmatpush1.bf16.msra.mxu0 %v9895_v56  ;;  %v9949_v56 = vld [vmem:[%s10748_s12 + $0x448] ss:$16 sps:$4 sm:$0xff]  }
 0x1e8   : > { %6268 = vmatpush2.bf16.msra.mxu1 %v9892_v55  ;;  %6294 = vmatprep.subr.bf16.mxu0 %v9903_v1  ;;  %v9946_v55 = vld [vmem:[%s10748_s12 + $0x348] ss:$16 sps:$4 sm:$0xff]   ;;  %v9957_v1 = vld [vmem:[%s10748_s12 + $0x42c] ss:$16 sps:$4 sm:$0xff]  }
 0x1e9   : > { %6269 = vmatprep.subr.bf16.mxu1 %v9900_v61  ;;  %v9954_v61 = vld [vmem:[%s10748_s12 + $0x32c] ss:$16 sps:$4 sm:$0xff]  }
 0x1eb   : > { %6295 = vmatpush1.bf16.msra.mxu0 %v9901_v22  ;;  %v9955_v22 = vld [vmem:[%s10748_s12 + $0x428] ss:$16 sps:$4 sm:$0xff]  }
 0x1ec   : > { %6270 = vmatpush2.bf16.msra.mxu1 %v9898_v21  ;;  %6296 = vmatprep.subr.bf16.mxu0 %v9909_v2  ;;  %v9952_v21 = vld [vmem:[%s10748_s12 + $0x328] ss:$16 sps:$4 sm:$0xff]   ;;  %v9963_v2 = vld [vmem:[%s10748_s12 + $0x40c] ss:$16 sps:$4 sm:$0xff]  }
 0x1ed   : > { %6271 = vmatprep.subr.bf16.mxu1 %v9906_v29  ;;  %v9960_v29 = vld [vmem:[%s10748_s12 + $0x30c] ss:$16 sps:$4 sm:$0xff]  }
 0x1ef   : > { %6297 = vmatpush1.bf16.msra.mxu0 %v9907_v3  ;;  %v9961_v3 = vld [vmem:[%s10748_s12 + $0x408] ss:$16 sps:$4 sm:$0xff]  }
 0x1f0   : > { %6272 = vmatpush2.bf16.msra.mxu1 %v9904_v47  ;;  %6298 = vmatprep.subr.bf16.mxu0 %v9915_v45  ;;  %v9958_v47 = vld [vmem:[%s10748_s12 + $0x308] ss:$16 sps:$4 sm:$0xff]   ;;  %v9969_v45 = vld [vmem:[%s10748_s12 + $0x6ec] ss:$16 sps:$4 sm:$0xff]  }
 0x1f1   : > { %6273 = vmatprep.subr.bf16.mxu1 %v9912_v10  ;;  %v9966_v10 = vld [vmem:[%s10748_s12 + $0x5ec] ss:$16 sps:$4 sm:$0xff]  }
 0x1f3   : > { %6299 = vmatpush1.bf16.msra.mxu0 %v9913_v13  ;;  %v9967_v13 = vld [vmem:[%s10748_s12 + $0x6e8] ss:$16 sps:$4 sm:$0xff]  }
 0x1f4   : > { %6274 = vmatpush2.bf16.msra.mxu1 %v9910_v62  ;;  %6300 = vmatprep.subr.bf16.mxu0 %v9918_v15  ;;  %v9964_v62 = vld [vmem:[%s10748_s12 + $0x5e8] ss:$16 sps:$4 sm:$0xff]   ;;  %v9972_v15 = vld [vmem:[%s10748_s12 + $0x5cc] ss:$16 sps:$4 sm:$0xff]  }
 0x1f5   : > { %6325 = vmatprep.subr.bf16.mxu1 %v9921_v7  ;;  %v9975_v7 = vld [vmem:[%s10748_s12 + $0x6cc] ss:$16 sps:$4 sm:$0xff]  }
 0x1f7   : > { %6276 = vmatmul.mubr.bf16.vlgmr.msra.gmra.mxu1 %v10831_v17  ;;  %6301 = vmatpush2.bf16.msra.mxu0 %v9916_v16  ;;  %v9936_v17 = vld [vmem:[%s10748_s12 + $0x38c] ss:$16 sps:$4 sm:$0xff]  }
 0x1f8   : > { %6326 = vmatpush1.bf16.msra.mxu1 %v9919_v30  ;;  %6302 = vmatprep.subr.bf16.mxu0 %v9924_v19 }
 0x1f9   : > { %6327 = vmatprep.subr.bf16.mxu1 %v9927_v20  ;;  %6357 = vmatprep.mubr.bf16.mxu1 %v10874_v54  ;;  %v9945_v54 = vld [vmem:[%s10748_s12 + $0x46c] ss:$16 sps:$4 sm:$0xff]   ;;  %v9970_v20 = vld [vmem:[%s10748_s12 + $0x5c8] ss:$16 sps:$4 sm:$0xff]  }
 0x1fb   : > { %6303 = vmatpush2.bf16.msra.mxu0 %v9922_v23  ;;  %v9973_v23 = vld [vmem:[%s10748_s12 + $0x6c8] ss:$16 sps:$4 sm:$0xff]  }
 0x1fc   : > { %6328 = vmatpush1.bf16.msra.mxu1 %v9925_v27  ;;  %6304 = vmatprep.subr.bf16.mxu0 %v9930_v63 }
 0x1fd   : > { %6329 = vmatprep.subr.bf16.mxu1 %v9933_v28  ;;  %v9978_v28 = vld [vmem:[%s10748_s12 + $0x5ac] ss:$16 sps:$4 sm:$0xff]  }
 0x1ff   : > { %6305 = vmatpush2.bf16.msra.mxu0 %v9928_v9  ;;  %v9981_v9 = vld [vmem:[%s10748_s12 + $0x6ac] ss:$16 sps:$4 sm:$0xff]  }
 0x200   : > { %6330 = vmatpush1.bf16.msra.mxu1 %v9931_v31  ;;  %6306 = vmatprep.subr.bf16.mxu0 %v9936_v17 }
 0x201   : > { %6331 = vmatprep.subr.bf16.mxu1 %v9939_v39 }
 0x203   : > { %6307 = vmatpush2.bf16.msra.mxu0 %v9934_v41  ;;  %v9976_v41 = vld [vmem:[%s10748_s12 + $0x5a8] ss:$16 sps:$4 sm:$0xff]  }
 0x204   : > { %6332 = vmatpush1.bf16.msra.mxu1 %v9937_v14  ;;  %6308 = vmatprep.subr.bf16.mxu0 %v9942_v43  ;;  %v9979_v14 = vld [vmem:[%s10748_s12 + $0x6a8] ss:$16 sps:$4 sm:$0xff]  }
 0x205   : > { %6333 = vmatprep.subr.bf16.mxu1 %v9945_v54 }
 0x207   : > { %6309 = vmatpush2.bf16.msra.mxu0 %v9940_v4  ;;  %v9982_v4 = vld [vmem:[%s10748_s12 + $0x588] ss:$16 sps:$4 sm:$0xff]  }
 0x208   : > { %6334 = vmatpush1.bf16.msra.mxu1 %v9943_v46  ;;  %6310 = vmatprep.subr.bf16.mxu0 %v9948_v25  ;;  %v9985_v46 = vld [vmem:[%s10748_s12 + $0x688] ss:$16 sps:$4 sm:$0xff]   ;;  %v9990_v25 = vld [vmem:[%s10748_s12 + $0x56c] ss:$16 sps:$4 sm:$0xff]  }
 0x209   : > { %6335 = vmatprep.subr.bf16.mxu1 %v9951_v52  ;;  %v9993_v52 = vld [vmem:[%s10748_s12 + $0x66c] ss:$16 sps:$4 sm:$0xff]  }
 0x20b   : > { %6311 = vmatpush2.bf16.msra.mxu0 %v9946_v55  ;;  %v9988_v55 = vld [vmem:[%s10748_s12 + $0x568] ss:$16 sps:$4 sm:$0xff]  }
 0x20c   : > { %6336 = vmatpush1.bf16.msra.mxu1 %v9949_v56  ;;  %6312 = vmatprep.subr.bf16.mxu0 %v9954_v61  ;;  %v9991_v56 = vld [vmem:[%s10748_s12 + $0x668] ss:$16 sps:$4 sm:$0xff]   ;;  %v9996_v61 = vld [vmem:[%s10748_s12 + $0x54c] ss:$16 sps:$4 sm:$0xff]  }
 0x20d   : > { %6337 = vmatprep.subr.bf16.mxu1 %v9957_v1  ;;  %v9999_v1 = vld [vmem:[%s10748_s12 + $0x64c] ss:$16 sps:$4 sm:$0xff]  }
 0x20f   : > { %6313 = vmatpush2.bf16.msra.mxu0 %v9952_v21  ;;  %v9994_v21 = vld [vmem:[%s10748_s12 + $0x548] ss:$16 sps:$4 sm:$0xff]  }
 0x210   : > { %6338 = vmatpush1.bf16.msra.mxu1 %v9955_v22  ;;  %6314 = vmatprep.subr.bf16.mxu0 %v9960_v29  ;;  %v9997_v22 = vld [vmem:[%s10748_s12 + $0x648] ss:$16 sps:$4 sm:$0xff]   ;;  %v10002_v29 = vld [vmem:[%s10748_s12 + $0x52c] ss:$16 sps:$4 sm:$0xff]  }
 0x211   : > { %6339 = vmatprep.subr.bf16.mxu1 %v9963_v2  ;;  %v10005_v2 = vld [vmem:[%s10748_s12 + $0x62c] ss:$16 sps:$4 sm:$0xff]  }
 0x213   : > { %6315 = vmatpush2.bf16.msra.mxu0 %v9958_v47  ;;  %v10000_v47 = vld [vmem:[%s10748_s12 + $0x528] ss:$16 sps:$4 sm:$0xff]  }
 0x214   : > { %6340 = vmatpush1.bf16.msra.mxu1 %v9961_v3  ;;  %6366 = vmatprep.subr.bf16.mxu0 %v9969_v45  ;;  %v10003_v3 = vld [vmem:[%s10748_s12 + $0x628] ss:$16 sps:$4 sm:$0xff]   ;;  %v10011_v45 = vld [vmem:[%s10748_s12 + $0x60c] ss:$16 sps:$4 sm:$0xff]  }
 0x215   : > { %6341 = vmatprep.subr.bf16.mxu1 %v9966_v10  ;;  %v10008_v10 = vld [vmem:[%s10748_s12 + $0x50c] ss:$16 sps:$4 sm:$0xff]  }
 0x216   : > { %v6031_v16 = vpop.f32.mrf.mxu0  ;;  %6317 = vmatmul.mubr.bf16.vlgmr.msra.gmra.mxu0 %v10833_v18 }
 0x217   : > { %v6072_v30 = vpop.f32.mrf.mxu1  ;;  %v6032_v19 = vadd.f32 %v6031_v16, %v11406_v24  ;;  %6367 = vmatpush1.bf16.msra.mxu0 %v9967_v13  ;;  %6398 = vmatprep.mubr.bf16.mxu0 %v10880_v58  ;;  %v9987_v58 = vld [vmem:[%s10748_s12 + $0x68c] ss:$16 sps:$4 sm:$0xff]   ;;  %v10009_v13 = vld [vmem:[%s10748_s12 + $0x608] ss:$16 sps:$4 sm:$0xff]  }
 0x218   : > { %6342 = vmatpush2.bf16.msra.mxu1 %v9964_v62  ;;  %v6033_v27 = vpop.f32.mrf.mxu0  ;;  %6368 = vmatprep.subr.bf16.mxu0 %v9975_v7  ;;  %v10006_v62 = vld [vmem:[%s10748_s12 + $0x508] ss:$16 sps:$4 sm:$0xff]   ;;  %v10017_v7 = vld [vmem:[%s10748_s12 + $0x8ec] ss:$16 sps:$4 sm:$0xff]  }
 0x219   : > { %v6074_v63 = vpop.f32.mrf.mxu1  ;;  %6343 = vmatprep.subr.bf16.mxu1 %v9972_v15  ;;  %v11480_v31 = vadd.f32 %v6072_v30, %v6032_v19  ;;  %v6034_v18 = vadd.f32 %v6033_v27, %v11412_v32  ;;  %v9984_v32 = vld [vmem:[%s10748_s12 + $0x58c] ss:$16 sps:$4 sm:$0xff]   ;;  %v10012_v16 = vld [vmem:[%s10748_s12 + $0x7e8] ss:$16 sps:$4 sm:$0xff]  }
 0x21a   : > { %v6035_v24 = vpop.f32.mrf.mxu0  ;;  %v10014_v15 = vld [vmem:[%s10748_s12 + $0x7ec] ss:$16 sps:$4 sm:$0xff]   ;;  %v10015_v30 = vld [vmem:[%s10748_s12 + $0x8e8] ss:$16 sps:$4 sm:$0xff]  }
 0x21b   : > { %v6076_v17 = vpop.f32.mrf.mxu1  ;;  %v11484_v39 = vadd.f32 %v6074_v63, %v6034_v18  ;;  %6369 = vmatpush1.bf16.msra.mxu0 %v9973_v23  ;;  %v10020_v19 = vld [vmem:[%s10748_s12 + $0x7cc] ss:$16 sps:$4 sm:$0xff]   ;;  %v10018_v23 = vld [vmem:[%s10748_s12 + $0x7c8] ss:$16 sps:$4 sm:$0xff]  }
 0x21c   : > { %6344 = vmatpush2.bf16.msra.mxu1 %v9970_v20  ;;  %v6036_v43 = vpop.f32.mrf.mxu0  ;;  %6370 = vmatprep.subr.bf16.mxu0 %v9981_v9  ;;  %v10023_v20 = vld [vmem:[%s10748_s12 + $0x8cc] ss:$16 sps:$4 sm:$0xff]   ;;  %v10021_v27 = vld [vmem:[%s10748_s12 + $0x8c8] ss:$16 sps:$4 sm:$0xff]  }
 0x21d   : > { %v6077_v54 = vpop.f32.mrf.mxu1  ;;  %6345 = vmatprep.subr.bf16.mxu1 %v9978_v28  ;;  %v10026_v63 = vld [vmem:[%s10748_s12 + $0x7ac] ss:$16 sps:$4 sm:$0xff]   ;;  %v10024_v9 = vld [vmem:[%s10748_s12 + $0x7a8] ss:$16 sps:$4 sm:$0xff]  }
 0x21e   : > { %v10029_v28 = vld [vmem:[%s10748_s12 + $0x8ac] ss:$16 sps:$4 sm:$0xff]   ;;  %v10030_v17 = vld [vmem:[%s10748_s12 + $0x788] ss:$16 sps:$4 sm:$0xff]  }
 0x21f   : > { %6371 = vmatpush1.bf16.msra.mxu0 %v9979_v14  ;;  %v10032_v18 = vld [vmem:[%s10748_s12 + $0x78c] ss:$16 sps:$4 sm:$0xff]   ;;  %v10036_v43 = vld [vmem:[%s10748_s12 + $0x768] ss:$16 sps:$4 sm:$0xff]  }
 0x220   : > { %6346 = vmatpush2.bf16.msra.mxu1 %v9976_v41  ;;  %6372 = vmatprep.subr.bf16.mxu0 %v9987_v58  ;;  %v10035_v24 = vld [vmem:[%s10748_s12 + $0x88c] ss:$16 sps:$4 sm:$0xff]   ;;  %v10033_v41 = vld [vmem:[%s10748_s12 + $0x888] ss:$16 sps:$4 sm:$0xff]  }
 0x221   : > { %6347 = vmatprep.subr.bf16.mxu1 %v9984_v32  ;;  %v10041_v14 = vld [vmem:[%s10748_s12 + $0x86c] ss:$16 sps:$4 sm:$0xff]   ;;  %v10039_v54 = vld [vmem:[%s10748_s12 + $0x868] ss:$16 sps:$4 sm:$0xff]  }
 0x222   : > { %v10044_v32 = vld [vmem:[%s10748_s12 + $0x74c] ss:$16 sps:$4 sm:$0xff]  }
 0x223   : > { %6373 = vmatpush1.bf16.msra.mxu0 %v9985_v46  ;;  %v10047_v58 = vld [vmem:[%s10748_s12 + $0x84c] ss:$16 sps:$4 sm:$0xff]   ;;  %v10045_v46 = vld [vmem:[%s10748_s12 + $0x848] ss:$16 sps:$4 sm:$0xff]  }
 0x224   : > { %6348 = vmatpush2.bf16.msra.mxu1 %v9982_v4  ;;  %6374 = vmatprep.subr.bf16.mxu0 %v9993_v52  ;;  %v10042_v4 = vld [vmem:[%s10748_s12 + $0x748] ss:$16 sps:$4 sm:$0xff]   ;;  %v10053_v52 = vld [vmem:[%s10748_s12 + $0x82c] ss:$16 sps:$4 sm:$0xff]  }
 0x225   : > { %6349 = vmatprep.subr.bf16.mxu1 %v9990_v25  ;;  %v10050_v25 = vld [vmem:[%s10748_s12 + $0x72c] ss:$16 sps:$4 sm:$0xff]  }
 0x227   : > { %6375 = vmatpush1.bf16.msra.mxu0 %v9991_v56  ;;  %v10051_v56 = vld [vmem:[%s10748_s12 + $0x828] ss:$16 sps:$4 sm:$0xff]  }
 0x228   : > { %6350 = vmatpush2.bf16.msra.mxu1 %v9988_v55  ;;  %6376 = vmatprep.subr.bf16.mxu0 %v9999_v1  ;;  %v10048_v55 = vld [vmem:[%s10748_s12 + $0x728] ss:$16 sps:$4 sm:$0xff]   ;;  %v10059_v1 = vld [vmem:[%s10748_s12 + $0x80c] ss:$16 sps:$4 sm:$0xff]  }
 0x229   : > { %6351 = vmatprep.subr.bf16.mxu1 %v9996_v61  ;;  %v10056_v61 = vld [vmem:[%s10748_s12 + $0x70c] ss:$16 sps:$4 sm:$0xff]  }
 0x22b   : > { %6377 = vmatpush1.bf16.msra.mxu0 %v9997_v22  ;;  %v10057_v22 = vld [vmem:[%s10748_s12 + $0x808] ss:$16 sps:$4 sm:$0xff]  }
 0x22c   : > { %6352 = vmatpush2.bf16.msra.mxu1 %v9994_v21  ;;  %6378 = vmatprep.subr.bf16.mxu0 %v10005_v2  ;;  %v10054_v21 = vld [vmem:[%s10748_s12 + $0x708] ss:$16 sps:$4 sm:$0xff]   ;;  %v10065_v2 = vld [vmem:[%s10748_s12 + $0xaec] ss:$16 sps:$4 sm:$0xff]  }
 0x22d   : > { %6353 = vmatprep.subr.bf16.mxu1 %v10002_v29  ;;  %v10062_v29 = vld [vmem:[%s10748_s12 + $0x9ec] ss:$16 sps:$4 sm:$0xff]  }
 0x22f   : > { %6379 = vmatpush1.bf16.msra.mxu0 %v10003_v3  ;;  %v10063_v3 = vld [vmem:[%s10748_s12 + $0xae8] ss:$16 sps:$4 sm:$0xff]  }
 0x230   : > { %6354 = vmatpush2.bf16.msra.mxu1 %v10000_v47  ;;  %6380 = vmatprep.subr.bf16.mxu0 %v10011_v45  ;;  %v10060_v47 = vld [vmem:[%s10748_s12 + $0x9e8] ss:$16 sps:$4 sm:$0xff]   ;;  %v10071_v45 = vld [vmem:[%s10748_s12 + $0xacc] ss:$16 sps:$4 sm:$0xff]  }
 0x231   : > { %6355 = vmatprep.subr.bf16.mxu1 %v10008_v10  ;;  %v10068_v10 = vld [vmem:[%s10748_s12 + $0x9cc] ss:$16 sps:$4 sm:$0xff]  }
 0x233   : > { %6381 = vmatpush1.bf16.msra.mxu0 %v10009_v13 }
 0x234   : > { %6356 = vmatpush2.bf16.msra.mxu1 %v10006_v62  ;;  %6382 = vmatprep.subr.bf16.mxu0 %v10014_v15 }
 0x235   : > { %6407 = vmatprep.subr.bf16.mxu1 %v10017_v7  ;;  %v10066_v7 = vld [vmem:[%s10748_s12 + $0x9c8] ss:$16 sps:$4 sm:$0xff]  }
 0x237   : > { %6358 = vmatmul.mubr.bf16.vlgmr.msra.gmra.mxu1 %v10920_v33  ;;  %6383 = vmatpush2.bf16.msra.mxu0 %v10012_v16  ;;  %v10027_v33 = vld [vmem:[%s10748_s12 + $0x8a8] ss:$16 sps:$4 sm:$0xff]  }
 0x238   : > { %6408 = vmatpush1.bf16.msra.mxu1 %v10015_v30  ;;  %6384 = vmatprep.subr.bf16.mxu0 %v10020_v19  ;;  %v10069_v16 = vld [vmem:[%s10748_s12 + $0xac8] ss:$16 sps:$4 sm:$0xff]  }
 0x239   : > { %6409 = vmatprep.subr.bf16.mxu1 %v10023_v20  ;;  %6439 = vmatprep.mubr.bf16.mxu1 %v10945_v49  ;;  %v10038_v49 = vld [vmem:[%s10748_s12 + $0x76c] ss:$16 sps:$4 sm:$0xff]  }
 0x23a   : > { %v10074_v20 = vld [vmem:[%s10748_s12 + $0x9ac] ss:$16 sps:$4 sm:$0xff]  }
 0x23b   : > { %6385 = vmatpush2.bf16.msra.mxu0 %v10018_v23  ;;  %v10077_v23 = vld [vmem:[%s10748_s12 + $0xaac] ss:$16 sps:$4 sm:$0xff]  }
 0x23c   : > { %6410 = vmatpush1.bf16.msra.mxu1 %v10021_v27  ;;  %6386 = vmatprep.subr.bf16.mxu0 %v10026_v63 }
 0x23d   : > { %6411 = vmatprep.subr.bf16.mxu1 %v10029_v28 }
 0x23f   : > { %6387 = vmatpush2.bf16.msra.mxu0 %v10024_v9  ;;  %v10072_v9 = vld [vmem:[%s10748_s12 + $0x9a8] ss:$16 sps:$4 sm:$0xff]  }
 0x240   : > { %6412 = vmatpush1.bf16.msra.mxu1 %v10027_v33  ;;  %6388 = vmatprep.subr.bf16.mxu0 %v10032_v18  ;;  %v10075_v33 = vld [vmem:[%s10748_s12 + $0xaa8] ss:$16 sps:$4 sm:$0xff]  }
 0x241   : > { %6413 = vmatprep.subr.bf16.mxu1 %v10035_v24 }
 0x243   : > { %6389 = vmatpush2.bf16.msra.mxu0 %v10030_v17  ;;  %v10078_v17 = vld [vmem:[%s10748_s12 + $0x988] ss:$16 sps:$4 sm:$0xff]  }
 0x244   : > { %6414 = vmatpush1.bf16.msra.mxu1 %v10033_v41  ;;  %6390 = vmatprep.subr.bf16.mxu0 %v10038_v49  ;;  %v10081_v41 = vld [vmem:[%s10748_s12 + $0xa88] ss:$16 sps:$4 sm:$0xff]   ;;  %v10086_v49 = vld [vmem:[%s10748_s12 + $0x96c] ss:$16 sps:$4 sm:$0xff]  }
 0x245   : > { %6415 = vmatprep.subr.bf16.mxu1 %v10041_v14  ;;  %v10089_v14 = vld [vmem:[%s10748_s12 + $0xa6c] ss:$16 sps:$4 sm:$0xff]  }
 0x247   : > { %6391 = vmatpush2.bf16.msra.mxu0 %v10036_v43  ;;  %v10084_v43 = vld [vmem:[%s10748_s12 + $0x968] ss:$16 sps:$4 sm:$0xff]  }
 0x248   : > { %6416 = vmatpush1.bf16.msra.mxu1 %v10039_v54  ;;  %6392 = vmatprep.subr.bf16.mxu0 %v10044_v32  ;;  %v10087_v54 = vld [vmem:[%s10748_s12 + $0xa68] ss:$16 sps:$4 sm:$0xff]   ;;  %v10092_v32 = vld [vmem:[%s10748_s12 + $0x94c] ss:$16 sps:$4 sm:$0xff]  }
 0x249   : > { %6417 = vmatprep.subr.bf16.mxu1 %v10047_v58  ;;  %v10095_v58 = vld [vmem:[%s10748_s12 + $0xa4c] ss:$16 sps:$4 sm:$0xff]  }
 0x24b   : > { %6393 = vmatpush2.bf16.msra.mxu0 %v10042_v4  ;;  %v10090_v4 = vld [vmem:[%s10748_s12 + $0x948] ss:$16 sps:$4 sm:$0xff]  }
 0x24c   : > { %6418 = vmatpush1.bf16.msra.mxu1 %v10045_v46  ;;  %6394 = vmatprep.subr.bf16.mxu0 %v10050_v25  ;;  %v10093_v46 = vld [vmem:[%s10748_s12 + $0xa48] ss:$16 sps:$4 sm:$0xff]   ;;  %v10098_v25 = vld [vmem:[%s10748_s12 + $0x92c] ss:$16 sps:$4 sm:$0xff]  }
 0x24d   : > { %6419 = vmatprep.subr.bf16.mxu1 %v10053_v52  ;;  %v10101_v52 = vld [vmem:[%s10748_s12 + $0xa2c] ss:$16 sps:$4 sm:$0xff]  }
 0x24f   : > { %6395 = vmatpush2.bf16.msra.mxu0 %v10048_v55  ;;  %v10096_v55 = vld [vmem:[%s10748_s12 + $0x928] ss:$16 sps:$4 sm:$0xff]  }
 0x250   : > { %6420 = vmatpush1.bf16.msra.mxu1 %v10051_v56  ;;  %6396 = vmatprep.subr.bf16.mxu0 %v10056_v61  ;;  %v10099_v56 = vld [vmem:[%s10748_s12 + $0xa28] ss:$16 sps:$4 sm:$0xff]   ;;  %v10104_v61 = vld [vmem:[%s10748_s12 + $0x90c] ss:$16 sps:$4 sm:$0xff]  }
 0x251   : > { %6421 = vmatprep.subr.bf16.mxu1 %v10059_v1  ;;  %v10107_v1 = vld [vmem:[%s10748_s12 + $0xa0c] ss:$16 sps:$4 sm:$0xff]  }
 0x253   : > { %6397 = vmatpush2.bf16.msra.mxu0 %v10054_v21  ;;  %v10102_v21 = vld [vmem:[%s10748_s12 + $0x908] ss:$16 sps:$4 sm:$0xff]  }
 0x254   : > { %6422 = vmatpush1.bf16.msra.mxu1 %v10057_v22  ;;  %6448 = vmatprep.subr.bf16.mxu0 %v10065_v2  ;;  %v10105_v22 = vld [vmem:[%s10748_s12 + $0xa08] ss:$16 sps:$4 sm:$0xff]   ;;  %v10113_v2 = vld [vmem:[%s10748_s12 + $0xcec] ss:$16 sps:$4 sm:$0xff]  }
 0x255   : > { %6423 = vmatprep.subr.bf16.mxu1 %v10062_v29  ;;  %v10110_v29 = vld [vmem:[%s10748_s12 + $0xbec] ss:$16 sps:$4 sm:$0xff]  }
 0x256   : > { %v6113_v62 = vpop.f32.mrf.mxu0  ;;  %6399 = vmatmul.mubr.bf16.vlgmr.msra.gmra.mxu0 %v10924_v34 }
 0x257   : > { %v6154_v13 = vpop.f32.mrf.mxu1  ;;  %v6114_v15 = vadd.f32 %v6113_v62, %v11480_v31  ;;  %6449 = vmatpush1.bf16.msra.mxu0 %v10063_v3  ;;  %6480 = vmatprep.mubr.bf16.mxu0 %v10951_v53  ;;  %v10083_v53 = vld [vmem:[%s10748_s12 + $0xa8c] ss:$16 sps:$4 sm:$0xff]   ;;  %v10111_v3 = vld [vmem:[%s10748_s12 + $0xce8] ss:$16 sps:$4 sm:$0xff]  }
 0x258   : > { %6424 = vmatpush2.bf16.msra.mxu1 %v10060_v47  ;;  %v6115_v30 = vpop.f32.mrf.mxu0  ;;  %6450 = vmatprep.subr.bf16.mxu0 %v10071_v45  ;;  %v10108_v47 = vld [vmem:[%s10748_s12 + $0xbe8] ss:$16 sps:$4 sm:$0xff]   ;;  %v10119_v45 = vld [vmem:[%s10748_s12 + $0xccc] ss:$16 sps:$4 sm:$0xff]  }
 0x259   : > { %v6156_v19 = vpop.f32.mrf.mxu1  ;;  %6425 = vmatprep.subr.bf16.mxu1 %v10068_v10  ;;  %v11554_v27 = vadd.f32 %v6154_v13, %v6114_v15  ;;  %v6116_v34 = vadd.f32 %v6115_v30, %v11484_v39  ;;  %v10080_v39 = vld [vmem:[%s10748_s12 + $0x98c] ss:$16 sps:$4 sm:$0xff]   ;;  %v10114_v13 = vld [vmem:[%s10748_s12 + $0xbc8] ss:$16 sps:$4 sm:$0xff]  }
 0x25a   : > { %v6117_v31 = vpop.f32.mrf.mxu0  ;;  %v10116_v10 = vld [vmem:[%s10748_s12 + $0xbcc] ss:$16 sps:$4 sm:$0xff]   ;;  %v10117_v15 = vld [vmem:[%s10748_s12 + $0xcc8] ss:$16 sps:$4 sm:$0xff]  }
 0x25b   : > { %v6158_v63 = vpop.f32.mrf.mxu1  ;;  %v11558_v28 = vadd.f32 %v6156_v19, %v6116_v34  ;;  %6451 = vmatpush1.bf16.msra.mxu0 %v10069_v16  ;;  %v10122_v16 = vld [vmem:[%s10748_s12 + $0xbac] ss:$16 sps:$4 sm:$0xff]  }
 0x25c   : > { %6426 = vmatpush2.bf16.msra.mxu1 %v10066_v7  ;;  %v6118_v18 = vpop.f32.mrf.mxu0  ;;  %6452 = vmatprep.subr.bf16.mxu0 %v10077_v23  ;;  %v10125_v30 = vld [vmem:[%s10748_s12 + $0xcac] ss:$16 sps:$4 sm:$0xff]   ;;  %v10126_v63 = vld [vmem:[%s10748_s12 + $0xb88] ss:$16 sps:$4 sm:$0xff]  }
 0x25d   : > { %v6159_v24 = vpop.f32.mrf.mxu1  ;;  %6427 = vmatprep.subr.bf16.mxu1 %v10074_v20  ;;  %v10123_v20 = vld [vmem:[%s10748_s12 + $0xca8] ss:$16 sps:$4 sm:$0xff]   ;;  %v10128_v34 = vld [vmem:[%s10748_s12 + $0xb8c] ss:$16 sps:$4 sm:$0xff]  }
 0x25e   : > { %v10131_v31 = vld [vmem:[%s10748_s12 + $0xc8c] ss:$16 sps:$4 sm:$0xff]   ;;  %v10132_v18 = vld [vmem:[%s10748_s12 + $0xb68] ss:$16 sps:$4 sm:$0xff]  }
 0x25f   : > { %6453 = vmatpush1.bf16.msra.mxu0 %v10075_v33  ;;  %v10137_v33 = vld [vmem:[%s10748_s12 + $0xc6c] ss:$16 sps:$4 sm:$0xff]   ;;  %v10135_v24 = vld [vmem:[%s10748_s12 + $0xc68] ss:$16 sps:$4 sm:$0xff]  }
 0x260   : > { %6428 = vmatpush2.bf16.msra.mxu1 %v10072_v9  ;;  %6454 = vmatprep.subr.bf16.mxu0 %v10083_v53  ;;  %v10134_v9 = vld [vmem:[%s10748_s12 + $0xb6c] ss:$16 sps:$4 sm:$0xff]  }
 0x261   : > { %6429 = vmatprep.subr.bf16.mxu1 %v10080_v39  ;;  %v10140_v39 = vld [vmem:[%s10748_s12 + $0xb4c] ss:$16 sps:$4 sm:$0xff]  }
 0x262   : > { %v10143_v53 = vld [vmem:[%s10748_s12 + $0xc4c] ss:$16 sps:$4 sm:$0xff]  }
 0x263   : > { %6455 = vmatpush1.bf16.msra.mxu0 %v10081_v41  ;;  %v10141_v41 = vld [vmem:[%s10748_s12 + $0xc48] ss:$16 sps:$4 sm:$0xff]  }
 0x264   : > { %6430 = vmatpush2.bf16.msra.mxu1 %v10078_v17  ;;  %6456 = vmatprep.subr.bf16.mxu0 %v10089_v14  ;;  %v10138_v17 = vld [vmem:[%s10748_s12 + $0xb48] ss:$16 sps:$4 sm:$0xff]   ;;  %v10149_v14 = vld [vmem:[%s10748_s12 + $0xc2c] ss:$16 sps:$4 sm:$0xff]  }
 0x265   : > { %6431 = vmatprep.subr.bf16.mxu1 %v10086_v49  ;;  %v10146_v49 = vld [vmem:[%s10748_s12 + $0xb2c] ss:$16 sps:$4 sm:$0xff]  }
 0x267   : > { %6457 = vmatpush1.bf16.msra.mxu0 %v10087_v54  ;;  %v10147_v54 = vld [vmem:[%s10748_s12 + $0xc28] ss:$16 sps:$4 sm:$0xff]  }
 0x268   : > { %6432 = vmatpush2.bf16.msra.mxu1 %v10084_v43  ;;  %6458 = vmatprep.subr.bf16.mxu0 %v10095_v58  ;;  %v10144_v43 = vld [vmem:[%s10748_s12 + $0xb28] ss:$16 sps:$4 sm:$0xff]   ;;  %v10155_v58 = vld [vmem:[%s10748_s12 + $0xc0c] ss:$16 sps:$4 sm:$0xff]  }
 0x269   : > { %6433 = vmatprep.subr.bf16.mxu1 %v10092_v32  ;;  %v10152_v32 = vld [vmem:[%s10748_s12 + $0xb0c] ss:$16 sps:$4 sm:$0xff]  }
 0x26b   : > { %6459 = vmatpush1.bf16.msra.mxu0 %v10093_v46  ;;  %v10153_v46 = vld [vmem:[%s10748_s12 + $0xc08] ss:$16 sps:$4 sm:$0xff]  }
 0x26c   : > { %6434 = vmatpush2.bf16.msra.mxu1 %v10090_v4  ;;  %6460 = vmatprep.subr.bf16.mxu0 %v10101_v52  ;;  %v10150_v4 = vld [vmem:[%s10748_s12 + $0xb08] ss:$16 sps:$4 sm:$0xff]   ;;  %v10161_v52 = vld [vmem:[%s10748_s12 + $0xeec] ss:$16 sps:$4 sm:$0xff]  }
 0x26d   : > { %6435 = vmatprep.subr.bf16.mxu1 %v10098_v25  ;;  %v10158_v25 = vld [vmem:[%s10748_s12 + $0xdec] ss:$16 sps:$4 sm:$0xff]  }
 0x26f   : > { %6461 = vmatpush1.bf16.msra.mxu0 %v10099_v56  ;;  %v10159_v56 = vld [vmem:[%s10748_s12 + $0xee8] ss:$16 sps:$4 sm:$0xff]  }
 0x270   : > { %6436 = vmatpush2.bf16.msra.mxu1 %v10096_v55  ;;  %6462 = vmatprep.subr.bf16.mxu0 %v10107_v1  ;;  %v10156_v55 = vld [vmem:[%s10748_s12 + $0xde8] ss:$16 sps:$4 sm:$0xff]   ;;  %v10167_v1 = vld [vmem:[%s10748_s12 + $0xecc] ss:$16 sps:$4 sm:$0xff]  }
 0x271   : > { %6437 = vmatprep.subr.bf16.mxu1 %v10104_v61  ;;  %v10164_v61 = vld [vmem:[%s10748_s12 + $0xdcc] ss:$16 sps:$4 sm:$0xff]  }
 0x273   : > { %6463 = vmatpush1.bf16.msra.mxu0 %v10105_v22 }
 0x274   : > { %6438 = vmatpush2.bf16.msra.mxu1 %v10102_v21  ;;  %6464 = vmatprep.subr.bf16.mxu0 %v10110_v29  ;;  %v10162_v29 = vld [vmem:[%s10748_s12 + $0xdc8] ss:$16 sps:$4 sm:$0xff]  }
 0x275   : > { %6489 = vmatprep.subr.bf16.mxu1 %v10113_v2  ;;  %v10165_v2 = vld [vmem:[%s10748_s12 + $0xec8] ss:$16 sps:$4 sm:$0xff]  }
 0x277   : > { %v11588_v62 = vpop.f32.mrf.mxu1  ;;  %6440 = vmatmul.mubr.bf16.vlgmr.msra.gmra.mxu1 %v11022_v5  ;;  %6465 = vmatpush2.bf16.msra.mxu0 %v10108_v47  ;;  %v10120_v5 = vld [vmem:[%s10748_s12 + $0xba8] ss:$16 sps:$4 sm:$0xff]  }
 0x278   : > { %6490 = vmatpush1.bf16.msra.mxu1 %v10111_v3  ;;  %6466 = vmatprep.subr.bf16.mxu0 %v10116_v10  ;;  %v10170_v3 = vld [vmem:[%s10748_s12 + $0xdac] ss:$16 sps:$4 sm:$0xff]  }
 0x279   : > { %v11593_v7 = vpop.f32.mrf.mxu1  ;;  %6491 = vmatprep.subr.bf16.mxu1 %v10119_v45  ;;  %6521 = vmatprep.mubr.bf16.mxu1 %v11032_v11  ;;  %v10129_v11 = vld [vmem:[%s10748_s12 + $0xc88] ss:$16 sps:$4 sm:$0xff]   ;;  %v10173_v10 = vld [vmem:[%s10748_s12 + $0xeac] ss:$16 sps:$4 sm:$0xff]  }
 0x27b   : > { %v6240_v19 = vpop.f32.mrf.mxu1  ;;  %6467 = vmatpush2.bf16.msra.mxu0 %v10114_v13 }
 0x27c   : > { %6492 = vmatpush1.bf16.msra.mxu1 %v10117_v15  ;;  %6468 = vmatprep.subr.bf16.mxu0 %v10122_v16  ;;  %v10168_v15 = vld [vmem:[%s10748_s12 + $0xda8] ss:$16 sps:$4 sm:$0xff]  }
 0x27d   : > { %v6241_v23 = vpop.f32.mrf.mxu1  ;;  %6493 = vmatprep.subr.bf16.mxu1 %v10125_v30  ;;  %v10171_v16 = vld [vmem:[%s10748_s12 + $0xea8] ss:$16 sps:$4 sm:$0xff]  }
 0x27e   : > { %v10177_v19 = vld [vmem:[%s10748_s12 + $0xe88] ss:$16 sps:$4 sm:$0xff]  }
 0x27f   : > { %6469 = vmatpush2.bf16.msra.mxu0 %v10120_v5  ;;  %v10182_v5 = vld [vmem:[%s10748_s12 + $0xd6c] ss:$16 sps:$4 sm:$0xff]   ;;  %v10180_v23 = vld [vmem:[%s10748_s12 + $0xd68] ss:$16 sps:$4 sm:$0xff]  }
 0x280   : > { %6494 = vmatpush1.bf16.msra.mxu1 %v10123_v20  ;;  %6470 = vmatprep.subr.bf16.mxu0 %v10128_v34  ;;  %v10185_v20 = vld [vmem:[%s10748_s12 + $0xe6c] ss:$16 sps:$4 sm:$0xff]   ;;  %v10183_v34 = vld [vmem:[%s10748_s12 + $0xe68] ss:$16 sps:$4 sm:$0xff]  }
 0x281   : > { %6495 = vmatprep.subr.bf16.mxu1 %v10131_v31  ;;  %v10188_v31 = vld [vmem:[%s10748_s12 + $0xd4c] ss:$16 sps:$4 sm:$0xff]  }
 0x283   : > { %6471 = vmatpush2.bf16.msra.mxu0 %v10126_v63  ;;  %v10191_v63 = vld [vmem:[%s10748_s12 + $0xe4c] ss:$16 sps:$4 sm:$0xff]  }
 0x284   : > { %6496 = vmatpush1.bf16.msra.mxu1 %v10129_v11  ;;  %6472 = vmatprep.subr.bf16.mxu0 %v10134_v9  ;;  %v10186_v11 = vld [vmem:[%s10748_s12 + $0xd48] ss:$16 sps:$4 sm:$0xff]  }
 0x285   : > { %6497 = vmatprep.subr.bf16.mxu1 %v10137_v33  ;;  %v10189_v9 = vld [vmem:[%s10748_s12 + $0xe48] ss:$16 sps:$4 sm:$0xff]   ;;  %v10194_v33 = vld [vmem:[%s10748_s12 + $0xd2c] ss:$16 sps:$4 sm:$0xff]  }
 0x287   : > { %6473 = vmatpush2.bf16.msra.mxu0 %v10132_v18  ;;  %v10197_v18 = vld [vmem:[%s10748_s12 + $0xe2c] ss:$16 sps:$4 sm:$0xff]  }
 0x288   : > { %6498 = vmatpush1.bf16.msra.mxu1 %v10135_v24  ;;  %6474 = vmatprep.subr.bf16.mxu0 %v10140_v39  ;;  %v10192_v24 = vld [vmem:[%s10748_s12 + $0xd28] ss:$16 sps:$4 sm:$0xff]  }
 0x289   : > { %6499 = vmatprep.subr.bf16.mxu1 %v10143_v53  ;;  %v10195_v39 = vld [vmem:[%s10748_s12 + $0xe28] ss:$16 sps:$4 sm:$0xff]   ;;  %v10200_v53 = vld [vmem:[%s10748_s12 + $0xd0c] ss:$16 sps:$4 sm:$0xff]  }
 0x28b   : > { %6475 = vmatpush2.bf16.msra.mxu0 %v10138_v17  ;;  %v10203_v17 = vld [vmem:[%s10748_s12 + $0xe0c] ss:$16 sps:$4 sm:$0xff]  }
 0x28c   : > { %6500 = vmatpush1.bf16.msra.mxu1 %v10141_v41  ;;  %6476 = vmatprep.subr.bf16.mxu0 %v10146_v49  ;;  %v10198_v41 = vld [vmem:[%s10748_s12 + $0xd08] ss:$16 sps:$4 sm:$0xff]  }
 0x28d   : > { %6501 = vmatprep.subr.bf16.mxu1 %v10149_v14  ;;  %v10201_v49 = vld [vmem:[%s10748_s12 + $0xe08] ss:$16 sps:$4 sm:$0xff]   ;;  %v10206_v14 = vld [vmem:[%s10748_s12 + $0xfec] ss:$16 sps:$4 sm:$0xff]  }
 0x28f   : > { %6477 = vmatpush2.bf16.msra.mxu0 %v10144_v43  ;;  %v10209_v43 = vld [vmem:[%s10748_s12 + $0x10ec] ss:$16 sps:$4 sm:$0xff]  }
 0x290   : > { %6502 = vmatpush1.bf16.msra.mxu1 %v10147_v54  ;;  %6478 = vmatprep.subr.bf16.mxu0 %v10152_v32  ;;  %v10204_v54 = vld [vmem:[%s10748_s12 + $0xfe8] ss:$16 sps:$4 sm:$0xff]  }
 0x291   : > { %6503 = vmatprep.subr.bf16.mxu1 %v10155_v58  ;;  %v10207_v32 = vld [vmem:[%s10748_s12 + $0x10e8] ss:$16 sps:$4 sm:$0xff]   ;;  %v10212_v58 = vld [vmem:[%s10748_s12 + $0xfcc] ss:$16 sps:$4 sm:$0xff]  }
 0x293   : > { %6479 = vmatpush2.bf16.msra.mxu0 %v10150_v4  ;;  %v10215_v4 = vld [vmem:[%s10748_s12 + $0x10cc] ss:$16 sps:$4 sm:$0xff]  }
 0x294   : > { %6504 = vmatpush1.bf16.msra.mxu1 %v10153_v46  ;;  %6530 = vmatprep.subr.bf16.mxu0 %v10161_v52  ;;  %v10213_v52 = vld [vmem:[%s10748_s12 + $0x10c8] ss:$16 sps:$4 sm:$0xff]  }
 0x295   : > { %6505 = vmatprep.subr.bf16.mxu1 %v10158_v25  ;;  %v10210_v25 = vld [vmem:[%s10748_s12 + $0xfc8] ss:$16 sps:$4 sm:$0xff]  }
 0x296   : > { %v6195_v21 = vpop.f32.mrf.mxu0  ;;  %6481 = vmatmul.mubr.bf16.vlgmr.msra.gmra.mxu0 %v11026_v6 }
 0x297   : > { %v6196_v22 = vadd.f32 %v6195_v21, %v11554_v27  ;;  %6531 = vmatpush1.bf16.msra.mxu0 %v10159_v56  ;;  %6562 = vmatprep.mubr.bf16.mxu0 %v11034_v40  ;;  %v10218_v56 = vld [vmem:[%s10748_s12 + $0xfac] ss:$16 sps:$4 sm:$0xff]   ;;  %v10219_v21 = vld [vmem:[%s10748_s12 + $0x10a8] ss:$16 sps:$4 sm:$0xff]  }
 0x298   : > { %6506 = vmatpush2.bf16.msra.mxu1 %v10156_v55  ;;  %v6197_v47 = vpop.f32.mrf.mxu0  ;;  %6532 = vmatprep.subr.bf16.mxu0 %v10167_v1 }
 0x299   : > { %6507 = vmatprep.subr.bf16.mxu1 %v10164_v61  ;;  %v11633_v45 = vadd.f32 %v11588_v62, %v6196_v22  ;;  %v6198_v6 = vadd.f32 %v6197_v47, %v11558_v28  ;;  %v10176_v28 = vld [vmem:[%s10748_s12 + $0xd8c] ss:$16 sps:$4 sm:$0xff]   ;;  %v10222_v47 = vld [vmem:[%s10748_s12 + $0xf88] ss:$16 sps:$4 sm:$0xff]  }
 0x29a   : > { %v6199_v27 = vpop.f32.mrf.mxu0  ;;  %v10179_v62 = vld [vmem:[%s10748_s12 + $0xe8c] ss:$16 sps:$4 sm:$0xff]  }
 0x29b   : > { %v11638_v13 = vadd.f32 %v11593_v7, %v6198_v6  ;;  %6533 = vmatpush1.bf16.msra.mxu0 %v10165_v2  ;;  %v10174_v7 = vld [vmem:[%s10748_s12 + $0xd88] ss:$16 sps:$4 sm:$0xff]   ;;  %v10221_v61 = vld [vmem:[%s10748_s12 + $0x10ac] ss:$16 sps:$4 sm:$0xff]  }
 0x29c   : > { %6508 = vmatpush2.bf16.msra.mxu1 %v10162_v29  ;;  %v6200_v30 = vpop.f32.mrf.mxu0  ;;  %6534 = vmatprep.subr.bf16.mxu0 %v10173_v10  ;;  %v10224_v29 = vld [vmem:[%s10748_s12 + $0xf8c] ss:$16 sps:$4 sm:$0xff]   ;;  %v10228_v6 = vld [vmem:[%s10748_s12 + $0xf68] ss:$16 sps:$4 sm:$0xff]  }
 0x29d   : > { %6509 = vmatprep.subr.bf16.mxu1 %v10170_v3  ;;  %v6821_v40 = vcombine.low %v11633_v45, %v11638_v13  ;;  %v10227_v2 = vld [vmem:[%s10748_s12 + $0x108c] ss:$16 sps:$4 sm:$0xff]   ;;  %v10231_v27 = vld [vmem:[%s10748_s12 + $0x1068] ss:$16 sps:$4 sm:$0xff]  }
 0x29e   : > { %v10230_v3 = vld [vmem:[%s10748_s12 + $0xf6c] ss:$16 sps:$4 sm:$0xff]   ;;  %v10234_v30 = vld [vmem:[%s10748_s12 + $0xf48] ss:$16 sps:$4 sm:$0xff]  }
 0x29f   : > { %6535 = vmatpush1.bf16.msra.mxu0 %v10171_v16  ;;  %v10233_v10 = vld [vmem:[%s10748_s12 + $0x106c] ss:$16 sps:$4 sm:$0xff]  }
 0x2a0   : > { %6510 = vmatpush2.bf16.msra.mxu1 %v10168_v15  ;;  %6536 = vmatprep.subr.bf16.mxu0 %v10179_v62  ;;  %v10236_v15 = vld [vmem:[%s10748_s12 + $0xf4c] ss:$16 sps:$4 sm:$0xff]  }
 0x2a1   : > { %6511 = vmatprep.subr.bf16.mxu1 %v10176_v28  ;;  %v10239_v16 = vld [vmem:[%s10748_s12 + $0x104c] ss:$16 sps:$4 sm:$0xff]   ;;  %v10237_v28 = vld [vmem:[%s10748_s12 + $0x1048] ss:$16 sps:$4 sm:$0xff]  }
 0x2a2   : > { %v10242_v62 = vld [vmem:[%s10748_s12 + $0xf2c] ss:$16 sps:$4 sm:$0xff]  }
 0x2a3   : > { %6537 = vmatpush1.bf16.msra.mxu0 %v10177_v19  ;;  %v10240_v19 = vld [vmem:[%s10748_s12 + $0xf28] ss:$16 sps:$4 sm:$0xff]  }
 0x2a4   : > { %6512 = vmatpush2.bf16.msra.mxu1 %v10174_v7  ;;  %6538 = vmatprep.subr.bf16.mxu0 %v10185_v20  ;;  %v10245_v7 = vld [vmem:[%s10748_s12 + $0x102c] ss:$16 sps:$4 sm:$0xff]  }
 0x2a5   : > { %6513 = vmatprep.subr.bf16.mxu1 %v10182_v5  ;;  %v10243_v5 = vld [vmem:[%s10748_s12 + $0x1028] ss:$16 sps:$4 sm:$0xff]   ;;  %v10248_v20 = vld [vmem:[%s10748_s12 + $0xf0c] ss:$16 sps:$4 sm:$0xff]  }
 0x2a7   : > { %6539 = vmatpush1.bf16.msra.mxu0 %v10183_v34  ;;  %v10246_v34 = vld [vmem:[%s10748_s12 + $0xf08] ss:$16 sps:$4 sm:$0xff]  }
 0x2a8   : > { %6514 = vmatpush2.bf16.msra.mxu1 %v10180_v23  ;;  %6540 = vmatprep.subr.bf16.mxu0 %v10191_v63  ;;  %v10251_v23 = vld [vmem:[%s10748_s12 + $0x100c] ss:$16 sps:$4 sm:$0xff]  }
 0x2a9   : > { %6515 = vmatprep.subr.bf16.mxu1 %v10188_v31  ;;  %v10249_v31 = vld [vmem:[%s10748_s12 + $0x1008] ss:$16 sps:$4 sm:$0xff]   ;;  %v10254_v63 = vld [vmem:[%s10748_s12 + $0x11ec] ss:$16 sps:$4 sm:$0xff]  }
 0x2ab   : > { %6541 = vmatpush1.bf16.msra.mxu0 %v10189_v9  ;;  %v10252_v9 = vld [vmem:[%s10748_s12 + $0x11e8] ss:$16 sps:$4 sm:$0xff]  }
 0x2ac   : > { %6516 = vmatpush2.bf16.msra.mxu1 %v10186_v11  ;;  %6542 = vmatprep.subr.bf16.mxu0 %v10197_v18  ;;  %v10257_v11 = vld [vmem:[%s10748_s12 + $0x12ec] ss:$16 sps:$4 sm:$0xff]  }
 0x2ad   : > { %6517 = vmatprep.subr.bf16.mxu1 %v10194_v33  ;;  %v10255_v33 = vld [vmem:[%s10748_s12 + $0x12e8] ss:$16 sps:$4 sm:$0xff]   ;;  %v10260_v18 = vld [vmem:[%s10748_s12 + $0x11cc] ss:$16 sps:$4 sm:$0xff]  }
 0x2af   : > { %6543 = vmatpush1.bf16.msra.mxu0 %v10195_v39 }
 0x2b0   : > { %6518 = vmatpush2.bf16.msra.mxu1 %v10192_v24  ;;  %6544 = vmatprep.subr.bf16.mxu0 %v10203_v17  ;;  %v10263_v24 = vld [vmem:[%s10748_s12 + $0x12cc] ss:$16 sps:$4 sm:$0xff]   ;;  %v10258_v17 = vld [vmem:[%s10748_s12 + $0x11c8] ss:$16 sps:$4 sm:$0xff]  }
 0x2b1   : > { %6519 = vmatprep.subr.bf16.mxu1 %v10200_v53 }
 0x2b3   : > { %6545 = vmatpush1.bf16.msra.mxu0 %v10201_v49 }
 0x2b4   : > { %6520 = vmatpush2.bf16.msra.mxu1 %v10198_v41  ;;  %6546 = vmatprep.subr.bf16.mxu0 %v10206_v14  ;;  %v10261_v41 = vld [vmem:[%s10748_s12 + $0x12c8] ss:$16 sps:$4 sm:$0xff]   ;;  %v10266_v14 = vld [vmem:[%s10748_s12 + $0x11ac] ss:$16 sps:$4 sm:$0xff]  }
 0x2b5   : > { %6571 = vmatprep.subr.bf16.mxu1 %v10209_v43  ;;  %v10269_v43 = vld [vmem:[%s10748_s12 + $0x12ac] ss:$16 sps:$4 sm:$0xff]  }
 0x2b7   : > { %v11670_v46 = vpop.f32.mrf.mxu1  ;;  %6522 = vmatmul.mubr.bf16.vlgmr.msra.gmra.mxu1 %v11113_v35  ;;  %6547 = vmatpush2.bf16.msra.mxu0 %v10204_v54  ;;  %v10216_v35 = vld [vmem:[%s10748_s12 + $0xfa8] ss:$16 sps:$4 sm:$0xff]  }
 0x2b8   : > { %6572 = vmatpush1.bf16.msra.mxu1 %v10207_v32  ;;  %6548 = vmatprep.subr.bf16.mxu0 %v10212_v58  ;;  %v10264_v32 = vld [vmem:[%s10748_s12 + $0x11a8] ss:$16 sps:$4 sm:$0xff]  }
 0x2b9   : > { %v11675_v55 = vpop.f32.mrf.mxu1  ;;  %6573 = vmatprep.subr.bf16.mxu1 %v10215_v4  ;;  %6603 = vmatprep.mubr.bf16.mxu1 %v11123_v42  ;;  %v10225_v42 = vld [vmem:[%s10748_s12 + $0x1088] ss:$16 sps:$4 sm:$0xff]  }
 0x2ba   : > { %v10267_v58 = vld [vmem:[%s10748_s12 + $0x12a8] ss:$16 sps:$4 sm:$0xff]  }
 0x2bb   : > { %v6281_v1 = vpop.f32.mrf.mxu1  ;;  %6549 = vmatpush2.bf16.msra.mxu0 %v10210_v25  ;;  %v10275_v25 = vld [vmem:[%s10748_s12 + $0x128c] ss:$16 sps:$4 sm:$0xff]  }
 0x2bc   : > { %6574 = vmatpush1.bf16.msra.mxu1 %v10213_v52  ;;  %6550 = vmatprep.subr.bf16.mxu0 %v10218_v56  ;;  %v10270_v52 = vld [vmem:[%s10748_s12 + $0x1188] ss:$16 sps:$4 sm:$0xff]   ;;  %v10281_v56 = vld [vmem:[%s10748_s12 + $0x126c] ss:$16 sps:$4 sm:$0xff]  }
 0x2bd   : > { %v6282_v22 = vpop.f32.mrf.mxu1  ;;  %6575 = vmatprep.subr.bf16.mxu1 %v10221_v61  ;;  %v10276_v61 = vld [vmem:[%s10748_s12 + $0x1168] ss:$16 sps:$4 sm:$0xff]  }
 0x2be   : > { %v10279_v1 = vld [vmem:[%s10748_s12 + $0x1268] ss:$16 sps:$4 sm:$0xff]  }
 0x2bf   : > { %6551 = vmatpush2.bf16.msra.mxu0 %v10216_v35  ;;  %v10284_v35 = vld [vmem:[%s10748_s12 + $0x114c] ss:$16 sps:$4 sm:$0xff]   ;;  %v10282_v22 = vld [vmem:[%s10748_s12 + $0x1148] ss:$16 sps:$4 sm:$0xff]  }
 0x2c0   : > { %6576 = vmatpush1.bf16.msra.mxu1 %v10219_v21  ;;  %6552 = vmatprep.subr.bf16.mxu0 %v10224_v29  ;;  %v10287_v21 = vld [vmem:[%s10748_s12 + $0x124c] ss:$16 sps:$4 sm:$0xff]   ;;  %v10285_v29 = vld [vmem:[%s10748_s12 + $0x1248] ss:$16 sps:$4 sm:$0xff]  }
 0x2c1   : > { %6577 = vmatprep.subr.bf16.mxu1 %v10227_v2  ;;  %v10290_v2 = vld [vmem:[%s10748_s12 + $0x112c] ss:$16 sps:$4 sm:$0xff]  }
 0x2c3   : > { %6553 = vmatpush2.bf16.msra.mxu0 %v10222_v47  ;;  %v10293_v47 = vld [vmem:[%s10748_s12 + $0x122c] ss:$16 sps:$4 sm:$0xff]  }
 0x2c4   : > { %6578 = vmatpush1.bf16.msra.mxu1 %v10225_v42  ;;  %6554 = vmatprep.subr.bf16.mxu0 %v10230_v3  ;;  %v10288_v42 = vld [vmem:[%s10748_s12 + $0x1128] ss:$16 sps:$4 sm:$0xff]  }
 0x2c5   : > { %6579 = vmatprep.subr.bf16.mxu1 %v10233_v10  ;;  %v10291_v3 = vld [vmem:[%s10748_s12 + $0x1228] ss:$16 sps:$4 sm:$0xff]   ;;  %v10296_v10 = vld [vmem:[%s10748_s12 + $0x110c] ss:$16 sps:$4 sm:$0xff]  }
 0x2c7   : > { %6555 = vmatpush2.bf16.msra.mxu0 %v10228_v6  ;;  %v10299_v6 = vld [vmem:[%s10748_s12 + $0x120c] ss:$16 sps:$4 sm:$0xff]  }
 0x2c8   : > { %6580 = vmatpush1.bf16.msra.mxu1 %v10231_v27  ;;  %6556 = vmatprep.subr.bf16.mxu0 %v10236_v15  ;;  %v10294_v27 = vld [vmem:[%s10748_s12 + $0x1108] ss:$16 sps:$4 sm:$0xff]  }
 0x2c9   : > { %6581 = vmatprep.subr.bf16.mxu1 %v10239_v16  ;;  %v10297_v15 = vld [vmem:[%s10748_s12 + $0x1208] ss:$16 sps:$4 sm:$0xff]   ;;  %v10302_v16 = vld [vmem:[%s10748_s12 + $0x13ec] ss:$16 sps:$4 sm:$0xff]  }
 0x2cb   : > { %6557 = vmatpush2.bf16.msra.mxu0 %v10234_v30  ;;  %v10305_v30 = vld [vmem:[%s10748_s12 + $0x14ec] ss:$16 sps:$4 sm:$0xff]  }
 0x2cc   : > { %6582 = vmatpush1.bf16.msra.mxu1 %v10237_v28  ;;  %6558 = vmatprep.subr.bf16.mxu0 %v10242_v62  ;;  %v10300_v28 = vld [vmem:[%s10748_s12 + $0x13e8] ss:$16 sps:$4 sm:$0xff]  }
 0x2cd   : > { %6583 = vmatprep.subr.bf16.mxu1 %v10245_v7  ;;  %v10303_v62 = vld [vmem:[%s10748_s12 + $0x14e8] ss:$16 sps:$4 sm:$0xff]   ;;  %v10308_v7 = vld [vmem:[%s10748_s12 + $0x13cc] ss:$16 sps:$4 sm:$0xff]  }
 0x2cf   : > { %6559 = vmatpush2.bf16.msra.mxu0 %v10240_v19  ;;  %v10311_v19 = vld [vmem:[%s10748_s12 + $0x14cc] ss:$16 sps:$4 sm:$0xff]  }
 0x2d0   : > { %6584 = vmatpush1.bf16.msra.mxu1 %v10243_v5  ;;  %6560 = vmatprep.subr.bf16.mxu0 %v10248_v20 }
 0x2d1   : > { %6585 = vmatprep.subr.bf16.mxu1 %v10251_v23  ;;  %v10306_v23 = vld [vmem:[%s10748_s12 + $0x13c8] ss:$16 sps:$4 sm:$0xff]  }
 0x2d3   : > { %6561 = vmatpush2.bf16.msra.mxu0 %v10246_v34  ;;  %v10309_v34 = vld [vmem:[%s10748_s12 + $0x14c8] ss:$16 sps:$4 sm:$0xff]  }
 0x2d4   : > { %6586 = vmatpush1.bf16.msra.mxu1 %v10249_v31  ;;  %6612 = vmatprep.subr.bf16.mxu0 %v10257_v11  ;;  %v10317_v11 = vld [vmem:[%s10748_s12 + $0x14ac] ss:$16 sps:$4 sm:$0xff]  }
 0x2d5   : > { %6587 = vmatprep.subr.bf16.mxu1 %v10254_v63  ;;  %v10314_v63 = vld [vmem:[%s10748_s12 + $0x13ac] ss:$16 sps:$4 sm:$0xff]  }
 0x2d6   : > { %v6318_v39 = vpop.f32.mrf.mxu0  ;;  %6563 = vmatmul.mubr.bf16.vlgmr.msra.gmra.mxu0 %v11117_v36 }
 0x2d7   : > { %v11710_v53 = vadd.f32 %v6318_v39, %v11670_v46  ;;  %6613 = vmatpush1.bf16.msra.mxu0 %v10255_v33  ;;  %6644 = vmatprep.mubr.bf16.mxu0 %v11125_v59  ;;  %v10272_v46 = vld [vmem:[%s10748_s12 + $0x118c] ss:$16 sps:$4 sm:$0xff]   ;;  %v10273_v59 = vld [vmem:[%s10748_s12 + $0x1288] ss:$16 sps:$4 sm:$0xff]  }
 0x2d8   : > { %6588 = vmatpush2.bf16.msra.mxu1 %v10252_v9  ;;  %v6320_v49 = vpop.f32.mrf.mxu0  ;;  %6614 = vmatprep.subr.bf16.mxu0 %v10263_v24  ;;  %v10312_v33 = vld [vmem:[%s10748_s12 + $0x13a8] ss:$16 sps:$4 sm:$0xff]   ;;  %v10320_v39 = vld [vmem:[%s10748_s12 + $0x138c] ss:$16 sps:$4 sm:$0xff]  }
 0x2d9   : > { %6589 = vmatprep.subr.bf16.mxu1 %v10260_v18  ;;  %v11717_v36 = vadd.f32 %v6320_v49, %v11675_v55  ;;  %v10278_v55 = vld [vmem:[%s10748_s12 + $0x116c] ss:$16 sps:$4 sm:$0xff]   ;;  %v10315_v18 = vld [vmem:[%s10748_s12 + $0x14a8] ss:$16 sps:$4 sm:$0xff]  }
 0x2da   : > { %v6322_v54 = vpop.f32.mrf.mxu0  ;;  %v10329_v49 = vld [vmem:[%s10748_s12 + $0x146c] ss:$16 sps:$4 sm:$0xff]  }
 0x2db   : > { %6615 = vmatpush1.bf16.msra.mxu0 %v10261_v41  ;;  %v10326_v41 = vld [vmem:[%s10748_s12 + $0x136c] ss:$16 sps:$4 sm:$0xff]  }
 0x2dc   : > { %6590 = vmatpush2.bf16.msra.mxu1 %v10258_v17  ;;  %v6323_v4 = vpop.f32.mrf.mxu0  ;;  %6616 = vmatprep.subr.bf16.mxu0 %v10269_v43  ;;  %v10318_v17 = vld [vmem:[%s10748_s12 + $0x1388] ss:$16 sps:$4 sm:$0xff]   ;;  %v10335_v54 = vld [vmem:[%s10748_s12 + $0x144c] ss:$16 sps:$4 sm:$0xff]  }
 0x2dd   : > { %6591 = vmatprep.subr.bf16.mxu1 %v10266_v14  ;;  %v10324_v14 = vld [vmem:[%s10748_s12 + $0x1368] ss:$16 sps:$4 sm:$0xff]   ;;  %v10338_v4 = vld [vmem:[%s10748_s12 + $0x132c] ss:$16 sps:$4 sm:$0xff]  }
 0x2de   : > { %v10327_v43 = vld [vmem:[%s10748_s12 + $0x1468] ss:$16 sps:$4 sm:$0xff]  }
 0x2df   : > { %6617 = vmatpush1.bf16.msra.mxu0 %v10267_v58  ;;  %v10333_v58 = vld [vmem:[%s10748_s12 + $0x1448] ss:$16 sps:$4 sm:$0xff]  }
 0x2e0   : > { %6592 = vmatpush2.bf16.msra.mxu1 %v10264_v32  ;;  %6618 = vmatprep.subr.bf16.mxu0 %v10275_v25  ;;  %v10330_v32 = vld [vmem:[%s10748_s12 + $0x1348] ss:$16 sps:$4 sm:$0xff]  }
 0x2e1   : > { %6593 = vmatprep.subr.bf16.mxu1 %v10272_v46  ;;  %v10341_v46 = vld [vmem:[%s10748_s12 + $0x142c] ss:$16 sps:$4 sm:$0xff]   ;;  %v10336_v25 = vld [vmem:[%s10748_s12 + $0x1328] ss:$16 sps:$4 sm:$0xff]  }
 0x2e3   : > { %6619 = vmatpush1.bf16.msra.mxu0 %v10273_v59  ;;  %v10344_v59 = vld [vmem:[%s10748_s12 + $0x130c] ss:$16 sps:$4 sm:$0xff]  }
 0x2e4   : > { %6594 = vmatpush2.bf16.msra.mxu1 %v10270_v52  ;;  %6620 = vmatprep.subr.bf16.mxu0 %v10281_v56  ;;  %v10339_v52 = vld [vmem:[%s10748_s12 + $0x1428] ss:$16 sps:$4 sm:$0xff]  }
 0x2e5   : > { %6595 = vmatprep.subr.bf16.mxu1 %v10278_v55  ;;  %v10347_v55 = vld [vmem:[%s10748_s12 + $0x140c] ss:$16 sps:$4 sm:$0xff]   ;;  %v10342_v56 = vld [vmem:[%s10748_s12 + $0x1308] ss:$16 sps:$4 sm:$0xff]  }
 0x2e7   : > { %6621 = vmatpush1.bf16.msra.mxu0 %v10279_v1  ;;  %v10350_v1 = vld [vmem:[%s10748_s12 + $0x15ec] ss:$16 sps:$4 sm:$0xff]  }
 0x2e8   : > { %6596 = vmatpush2.bf16.msra.mxu1 %v10276_v61  ;;  %6622 = vmatprep.subr.bf16.mxu0 %v10287_v21  ;;  %v10345_v61 = vld [vmem:[%s10748_s12 + $0x1408] ss:$16 sps:$4 sm:$0xff]  }
 0x2e9   : > { %6597 = vmatprep.subr.bf16.mxu1 %v10284_v35  ;;  %v10353_v35 = vld [vmem:[%s10748_s12 + $0x16ec] ss:$16 sps:$4 sm:$0xff]   ;;  %v10348_v21 = vld [vmem:[%s10748_s12 + $0x15e8] ss:$16 sps:$4 sm:$0xff]  }
 0x2eb   : > { %6623 = vmatpush1.bf16.msra.mxu0 %v10285_v29  ;;  %v10356_v29 = vld [vmem:[%s10748_s12 + $0x15cc] ss:$16 sps:$4 sm:$0xff]  }
 0x2ec   : > { %6598 = vmatpush2.bf16.msra.mxu1 %v10282_v22  ;;  %6624 = vmatprep.subr.bf16.mxu0 %v10293_v47  ;;  %v10351_v22 = vld [vmem:[%s10748_s12 + $0x16e8] ss:$16 sps:$4 sm:$0xff]  }
 0x2ed   : > { %6599 = vmatprep.subr.bf16.mxu1 %v10290_v2  ;;  %v10359_v2 = vld [vmem:[%s10748_s12 + $0x16cc] ss:$16 sps:$4 sm:$0xff]  }
 0x2ef   : > { %6625 = vmatpush1.bf16.msra.mxu0 %v10291_v3  ;;  %v10354_v3 = vld [vmem:[%s10748_s12 + $0x15c8] ss:$16 sps:$4 sm:$0xff]  }
 0x2f0   : > { %6600 = vmatpush2.bf16.msra.mxu1 %v10288_v42  ;;  %6626 = vmatprep.subr.bf16.mxu0 %v10299_v6 }
 0x2f1   : > { %6601 = vmatprep.subr.bf16.mxu1 %v10296_v10  ;;  %v10357_v10 = vld [vmem:[%s10748_s12 + $0x16c8] ss:$16 sps:$4 sm:$0xff]  }
 0x2f3   : > { %6627 = vmatpush1.bf16.msra.mxu0 %v10297_v15  ;;  %v10365_v15 = vld [vmem:[%s10748_s12 + $0x16ac] ss:$16 sps:$4 sm:$0xff]  }
 0x2f4   : > { %6602 = vmatpush2.bf16.msra.mxu1 %v10294_v27  ;;  %6628 = vmatprep.subr.bf16.mxu0 %v10302_v16  ;;  %v10362_v27 = vld [vmem:[%s10748_s12 + $0x15ac] ss:$16 sps:$4 sm:$0xff]  }
 0x2f5   : > { %6653 = vmatprep.subr.bf16.mxu1 %v10305_v30  ;;  %v10360_v30 = vld [vmem:[%s10748_s12 + $0x15a8] ss:$16 sps:$4 sm:$0xff]  }
 0x2f7   : > { %v6359_v5 = vpop.f32.mrf.mxu1  ;;  %6604 = vmatmul.mubr.bf16.vlgmr.msra.gmra.mxu1 %v11210_v37  ;;  %6629 = vmatpush2.bf16.msra.mxu0 %v10300_v28  ;;  %v10363_v28 = vld [vmem:[%s10748_s12 + $0x16a8] ss:$16 sps:$4 sm:$0xff]  }
 0x2f8   : > { %v11750_v20 = vadd.f32 %v6359_v5, %v11710_v53  ;;  %6654 = vmatpush1.bf16.msra.mxu1 %v10303_v62  ;;  %6630 = vmatprep.subr.bf16.mxu0 %v10308_v7  ;;  %v10323_v53 = vld [vmem:[%s10748_s12 + $0x148c] ss:$16 sps:$4 sm:$0xff]   ;;  %v10366_v5 = vld [vmem:[%s10748_s12 + $0x1588] ss:$16 sps:$4 sm:$0xff]  }
 0x2f9   : > { %v6361_v31 = vpop.f32.mrf.mxu1  ;;  %6655 = vmatprep.subr.bf16.mxu1 %v10311_v19  ;;  %6685 = vmatprep.mubr.bf16.mxu1 %v11220_v60  ;;  %v10321_v60 = vld [vmem:[%s10748_s12 + $0x1488] ss:$16 sps:$4 sm:$0xff]   ;;  %v10368_v7 = vld [vmem:[%s10748_s12 + $0x158c] ss:$16 sps:$4 sm:$0xff]  }
 0x2fa   : > { %v11757_v37 = vadd.f32 %v6361_v31, %v11717_v36  ;;  %v10332_v36 = vld [vmem:[%s10748_s12 + $0x134c] ss:$16 sps:$4 sm:$0xff]   ;;  %v10375_v31 = vld [vmem:[%s10748_s12 + $0x1668] ss:$16 sps:$4 sm:$0xff]  }
 0x2fb   : > { %v6363_v9 = vpop.f32.mrf.mxu1  ;;  %6631 = vmatpush2.bf16.msra.mxu0 %v10306_v23  ;;  %v10371_v19 = vld [vmem:[%s10748_s12 + $0x168c] ss:$16 sps:$4 sm:$0xff]  }
 0x2fc   : > { %6656 = vmatpush1.bf16.msra.mxu1 %v10309_v34  ;;  %6632 = vmatprep.subr.bf16.mxu0 %v10314_v63  ;;  %v10377_v23 = vld [vmem:[%s10748_s12 + $0x166c] ss:$16 sps:$4 sm:$0xff]   ;;  %v10372_v34 = vld [vmem:[%s10748_s12 + $0x1568] ss:$16 sps:$4 sm:$0xff]  }
 0x2fd   : > { %v6364_v24 = vpop.f32.mrf.mxu1  ;;  %6657 = vmatprep.subr.bf16.mxu1 %v10317_v11  ;;  %v10380_v63 = vld [vmem:[%s10748_s12 + $0x154c] ss:$16 sps:$4 sm:$0xff]   ;;  %v10381_v9 = vld [vmem:[%s10748_s12 + $0x1648] ss:$16 sps:$4 sm:$0xff]  }
 0x2fe   : > { %v10383_v11 = vld [vmem:[%s10748_s12 + $0x164c] ss:$16 sps:$4 sm:$0xff]   ;;  %v10384_v24 = vld [vmem:[%s10748_s12 + $0x1528] ss:$16 sps:$4 sm:$0xff]  }
 0x2ff   : > { %6633 = vmatpush2.bf16.msra.mxu0 %v10312_v33  ;;  %v10386_v33 = vld [vmem:[%s10748_s12 + $0x152c] ss:$16 sps:$4 sm:$0xff]  }
 0x300   : > { %6658 = vmatpush1.bf16.msra.mxu1 %v10315_v18  ;;  %6634 = vmatprep.subr.bf16.mxu0 %v10320_v39  ;;  %v10389_v18 = vld [vmem:[%s10748_s12 + $0x162c] ss:$16 sps:$4 sm:$0xff]   ;;  %v10387_v39 = vld [vmem:[%s10748_s12 + $0x1628] ss:$16 sps:$4 sm:$0xff]  }
 0x301   : > { %6659 = vmatprep.subr.bf16.mxu1 %v10323_v53  ;;  %v10392_v53 = vld [vmem:[%s10748_s12 + $0x150c] ss:$16 sps:$4 sm:$0xff]  }
 0x303   : > { %6635 = vmatpush2.bf16.msra.mxu0 %v10318_v17  ;;  %v10395_v17 = vld [vmem:[%s10748_s12 + $0x160c] ss:$16 sps:$4 sm:$0xff]  }
 0x304   : > { %6660 = vmatpush1.bf16.msra.mxu1 %v10321_v60  ;;  %6636 = vmatprep.subr.bf16.mxu0 %v10326_v41  ;;  %v10390_v60 = vld [vmem:[%s10748_s12 + $0x1508] ss:$16 sps:$4 sm:$0xff]  }
 0x305   : > { %6661 = vmatprep.subr.bf16.mxu1 %v10329_v49  ;;  %v10393_v41 = vld [vmem:[%s10748_s12 + $0x1608] ss:$16 sps:$4 sm:$0xff]   ;;  %v10398_v49 = vld [vmem:[%s10748_s12 + $0x17ec] ss:$16 sps:$4 sm:$0xff]  }
 0x307   : > { %6637 = vmatpush2.bf16.msra.mxu0 %v10324_v14  ;;  %v10401_v14 = vld [vmem:[%s10748_s12 + $0x18ec] ss:$16 sps:$4 sm:$0xff]  }
 0x308   : > { %6662 = vmatpush1.bf16.msra.mxu1 %v10327_v43  ;;  %6638 = vmatprep.subr.bf16.mxu0 %v10332_v36  ;;  %v10396_v43 = vld [vmem:[%s10748_s12 + $0x17e8] ss:$16 sps:$4 sm:$0xff]  }
 0x309   : > { %6663 = vmatprep.subr.bf16.mxu1 %v10335_v54  ;;  %v10399_v36 = vld [vmem:[%s10748_s12 + $0x18e8] ss:$16 sps:$4 sm:$0xff]   ;;  %v10404_v54 = vld [vmem:[%s10748_s12 + $0x17cc] ss:$16 sps:$4 sm:$0xff]  }
 0x30b   : > { %6639 = vmatpush2.bf16.msra.mxu0 %v10330_v32  ;;  %v10407_v32 = vld [vmem:[%s10748_s12 + $0x18cc] ss:$16 sps:$4 sm:$0xff]  }
 0x30c   : > { %6664 = vmatpush1.bf16.msra.mxu1 %v10333_v58  ;;  %6640 = vmatprep.subr.bf16.mxu0 %v10338_v4 }
 0x30d   : > { %6665 = vmatprep.subr.bf16.mxu1 %v10341_v46  ;;  %v10402_v46 = vld [vmem:[%s10748_s12 + $0x17c8] ss:$16 sps:$4 sm:$0xff]  }
 0x30f   : > { %6641 = vmatpush2.bf16.msra.mxu0 %v10336_v25  ;;  %v10405_v25 = vld [vmem:[%s10748_s12 + $0x18c8] ss:$16 sps:$4 sm:$0xff]  }
 0x310   : > { %6666 = vmatpush1.bf16.msra.mxu1 %v10339_v52  ;;  %6642 = vmatprep.subr.bf16.mxu0 %v10344_v59  ;;  %v10410_v59 = vld [vmem:[%s10748_s12 + $0x17ac] ss:$16 sps:$4 sm:$0xff]  }
 0x311   : > { %6667 = vmatprep.subr.bf16.mxu1 %v10347_v55  ;;  %v10413_v55 = vld [vmem:[%s10748_s12 + $0x18ac] ss:$16 sps:$4 sm:$0xff]  }
 0x313   : > { %6643 = vmatpush2.bf16.msra.mxu0 %v10342_v56 }
 0x314   : > { %6668 = vmatpush1.bf16.msra.mxu1 %v10345_v61  ;;  %6694 = vmatprep.subr.bf16.mxu0 %v10353_v35  ;;  %v10408_v61 = vld [vmem:[%s10748_s12 + $0x17a8] ss:$16 sps:$4 sm:$0xff]  }
 0x315   : > { %6669 = vmatprep.subr.bf16.mxu1 %v10350_v1  ;;  %v10411_v1 = vld [vmem:[%s10748_s12 + $0x18a8] ss:$16 sps:$4 sm:$0xff]  }
 0x316   : > { %v6400_v47 = vpop.f32.mrf.mxu0  ;;  %6645 = vmatmul.mubr.bf16.vlgmr.msra.gmra.mxu0 %v11214_v38 }
 0x317   : > { %v11790_v42 = vadd.f32 %v6400_v47, %v11750_v20  ;;  %6695 = vmatpush1.bf16.msra.mxu0 %v10351_v22  ;;  %6726 = vmatprep.mubr.bf16.mxu0 %v11222_v48  ;;  %v10369_v48 = vld [vmem:[%s10748_s12 + $0x1688] ss:$16 sps:$4 sm:$0xff]   ;;  %v10374_v20 = vld [vmem:[%s10748_s12 + $0x156c] ss:$16 sps:$4 sm:$0xff]  }
 0x318   : > { %6670 = vmatpush2.bf16.msra.mxu1 %v10348_v21  ;;  %v6402_v6 = vpop.f32.mrf.mxu0  ;;  %6696 = vmatprep.subr.bf16.mxu0 %v10359_v2  ;;  %v10416_v21 = vld [vmem:[%s10748_s12 + $0x178c] ss:$16 sps:$4 sm:$0xff]  }
 0x319   : > { %6671 = vmatprep.subr.bf16.mxu1 %v10356_v29  ;;  %v11797_v38 = vadd.f32 %v6402_v6, %v11757_v37  ;;  %v10378_v37 = vld [vmem:[%s10748_s12 + $0x1548] ss:$16 sps:$4 sm:$0xff]   ;;  %v10419_v22 = vld [vmem:[%s10748_s12 + $0x188c] ss:$16 sps:$4 sm:$0xff]  }
 0x31a   : > { %v6404_v16 = vpop.f32.mrf.mxu0  ;;  %v10414_v29 = vld [vmem:[%s10748_s12 + $0x1788] ss:$16 sps:$4 sm:$0xff]   ;;  %v10422_v2 = vld [vmem:[%s10748_s12 + $0x176c] ss:$16 sps:$4 sm:$0xff]  }
 0x31b   : > { %6697 = vmatpush1.bf16.msra.mxu0 %v10357_v10  ;;  %v10425_v47 = vld [vmem:[%s10748_s12 + $0x186c] ss:$16 sps:$4 sm:$0xff]  }
 0x31c   : > { %6672 = vmatpush2.bf16.msra.mxu1 %v10354_v3  ;;  %v6405_v62 = vpop.f32.mrf.mxu0  ;;  %6698 = vmatprep.subr.bf16.mxu0 %v10365_v15  ;;  %v10423_v3 = vld [vmem:[%s10748_s12 + $0x1868] ss:$16 sps:$4 sm:$0xff]   ;;  %v10428_v10 = vld [vmem:[%s10748_s12 + $0x174c] ss:$16 sps:$4 sm:$0xff]  }
 0x31d   : > { %6673 = vmatprep.subr.bf16.mxu1 %v10362_v27  ;;  %v10431_v6 = vld [vmem:[%s10748_s12 + $0x184c] ss:$16 sps:$4 sm:$0xff]   ;;  %v10426_v27 = vld [vmem:[%s10748_s12 + $0x1748] ss:$16 sps:$4 sm:$0xff]  }
 0x31e   : > { %v10429_v15 = vld [vmem:[%s10748_s12 + $0x1848] ss:$16 sps:$4 sm:$0xff]   ;;  %v10437_v16 = vld [vmem:[%s10748_s12 + $0x182c] ss:$16 sps:$4 sm:$0xff]  }
 0x31f   : > { %6699 = vmatpush1.bf16.msra.mxu0 %v10363_v28  ;;  %v10435_v28 = vld [vmem:[%s10748_s12 + $0x1828] ss:$16 sps:$4 sm:$0xff]   ;;  %v10440_v62 = vld [vmem:[%s10748_s12 + $0x170c] ss:$16 sps:$4 sm:$0xff]  }
 0x320   : > { %6674 = vmatpush2.bf16.msra.mxu1 %v10360_v30  ;;  %6700 = vmatprep.subr.bf16.mxu0 %v10371_v19  ;;  %v10432_v30 = vld [vmem:[%s10748_s12 + $0x1728] ss:$16 sps:$4 sm:$0xff]  }
 0x321   : > { %6675 = vmatprep.subr.bf16.mxu1 %v10368_v7  ;;  %v10443_v7 = vld [vmem:[%s10748_s12 + $0x180c] ss:$16 sps:$4 sm:$0xff]   ;;  %v10438_v19 = vld [vmem:[%s10748_s12 + $0x1708] ss:$16 sps:$4 sm:$0xff]  }
 0x323   : > { %6701 = vmatpush1.bf16.msra.mxu0 %v10369_v48  ;;  %v10446_v48 = vld [vmem:[%s10748_s12 + $0x19ec] ss:$16 sps:$4 sm:$0xff]  }
 0x324   : > { %6676 = vmatpush2.bf16.msra.mxu1 %v10366_v5  ;;  %6702 = vmatprep.subr.bf16.mxu0 %v10377_v23  ;;  %v10441_v5 = vld [vmem:[%s10748_s12 + $0x1808] ss:$16 sps:$4 sm:$0xff]  }
 0x325   : > { %6677 = vmatprep.subr.bf16.mxu1 %v10374_v20  ;;  %v10449_v20 = vld [vmem:[%s10748_s12 + $0x1aec] ss:$16 sps:$4 sm:$0xff]   ;;  %v10444_v23 = vld [vmem:[%s10748_s12 + $0x19e8] ss:$16 sps:$4 sm:$0xff]  }
 0x327   : > { %6703 = vmatpush1.bf16.msra.mxu0 %v10375_v31  ;;  %v10452_v31 = vld [vmem:[%s10748_s12 + $0x19cc] ss:$16 sps:$4 sm:$0xff]  }
 0x328   : > { %6678 = vmatpush2.bf16.msra.mxu1 %v10372_v34  ;;  %6704 = vmatprep.subr.bf16.mxu0 %v10383_v11  ;;  %v10447_v34 = vld [vmem:[%s10748_s12 + $0x1ae8] ss:$16 sps:$4 sm:$0xff]  }
 0x329   : > { %6679 = vmatprep.subr.bf16.mxu1 %v10380_v63  ;;  %v10455_v63 = vld [vmem:[%s10748_s12 + $0x1acc] ss:$16 sps:$4 sm:$0xff]  }
 0x32b   : > { %6705 = vmatpush1.bf16.msra.mxu0 %v10381_v9  ;;  %v10450_v9 = vld [vmem:[%s10748_s12 + $0x19c8] ss:$16 sps:$4 sm:$0xff]  }
 0x32c   : > { %6680 = vmatpush2.bf16.msra.mxu1 %v10378_v37  ;;  %6706 = vmatprep.subr.bf16.mxu0 %v10389_v18 }
 0x32d   : > { %6681 = vmatprep.subr.bf16.mxu1 %v10386_v33  ;;  %v10453_v33 = vld [vmem:[%s10748_s12 + $0x1ac8] ss:$16 sps:$4 sm:$0xff]  }
 0x32f   : > { %6707 = vmatpush1.bf16.msra.mxu0 %v10387_v39  ;;  %v10461_v39 = vld [vmem:[%s10748_s12 + $0x1aac] ss:$16 sps:$4 sm:$0xff]  }
 0x330   : > { %6682 = vmatpush2.bf16.msra.mxu1 %v10384_v24  ;;  %6708 = vmatprep.subr.bf16.mxu0 %v10395_v17  ;;  %v10458_v24 = vld [vmem:[%s10748_s12 + $0x19ac] ss:$16 sps:$4 sm:$0xff]   ;;  %v10456_v17 = vld [vmem:[%s10748_s12 + $0x19a8] ss:$16 sps:$4 sm:$0xff]  }
 0x331   : > { %6683 = vmatprep.subr.bf16.mxu1 %v10392_v53 }
 0x333   : > { %6709 = vmatpush1.bf16.msra.mxu0 %v10393_v41 }
 0x334   : > { %6684 = vmatpush2.bf16.msra.mxu1 %v10390_v60  ;;  %6710 = vmatprep.subr.bf16.mxu0 %v10398_v49  ;;  %v10459_v60 = vld [vmem:[%s10748_s12 + $0x1aa8] ss:$16 sps:$4 sm:$0xff]   ;;  %v10464_v49 = vld [vmem:[%s10748_s12 + $0x198c] ss:$16 sps:$4 sm:$0xff]  }
 0x335   : > { %6735 = vmatprep.subr.bf16.mxu1 %v10401_v14  ;;  %v10467_v14 = vld [vmem:[%s10748_s12 + $0x1a8c] ss:$16 sps:$4 sm:$0xff]  }
 0x337   : > { %v6441_v58 = vpop.f32.mrf.mxu1  ;;  %6686 = vmatmul.mubr.bf16.vlgmr.msra.gmra.mxu1 %v11305_v51  ;;  %6711 = vmatpush2.bf16.msra.mxu0 %v10396_v43  ;;  %v10462_v43 = vld [vmem:[%s10748_s12 + $0x1988] ss:$16 sps:$4 sm:$0xff]  }
 0x338   : > { %v11830_v4 = vadd.f32 %v6441_v58, %v11790_v42  ;;  %6736 = vmatpush1.bf16.msra.mxu1 %v10399_v36  ;;  %6712 = vmatprep.subr.bf16.mxu0 %v10404_v54  ;;  %v10420_v42 = vld [vmem:[%s10748_s12 + $0x1768] ss:$16 sps:$4 sm:$0xff]   ;;  %v10470_v36 = vld [vmem:[%s10748_s12 + $0x196c] ss:$16 sps:$4 sm:$0xff]  }
 0x339   : > { %v6443_v52 = vpop.f32.mrf.mxu1  ;;  %6737 = vmatprep.subr.bf16.mxu1 %v10407_v32  ;;  %6767 = vmatprep.mubr.bf16.mxu1 %v11315_v0  ;;  %v10417_v0 = vld [vmem:[%s10748_s12 + $0x1888] ss:$16 sps:$4 sm:$0xff]   ;;  %v10473_v54 = vld [vmem:[%s10748_s12 + $0x1a6c] ss:$16 sps:$4 sm:$0xff]  }
 0x33a   : > { %v11837_v51 = vadd.f32 %v6443_v52, %v11797_v38  ;;  %v10434_v38 = vld [vmem:[%s10748_s12 + $0x172c] ss:$16 sps:$4 sm:$0xff]   ;;  %v10468_v32 = vld [vmem:[%s10748_s12 + $0x1968] ss:$16 sps:$4 sm:$0xff]  }
 0x33b   : > { %v6445_v56 = vpop.f32.mrf.mxu1  ;;  %6713 = vmatpush2.bf16.msra.mxu0 %v10402_v46  ;;  %v10471_v58 = vld [vmem:[%s10748_s12 + $0x1a68] ss:$16 sps:$4 sm:$0xff]   ;;  %v10479_v46 = vld [vmem:[%s10748_s12 + $0x1a4c] ss:$16 sps:$4 sm:$0xff]  }
 0x33c   : > { %6738 = vmatpush1.bf16.msra.mxu1 %v10405_v25  ;;  %6714 = vmatprep.subr.bf16.mxu0 %v10410_v59  ;;  %v10474_v25 = vld [vmem:[%s10748_s12 + $0x1948] ss:$16 sps:$4 sm:$0xff]   ;;  %v10482_v59 = vld [vmem:[%s10748_s12 + $0x192c] ss:$16 sps:$4 sm:$0xff]  }
 0x33d   : > { %v6446_v35 = vpop.f32.mrf.mxu1  ;;  %6739 = vmatprep.subr.bf16.mxu1 %v10413_v55  ;;  %v10477_v52 = vld [vmem:[%s10748_s12 + $0x1a48] ss:$16 sps:$4 sm:$0xff]   ;;  %v10485_v55 = vld [vmem:[%s10748_s12 + $0x1a2c] ss:$16 sps:$4 sm:$0xff]  }
 0x33e   : > { %v10483_v56 = vld [vmem:[%s10748_s12 + $0x1a28] ss:$16 sps:$4 sm:$0xff]  }
 0x33f   : > { %6715 = vmatpush2.bf16.msra.mxu0 %v10408_v61  ;;  %v10488_v61 = vld [vmem:[%s10748_s12 + $0x190c] ss:$16 sps:$4 sm:$0xff]   ;;  %v10486_v35 = vld [vmem:[%s10748_s12 + $0x1908] ss:$16 sps:$4 sm:$0xff]  }
 0x340   : > { %6740 = vmatpush1.bf16.msra.mxu1 %v10411_v1  ;;  %6716 = vmatprep.subr.bf16.mxu0 %v10416_v21  ;;  %v10491_v1 = vld [vmem:[%s10748_s12 + $0x1a0c] ss:$16 sps:$4 sm:$0xff]   ;;  %v10489_v21 = vld [vmem:[%s10748_s12 + $0x1a08] ss:$16 sps:$4 sm:$0xff]  }
 0x341   : > { %6741 = vmatprep.subr.bf16.mxu1 %v10419_v22 }
 0x343   : > { %6717 = vmatpush2.bf16.msra.mxu0 %v10414_v29 }
 0x344   : > { %6742 = vmatpush1.bf16.msra.mxu1 %v10417_v0  ;;  %6718 = vmatprep.subr.bf16.mxu0 %v10422_v2 }
 0x345   : > { %6743 = vmatprep.subr.bf16.mxu1 %v10425_v47 }
 0x347   : > { %6719 = vmatpush2.bf16.msra.mxu0 %v10420_v42 }
 0x348   : > { %6744 = vmatpush1.bf16.msra.mxu1 %v10423_v3  ;;  %6720 = vmatprep.subr.bf16.mxu0 %v10428_v10 }
 0x349   : > { %6745 = vmatprep.subr.bf16.mxu1 %v10431_v6 }
 0x34b   : > { %6721 = vmatpush2.bf16.msra.mxu0 %v10426_v27 }
 0x34c   : > { %6746 = vmatpush1.bf16.msra.mxu1 %v10429_v15  ;;  %6722 = vmatprep.subr.bf16.mxu0 %v10434_v38 }
 0x34d   : > { %6747 = vmatprep.subr.bf16.mxu1 %v10437_v16 }
 0x34f   : > { %6723 = vmatpush2.bf16.msra.mxu0 %v10432_v30 }
 0x350   : > { %6748 = vmatpush1.bf16.msra.mxu1 %v10435_v28  ;;  %6724 = vmatprep.subr.bf16.mxu0 %v10440_v62 }
 0x351   : > { %6749 = vmatprep.subr.bf16.mxu1 %v10443_v7 }
 0x353   : > { %6725 = vmatpush2.bf16.msra.mxu0 %v10438_v19 }
 0x354   : > { %6750 = vmatpush1.bf16.msra.mxu1 %v10441_v5  ;;  %6776 = vmatprep.subr.bf16.mxu0 %v10449_v20 }
 0x355   : > { %6751 = vmatprep.subr.bf16.mxu1 %v10446_v48 }
 0x356   : > { %v6482_v11 = vpop.f32.mrf.mxu0  ;;  %6727 = vmatmul.mubr.bf16.vlgmr.msra.gmra.mxu0 %v11309_v26 }
 0x357   : > { %v11870_v37 = vadd.f32 %v6482_v11, %v11830_v4  ;;  %6777 = vmatpush1.bf16.msra.mxu0 %v10447_v34  ;;  %6808 = vmatprep.mubr.bf16.mxu0 %v10684_v12  ;;  %v10465_v12 = vld [vmem:[%s10748_s12 + $0x1a88] ss:$16 sps:$4 sm:$0xff]   ;;  %v10476_v4 = vld [vmem:[%s10748_s12 + $0x194c] ss:$16 sps:$4 sm:$0xff]  }
 0x358   : > { %6752 = vmatpush2.bf16.msra.mxu1 %v10444_v23  ;;  %v6484_v18 = vpop.f32.mrf.mxu0  ;;  %6778 = vmatprep.subr.bf16.mxu0 %v10455_v63 }
 0x359   : > { %6753 = vmatprep.subr.bf16.mxu1 %v10452_v31  ;;  %v6485_v26 = vadd.f32 %v6484_v18, %v11837_v51  ;;  %v10480_v51 = vld [vmem:[%s10748_s12 + $0x1928] ss:$16 sps:$4 sm:$0xff]  }
 0x35a   : > { %v6486_v53 = vpop.f32.mrf.mxu0 }
 0x35b   : > { %6779 = vmatpush1.bf16.msra.mxu0 %v10453_v33 }
 0x35c   : > { %6754 = vmatpush2.bf16.msra.mxu1 %v10450_v9  ;;  %v6487_v41 = vpop.f32.mrf.mxu0  ;;  %6780 = vmatprep.subr.bf16.mxu0 %v10461_v39 }
 0x35d   : > { %6755 = vmatprep.subr.bf16.mxu1 %v10458_v24 }
 0x35f   : > { %6781 = vmatpush1.bf16.msra.mxu0 %v10459_v60 }
 0x360   : > { %6756 = vmatpush2.bf16.msra.mxu1 %v10456_v17  ;;  %6782 = vmatprep.subr.bf16.mxu0 %v10467_v14 }
 0x361   : > { %6757 = vmatprep.subr.bf16.mxu1 %v10464_v49 }
 0x363   : > { %6783 = vmatpush1.bf16.msra.mxu0 %v10465_v12 }
 0x364   : > { %6758 = vmatpush2.bf16.msra.mxu1 %v10462_v43  ;;  %6784 = vmatprep.subr.bf16.mxu0 %v10473_v54 }
 0x365   : > { %6759 = vmatprep.subr.bf16.mxu1 %v10470_v36 }
 0x367   : > { %6785 = vmatpush1.bf16.msra.mxu0 %v10471_v58 }
 0x368   : > { %6760 = vmatpush2.bf16.msra.mxu1 %v10468_v32  ;;  %6786 = vmatprep.subr.bf16.mxu0 %v10479_v46 }
 0x369   : > { %6761 = vmatprep.subr.bf16.mxu1 %v10476_v4 }
 0x36b   : > { %6787 = vmatpush1.bf16.msra.mxu0 %v10477_v52 }
 0x36c   : > { %6762 = vmatpush2.bf16.msra.mxu1 %v10474_v25  ;;  %6788 = vmatprep.subr.bf16.mxu0 %v10485_v55  ;;  %v6829_v25 = vrot.slane %v6821_v40, %v10798_v50 }
 0x36d   : > { %6763 = vmatprep.subr.bf16.mxu1 %v10482_v59  ;;  %v484_v59 = vld [vmem:[#allocation2] sm:$0xff] }
 0x36f   : > { %6789 = vmatpush1.bf16.msra.mxu0 %v10483_v56 }
 0x370   : > { %6764 = vmatpush2.bf16.msra.mxu1 %v10480_v51  ;;  %6790 = vmatprep.subr.bf16.mxu0 %v10491_v1 }
 0x371   : > { %6765 = vmatprep.subr.bf16.mxu1 %v10488_v61 }
 0x373   : > { %6791 = vmatpush1.bf16.msra.mxu0 %v10489_v21 }
 0x374   : > { %6766 = vmatpush2.bf16.msra.mxu1 %v10486_v35 }
 0x376   : > { %6809 = vmatmul.mubr.bf16.vlgmr.msra.gmra.mxu0 %v11358_v57 }
 0x377   : > { %v6523_v22 = vpop.f32.mrf.mxu1  ;;  %6768 = vmatmul.mubr.bf16.vlgmr.msra.gmra.mxu1 %v11396_v8 }
 0x378   : > { %v6524_v29 = vadd.f32 %v6523_v22, %v11870_v37 }
 0x379   : > { %v6525_v0 = vpop.f32.mrf.mxu1 }
 0x37a   : > { %v6526_v2 = vadd.f32 %v6525_v0, %v6485_v26 }
 0x37b   : > { %v6527_v47 = vpop.f32.mrf.mxu1 }
 0x37d   : > { %v6528_v42 = vpop.f32.mrf.mxu1 }
 0x396   : > { %v6564_v3 = vpop.f32.mrf.mxu0 }
 0x397   : > { %v6565_v10 = vadd.f32 %v6564_v3, %v6524_v29 }
 0x398   : > { %v6566_v6 = vpop.f32.mrf.mxu0 }
 0x399   : > { %v6567_v27 = vadd.f32 %v6566_v6, %v6526_v2 }
 0x39a   : > { %v6568_v15 = vpop.f32.mrf.mxu0 }
 0x39c   : > { %v6569_v38 = vpop.f32.mrf.mxu0 }
 0x3b7   : > { %v6605_v16 = vpop.f32.mrf.mxu1 }
 0x3b8   : > { %v6606_v30 = vadd.f32 %v6605_v16, %v6565_v10 }
 0x3b9   : > { %v6607_v28 = vpop.f32.mrf.mxu1 }
 0x3ba   : > { %v6608_v62 = vadd.f32 %v6607_v28, %v6567_v27 }
 0x3bb   : > { %v6609_v7 = vpop.f32.mrf.mxu1 }
 0x3bd   : > { %v6610_v8 = vpop.f32.mrf.mxu1 }
 0x3d6   : > { %v6646_v19 = vpop.f32.mrf.mxu0 }
 0x3d7   : > { %v6647_v57 = vadd.f32 %v6646_v19, %v6606_v30 }
 0x3d8   : > { %v6648_v5 = vpop.f32.mrf.mxu0 }
 0x3d9   : > { %v6649_v48 = vadd.f32 %v6648_v5, %v6608_v62 }
 0x3da   : > { %v6650_v20 = vpop.f32.mrf.mxu0 }
 0x3dc   : > { %v6651_v23 = vpop.f32.mrf.mxu0 }
 0x3f7   : > { %v6687_v34 = vpop.f32.mrf.mxu1 }
 0x3f8   : > { %v6688_v24 = vadd.f32 %v6687_v34, %v6647_v57 }
 0x3f9   : > { %v6689_v31 = vpop.f32.mrf.mxu1 }
 0x3fa   : > { %v6690_v39 = vadd.f32 %v6689_v31, %v6649_v48 }
 0x3fb   : > { %v6691_v63 = vpop.f32.mrf.mxu1 }
 0x3fd   : > { %v6692_v11 = vpop.f32.mrf.mxu1 }
 0x416   : > { %v6728_v37 = vpop.f32.mrf.mxu0 }
 0x417   : > { %v6729_v26 = vadd.f32 %v6728_v37, %v6688_v24 }
 0x418   : > { %v6730_v9 = vpop.f32.mrf.mxu0 }
 0x419   : > { %v6731_v60 = vadd.f32 %v6730_v9, %v6690_v39 }
 0x41a   : > { %v6732_v33 = vpop.f32.mrf.mxu0 }
 0x41c   : > { %v6733_v18 = vpop.f32.mrf.mxu0 }
 0x436   : > { %v6810_v17 = vpop.f32.mrf.mxu0 }
 0x437   : > { %v6769_v53 = vpop.f32.mrf.mxu1 }
 0x438   : > { %v6770_v41 = vadd.f32 %v6769_v53, %v6729_v26  ;;  %v6812_v14 = vpop.f32.mrf.mxu0 }
 0x439   : > { %v6771_v49 = vpop.f32.mrf.mxu1 }
 0x43a   : > { %v6772_v43 = vadd.f32 %v6771_v49, %v6731_v60  ;;  %v6814_v36 = vpop.f32.mrf.mxu0  ;;  %v6811_v54 = vadd.f32 %v6810_v17, %v6770_v41 }
 0x43b   : > { %v6773_v12 = vpop.f32.mrf.mxu1 }
 0x43c   : > { %v6813_v32 = vadd.f32 %v6812_v14, %v6772_v43  ;;  %v6815_v4 = vpop.f32.mrf.mxu0 }
 0x43d   : > { %v6774_v58 = vpop.f32.mrf.mxu1 }
 0x43e   : > { %v6822_v46 = vcombine.low %v6811_v54, %v6813_v32 }
 0x440   : > { %v6836_v52 = vrot.slane %v6822_v46, %v10798_v50 }
 0x442   : > { %v6837_v55 = vcombine.low %v6829_v25, %v6836_v52  ;;  %6844 = sbr.rel (%p8947_p6) target bundleno = 1609 (0x649), region = 56 }
 0x444   : > { %v6839_v51 = vadd.f32 %v6837_v55, %v484_v59 }
 0x446   : > { %6840 = vst [vmem:[#allocation2] sm:$0xff] %v6839_v51 }
 0x447   : > { %v10492_v56 = vld [vmem:[%s12324_s3 + $0xac] ss:$12 sps:$4 sm:$0xff]   ;;  %v10496_v45 = vld [vmem:[%s12324_s3 + $0xa8] ss:$12 sps:$4 sm:$0xff]   ;;  %v10502_v35 = vld [vmem:[%s12324_s3 + $0x90] ss:$12 sps:$4 sm:$0xff]  }
 0x448   : > { %v10494_v61 = vld [vmem:[%s12324_s3 + $0x22c] ss:$12 sps:$4 sm:$0xff]   ;;  %7567 = vmatprep.subr.bf16.mxu0 %v10492_v56  ;;  %v10497_v13 = vld [vmem:[%s12324_s3 + $0x228] ss:$12 sps:$4 sm:$0xff]   ;;  %v10503_v21 = vld [vmem:[%s12324_s3 + $0x210] ss:$12 sps:$4 sm:$0xff]  }
 0x449   : > { %7608 = vmatprep.subr.bf16.mxu1 %v10494_v61  ;;  %v10498_v40 = vld [vmem:[%s12324_s3 + $0x94] ss:$12 sps:$4 sm:$0xff]   ;;  %7568 = vmatpush1.bf16.msra.mxu0 %v10496_v45  ;;  %v10504_v22 = vld [vmem:[%s12324_s3 + $0x7c] ss:$12 sps:$4 sm:$0xff]   ;;  %v10508_v0 = vld [vmem:[%s12324_s3 + $0x78] ss:$12 sps:$4 sm:$0xff]  }
 0x44a   : > { %7609 = vmatpush1.bf16.msra.mxu1 %v10497_v13  ;;  %v10500_v1 = vld [vmem:[%s12324_s3 + $0x214] ss:$12 sps:$4 sm:$0xff]   ;;  %7569 = vmatprep.subr.bf16.mxu0 %v10498_v40  ;;  %v10506_v29 = vld [vmem:[%s12324_s3 + $0x1fc] ss:$12 sps:$4 sm:$0xff]   ;;  %v10509_v2 = vld [vmem:[%s12324_s3 + $0x1f8] ss:$12 sps:$4 sm:$0xff]  }
 0x44b   : > { %7610 = vmatprep.subr.bf16.mxu1 %v10500_v1  ;;  %v10510_v47 = vld [vmem:[%s12324_s3 + $0x64] ss:$12 sps:$4 sm:$0xff]   ;;  %v10514_v3 = vld [vmem:[%s12324_s3 + $0x60] ss:$12 sps:$4 sm:$0xff]   ;;  %v10520_v15 = vld [vmem:[%s12324_s3 + $0x48] ss:$12 sps:$4 sm:$0xff]  }
 0x44c   : > { %v10512_v42 = vld [vmem:[%s12324_s3 + $0x1e4] ss:$12 sps:$4 sm:$0xff]   ;;  %v10515_v10 = vld [vmem:[%s12324_s3 + $0x1e0] ss:$12 sps:$4 sm:$0xff]   ;;  %v10521_v38 = vld [vmem:[%s12324_s3 + $0x1c8] ss:$12 sps:$4 sm:$0xff]  }
 0x44d   : > { %7570 = vmatpush1.bf16.msra.mxu0 %v10502_v35  ;;  %v10516_v6 = vld [vmem:[%s12324_s3 + $0x4c] ss:$12 sps:$4 sm:$0xff]   ;;  %v10522_v16 = vld [vmem:[%s12324_s3 + $0x34] ss:$12 sps:$4 sm:$0xff]   ;;  %v10526_v28 = vld [vmem:[%s12324_s3 + $0x30] ss:$12 sps:$4 sm:$0xff]  }
 0x44e   : > { %7611 = vmatpush1.bf16.msra.mxu1 %v10503_v21  ;;  %7571 = vmatprep.subr.bf16.mxu0 %v10504_v22  ;;  %v10518_v27 = vld [vmem:[%s12324_s3 + $0x1cc] ss:$12 sps:$4 sm:$0xff]   ;;  %v10524_v30 = vld [vmem:[%s12324_s3 + $0x1b4] ss:$12 sps:$4 sm:$0xff]   ;;  %v10527_v62 = vld [vmem:[%s12324_s3 + $0x1b0] ss:$12 sps:$4 sm:$0xff]  }
 0x44f   : > { %7612 = vmatprep.subr.bf16.mxu1 %v10506_v29  ;;  %v10528_v7 = vld [vmem:[%s12324_s3 + $0x1c] ss:$12 sps:$4 sm:$0xff]   ;;  %v10532_v19 = vld [vmem:[%s12324_s3 + $0x18] ss:$12 sps:$4 sm:$0xff]   ;;  %v10538_v20 = vld [vmem:[%s12324_s3] ss:$12 sps:$4 sm:$0xff]  }
 0x450   : > { %v10530_v8 = vld [vmem:[%s12324_s3 + $0x19c] ss:$12 sps:$4 sm:$0xff]   ;;  %v10533_v57 = vld [vmem:[%s12324_s3 + $0x198] ss:$12 sps:$4 sm:$0xff]   ;;  %v10539_v23 = vld [vmem:[%s12324_s3 + $0x180] ss:$12 sps:$4 sm:$0xff]  }
 0x451   : > { %7572 = vmatpush1.bf16.msra.mxu0 %v10508_v0  ;;  %v10534_v5 = vld [vmem:[%s12324_s3 + $0x4] ss:$12 sps:$4 sm:$0xff]   ;;  %v10540_v34 = vld [vmem:[%s12324_s3 + $0x16c] ss:$12 sps:$4 sm:$0xff]   ;;  %v10544_v63 = vld [vmem:[%s12324_s3 + $0x168] ss:$12 sps:$4 sm:$0xff]  }
 0x452   : > { %7613 = vmatpush1.bf16.msra.mxu1 %v10509_v2  ;;  %7573 = vmatprep.subr.bf16.mxu0 %v10510_v47  ;;  %v10536_v48 = vld [vmem:[%s12324_s3 + $0x184] ss:$12 sps:$4 sm:$0xff]   ;;  %v10542_v31 = vld [vmem:[%s12324_s3 + $0x2ec] ss:$12 sps:$4 sm:$0xff]   ;;  %v10545_v11 = vld [vmem:[%s12324_s3 + $0x2e8] ss:$12 sps:$4 sm:$0xff]  }
 0x453   : > { %7614 = vmatprep.subr.bf16.mxu1 %v10512_v42  ;;  %v10546_v37 = vld [vmem:[%s12324_s3 + $0x154] ss:$12 sps:$4 sm:$0xff]   ;;  %v10550_v33 = vld [vmem:[%s12324_s3 + $0x150] ss:$12 sps:$4 sm:$0xff]   ;;  %v10556_v26 = vld [vmem:[%s12324_s3 + $0x138] ss:$12 sps:$4 sm:$0xff]  }
 0x454   : > { %v10548_v9 = vld [vmem:[%s12324_s3 + $0x2d4] ss:$12 sps:$4 sm:$0xff]   ;;  %v10551_v18 = vld [vmem:[%s12324_s3 + $0x2d0] ss:$12 sps:$4 sm:$0xff]   ;;  %v10557_v53 = vld [vmem:[%s12324_s3 + $0x2b8] ss:$12 sps:$4 sm:$0xff]  }
 0x455   : > { %7574 = vmatpush1.bf16.msra.mxu0 %v10514_v3  ;;  %v10552_v24 = vld [vmem:[%s12324_s3 + $0x13c] ss:$12 sps:$4 sm:$0xff]   ;;  %v6850_v17 = vsub.s32 0, %v10790_v44  ;;  %v10558_v60 = vld [vmem:[%s12324_s3 + $0x124] ss:$12 sps:$4 sm:$0xff]   ;;  %v6854_v41 = vsub.s32 1, %v10790_v44 }
 0x456   : > { %7615 = vmatpush1.bf16.msra.mxu1 %v10515_v10  ;;  %7575 = vmatprep.subr.bf16.mxu0 %v10516_v6  ;;  %v10554_v39 = vld [vmem:[%s12324_s3 + $0x2bc] ss:$12 sps:$4 sm:$0xff]   ;;  %v6858_v49 = vsub.s32 2, %v10790_v44  ;;  %v10560_v14 = vld [vmem:[%s12324_s3 + $0x2a4] ss:$12 sps:$4 sm:$0xff]   ;;  %v6862_v43 = vsub.s32 3, %v10790_v44 }
 0x457   : > { %7616 = vmatprep.subr.bf16.mxu1 %v10518_v27  ;;  %v10562_v12 = vld [vmem:[%s12324_s3 + $0x120] ss:$12 sps:$4 sm:$0xff]   ;;  %v10568_v59 = vld [vmem:[%s12324_s3 + $0x108] ss:$12 sps:$4 sm:$0xff]   ;;  %v10574_v1 = vld [vmem:[%s12324_s3 + $0xf0] ss:$12 sps:$4 sm:$0xff]  }
 0x458   : > { %v10563_v36 = vld [vmem:[%s12324_s3 + $0x2a0] ss:$12 sps:$4 sm:$0xff]   ;;  %v10569_v51 = vld [vmem:[%s12324_s3 + $0x288] ss:$12 sps:$4 sm:$0xff]   ;;  %v10575_v21 = vld [vmem:[%s12324_s3 + $0x270] ss:$12 sps:$4 sm:$0xff]  }
 0x459   : > { %7576 = vmatpush1.bf16.msra.mxu0 %v10520_v15  ;;  %v6846_v54 = vld [vmem:[%s12323_s2] sm:$0xf]  ;;  %v10564_v32 = vld [vmem:[%s12324_s3 + $0x10c] ss:$12 sps:$4 sm:$0xff]   ;;  %v10576_v29 = vld [vmem:[%s12324_s3 + $0xdc] ss:$12 sps:$4 sm:$0xff]  }
 0x45a   : > { %7617 = vmatpush1.bf16.msra.mxu1 %v10521_v38  ;;  %7577 = vmatprep.subr.bf16.mxu0 %v10522_v16  ;;  %v6851_v58 = vrot.slane %v6846_v54, %v6850_v17  ;;  %v6855_v4 = vrot.slane %v6846_v54, %v6854_v41  ;;  %v6859_v46 = vrot.slane %v6846_v54, %v6858_v49  ;;  %v10566_v25 = vld [vmem:[%s12324_s3 + $0x28c] ss:$12 sps:$4 sm:$0xff]   ;;  %v10570_v61 = vld [vmem:[%s12324_s3 + $0xf4] ss:$12 sps:$4 sm:$0xff]   ;;  %v10578_v0 = vld [vmem:[%s12324_s3 + $0x25c] ss:$12 sps:$4 sm:$0xff]  }
 0x45b   : > { %7618 = vmatprep.subr.bf16.mxu1 %v10524_v30  ;;  %v6863_v52 = vrot.slane %v6846_v54, %v6862_v43  ;;  %v10572_v13 = vld [vmem:[%s12324_s3 + $0x274] ss:$12 sps:$4 sm:$0xff]   ;;  %v10580_v47 = vld [vmem:[%s12324_s3 + $0xd8] ss:$12 sps:$4 sm:$0xff]   ;;  %v10607_v43 = vld [vmem:[%s12324_s3 + $0x1d0] ss:$12 sps:$4 sm:$0xff]  }
 0x45c   : > { %v6864_v55 = vcombine.low %v6851_v58, %v6855_v4  ;;  %v6845_v35 = vld [vmem:[#allocation2] sm:$0xff]  ;;  %vm10686_vm0 = vmmov 0  }
 0x45d   : > { %7578 = vmatpush1.bf16.msra.mxu0 %v10526_v28  ;;  %v6865_v56 = vcombine.low %v6859_v46, %v6863_v52  ;;  %v10581_v42 = vld [vmem:[%s12324_s3 + $0x258] ss:$12 sps:$4 sm:$0xff]   ;;  %v10586_v38 = vld [vmem:[%s12324_s3 + $0xc0] ss:$12 sps:$4 sm:$0xff]   ;;  %v10616_v52 = vld [vmem:[%s12324_s3 + $0xc8] ss:$12 sps:$4 sm:$0xff]  }
 0x45e   : > { %7619 = vmatpush1.bf16.msra.mxu1 %v10527_v62  ;;  %7579 = vmatprep.subr.bf16.mxu0 %v10528_v7  ;;  %v6872_v45 = vrot.slane %v6864_v55, %v10798_v50  ;;  %v10582_v10 = vld [vmem:[%s12324_s3 + $0xc4] ss:$12 sps:$4 sm:$0xff]   ;;  %v10587_v16 = vld [vmem:[%s12324_s3 + $0x240] ss:$12 sps:$4 sm:$0xff]   ;;  %v10618_v55 = vld [vmem:[%s12324_s3 + $0x8] ss:$12 sps:$4 sm:$0xff]  }
 0x45f   : > { %7620 = vmatprep.subr.bf16.mxu1 %v10530_v8  ;;  %v6879_v40 = vrot.slane %v6865_v56, %v10798_v50  ;;  %v10584_v6 = vld [vmem:[%s12324_s3 + $0x244] ss:$12 sps:$4 sm:$0xff]   ;;  %v10612_v58 = vld [vmem:[%s12324_s3 + $0xe0] ss:$12 sps:$4 sm:$0xff]   ;;  %v10620_v56 = vld [vmem:[%s12326_s5 + $0x78] sm:$0xff]  }
 0x460   : > { %v10588_v62 = vld [vmem:[%s12324_s3 + $0x170] ss:$12 sps:$4 sm:$0xff]   ;;  %v10610_v54 = vld [vmem:[%s12324_s3 + $0x38] ss:$12 sps:$4 sm:$0xff]   ;;  %v10613_v4 = vld [vmem:[%s12324_s3 + $0x260] ss:$12 sps:$4 sm:$0xff]  }
 0x461   : > { %7580 = vmatpush1.bf16.msra.mxu0 %v10532_v19  ;;  %v6880_v22 = vcombine.low %v6872_v45, %v6879_v40  ;;  %v10589_v19 = vld [vmem:[%s12324_s3 + $0x2f0] ss:$12 sps:$4 sm:$0xff]   ;;  %v10614_v46 = vld [vmem:[%s12324_s3 + $0x20] ss:$12 sps:$4 sm:$0xff]  }
 0x462   : > { %7621 = vmatpush1.bf16.msra.mxu1 %v10533_v57  ;;  %7581 = vmatprep.subr.bf16.mxu0 %v10534_v5  ;;  %v10590_v57 = vld [vmem:[%s12324_s3 + $0xb0] ss:$12 sps:$4 sm:$0xff]   ;;  %v10624_v40 = vld [vmem:[%s12326_s5 + $0x68] sm:$0xff]   ;;  %v9044_v44 = vld [vmem:[%s12327_s6] ss:$0 sm:$0xff] }
 0x463   : > { %7622 = vmatprep.subr.bf16.mxu1 %v10536_v48  ;;  %v6882_v2 = vadd.f32 %v6880_v22, %v6845_v35  ;;  %v10622_v45 = vld [vmem:[%s12326_s5 + $0x70] sm:$0xff]   ;;  %v10626_v35 = vld [vmem:[%s12326_s5 + $0x60] sm:$0xff]   ;;  %v10628_v22 = vld [vmem:[%s12326_s5 + $0x58] sm:$0xff]  }
 0x465   : > { %7582 = vmatpush1.bf16.msra.mxu0 %v10538_v20  ;;  %v6883_v3 = vmax.f32 %v6882_v2, 0.0  ;;  %v10591_v20 = vld [vmem:[%s12324_s3 + $0x230] ss:$12 sps:$4 sm:$0xff]  }
 0x466   : > { %7623 = vmatpush1.bf16.msra.mxu1 %v10539_v23  ;;  %7583 = vmatprep.subr.bf16.mxu0 %v10540_v34  ;;  %v10592_v23 = vld [vmem:[%s12324_s3 + $0x158] ss:$12 sps:$4 sm:$0xff]   ;;  %v10631_v2 = vld [vmem:[%s12326_s5 + $0x10] sm:$0xff]  }
 0x467   : > { %7624 = vmatprep.subr.bf16.mxu1 %v10542_v31  ;;  %v6892_v27 = vrot.slane %v6883_v3, %v10798_v50  ;;  %v6885_v15 = vcombine.high %v6883_v3, %v6883_v3  ;;  %v10593_v34 = vld [vmem:[%s12324_s3 + $0x2d8] ss:$12 sps:$4 sm:$0xff]  }
 0x468   : > { %v10594_v31 = vld [vmem:[%s12324_s3 + $0x98] ss:$12 sps:$4 sm:$0xff]  }
 0x469   : > { %7584 = vmatpush2.bf16.msra.mxu0 %v10544_v63  ;;  %v6900_v30 = vcombine.high %v6892_v27, %v6892_v27  ;;  %v6899_v28 = vrot.slane %v6885_v15, %v10798_v50  ;;  %v12127_v5 = vpack.c.bf16 %v6892_v27, %v6892_v27  ;;  %v10595_v63 = vld [vmem:[%s12324_s3 + $0x218] ss:$12 sps:$4 sm:$0xff]   ;;  %v10685_v27 = vmov 0.0   ;;  %v10637_v15 = vld [vmem:[%s12326_s5 + $0xb0] sm:$0xff]  }
 0x46a   : > { %7625 = vmatpush2.bf16.msra.mxu1 %v10545_v11  ;;  %7585 = vmatprep.subr.bf16.mxu0 %v10546_v37  ;;  %v10596_v11 = vld [vmem:[%s12324_s3 + $0x140] ss:$12 sps:$4 sm:$0xff]  }
 0x46b   : > { %7626 = vmatprep.subr.bf16.mxu1 %v10548_v9  ;;  %v6907_v7 = vpack.c.bf16 %v6900_v30, %v6900_v30  ;;  %v6901_v8 = vcombine.high %v6899_v28, %v6899_v28  ;;  %v12129_v48 = vpack.c.bf16 %v6899_v28, %v6899_v28  ;;  %v10597_v37 = vld [vmem:[%s12324_s3 + $0x2c0] ss:$12 sps:$4 sm:$0xff]   ;;  %v10640_v30 = vld [vmem:[%s12326_s5 + $0x98] sm:$0xff]   ;;  %v10641_v28 = vld [vmem:[%s12326_s5 + $0x90] sm:$0xff]  }
 0x46c   : > { %v10598_v9 = vld [vmem:[%s12324_s3 + $0x80] ss:$12 sps:$4 sm:$0xff]  }
 0x46d   : > { %7586 = vmatpush2.bf16.msra.mxu0 %v10550_v33  ;;  %7599 = vmatprep.mubr.bf16.mxu0 %v6907_v7  ;;  %v6909_v50 = vpack.c.bf16 %v6901_v8, %v6901_v8  ;;  %v10599_v33 = vld [vmem:[%s12324_s3 + $0x200] ss:$12 sps:$4 sm:$0xff]  }
 0x46e   : > { %7627 = vmatpush2.bf16.msra.mxu1 %v10551_v18  ;;  %7587 = vmatprep.subr.bf16.mxu0 %v10552_v24  ;;  %v10600_v18 = vld [vmem:[%s12324_s3 + $0x128] ss:$12 sps:$4 sm:$0xff]   ;;  %v10634_v3 = vld [vmem:[%s12326_s5 + $0x40] sm:$0xff]  }
 0x46f   : > { %7628 = vmatprep.subr.bf16.mxu1 %v10554_v39  ;;  %7640 = vmatprep.mubr.bf16.mxu1 %v6909_v50  ;;  %v10601_v24 = vld [vmem:[%s12324_s3 + $0x2a8] ss:$12 sps:$4 sm:$0xff]   ;;  %v7038_v8 = vld [vmem:[%s12325_s4] sm:$0x7] }
 0x470   : > { %v10602_v39 = vld [vmem:[%s12324_s3 + $0x68] ss:$12 sps:$4 sm:$0xff]  }
 0x471   : > { %7588 = vmatpush2.bf16.msra.mxu0 %v10556_v26  ;;  %v10603_v26 = vld [vmem:[%s12324_s3 + $0x1e8] ss:$12 sps:$4 sm:$0xff]  }
 0x472   : > { %7629 = vmatpush2.bf16.msra.mxu1 %v10557_v53  ;;  %7589 = vmatprep.subr.bf16.mxu0 %v10558_v60  ;;  %v10604_v53 = vld [vmem:[%s12324_s3 + $0x110] ss:$12 sps:$4 sm:$0xff]  }
 0x473   : > { %7630 = vmatprep.subr.bf16.mxu1 %v10560_v14  ;;  %v10605_v60 = vld [vmem:[%s12324_s3 + $0x290] ss:$12 sps:$4 sm:$0xff]  }
 0x474   : > { %v10606_v14 = vld [vmem:[%s12324_s3 + $0x50] ss:$12 sps:$4 sm:$0xff]  }
 0x475   : > { %7590 = vmatpush2.bf16.msra.mxu0 %v10562_v12  ;;  %v10608_v12 = vld [vmem:[%s12324_s3 + $0xf8] ss:$12 sps:$4 sm:$0xff]  }
 0x476   : > { %7631 = vmatpush2.bf16.msra.mxu1 %v10563_v36  ;;  %7591 = vmatprep.subr.bf16.mxu0 %v10564_v32  ;;  %v10609_v36 = vld [vmem:[%s12324_s3 + $0x278] ss:$12 sps:$4 sm:$0xff]  }
 0x477   : > { %7632 = vmatprep.subr.bf16.mxu1 %v10566_v25  ;;  %v10611_v32 = vld [vmem:[%s12324_s3 + $0x1b8] ss:$12 sps:$4 sm:$0xff]   ;;  %v10615_v25 = vld [vmem:[%s12324_s3 + $0x1a0] ss:$12 sps:$4 sm:$0xff]  }
 0x479   : > { %7592 = vmatpush2.bf16.msra.mxu0 %v10568_v59  ;;  %v10617_v59 = vld [vmem:[%s12324_s3 + $0x248] ss:$12 sps:$4 sm:$0xff]  }
 0x47a   : > { %7633 = vmatpush2.bf16.msra.mxu1 %v10569_v51  ;;  %7593 = vmatprep.subr.bf16.mxu0 %v10570_v61  ;;  %v10619_v51 = vld [vmem:[%s12324_s3 + $0x188] ss:$12 sps:$4 sm:$0xff]   ;;  %v10621_v61 = vld [vmem:[%s12326_s5 + $0x38] sm:$0xff]  }
 0x47b   : > { %7634 = vmatprep.subr.bf16.mxu1 %v10572_v13  ;;  %v10623_v13 = vld [vmem:[%s12326_s5 + $0x30] sm:$0xff]  }
 0x47d   : > { %7594 = vmatpush2.bf16.msra.mxu0 %v10574_v1  ;;  %v10625_v1 = vld [vmem:[%s12326_s5 + $0x28] sm:$0xff]  }
 0x47e   : > { %7635 = vmatpush2.bf16.msra.mxu1 %v10575_v21  ;;  %7595 = vmatprep.subr.bf16.mxu0 %v10576_v29  ;;  %v10627_v21 = vld [vmem:[%s12326_s5 + $0x20] sm:$0xff]   ;;  %v10629_v29 = vld [vmem:[%s12326_s5 + $0x18] sm:$0xff]  }
 0x47f   : > { %7636 = vmatprep.subr.bf16.mxu1 %v10578_v0  ;;  %v10630_v0 = vld [vmem:[%s12326_s5 + $0x50] sm:$0xff]  }
 0x481   : > { %7596 = vmatpush2.bf16.msra.mxu0 %v10580_v47  ;;  %v10632_v47 = vld [vmem:[%s12326_s5 + $0x48] sm:$0xff]  }
 0x482   : > { %7637 = vmatpush2.bf16.msra.mxu1 %v10581_v42  ;;  %7597 = vmatprep.subr.bf16.mxu0 %v10582_v10  ;;  %v10633_v42 = vld [vmem:[%s12326_s5 + $0x8] sm:$0xff]   ;;  %v10635_v10 = vld [vmem:[%s12326_s5] sm:$0xff]  }
 0x483   : > { %7638 = vmatprep.subr.bf16.mxu1 %v10584_v6  ;;  %v10636_v6 = vld [vmem:[%s12326_s5 + $0xb8] sm:$0xff]  }
 0x485   : > { %7598 = vmatpush2.bf16.msra.mxu0 %v10586_v38  ;;  %v10638_v38 = vld [vmem:[%s12326_s5 + $0xa8] sm:$0xff]  }
 0x486   : > { %7639 = vmatpush2.bf16.msra.mxu1 %v10587_v16  ;;  %9074 = vmatprep.subr.bf16.mxu0 %v10588_v62  ;;  %v10639_v16 = vld [vmem:[%s12326_s5 + $0xa0] sm:$0xff]   ;;  %v10642_v62 = vld [vmem:[%s12326_s5 + $0x88] sm:$0xff]  }
 0x487   : > { %9096 = vmatprep.subr.bf16.mxu1 %v10589_v19  ;;  %v7043_v19 = vrot.slane %v7038_v8, %v6850_v17 }
 0x488   : > { %7600 = vmatmul.mubr.bf16.vlgmr.msra.gmra.mxu0 %v12127_v5 }
 0x489   : > { %7641 = vmatmul.mubr.bf16.vlgmr.msra.gmra.mxu1 %v12129_v48  ;;  %9075 = vmatpush3.bf16.msra.mxu0 %v10590_v57  ;;  %v7047_v57 = vrot.slane %v7038_v8, %v6854_v41 }
 0x48a   : > { %9097 = vmatpush3.bf16.msra.mxu1 %v10591_v20  ;;  %9076 = vmatprep.subr.bf16.mxu0 %v10592_v23 }
 0x48b   : > { %9098 = vmatprep.subr.bf16.mxu1 %v10593_v34  ;;  %7681 = vmatprep.mubr.bf16.mxu0 %v6907_v7  ;;  %v10643_v7 = vld [vmem:[%s12326_s5 + $0x80] sm:$0xff]  }
 0x48c   : > { %7721 = vmatprep.mubr.bf16.mxu1 %v6909_v50 }
 0x48d   : > { %9077 = vmatpush3.bf16.msra.mxu0 %v10594_v31 }
 0x48e   : > { %9099 = vmatpush3.bf16.msra.mxu1 %v10595_v63  ;;  %9078 = vmatprep.subr.bf16.mxu0 %v10596_v11 }
 0x48f   : > { %9100 = vmatprep.subr.bf16.mxu1 %v10597_v37 }
 0x491   : > { %9079 = vmatpush3.bf16.msra.mxu0 %v10598_v9 }
 0x492   : > { %9101 = vmatpush3.bf16.msra.mxu1 %v10599_v33  ;;  %9080 = vmatprep.subr.bf16.mxu0 %v10600_v18 }
 0x493   : > { %9102 = vmatprep.subr.bf16.mxu1 %v10601_v24 }
 0x495   : > { %9081 = vmatpush3.bf16.msra.mxu0 %v10602_v39 }
 0x496   : > { %9103 = vmatpush3.bf16.msra.mxu1 %v10603_v26  ;;  %9082 = vmatprep.subr.bf16.mxu0 %v10604_v53  ;;  %v7051_v53 = vrot.slane %v7038_v8, %v6858_v49 }
 0x497   : > { %9104 = vmatprep.subr.bf16.mxu1 %v10605_v60 }
 0x499   : > { %9083 = vmatpush3.bf16.msra.mxu0 %v10606_v14 }
 0x49a   : > { %9105 = vmatpush3.bf16.msra.mxu1 %v10607_v43  ;;  %9084 = vmatprep.subr.bf16.mxu0 %v10608_v12 }
 0x49b   : > { %9106 = vmatprep.subr.bf16.mxu1 %v10609_v36 }
 0x49d   : > { %9085 = vmatpush3.bf16.msra.mxu0 %v10610_v54 }
 0x49e   : > { %9107 = vmatpush3.bf16.msra.mxu1 %v10611_v32  ;;  %9086 = vmatprep.subr.bf16.mxu0 %v10612_v58 }
 0x49f   : > { %9108 = vmatprep.subr.bf16.mxu1 %v10613_v4 }
 0x4a1   : > { %9087 = vmatpush3.bf16.msra.mxu0 %v10614_v46 }
 0x4a2   : > { %9109 = vmatpush3.bf16.msra.mxu1 %v10615_v25  ;;  %9088 = vmatprep.subr.bf16.mxu0 %v10616_v52 }
 0x4a3   : > { %9110 = vmatprep.subr.bf16.mxu1 %v10617_v59 }
 0x4a5   : > { %9089 = vmatpush3.bf16.msra.mxu0 %v10618_v55 }
 0x4a6   : > { %9111 = vmatpush3.bf16.msra.mxu1 %v10619_v51  ;;  %9118 = vmatprep.subr.bf16.mxu0 %v10620_v56 }
 0x4a7   : > { %9149 = vmatprep.subr.bf16.mxu1 %v10685_v27 }
 0x4a8   : > { %7682 = vmatmul.mubr.bf16.vlgmr.msra.gmra.mxu0 %v12127_v5 }
 0x4a9   : > { %7722 = vmatmul.mubr.bf16.vlgmr.msra.gmra.mxu1 %v12129_v48  ;;  %9119 = vmatpush3.bf16.msra.mxu0 %v10621_v61 }
 0x4aa   : > { %9120 = vmatprep.subr.bf16.mxu0 %v10622_v45  ;;  %9150 = vmatpush3.bf16.msra.mxu1 %v10636_v6 }
 0x4ab   : > { %9151 = vmatprep.subr.bf16.mxu1 %v10685_v27  ;;  %9165 = vmatprep.mubr.msk.bf16.mxu1 %vm10686_vm0, %v10685_v27 }
 0x4ad   : > { %9121 = vmatpush3.bf16.msra.mxu0 %v10623_v13 }
 0x4ae   : > { %9122 = vmatprep.subr.bf16.mxu0 %v10624_v40  ;;  %9152 = vmatpush3.bf16.msra.mxu1 %v10637_v15 }
 0x4af   : > { %9153 = vmatprep.subr.bf16.mxu1 %v10685_v27 }
 0x4b1   : > { %9123 = vmatpush3.bf16.msra.mxu0 %v10625_v1 }
 0x4b2   : > { %9124 = vmatprep.subr.bf16.mxu0 %v10626_v35  ;;  %9154 = vmatpush3.bf16.msra.mxu1 %v10638_v38 }
 0x4b3   : > { %9155 = vmatprep.subr.bf16.mxu1 %v10685_v27 }
 0x4b5   : > { %9125 = vmatpush3.bf16.msra.mxu0 %v10627_v21 }
 0x4b6   : > { %9126 = vmatprep.subr.bf16.mxu0 %v10628_v22  ;;  %9156 = vmatpush3.bf16.msra.mxu1 %v10639_v16 }
 0x4b7   : > { %9157 = vmatprep.subr.bf16.mxu1 %v10685_v27 }
 0x4b9   : > { %9127 = vmatpush3.bf16.msra.mxu0 %v10629_v29 }
 0x4ba   : > { %9128 = vmatprep.subr.bf16.mxu0 %v10630_v0  ;;  %9158 = vmatpush3.bf16.msra.mxu1 %v10640_v30 }
 0x4bb   : > { %9159 = vmatprep.subr.bf16.mxu1 %v10685_v27 }
 0x4bd   : > { %9129 = vmatpush3.bf16.msra.mxu0 %v10631_v2 }
 0x4be   : > { %9130 = vmatprep.subr.bf16.mxu0 %v10632_v47  ;;  %9160 = vmatpush3.bf16.msra.mxu1 %v10641_v28 }
 0x4bf   : > { %9161 = vmatprep.subr.bf16.mxu1 %v10685_v27 }
 0x4c1   : > { %9131 = vmatpush3.bf16.msra.mxu0 %v10633_v42 }
 0x4c2   : > { %9132 = vmatprep.subr.bf16.mxu0 %v10634_v3  ;;  %9162 = vmatpush3.bf16.msra.mxu1 %v10642_v62 }
 0x4c3   : > { %9163 = vmatprep.subr.bf16.mxu1 %v10685_v27 }
 0x4c5   : > { %9133 = vmatpush3.bf16.msra.mxu0 %v10635_v10 }
 0x4c6   : > { %9164 = vmatpush3.bf16.msra.mxu1 %v10643_v7 }
 0x548   : > { %v7601_v50 = vpop.f32.mrf.mxu0 }
 0x549   : > { %v7642_v5 = vpop.f32.mrf.mxu1  ;;  %v7602_v48 = vadd.f32 %v7601_v50, %v7043_v19 }
 0x54a   : > { %v7603_v20 = vpop.f32.mrf.mxu0 }
 0x54b   : > { %v7644_v23 = vpop.f32.mrf.mxu1  ;;  %v7643_v34 = vadd.f32 %v7642_v5, %v7602_v48  ;;  %v7604_v31 = vadd.f32 %v7603_v20, %v7047_v57 }
 0x54c   : > { %v7605_v63 = vpop.f32.mrf.mxu0 }
 0x54d   : > { %v7646_v11 = vpop.f32.mrf.mxu1  ;;  %v7645_v37 = vadd.f32 %v7644_v23, %v7604_v31  ;;  %v7729_v9 = vmax.f32 %v7643_v34, 0.0 }
 0x54e   : > { %v7606_v33 = vpop.f32.mrf.mxu0 }
 0x54f   : > { %v7647_v18 = vpop.f32.mrf.mxu1  ;;  %v7730_v24 = vmax.f32 %v7645_v37, 0.0  ;;  %v7732_v26 = vpack.c.bf16 %v7729_v9, %v7729_v9 }
 0x551   : > { %v7733_v39 = vpack.c.bf16 %v7730_v24, %v7730_v24 }
 0x553   : > { %7966 = vmatprep.mubr.bf16.mxu0 %v7733_v39 }
 0x554   : > { %7967 = vmatmul.mubr.bf16.vlgmr.msra.gmra.mxu0 %v7732_v26 }
 0x568   : > { %v9090_v17 = vpop.f32.mrf.mxu0 }
 0x569   : > { %v9112_v41 = vpop.f32.mrf.mxu1 }
 0x56a   : > { %v9091_v60 = vpop.f32.mrf.mxu0 }
 0x56b   : > { %v9113_v14 = vpop.f32.mrf.mxu1  ;;  %v9092_v43 = vadd.f32 %v9091_v60, %v9090_v17 }
 0x56c   : > { %v9093_v12 = vpop.f32.mrf.mxu0  ;;  %v9114_v32 = vadd.f32 %v9113_v14, %v9112_v41 }
 0x56d   : > { %v9115_v36 = vpop.f32.mrf.mxu1  ;;  %v7684_v54 = vadd.f32 %v9092_v43, %v7051_v53 }
 0x56e   : > { %v9094_v58 = vpop.f32.mrf.mxu0 }
 0x56f   : > { %v9116_v4 = vpop.f32.mrf.mxu1  ;;  %v7724_v46 = vadd.f32 %v9114_v32, %v7684_v54 }
 0x571   : > { %v7731_v25 = vmax.f32 %v7724_v46, 0.0 }
 0x573   : > { %v7734_v52 = vpack.c.bf16 %v7731_v25, %v7731_v25 }
 0x575   : > { %9166 = vmatmul.mubr.bf16.vlgmr.msra.gmra.mxu1 %v7734_v52 }
 0x614   : > { %v9134_v59 = vpop.f32.mrf.mxu0 }
 0x616   : > { %v9135_v55 = vpop.f32.mrf.mxu0 }
 0x617   : > { %v9136_v61 = vadd.f32 %v9135_v55, %v9134_v59 }
 0x618   : > { %v9137_v51 = vpop.f32.mrf.mxu0 }
 0x619   : > { %v7969_v49 = vadd.f32 %v9136_v61, %v9044_v44 }
 0x61a   : > { %v9138_v56 = vpop.f32.mrf.mxu0 }
 0x635   : > { %v8008_v45 = vpop.f32.mrf.mxu1 }
 0x636   : > { %v8009_v13 = vadd.f32 %v8008_v45, %v7969_v49 }
 0x637   : > { %v9167_v40 = vpop.f32.mrf.mxu1 }
 0x638   : > { %v8014_v1 = vmax.f32 %v8009_v13, 0.0 }
 0x639   : > { %v8011_v35 = vpop.f32.mrf.mxu1 }
 0x63a   : > { %10644 = vtanh.f32 %v8014_v1 }
 0x63b   : > { %v9168_v21 = vpop.f32.mrf.mxu1 }
 0x647   : > { %v10645_v22 = vpop.eup %10644 }
 0x648   : > { %8016 = vst [vmem:[#allocation3] sm:$0x3] %v10645_v22 }
 0x649 PF: > { %p9173_p7 = scmp.eq.s32.totalorder %s10734_s25, 2  ;;  %s10687_s30 = smov [#allocation3]  }
 0x64a   : > { %s8024_s8 = sshll.u32 %s10687_s30, 4  ;;  %s8025_s8 = int_to_ptr.vmem [resolvable:$true] %s8024_s8 }
 0x64b   : > { %s10646_s9 = scalar_lea.vmem %s8025_s8, 32  ;;  %p10653_p11 = scmp.lt.s32.totalorder %s8025_s8, %s8025_s8 }
 0x64c   : > { %p10647_p8 = scmp.ne.s32.totalorder %s8025_s8, %s10646_s9  ;;  %p10654_p12 = scmp.lt.s32.totalorder %s10646_s9, %s10646_s9 }
 0x64e   : > { %p10648_p9 = pnand %p10647_p8, %p9173_p7  ;;  %p10655_p13 = por %p10654_p12, %p10653_p11 }
 0x650   : > { %p10649_p10 = pneg %p10648_p9 }
 0x652   : > { %p10656_p0 = pnand %p10655_p13, %p10649_p10 }
 0x654   : > { %10659 = shalt.err (!%p10656_p0)
}
 0x655   : > { %9170 = dma.vmem_to_hbm [thread:$0]  (%p9173_p7), %s8025_s8, 32, %s12328_s7, [#allocation4]  }
 0x656   : > { %10675 = dma.done.wait (%p9173_p7), [#allocation4], 32  }
 0x657   : > { %10677 = vsyncadd (%p9173_p7), [#allocation4], 4294967264 }
 0x658 PF: > { %s18_s24 = sadd.s32 1, %s10680_s24  }
 0x659   : > { %p15_p1 = scmp.ge.s32.totalorder %s18_s24, 5  }
 0x65b   :  { %17 = sbr.rel (!%p15_p1) target bundleno = 1 (0x1), region = 86 }
 0x660   :  { %8037 = vsyncpa [#allocation4], 1 }
 0x661   :  { %8039 = vsyncpa [#allocation4 + $0x1], 1 }

</bundles_post_ra>
